<compile_context>
chip_gen: v7x
topology: tpu7x:2x2x1
jax: 0.10.0
libtpu: 0.0.40
codegen_flags: <defaults>
</compile_context>

<pallas_src>
import functools

import jax
import jax.numpy as jnp
from jax import lax
from jax.experimental import pallas as pl
from jax.experimental.pallas import tpu as pltpu


FK = 2048  # fc1 feature-dim tile (w1 is pre-padded to a multiple of this at init)


def _vmem_limit_bytes():
    # 48 MiB is safe on v7x (64 MiB physical); go bigger on 128 MiB parts (v5e/v6e).
    try:
        cap = getattr(pltpu.get_tpu_info(), "vmem_capacity_bytes", 0)
        if cap and cap > 100 * 1024 * 1024:
            return 96 * 1024 * 1024
    except Exception:
        pass
    return 48 * 1024 * 1024


# ============================================================================
# Conv3d(3,3,3, stride 1, pad 1) + BatchNorm3d(eval) + ReLU, one sample per grid step.
# ============================================================================
def _border_masks(d, h, w):
    """(9, D*H*W) bf16: tap (kh,kw) validity mask for the H/W borders (1.0 valid, 0.0 pad)."""
    dhw = d * h * w
    m = jnp.arange(dhw, dtype=jnp.int32)
    hp = (m // w) % h
    wp = m % w
    rows = []
    for kh in range(3):
        for kw in range(3):
            ok = ((hp + (kh - 1) >= 0) & (hp + (kh - 1) < h)
                  & (wp + (kw - 1) >= 0) & (wp + (kw - 1) < w))
            rows.append(ok)
    return jnp.stack(rows, axis=0).astype(jnp.bfloat16)


def _conv_bn_relu_kernel(x_ref, w_ref, mask_ref, scale_ref, bias_ref, o_ref, slab_ref,
                         *, cin, dd, hh, ww, kpad, out_padded):
    # x_ref:     (1, cin, (dd+4)*hh*ww) bf16, depth padded 2 zero planes each side
    # w_ref:     (C_out, kpad)          bf16, rows packed tap-major: col = t*cin + c
    # mask_ref:  (9, dd*hh*ww)          bf16 border masks (precomputed, constant index_map)
    # scale_ref: (C_out, 1)             f32 folded BN scale  = gamma / sqrt(var+eps)
    # bias_ref:  (C_out, 1)             f32 folded bias      = (conv_b - mean)*scale + beta
    # o_ref:     (1, C_out, L_out)      bf16 padded-flat (intermediate) or f32 dhw (last)
    # slab_ref:  (kpad, dd*hh*ww)       bf16 VMEM scratch (the stacked 27-tap slab)
    hw = hh * ww
    dhw = dd * hw
    k = 27 * cin
    c_out = o_ref.shape[1]

    x_flat = x_ref[0]            # (cin, (dd+4)*hw) bf16 — stays VMEM/vreg resident
    masks = mask_ref[...]        # (9, dhw) bf16

    # Keep the matmul K clean: zero the slab's padding rows (<=127 rows, a few vregs).
    if kpad > k:
        slab_ref[k:, :] = jnp.zeros((kpad - k, dhw), slab_ref.dtype)

    # Build the (27*cin, dhw) slab: each tap is a static lane-shifted slice of the padded
    # volume, multiplied by its H/W border mask while being stored (bf16 all the way).
    for kd in range(3):
        for kh in range(3):
            for kw in range(3):
                t = (kd * 3 + kh) * 3 + kw
                # Flat source offset (>= 0 thanks to the front guard plane).
                off = (kd + 1) * hw + (kh - 1) * ww + (kw - 1)
                xs = x_flat[:, off:off + dhw]                    # (cin, dhw) bf16
                if kh == 1 and kw == 1:
                    tap = xs                                     # interior tap: no mask
                else:
                    r = kh * 3 + kw
                    tap = xs * masks[r:r + 1, :]
                slab_ref[t * cin:(t + 1) * cin, :] = tap

    # Single bf16 x bf16 MXU matmul with f32 accumulation (K = kpad, N = dhw).
    acc = jnp.dot(w_ref[...], slab_ref[...], preferred_element_type=jnp.float32)
    out = jnp.maximum(acc * scale_ref[...] + bias_ref[...], 0.0)  # (C_out, dhw) f32

    if out_padded:
        # Emit directly in the next block's expected layout: bf16, depth-padded flat,
        # guard+halo planes zeroed (so the next kernel needs no XLA pad/cast pass).
        zeros = jnp.zeros((c_out, 2 * hw), o_ref.dtype)
        o_ref[0, :, 0:2 * hw] = zeros
        o_ref[0, :, 2 * hw:2 * hw + dhw] = out.astype(o_ref.dtype)
        o_ref[0, :, 2 * hw + dhw:(dd + 4) * hw] = zeros
    else:
        o_ref[0, :, :] = out.astype(o_ref.dtype)                  # last block: f32, lane-dense


def _conv_block(x_lin, blk, *, n, cin, d, h, w, out_padded, eps=1e-5):
    """x_lin: (N, cin, (D+4)*H*W) bf16 padded-flat -> padded-flat bf16 or (N, C_out, D*H*W) f32."""
    hw = h * w
    dhw = d * hw
    l_in = (d + 4) * hw
    c_out = blk["conv_w"].shape[0]
    k = 27 * cin
    kpad = ((k + 127) // 128) * 128

    # (C_out, C_in, kd, kh, kw) -> (C_out, kd, kh, kw, C_in) -> (C_out, 27*C_in) -> pad K.
    w2d = jnp.transpose(blk["conv_w"], (0, 2, 3, 4, 1)).reshape(c_out, k)
    w2d = jnp.pad(w2d, ((0, 0), (0, kpad - k))).astype(jnp.bfloat16)

    inv_std = 1.0 / jnp.sqrt(blk["bn_var"] + eps)
    scale = (blk["bn_gamma"] * inv_std).reshape(c_out, 1).astype(jnp.float32)
    bias = ((blk["conv_b"] - blk["bn_mean"]) * blk["bn_gamma"] * inv_std
            + blk["bn_beta"]).reshape(c_out, 1).astype(jnp.float32)

    masks = _border_masks(d, h, w)                                # (9, dhw), constant-folded

    if out_padded:
        out_shape = jax.ShapeDtypeStruct((n, c_out, l_in), jnp.bfloat16)
        out_block = (1, c_out, l_in)
    else:
        out_shape = jax.ShapeDtypeStruct((n, c_out, dhw), jnp.float32)
        out_block = (1, c_out, dhw)

    kern = functools.partial(_conv_bn_relu_kernel, cin=cin, dd=d, hh=h, ww=w,
                             kpad=kpad, out_padded=out_padded)
    return pl.pallas_call(
        kern,
        out_shape=out_shape,
        grid_spec=pltpu.PrefetchScalarGridSpec(
            num_scalar_prefetch=0,
            grid=(n,),                                            # one sample per step
            in_specs=[
                pl.BlockSpec((1, cin, l_in), lambda i: (i, 0, 0)),
                pl.BlockSpec((c_out, kpad), lambda i: (0, 0)),
                pl.BlockSpec((9, dhw), lambda i: (0, 0)),
                pl.BlockSpec((c_out, 1), lambda i: (0, 0)),
                pl.BlockSpec((c_out, 1), lambda i: (0, 0)),
            ],
            out_specs=pl.BlockSpec(out_block, lambda i: (i, 0, 0)),
            scratch_shapes=[pltpu.VMEM((kpad, dhw), jnp.bfloat16)],
        ),
        compiler_params=pltpu.CompilerParams(
            dimension_semantics=("parallel",),
            vmem_limit_bytes=_vmem_limit_bytes(),
        ),
    )(x_lin, w2d, masks, scale, bias)


def conv_stack(x, blocks, *, eps=1e-5):
    """x: (N, C_in, D, H, W) f32 -> (N, C_last, D, H, W) f32 (NCDHW, like PyTorch)."""
    n, c, d, h, w = x.shape
    hw = h * w
    # Only the FIRST block needs an XLA pad+cast pass; later blocks consume the previous
    # kernel's bf16 padded-flat output directly.
    x_lin = jnp.pad(x.astype(jnp.bfloat16),
                    ((0, 0), (0, 0), (2, 2), (0, 0), (0, 0))).reshape(n, c, (d + 4) * hw)
    nb = len(blocks)
    for i, blk in enumerate(blocks):
        last = (i == nb - 1)
        x_lin = _conv_block(x_lin, blk, n=n, cin=c, d=d, h=h, w=w,
                            out_padded=not last, eps=eps)
        c = blk["conv_w"].shape[0]
    # Last block output is (N, C, D*H*W) f32 -> NCDHW via a pure reshape (no transpose).
    return x_lin.reshape(n, c, d, h, w)


# ============================================================================
# fc1 -> fc2 -> fc3 (no activations), fc1 contraction tiled over features.
# ============================================================================
def _mlp_kernel(x_ref, w1_ref, b1_ref, w2_ref, b2_ref, w3_ref, b3_ref, o_ref, h_ref):
    j = pl.program_id(0)

    @pl.when(j == 0)
    def _init():
        h_ref[...] = jnp.zeros_like(h_ref)

    # fc1 partial product for this feature tile: bf16 x bf16 MXU, f32 VMEM accumulator.
    h_ref[...] += jnp.dot(x_ref[...], w1_ref[...], preferred_element_type=jnp.float32)

    @pl.when(j == pl.num_programs(0) - 1)
    def _final():
        h1 = (h_ref[...] + b1_ref[...]).astype(jnp.bfloat16)
        h2 = (jnp.dot(h1, w2_ref[...], preferred_element_type=jnp.float32)
              + b2_ref[...]).astype(jnp.bfloat16)
        logits = jnp.dot(h2, w3_ref[...], preferred_element_type=jnp.float32) + b3_ref[...]
        o_ref[...] = logits.astype(o_ref.dtype)


def mlp_head(x2d, fc):
    """x2d: (N, F) f32 -> (N, num_class) f32.  Weights are pre-packed bf16 (see init)."""
    n, f = x2d.shape
    w1, b1 = fc["w1"], fc["b1"]                # (Fp, 1024) bf16 pre-padded, (1, 1024) f32
    w2, b2 = fc["w2"], fc["b2"]                # (1024, 256) bf16, (1, 256) f32
    w3, b3 = fc["w3"], fc["b3"]                # (256, num_class) bf16, (1, num_class) f32
    fp, hidden1 = w1.shape
    hidden2 = w2.shape[1]
    nc = w3.shape[1]
    fk = min(FK, fp)
    assert fp % fk == 0

    # Activations enter bf16 (conv chain already ran in bf16); zero-pad to the tile multiple.
    x_p = jnp.pad(x2d.astype(jnp.bfloat16), ((0, 0), (0, fp - f)))

    return pl.pallas_call(
        _mlp_kernel,
        out_shape=jax.ShapeDtypeStruct((n, nc), jnp.float32),
        grid_spec=pltpu.PrefetchScalarGridSpec(
            num_scalar_prefetch=0,
            grid=(fp // fk,),
            in_specs=[
                pl.BlockSpec((n, fk), lambda j: (0, j)),
                pl.BlockSpec((fk, hidden1), lambda j: (j, 0)),
                pl.BlockSpec((1, hidden1), lambda j: (0, 0)),
                pl.BlockSpec((hidden1, hidden2), lambda j: (0, 0)),
                pl.BlockSpec((1, hidden2), lambda j: (0, 0)),
                pl.BlockSpec((hidden2, nc), lambda j: (0, 0)),
                pl.BlockSpec((1, nc), lambda j: (0, 0)),
            ],
            out_specs=pl.BlockSpec((n, nc), lambda j: (0, 0)),
            scratch_shapes=[pltpu.VMEM((n, hidden1), jnp.float32)],
        ),
        compiler_params=pltpu.CompilerParams(
            dimension_semantics=("arbitrary",),                   # reduction over feature tiles
            vmem_limit_bytes=_vmem_limit_bytes(),
        ),
    )(x_p, w1, b1, w2, b2, w3, b3)


# ============================================================================
# Network forward: conv blocks -> flatten -> fc1 -> fc2 -> fc3
# ============================================================================
def network_forward(x, params):
    conv_out = conv_stack(x, params["blocks"])
    flat = conv_out.reshape(conv_out.shape[0], -1)                # == torch .view(N, -1)
    logits = mlp_head(flat, params["fc"])
    return conv_out, logits


# ============================================================================
# Deterministic parameter init (shapes follow nn.Conv3d / nn.BatchNorm3d / nn.Linear);
# FC weights are pre-packed for the kernel here (outside the jitted forward).
# ============================================================================
def _init_block(key, c_in, c_out):
    k0, k1, k2, k3 = jax.random.split(key, 4)
    bound = 1.0 / jnp.sqrt(c_in * 27)
    return {
        "conv_w": jax.random.uniform(k0, (c_out, c_in, 3, 3, 3), jnp.float32, -bound, bound),
        "conv_b": jax.random.uniform(k1, (c_out,), jnp.float32, -bound, bound),
        "bn_gamma": jnp.ones((c_out,), jnp.float32),
        "bn_beta": jnp.zeros((c_out,), jnp.float32),
        # synthetic deterministic running stats so the eval-mode BN math is exercised
        "bn_mean": 0.1 * jax.random.normal(k2, (c_out,), jnp.float32),
        "bn_var": 1.0 + 0.1 * jax.random.uniform(k3, (c_out,), jnp.float32),
    }


def _init_linear(key, fan_in, fan_out):
    kw, kb = jax.random.split(key)
    bound = 1.0 / jnp.sqrt(fan_in)
    w = jax.random.uniform(kw, (fan_in, fan_out), jnp.float32, -bound, bound)
    b = jax.random.uniform(kb, (1, fan_out), jnp.float32, -bound, bound)
    return w, b


def init_params(key, in_channel, out_channels, img_size, num_class):
    keys = jax.random.split(key, len(out_channels) + 3)
    blocks = []
    c_in = in_channel
    for i, c_out in enumerate(out_channels):
        blocks.append(_init_block(keys[i], c_in, c_out))
        c_in = c_out
    d, h, w = img_size
    feat = c_in * d * h * w
    w1, b1 = _init_linear(keys[-3], feat, 1024)
    w2, b2 = _init_linear(keys[-2], 1024, 256)
    w3, b3 = _init_linear(keys[-1], 256, num_class)
    fp = ((feat + FK - 1) // FK) * FK
    fc = {
        # pre-cast/pre-pad once so no weight conversion traffic inside the forward pass
        "w1": jnp.pad(w1, ((0, fp - feat), (0, 0))).astype(jnp.bfloat16),
        "b1": b1,
        "w2": w2.astype(jnp.bfloat16), "b2": b2,
        "w3": w3.astype(jnp.bfloat16), "b3": b3,
    }
    return {"blocks": tuple(blocks), "fc": fc}


# ============================================================================
# Pure-JAX reference (matches the kernel's bf16 rounding points, f32 accumulation).
# ============================================================================
def reference_forward(x, params, *, eps=1e-5):
    hp = lax.Precision.HIGHEST
    out = x
    for blk in params["blocks"]:
        xb = out.astype(jnp.bfloat16).astype(jnp.float32)
        wb = blk["conv_w"].astype(jnp.bfloat16).astype(jnp.float32)
        out = lax.conv_general_dilated(
            xb, wb, window_strides=(1, 1, 1), padding=((1, 1), (1, 1), (1, 1)),
            dimension_numbers=("NCDHW", "OIDHW", "NCDHW"), precision=hp)
        out = out + blk["conv_b"][None, :, None, None, None]
        s = blk["bn_gamma"] / jnp.sqrt(blk["bn_var"] + eps)
        out = (out - blk["bn_mean"][None, :, None, None, None]) * \
            s[None, :, None, None, None] + blk["bn_beta"][None, :, None, None, None]
        out = jnp.maximum(out, 0.0)
    flat = out.reshape(out.shape[0], -1)
    fc = params["fc"]
    f = flat.shape[1]
    flat_b = flat.astype(jnp.bfloat16).astype(jnp.float32)
    w1 = fc["w1"][:f].astype(jnp.float32)
    w2 = fc["w2"].astype(jnp.float32)
    w3 = fc["w3"].astype(jnp.float32)
    h1 = jnp.dot(flat_b, w1, precision=hp) + fc["b1"]
    h1 = h1.astype(jnp.bfloat16).astype(jnp.float32)
    h2 = jnp.dot(h1, w2, precision=hp) + fc["b2"]
    h2 = h2.astype(jnp.bfloat16).astype(jnp.float32)
    logits = jnp.dot(h2, w3, precision=hp) + fc["b3"]
    return out, logits


if __name__ == "__main__":
    key = jax.random.PRNGKey(0)
    kx, kp = jax.random.split(key)

    # Small Network config: 2 default conv blocks (4 -> 8 -> 8 channels),
    # img_size (8, 8, 8), 10 classes.  Input is NCDHW like the PyTorch module.
    n, c_in, d, h, w = 2, 4, 8, 8, 8
    out_channels = (8, 8)
    num_class = 10

    x = jax.random.normal(kx, (n, c_in, d, h, w), jnp.float32)
    params = init_params(kp, c_in, out_channels, (d, h, w), num_class)

    conv_out, logits = jax.block_until_ready(jax.jit(network_forward)(x, params))
    ref_conv, ref_logits = jax.block_until_ready(jax.jit(reference_forward)(x, params))

    assert conv_out.shape == (n, out_channels[-1], d, h, w), conv_out.shape
    assert logits.shape == (n, num_class), logits.shape
    assert jnp.allclose(conv_out, ref_conv, atol=3e-3, rtol=3e-3), float(
        jnp.max(jnp.abs(conv_out - ref_conv)))
    assert jnp.allclose(logits, ref_logits, atol=5e-3, rtol=5e-3), float(
        jnp.max(jnp.abs(logits - ref_logits)))

    print("KERNEL_OK")
</pallas_src>

<mosaic_0001>
module attributes {stable_mosaic.version = 11 : i64} {
  func.func @_conv_bn_relu_kernel(%arg0: i32, %arg1: memref<1x4x768xbf16, #tpu.memory_space<vmem>>, %arg2: memref<8x128xbf16, #tpu.memory_space<vmem>>, %arg3: memref<9x512xbf16, #tpu.memory_space<vmem>>, %arg4: memref<8x1xf32, #tpu.memory_space<vmem>>, %arg5: memref<8x1xf32, #tpu.memory_space<vmem>>, %arg6: memref<1x8x768xbf16, #tpu.memory_space<vmem>>, %arg7: memref<128x512xbf16, #tpu.memory_space<vmem>>) attributes {dimension_semantics = [#tpu.dimension_semantics<parallel>], iteration_bounds = array<i64: 2>, scalar_prefetch = 0 : i64, scratch_operands = 1 : i64, tpu.core_type = #tpu.core_type<tc>, window_params = [{transform_indices = @transform_0, window_bounds = array<i64: 1, 4, 768>}, {pipeline_mode = #tpu.pipeline_mode<synchronous>, transform_indices = @transform_1, window_bounds = array<i64: 8, 128>}, {pipeline_mode = #tpu.pipeline_mode<synchronous>, transform_indices = @transform_2, window_bounds = array<i64: 9, 512>}, {pipeline_mode = #tpu.pipeline_mode<synchronous>, transform_indices = @transform_3, window_bounds = array<i64: 8, 1>}, {pipeline_mode = #tpu.pipeline_mode<synchronous>, transform_indices = @transform_4, window_bounds = array<i64: 8, 1>}, {transform_indices = @transform_5, window_bounds = array<i64: 1, 8, 768>}]} {
    %c0 = arith.constant 0 : index
    %c0_0 = arith.constant 0 : index
    %c0_1 = arith.constant 0 : index
    %0 = vector.load %arg1[%c0, %c0_0, %c0_1] : memref<1x4x768xbf16, #tpu.memory_space<vmem>>, vector<1x4x768xbf16>
    %1 = vector.shape_cast %0 : vector<1x4x768xbf16> to vector<4x768xbf16>
    %c0_2 = arith.constant 0 : index
    %c0_3 = arith.constant 0 : index
    %2 = vector.load %arg3[%c0_2, %c0_3] : memref<9x512xbf16, #tpu.memory_space<vmem>>, vector<9x512xbf16>
    %cst = arith.constant 0.000000e+00 : bf16
    %3 = vector.broadcast %cst : bf16 to vector<20x512xbf16>
    %c108 = arith.constant 108 : index
    %c0_4 = arith.constant 0 : index
    %4 = vector.load %arg7[%c108, %c0_4] : memref<128x512xbf16, #tpu.memory_space<vmem>>, vector<20x512xbf16>
    tpu.vector_store %arg7[%c108, %c0_4], %3 {strides = array<i32>} : memref<128x512xbf16, #tpu.memory_space<vmem>>, vector<20x512xbf16>,
    %5 = vector.extract_strided_slice %1 {offsets = [0, 55], sizes = [4, 512], strides = [1, 1]} : vector<4x768xbf16> to vector<4x512xbf16>
    %6 = vector.extract_strided_slice %2 {offsets = [0, 0], sizes = [1, 512], strides = [1, 1]} : vector<9x512xbf16> to vector<1x512xbf16>
    %7 = vector.broadcast %6 : vector<1x512xbf16> to vector<4x512xbf16>
    %8 = arith.mulf %5, %7 : vector<4x512xbf16>
    %c0_5 = arith.constant 0 : index
    %c0_6 = arith.constant 0 : index
    %9 = vector.load %arg7[%c0_5, %c0_6] : memref<128x512xbf16, #tpu.memory_space<vmem>>, vector<4x512xbf16>
    tpu.vector_store %arg7[%c0_5, %c0_6], %8 {strides = array<i32>} : memref<128x512xbf16, #tpu.memory_space<vmem>>, vector<4x512xbf16>,
    %10 = vector.extract_strided_slice %1 {offsets = [0, 56], sizes = [4, 512], strides = [1, 1]} : vector<4x768xbf16> to vector<4x512xbf16>
    %11 = vector.extract_strided_slice %2 {offsets = [1, 0], sizes = [1, 512], strides = [1, 1]} : vector<9x512xbf16> to vector<1x512xbf16>
    %12 = vector.broadcast %11 : vector<1x512xbf16> to vector<4x512xbf16>
    %13 = arith.mulf %10, %12 : vector<4x512xbf16>
    %c4 = arith.constant 4 : index
    %c0_7 = arith.constant 0 : index
    %14 = vector.load %arg7[%c4, %c0_7] : memref<128x512xbf16, #tpu.memory_space<vmem>>, vector<4x512xbf16>
    tpu.vector_store %arg7[%c4, %c0_7], %13 {strides = array<i32>} : memref<128x512xbf16, #tpu.memory_space<vmem>>, vector<4x512xbf16>,
    %15 = vector.extract_strided_slice %1 {offsets = [0, 57], sizes = [4, 512], strides = [1, 1]} : vector<4x768xbf16> to vector<4x512xbf16>
    %16 = vector.extract_strided_slice %2 {offsets = [2, 0], sizes = [1, 512], strides = [1, 1]} : vector<9x512xbf16> to vector<1x512xbf16>
    %17 = vector.broadcast %16 : vector<1x512xbf16> to vector<4x512xbf16>
    %18 = arith.mulf %15, %17 : vector<4x512xbf16>
    %c8 = arith.constant 8 : index
    %c0_8 = arith.constant 0 : index
    %19 = vector.load %arg7[%c8, %c0_8] : memref<128x512xbf16, #tpu.memory_space<vmem>>, vector<4x512xbf16>
    tpu.vector_store %arg7[%c8, %c0_8], %18 {strides = array<i32>} : memref<128x512xbf16, #tpu.memory_space<vmem>>, vector<4x512xbf16>,
    %20 = vector.extract_strided_slice %1 {offsets = [0, 63], sizes = [4, 512], strides = [1, 1]} : vector<4x768xbf16> to vector<4x512xbf16>
    %21 = vector.extract_strided_slice %2 {offsets = [3, 0], sizes = [1, 512], strides = [1, 1]} : vector<9x512xbf16> to vector<1x512xbf16>
    %22 = vector.broadcast %21 : vector<1x512xbf16> to vector<4x512xbf16>
    %23 = arith.mulf %20, %22 : vector<4x512xbf16>
    %c12 = arith.constant 12 : index
    %c0_9 = arith.constant 0 : index
    %24 = vector.load %arg7[%c12, %c0_9] : memref<128x512xbf16, #tpu.memory_space<vmem>>, vector<4x512xbf16>
    tpu.vector_store %arg7[%c12, %c0_9], %23 {strides = array<i32>} : memref<128x512xbf16, #tpu.memory_space<vmem>>, vector<4x512xbf16>,
    %25 = vector.extract_strided_slice %1 {offsets = [0, 64], sizes = [4, 512], strides = [1, 1]} : vector<4x768xbf16> to vector<4x512xbf16>
    %c16 = arith.constant 16 : index
    %c0_10 = arith.constant 0 : index
    %26 = vector.load %arg7[%c16, %c0_10] : memref<128x512xbf16, #tpu.memory_space<vmem>>, vector<4x512xbf16>
    tpu.vector_store %arg7[%c16, %c0_10], %25 {strides = array<i32>} : memref<128x512xbf16, #tpu.memory_space<vmem>>, vector<4x512xbf16>,
    %27 = vector.extract_strided_slice %1 {offsets = [0, 65], sizes = [4, 512], strides = [1, 1]} : vector<4x768xbf16> to vector<4x512xbf16>
    %28 = vector.extract_strided_slice %2 {offsets = [5, 0], sizes = [1, 512], strides = [1, 1]} : vector<9x512xbf16> to vector<1x512xbf16>
    %29 = vector.broadcast %28 : vector<1x512xbf16> to vector<4x512xbf16>
    %30 = arith.mulf %27, %29 : vector<4x512xbf16>
    %c20 = arith.constant 20 : index
    %c0_11 = arith.constant 0 : index
    %31 = vector.load %arg7[%c20, %c0_11] : memref<128x512xbf16, #tpu.memory_space<vmem>>, vector<4x512xbf16>
    tpu.vector_store %arg7[%c20, %c0_11], %30 {strides = array<i32>} : memref<128x512xbf16, #tpu.memory_space<vmem>>, vector<4x512xbf16>,
    %32 = vector.extract_strided_slice %1 {offsets = [0, 71], sizes = [4, 512], strides = [1, 1]} : vector<4x768xbf16> to vector<4x512xbf16>
    %33 = vector.extract_strided_slice %2 {offsets = [6, 0], sizes = [1, 512], strides = [1, 1]} : vector<9x512xbf16> to vector<1x512xbf16>
    %34 = vector.broadcast %33 : vector<1x512xbf16> to vector<4x512xbf16>
    %35 = arith.mulf %32, %34 : vector<4x512xbf16>
    %c24 = arith.constant 24 : index
    %c0_12 = arith.constant 0 : index
    %36 = vector.load %arg7[%c24, %c0_12] : memref<128x512xbf16, #tpu.memory_space<vmem>>, vector<4x512xbf16>
    tpu.vector_store %arg7[%c24, %c0_12], %35 {strides = array<i32>} : memref<128x512xbf16, #tpu.memory_space<vmem>>, vector<4x512xbf16>,
    %37 = vector.extract_strided_slice %1 {offsets = [0, 72], sizes = [4, 512], strides = [1, 1]} : vector<4x768xbf16> to vector<4x512xbf16>
    %38 = vector.extract_strided_slice %2 {offsets = [7, 0], sizes = [1, 512], strides = [1, 1]} : vector<9x512xbf16> to vector<1x512xbf16>
    %39 = vector.broadcast %38 : vector<1x512xbf16> to vector<4x512xbf16>
    %40 = arith.mulf %37, %39 : vector<4x512xbf16>
    %c28 = arith.constant 28 : index
    %c0_13 = arith.constant 0 : index
    %41 = vector.load %arg7[%c28, %c0_13] : memref<128x512xbf16, #tpu.memory_space<vmem>>, vector<4x512xbf16>
    tpu.vector_store %arg7[%c28, %c0_13], %40 {strides = array<i32>} : memref<128x512xbf16, #tpu.memory_space<vmem>>, vector<4x512xbf16>,
    %42 = vector.extract_strided_slice %1 {offsets = [0, 73], sizes = [4, 512], strides = [1, 1]} : vector<4x768xbf16> to vector<4x512xbf16>
    %43 = vector.extract_strided_slice %2 {offsets = [8, 0], sizes = [1, 512], strides = [1, 1]} : vector<9x512xbf16> to vector<1x512xbf16>
    %44 = vector.broadcast %43 : vector<1x512xbf16> to vector<4x512xbf16>
    %45 = arith.mulf %42, %44 : vector<4x512xbf16>
    %c32 = arith.constant 32 : index
    %c0_14 = arith.constant 0 : index
    %46 = vector.load %arg7[%c32, %c0_14] : memref<128x512xbf16, #tpu.memory_space<vmem>>, vector<4x512xbf16>
    tpu.vector_store %arg7[%c32, %c0_14], %45 {strides = array<i32>} : memref<128x512xbf16, #tpu.memory_space<vmem>>, vector<4x512xbf16>,
    %47 = vector.extract_strided_slice %1 {offsets = [0, 119], sizes = [4, 512], strides = [1, 1]} : vector<4x768xbf16> to vector<4x512xbf16>
    %48 = vector.extract_strided_slice %2 {offsets = [0, 0], sizes = [1, 512], strides = [1, 1]} : vector<9x512xbf16> to vector<1x512xbf16>
    %49 = vector.broadcast %48 : vector<1x512xbf16> to vector<4x512xbf16>
    %50 = arith.mulf %47, %49 : vector<4x512xbf16>
    %c36 = arith.constant 36 : index
    %c0_15 = arith.constant 0 : index
    %51 = vector.load %arg7[%c36, %c0_15] : memref<128x512xbf16, #tpu.memory_space<vmem>>, vector<4x512xbf16>
    tpu.vector_store %arg7[%c36, %c0_15], %50 {strides = array<i32>} : memref<128x512xbf16, #tpu.memory_space<vmem>>, vector<4x512xbf16>,
    %52 = vector.extract_strided_slice %1 {offsets = [0, 120], sizes = [4, 512], strides = [1, 1]} : vector<4x768xbf16> to vector<4x512xbf16>
    %53 = vector.extract_strided_slice %2 {offsets = [1, 0], sizes = [1, 512], strides = [1, 1]} : vector<9x512xbf16> to vector<1x512xbf16>
    %54 = vector.broadcast %53 : vector<1x512xbf16> to vector<4x512xbf16>
    %55 = arith.mulf %52, %54 : vector<4x512xbf16>
    %c40 = arith.constant 40 : index
    %c0_16 = arith.constant 0 : index
    %56 = vector.load %arg7[%c40, %c0_16] : memref<128x512xbf16, #tpu.memory_space<vmem>>, vector<4x512xbf16>
    tpu.vector_store %arg7[%c40, %c0_16], %55 {strides = array<i32>} : memref<128x512xbf16, #tpu.memory_space<vmem>>, vector<4x512xbf16>,
    %57 = vector.extract_strided_slice %1 {offsets = [0, 121], sizes = [4, 512], strides = [1, 1]} : vector<4x768xbf16> to vector<4x512xbf16>
    %58 = vector.extract_strided_slice %2 {offsets = [2, 0], sizes = [1, 512], strides = [1, 1]} : vector<9x512xbf16> to vector<1x512xbf16>
    %59 = vector.broadcast %58 : vector<1x512xbf16> to vector<4x512xbf16>
    %60 = arith.mulf %57, %59 : vector<4x512xbf16>
    %c44 = arith.constant 44 : index
    %c0_17 = arith.constant 0 : index
    %61 = vector.load %arg7[%c44, %c0_17] : memref<128x512xbf16, #tpu.memory_space<vmem>>, vector<4x512xbf16>
    tpu.vector_store %arg7[%c44, %c0_17], %60 {strides = array<i32>} : memref<128x512xbf16, #tpu.memory_space<vmem>>, vector<4x512xbf16>,
    %62 = vector.extract_strided_slice %1 {offsets = [0, 127], sizes = [4, 512], strides = [1, 1]} : vector<4x768xbf16> to vector<4x512xbf16>
    %63 = vector.extract_strided_slice %2 {offsets = [3, 0], sizes = [1, 512], strides = [1, 1]} : vector<9x512xbf16> to vector<1x512xbf16>
    %64 = vector.broadcast %63 : vector<1x512xbf16> to vector<4x512xbf16>
    %65 = arith.mulf %62, %64 : vector<4x512xbf16>
    %c48 = arith.constant 48 : index
    %c0_18 = arith.constant 0 : index
    %66 = vector.load %arg7[%c48, %c0_18] : memref<128x512xbf16, #tpu.memory_space<vmem>>, vector<4x512xbf16>
    tpu.vector_store %arg7[%c48, %c0_18], %65 {strides = array<i32>} : memref<128x512xbf16, #tpu.memory_space<vmem>>, vector<4x512xbf16>,
    %67 = vector.extract_strided_slice %1 {offsets = [0, 128], sizes = [4, 512], strides = [1, 1]} : vector<4x768xbf16> to vector<4x512xbf16>
    %c52 = arith.constant 52 : index
    %c0_19 = arith.constant 0 : index
    %68 = vector.load %arg7[%c52, %c0_19] : memref<128x512xbf16, #tpu.memory_space<vmem>>, vector<4x512xbf16>
    tpu.vector_store %arg7[%c52, %c0_19], %67 {strides = array<i32>} : memref<128x512xbf16, #tpu.memory_space<vmem>>, vector<4x512xbf16>,
    %69 = vector.extract_strided_slice %1 {offsets = [0, 129], sizes = [4, 512], strides = [1, 1]} : vector<4x768xbf16> to vector<4x512xbf16>
    %70 = vector.extract_strided_slice %2 {offsets = [5, 0], sizes = [1, 512], strides = [1, 1]} : vector<9x512xbf16> to vector<1x512xbf16>
    %71 = vector.broadcast %70 : vector<1x512xbf16> to vector<4x512xbf16>
    %72 = arith.mulf %69, %71 : vector<4x512xbf16>
    %c56 = arith.constant 56 : index
    %c0_20 = arith.constant 0 : index
    %73 = vector.load %arg7[%c56, %c0_20] : memref<128x512xbf16, #tpu.memory_space<vmem>>, vector<4x512xbf16>
    tpu.vector_store %arg7[%c56, %c0_20], %72 {strides = array<i32>} : memref<128x512xbf16, #tpu.memory_space<vmem>>, vector<4x512xbf16>,
    %74 = vector.extract_strided_slice %1 {offsets = [0, 135], sizes = [4, 512], strides = [1, 1]} : vector<4x768xbf16> to vector<4x512xbf16>
    %75 = vector.extract_strided_slice %2 {offsets = [6, 0], sizes = [1, 512], strides = [1, 1]} : vector<9x512xbf16> to vector<1x512xbf16>
    %76 = vector.broadcast %75 : vector<1x512xbf16> to vector<4x512xbf16>
    %77 = arith.mulf %74, %76 : vector<4x512xbf16>
    %c60 = arith.constant 60 : index
    %c0_21 = arith.constant 0 : index
    %78 = vector.load %arg7[%c60, %c0_21] : memref<128x512xbf16, #tpu.memory_space<vmem>>, vector<4x512xbf16>
    tpu.vector_store %arg7[%c60, %c0_21], %77 {strides = array<i32>} : memref<128x512xbf16, #tpu.memory_space<vmem>>, vector<4x512xbf16>,
    %79 = vector.extract_strided_slice %1 {offsets = [0, 136], sizes = [4, 512], strides = [1, 1]} : vector<4x768xbf16> to vector<4x512xbf16>
    %80 = vector.extract_strided_slice %2 {offsets = [7, 0], sizes = [1, 512], strides = [1, 1]} : vector<9x512xbf16> to vector<1x512xbf16>
    %81 = vector.broadcast %80 : vector<1x512xbf16> to vector<4x512xbf16>
    %82 = arith.mulf %79, %81 : vector<4x512xbf16>
    %c64 = arith.constant 64 : index
    %c0_22 = arith.constant 0 : index
    %83 = vector.load %arg7[%c64, %c0_22] : memref<128x512xbf16, #tpu.memory_space<vmem>>, vector<4x512xbf16>
    tpu.vector_store %arg7[%c64, %c0_22], %82 {strides = array<i32>} : memref<128x512xbf16, #tpu.memory_space<vmem>>, vector<4x512xbf16>,
    %84 = vector.extract_strided_slice %1 {offsets = [0, 137], sizes = [4, 512], strides = [1, 1]} : vector<4x768xbf16> to vector<4x512xbf16>
    %85 = vector.extract_strided_slice %2 {offsets = [8, 0], sizes = [1, 512], strides = [1, 1]} : vector<9x512xbf16> to vector<1x512xbf16>
    %86 = vector.broadcast %85 : vector<1x512xbf16> to vector<4x512xbf16>
    %87 = arith.mulf %84, %86 : vector<4x512xbf16>
    %c68 = arith.constant 68 : index
    %c0_23 = arith.constant 0 : index
    %88 = vector.load %arg7[%c68, %c0_23] : memref<128x512xbf16, #tpu.memory_space<vmem>>, vector<4x512xbf16>
    tpu.vector_store %arg7[%c68, %c0_23], %87 {strides = array<i32>} : memref<128x512xbf16, #tpu.memory_space<vmem>>, vector<4x512xbf16>,
    %89 = vector.extract_strided_slice %1 {offsets = [0, 183], sizes = [4, 512], strides = [1, 1]} : vector<4x768xbf16> to vector<4x512xbf16>
    %90 = vector.extract_strided_slice %2 {offsets = [0, 0], sizes = [1, 512], strides = [1, 1]} : vector<9x512xbf16> to vector<1x512xbf16>
    %91 = vector.broadcast %90 : vector<1x512xbf16> to vector<4x512xbf16>
    %92 = arith.mulf %89, %91 : vector<4x512xbf16>
    %c72 = arith.constant 72 : index
    %c0_24 = arith.constant 0 : index
    %93 = vector.load %arg7[%c72, %c0_24] : memref<128x512xbf16, #tpu.memory_space<vmem>>, vector<4x512xbf16>
    tpu.vector_store %arg7[%c72, %c0_24], %92 {strides = array<i32>} : memref<128x512xbf16, #tpu.memory_space<vmem>>, vector<4x512xbf16>,
    %94 = vector.extract_strided_slice %1 {offsets = [0, 184], sizes = [4, 512], strides = [1, 1]} : vector<4x768xbf16> to vector<4x512xbf16>
    %95 = vector.extract_strided_slice %2 {offsets = [1, 0], sizes = [1, 512], strides = [1, 1]} : vector<9x512xbf16> to vector<1x512xbf16>
    %96 = vector.broadcast %95 : vector<1x512xbf16> to vector<4x512xbf16>
    %97 = arith.mulf %94, %96 : vector<4x512xbf16>
    %c76 = arith.constant 76 : index
    %c0_25 = arith.constant 0 : index
    %98 = vector.load %arg7[%c76, %c0_25] : memref<128x512xbf16, #tpu.memory_space<vmem>>, vector<4x512xbf16>
    tpu.vector_store %arg7[%c76, %c0_25], %97 {strides = array<i32>} : memref<128x512xbf16, #tpu.memory_space<vmem>>, vector<4x512xbf16>,
    %99 = vector.extract_strided_slice %1 {offsets = [0, 185], sizes = [4, 512], strides = [1, 1]} : vector<4x768xbf16> to vector<4x512xbf16>
    %100 = vector.extract_strided_slice %2 {offsets = [2, 0], sizes = [1, 512], strides = [1, 1]} : vector<9x512xbf16> to vector<1x512xbf16>
    %101 = vector.broadcast %100 : vector<1x512xbf16> to vector<4x512xbf16>
    %102 = arith.mulf %99, %101 : vector<4x512xbf16>
    %c80 = arith.constant 80 : index
    %c0_26 = arith.constant 0 : index
    %103 = vector.load %arg7[%c80, %c0_26] : memref<128x512xbf16, #tpu.memory_space<vmem>>, vector<4x512xbf16>
    tpu.vector_store %arg7[%c80, %c0_26], %102 {strides = array<i32>} : memref<128x512xbf16, #tpu.memory_space<vmem>>, vector<4x512xbf16>,
    %104 = vector.extract_strided_slice %1 {offsets = [0, 191], sizes = [4, 512], strides = [1, 1]} : vector<4x768xbf16> to vector<4x512xbf16>
    %105 = vector.extract_strided_slice %2 {offsets = [3, 0], sizes = [1, 512], strides = [1, 1]} : vector<9x512xbf16> to vector<1x512xbf16>
    %106 = vector.broadcast %105 : vector<1x512xbf16> to vector<4x512xbf16>
    %107 = arith.mulf %104, %106 : vector<4x512xbf16>
    %c84 = arith.constant 84 : index
    %c0_27 = arith.constant 0 : index
    %108 = vector.load %arg7[%c84, %c0_27] : memref<128x512xbf16, #tpu.memory_space<vmem>>, vector<4x512xbf16>
    tpu.vector_store %arg7[%c84, %c0_27], %107 {strides = array<i32>} : memref<128x512xbf16, #tpu.memory_space<vmem>>, vector<4x512xbf16>,
    %109 = vector.extract_strided_slice %1 {offsets = [0, 192], sizes = [4, 512], strides = [1, 1]} : vector<4x768xbf16> to vector<4x512xbf16>
    %c88 = arith.constant 88 : index
    %c0_28 = arith.constant 0 : index
    %110 = vector.load %arg7[%c88, %c0_28] : memref<128x512xbf16, #tpu.memory_space<vmem>>, vector<4x512xbf16>
    tpu.vector_store %arg7[%c88, %c0_28], %109 {strides = array<i32>} : memref<128x512xbf16, #tpu.memory_space<vmem>>, vector<4x512xbf16>,
    %111 = vector.extract_strided_slice %1 {offsets = [0, 193], sizes = [4, 512], strides = [1, 1]} : vector<4x768xbf16> to vector<4x512xbf16>
    %112 = vector.extract_strided_slice %2 {offsets = [5, 0], sizes = [1, 512], strides = [1, 1]} : vector<9x512xbf16> to vector<1x512xbf16>
    %113 = vector.broadcast %112 : vector<1x512xbf16> to vector<4x512xbf16>
    %114 = arith.mulf %111, %113 : vector<4x512xbf16>
    %c92 = arith.constant 92 : index
    %c0_29 = arith.constant 0 : index
    %115 = vector.load %arg7[%c92, %c0_29] : memref<128x512xbf16, #tpu.memory_space<vmem>>, vector<4x512xbf16>
    tpu.vector_store %arg7[%c92, %c0_29], %114 {strides = array<i32>} : memref<128x512xbf16, #tpu.memory_space<vmem>>, vector<4x512xbf16>,
    %116 = vector.extract_strided_slice %1 {offsets = [0, 199], sizes = [4, 512], strides = [1, 1]} : vector<4x768xbf16> to vector<4x512xbf16>
    %117 = vector.extract_strided_slice %2 {offsets = [6, 0], sizes = [1, 512], strides = [1, 1]} : vector<9x512xbf16> to vector<1x512xbf16>
    %118 = vector.broadcast %117 : vector<1x512xbf16> to vector<4x512xbf16>
    %119 = arith.mulf %116, %118 : vector<4x512xbf16>
    %c96 = arith.constant 96 : index
    %c0_30 = arith.constant 0 : index
    %120 = vector.load %arg7[%c96, %c0_30] : memref<128x512xbf16, #tpu.memory_space<vmem>>, vector<4x512xbf16>
    tpu.vector_store %arg7[%c96, %c0_30], %119 {strides = array<i32>} : memref<128x512xbf16, #tpu.memory_space<vmem>>, vector<4x512xbf16>,
    %121 = vector.extract_strided_slice %1 {offsets = [0, 200], sizes = [4, 512], strides = [1, 1]} : vector<4x768xbf16> to vector<4x512xbf16>
    %122 = vector.extract_strided_slice %2 {offsets = [7, 0], sizes = [1, 512], strides = [1, 1]} : vector<9x512xbf16> to vector<1x512xbf16>
    %123 = vector.broadcast %122 : vector<1x512xbf16> to vector<4x512xbf16>
    %124 = arith.mulf %121, %123 : vector<4x512xbf16>
    %c100 = arith.constant 100 : index
    %c0_31 = arith.constant 0 : index
    %125 = vector.load %arg7[%c100, %c0_31] : memref<128x512xbf16, #tpu.memory_space<vmem>>, vector<4x512xbf16>
    tpu.vector_store %arg7[%c100, %c0_31], %124 {strides = array<i32>} : memref<128x512xbf16, #tpu.memory_space<vmem>>, vector<4x512xbf16>,
    %126 = vector.extract_strided_slice %1 {offsets = [0, 201], sizes = [4, 512], strides = [1, 1]} : vector<4x768xbf16> to vector<4x512xbf16>
    %127 = vector.extract_strided_slice %2 {offsets = [8, 0], sizes = [1, 512], strides = [1, 1]} : vector<9x512xbf16> to vector<1x512xbf16>
    %128 = vector.broadcast %127 : vector<1x512xbf16> to vector<4x512xbf16>
    %129 = arith.mulf %126, %128 : vector<4x512xbf16>
    %c104 = arith.constant 104 : index
    %c0_32 = arith.constant 0 : index
    %130 = vector.load %arg7[%c104, %c0_32] : memref<128x512xbf16, #tpu.memory_space<vmem>>, vector<4x512xbf16>
    tpu.vector_store %arg7[%c104, %c0_32], %129 {strides = array<i32>} : memref<128x512xbf16, #tpu.memory_space<vmem>>, vector<4x512xbf16>,
    %c0_33 = arith.constant 0 : index
    %c0_34 = arith.constant 0 : index
    %131 = vector.load %arg2[%c0_33, %c0_34] : memref<8x128xbf16, #tpu.memory_space<vmem>>, vector<8x128xbf16>
    %c0_35 = arith.constant 0 : index
    %c0_36 = arith.constant 0 : index
    %132 = vector.load %arg7[%c0_35, %c0_36] : memref<128x512xbf16, #tpu.memory_space<vmem>>, vector<128x512xbf16>
    %cst_37 = arith.constant dense<0.000000e+00> : vector<8x512xf32>
    %133 = tpu.matmul %131, %132, %cst_37 {dimension_numbers = #tpu.dot_dimension_numbers<[1], [0], [0], [1], [0, 0, 1, 1], [], []>} : vector<8x128xbf16>, vector<128x512xbf16>, vector<8x512xf32> -> vector<8x512xf32>
    %c0_38 = arith.constant 0 : index
    %c0_39 = arith.constant 0 : index
    %134 = vector.load %arg4[%c0_38, %c0_39] : memref<8x1xf32, #tpu.memory_space<vmem>>, vector<8x1xf32>
    %135 = vector.broadcast %134 : vector<8x1xf32> to vector<8x512xf32>
    %136 = arith.mulf %133, %135 : vector<8x512xf32>
    %c0_40 = arith.constant 0 : index
    %c0_41 = arith.constant 0 : index
    %137 = vector.load %arg5[%c0_40, %c0_41] : memref<8x1xf32, #tpu.memory_space<vmem>>, vector<8x1xf32>
    %138 = vector.broadcast %137 : vector<8x1xf32> to vector<8x512xf32>
    %139 = arith.addf %136, %138 : vector<8x512xf32>
    %cst_42 = arith.constant 0.000000e+00 : f32
    %140 = vector.broadcast %cst_42 : f32 to vector<8x512xf32>
    %141 = arith.maximumf %139, %140 : vector<8x512xf32>
    %cst_43 = arith.constant 0.000000e+00 : bf16
    %142 = vector.broadcast %cst_43 : bf16 to vector<8x128xbf16>
    %c0_44 = arith.constant 0 : index
    %c0_45 = arith.constant 0 : index
    %c0_46 = arith.constant 0 : index
    %143 = vector.load %arg6[%c0_44, %c0_45, %c0_46] : memref<1x8x768xbf16, #tpu.memory_space<vmem>>, vector<1x8x128xbf16>
    %144 = vector.shape_cast %143 : vector<1x8x128xbf16> to vector<8x128xbf16>
    %145 = vector.shape_cast %142 : vector<8x128xbf16> to vector<1x8x128xbf16>
    tpu.vector_store %arg6[%c0_44, %c0_45, %c0_46], %145 {strides = array<i32>} : memref<1x8x768xbf16, #tpu.memory_space<vmem>>, vector<1x8x128xbf16>,
    %146 = arith.truncf %141 : vector<8x512xf32> to vector<8x512xbf16>
    %c0_47 = arith.constant 0 : index
    %c0_48 = arith.constant 0 : index
    %c128 = arith.constant 128 : index
    %147 = vector.load %arg6[%c0_47, %c0_48, %c128] : memref<1x8x768xbf16, #tpu.memory_space<vmem>>, vector<1x8x512xbf16>
    %148 = vector.shape_cast %147 : vector<1x8x512xbf16> to vector<8x512xbf16>
    %149 = vector.shape_cast %146 : vector<8x512xbf16> to vector<1x8x512xbf16>
    tpu.vector_store %arg6[%c0_47, %c0_48, %c128], %149 {strides = array<i32>} : memref<1x8x768xbf16, #tpu.memory_space<vmem>>, vector<1x8x512xbf16>,
    %c0_49 = arith.constant 0 : index
    %c0_50 = arith.constant 0 : index
    %c640 = arith.constant 640 : index
    %150 = vector.load %arg6[%c0_49, %c0_50, %c640] : memref<1x8x768xbf16, #tpu.memory_space<vmem>>, vector<1x8x128xbf16>
    %151 = vector.shape_cast %150 : vector<1x8x128xbf16> to vector<8x128xbf16>
    %152 = vector.shape_cast %142 : vector<8x128xbf16> to vector<1x8x128xbf16>
    tpu.vector_store %arg6[%c0_49, %c0_50, %c640], %152 {strides = array<i32>} : memref<1x8x768xbf16, #tpu.memory_space<vmem>>, vector<1x8x128xbf16>,
    return
  }
  func.func @transform_0(%arg0: i32) -> (i32, i32, i32) {
    %c0_i32 = arith.constant 0 : i32
    %c0_i32_0 = arith.constant 0 : i32
    %c0_i32_1 = arith.constant 0 : i32
    return %arg0, %c0_i32, %c0_i32_0 : i32, i32, i32
  }
  func.func @transform_1(%arg0: i32) -> (i32, i32) {
    %c0_i32 = arith.constant 0 : i32
    %c0_i32_0 = arith.constant 0 : i32
    %c0_i32_1 = arith.constant 0 : i32
    return %c0_i32, %c0_i32_0 : i32, i32
  }
  func.func @transform_2(%arg0: i32) -> (i32, i32) {
    %c0_i32 = arith.constant 0 : i32
    %c0_i32_0 = arith.constant 0 : i32
    %c0_i32_1 = arith.constant 0 : i32
    return %c0_i32, %c0_i32_0 : i32, i32
  }
  func.func @transform_3(%arg0: i32) -> (i32, i32) {
    %c0_i32 = arith.constant 0 : i32
    %c0_i32_0 = arith.constant 0 : i32
    %c0_i32_1 = arith.constant 0 : i32
    return %c0_i32, %c0_i32_0 : i32, i32
  }
  func.func @transform_4(%arg0: i32) -> (i32, i32) {
    %c0_i32 = arith.constant 0 : i32
    %c0_i32_0 = arith.constant 0 : i32
    %c0_i32_1 = arith.constant 0 : i32
    return %c0_i32, %c0_i32_0 : i32, i32
  }
  func.func @transform_5(%arg0: i32) -> (i32, i32, i32) {
    %c0_i32 = arith.constant 0 : i32
    %c0_i32_0 = arith.constant 0 : i32
    %c0_i32_1 = arith.constant 0 : i32
    return %arg0, %c0_i32, %c0_i32_0 : i32, i32, i32
  }
}

module attributes {stable_mosaic.version = 11 : i64} {
  func.func @_conv_bn_relu_kernel(%arg0: i32, %arg1: memref<1x8x768xbf16, #tpu.memory_space<vmem>>, %arg2: memref<8x256xbf16, #tpu.memory_space<vmem>>, %arg3: memref<9x512xbf16, #tpu.memory_space<vmem>>, %arg4: memref<8x1xf32, #tpu.memory_space<vmem>>, %arg5: memref<8x1xf32, #tpu.memory_space<vmem>>, %arg6: memref<1x8x512xf32, #tpu.memory_space<vmem>>, %arg7: memref<256x512xbf16, #tpu.memory_space<vmem>>) attributes {dimension_semantics = [#tpu.dimension_semantics<parallel>], iteration_bounds = array<i64: 2>, scalar_prefetch = 0 : i64, scratch_operands = 1 : i64, tpu.core_type = #tpu.core_type<tc>, window_params = [{transform_indices = @transform_0, window_bounds = array<i64: 1, 8, 768>}, {pipeline_mode = #tpu.pipeline_mode<synchronous>, transform_indices = @transform_1, window_bounds = array<i64: 8, 256>}, {pipeline_mode = #tpu.pipeline_mode<synchronous>, transform_indices = @transform_2, window_bounds = array<i64: 9, 512>}, {pipeline_mode = #tpu.pipeline_mode<synchronous>, transform_indices = @transform_3, window_bounds = array<i64: 8, 1>}, {pipeline_mode = #tpu.pipeline_mode<synchronous>, transform_indices = @transform_4, window_bounds = array<i64: 8, 1>}, {transform_indices = @transform_5, window_bounds = array<i64: 1, 8, 512>}]} {
    %c0 = arith.constant 0 : index
    %c0_0 = arith.constant 0 : index
    %c0_1 = arith.constant 0 : index
    %0 = vector.load %arg1[%c0, %c0_0, %c0_1] : memref<1x8x768xbf16, #tpu.memory_space<vmem>>, vector<1x8x768xbf16>
    %1 = vector.shape_cast %0 : vector<1x8x768xbf16> to vector<8x768xbf16>
    %c0_2 = arith.constant 0 : index
    %c0_3 = arith.constant 0 : index
    %2 = vector.load %arg3[%c0_2, %c0_3] : memref<9x512xbf16, #tpu.memory_space<vmem>>, vector<9x512xbf16>
    %cst = arith.constant 0.000000e+00 : bf16
    %3 = vector.broadcast %cst : bf16 to vector<40x512xbf16>
    %c216 = arith.constant 216 : index
    %c0_4 = arith.constant 0 : index
    %4 = vector.load %arg7[%c216, %c0_4] : memref<256x512xbf16, #tpu.memory_space<vmem>>, vector<40x512xbf16>
    tpu.vector_store %arg7[%c216, %c0_4], %3 {strides = array<i32>} : memref<256x512xbf16, #tpu.memory_space<vmem>>, vector<40x512xbf16>,
    %5 = vector.extract_strided_slice %1 {offsets = [0, 55], sizes = [8, 512], strides = [1, 1]} : vector<8x768xbf16> to vector<8x512xbf16>
    %6 = vector.extract_strided_slice %2 {offsets = [0, 0], sizes = [1, 512], strides = [1, 1]} : vector<9x512xbf16> to vector<1x512xbf16>
    %7 = vector.broadcast %6 : vector<1x512xbf16> to vector<8x512xbf16>
    %8 = arith.mulf %5, %7 : vector<8x512xbf16>
    %c0_5 = arith.constant 0 : index
    %c0_6 = arith.constant 0 : index
    %9 = vector.load %arg7[%c0_5, %c0_6] : memref<256x512xbf16, #tpu.memory_space<vmem>>, vector<8x512xbf16>
    tpu.vector_store %arg7[%c0_5, %c0_6], %8 {strides = array<i32>} : memref<256x512xbf16, #tpu.memory_space<vmem>>, vector<8x512xbf16>,
    %10 = vector.extract_strided_slice %1 {offsets = [0, 56], sizes = [8, 512], strides = [1, 1]} : vector<8x768xbf16> to vector<8x512xbf16>
    %11 = vector.extract_strided_slice %2 {offsets = [1, 0], sizes = [1, 512], strides = [1, 1]} : vector<9x512xbf16> to vector<1x512xbf16>
    %12 = vector.broadcast %11 : vector<1x512xbf16> to vector<8x512xbf16>
    %13 = arith.mulf %10, %12 : vector<8x512xbf16>
    %c8 = arith.constant 8 : index
    %c0_7 = arith.constant 0 : index
    %14 = vector.load %arg7[%c8, %c0_7] : memref<256x512xbf16, #tpu.memory_space<vmem>>, vector<8x512xbf16>
    tpu.vector_store %arg7[%c8, %c0_7], %13 {strides = array<i32>} : memref<256x512xbf16, #tpu.memory_space<vmem>>, vector<8x512xbf16>,
    %15 = vector.extract_strided_slice %1 {offsets = [0, 57], sizes = [8, 512], strides = [1, 1]} : vector<8x768xbf16> to vector<8x512xbf16>
    %16 = vector.extract_strided_slice %2 {offsets = [2, 0], sizes = [1, 512], strides = [1, 1]} : vector<9x512xbf16> to vector<1x512xbf16>
    %17 = vector.broadcast %16 : vector<1x512xbf16> to vector<8x512xbf16>
    %18 = arith.mulf %15, %17 : vector<8x512xbf16>
    %c16 = arith.constant 16 : index
    %c0_8 = arith.constant 0 : index
    %19 = vector.load %arg7[%c16, %c0_8] : memref<256x512xbf16, #tpu.memory_space<vmem>>, vector<8x512xbf16>
    tpu.vector_store %arg7[%c16, %c0_8], %18 {strides = array<i32>} : memref<256x512xbf16, #tpu.memory_space<vmem>>, vector<8x512xbf16>,
    %20 = vector.extract_strided_slice %1 {offsets = [0, 63], sizes = [8, 512], strides = [1, 1]} : vector<8x768xbf16> to vector<8x512xbf16>
    %21 = vector.extract_strided_slice %2 {offsets = [3, 0], sizes = [1, 512], strides = [1, 1]} : vector<9x512xbf16> to vector<1x512xbf16>
    %22 = vector.broadcast %21 : vector<1x512xbf16> to vector<8x512xbf16>
    %23 = arith.mulf %20, %22 : vector<8x512xbf16>
    %c24 = arith.constant 24 : index
    %c0_9 = arith.constant 0 : index
    %24 = vector.load %arg7[%c24, %c0_9] : memref<256x512xbf16, #tpu.memory_space<vmem>>, vector<8x512xbf16>
    tpu.vector_store %arg7[%c24, %c0_9], %23 {strides = array<i32>} : memref<256x512xbf16, #tpu.memory_space<vmem>>, vector<8x512xbf16>,
    %25 = vector.extract_strided_slice %1 {offsets = [0, 64], sizes = [8, 512], strides = [1, 1]} : vector<8x768xbf16> to vector<8x512xbf16>
    %c32 = arith.constant 32 : index
    %c0_10 = arith.constant 0 : index
    %26 = vector.load %arg7[%c32, %c0_10] : memref<256x512xbf16, #tpu.memory_space<vmem>>, vector<8x512xbf16>
    tpu.vector_store %arg7[%c32, %c0_10], %25 {strides = array<i32>} : memref<256x512xbf16, #tpu.memory_space<vmem>>, vector<8x512xbf16>,
    %27 = vector.extract_strided_slice %1 {offsets = [0, 65], sizes = [8, 512], strides = [1, 1]} : vector<8x768xbf16> to vector<8x512xbf16>
    %28 = vector.extract_strided_slice %2 {offsets = [5, 0], sizes = [1, 512], strides = [1, 1]} : vector<9x512xbf16> to vector<1x512xbf16>
    %29 = vector.broadcast %28 : vector<1x512xbf16> to vector<8x512xbf16>
    %30 = arith.mulf %27, %29 : vector<8x512xbf16>
    %c40 = arith.constant 40 : index
    %c0_11 = arith.constant 0 : index
    %31 = vector.load %arg7[%c40, %c0_11] : memref<256x512xbf16, #tpu.memory_space<vmem>>, vector<8x512xbf16>
    tpu.vector_store %arg7[%c40, %c0_11], %30 {strides = array<i32>} : memref<256x512xbf16, #tpu.memory_space<vmem>>, vector<8x512xbf16>,
    %32 = vector.extract_strided_slice %1 {offsets = [0, 71], sizes = [8, 512], strides = [1, 1]} : vector<8x768xbf16> to vector<8x512xbf16>
    %33 = vector.extract_strided_slice %2 {offsets = [6, 0], sizes = [1, 512], strides = [1, 1]} : vector<9x512xbf16> to vector<1x512xbf16>
    %34 = vector.broadcast %33 : vector<1x512xbf16> to vector<8x512xbf16>
    %35 = arith.mulf %32, %34 : vector<8x512xbf16>
    %c48 = arith.constant 48 : index
    %c0_12 = arith.constant 0 : index
    %36 = vector.load %arg7[%c48, %c0_12] : memref<256x512xbf16, #tpu.memory_space<vmem>>, vector<8x512xbf16>
    tpu.vector_store %arg7[%c48, %c0_12], %35 {strides = array<i32>} : memref<256x512xbf16, #tpu.memory_space<vmem>>, vector<8x512xbf16>,
    %37 = vector.extract_strided_slice %1 {offsets = [0, 72], sizes = [8, 512], strides = [1, 1]} : vector<8x768xbf16> to vector<8x512xbf16>
    %38 = vector.extract_strided_slice %2 {offsets = [7, 0], sizes = [1, 512], strides = [1, 1]} : vector<9x512xbf16> to vector<1x512xbf16>
    %39 = vector.broadcast %38 : vector<1x512xbf16> to vector<8x512xbf16>
    %40 = arith.mulf %37, %39 : vector<8x512xbf16>
    %c56 = arith.constant 56 : index
    %c0_13 = arith.constant 0 : index
    %41 = vector.load %arg7[%c56, %c0_13] : memref<256x512xbf16, #tpu.memory_space<vmem>>, vector<8x512xbf16>
    tpu.vector_store %arg7[%c56, %c0_13], %40 {strides = array<i32>} : memref<256x512xbf16, #tpu.memory_space<vmem>>, vector<8x512xbf16>,
    %42 = vector.extract_strided_slice %1 {offsets = [0, 73], sizes = [8, 512], strides = [1, 1]} : vector<8x768xbf16> to vector<8x512xbf16>
    %43 = vector.extract_strided_slice %2 {offsets = [8, 0], sizes = [1, 512], strides = [1, 1]} : vector<9x512xbf16> to vector<1x512xbf16>
    %44 = vector.broadcast %43 : vector<1x512xbf16> to vector<8x512xbf16>
    %45 = arith.mulf %42, %44 : vector<8x512xbf16>
    %c64 = arith.constant 64 : index
    %c0_14 = arith.constant 0 : index
    %46 = vector.load %arg7[%c64, %c0_14] : memref<256x512xbf16, #tpu.memory_space<vmem>>, vector<8x512xbf16>
    tpu.vector_store %arg7[%c64, %c0_14], %45 {strides = array<i32>} : memref<256x512xbf16, #tpu.memory_space<vmem>>, vector<8x512xbf16>,
    %47 = vector.extract_strided_slice %1 {offsets = [0, 119], sizes = [8, 512], strides = [1, 1]} : vector<8x768xbf16> to vector<8x512xbf16>
    %48 = vector.extract_strided_slice %2 {offsets = [0, 0], sizes = [1, 512], strides = [1, 1]} : vector<9x512xbf16> to vector<1x512xbf16>
    %49 = vector.broadcast %48 : vector<1x512xbf16> to vector<8x512xbf16>
    %50 = arith.mulf %47, %49 : vector<8x512xbf16>
    %c72 = arith.constant 72 : index
    %c0_15 = arith.constant 0 : index
    %51 = vector.load %arg7[%c72, %c0_15] : memref<256x512xbf16, #tpu.memory_space<vmem>>, vector<8x512xbf16>
    tpu.vector_store %arg7[%c72, %c0_15], %50 {strides = array<i32>} : memref<256x512xbf16, #tpu.memory_space<vmem>>, vector<8x512xbf16>,
    %52 = vector.extract_strided_slice %1 {offsets = [0, 120], sizes = [8, 512], strides = [1, 1]} : vector<8x768xbf16> to vector<8x512xbf16>
    %53 = vector.extract_strided_slice %2 {offsets = [1, 0], sizes = [1, 512], strides = [1, 1]} : vector<9x512xbf16> to vector<1x512xbf16>
    %54 = vector.broadcast %53 : vector<1x512xbf16> to vector<8x512xbf16>
    %55 = arith.mulf %52, %54 : vector<8x512xbf16>
    %c80 = arith.constant 80 : index
    %c0_16 = arith.constant 0 : index
    %56 = vector.load %arg7[%c80, %c0_16] : memref<256x512xbf16, #tpu.memory_space<vmem>>, vector<8x512xbf16>
    tpu.vector_store %arg7[%c80, %c0_16], %55 {strides = array<i32>} : memref<256x512xbf16, #tpu.memory_space<vmem>>, vector<8x512xbf16>,
    %57 = vector.extract_strided_slice %1 {offsets = [0, 121], sizes = [8, 512], strides = [1, 1]} : vector<8x768xbf16> to vector<8x512xbf16>
    %58 = vector.extract_strided_slice %2 {offsets = [2, 0], sizes = [1, 512], strides = [1, 1]} : vector<9x512xbf16> to vector<1x512xbf16>
    %59 = vector.broadcast %58 : vector<1x512xbf16> to vector<8x512xbf16>
    %60 = arith.mulf %57, %59 : vector<8x512xbf16>
    %c88 = arith.constant 88 : index
    %c0_17 = arith.constant 0 : index
    %61 = vector.load %arg7[%c88, %c0_17] : memref<256x512xbf16, #tpu.memory_space<vmem>>, vector<8x512xbf16>
    tpu.vector_store %arg7[%c88, %c0_17], %60 {strides = array<i32>} : memref<256x512xbf16, #tpu.memory_space<vmem>>, vector<8x512xbf16>,
    %62 = vector.extract_strided_slice %1 {offsets = [0, 127], sizes = [8, 512], strides = [1, 1]} : vector<8x768xbf16> to vector<8x512xbf16>
    %63 = vector.extract_strided_slice %2 {offsets = [3, 0], sizes = [1, 512], strides = [1, 1]} : vector<9x512xbf16> to vector<1x512xbf16>
    %64 = vector.broadcast %63 : vector<1x512xbf16> to vector<8x512xbf16>
    %65 = arith.mulf %62, %64 : vector<8x512xbf16>
    %c96 = arith.constant 96 : index
    %c0_18 = arith.constant 0 : index
    %66 = vector.load %arg7[%c96, %c0_18] : memref<256x512xbf16, #tpu.memory_space<vmem>>, vector<8x512xbf16>
    tpu.vector_store %arg7[%c96, %c0_18], %65 {strides = array<i32>} : memref<256x512xbf16, #tpu.memory_space<vmem>>, vector<8x512xbf16>,
    %67 = vector.extract_strided_slice %1 {offsets = [0, 128], sizes = [8, 512], strides = [1, 1]} : vector<8x768xbf16> to vector<8x512xbf16>
    %c104 = arith.constant 104 : index
    %c0_19 = arith.constant 0 : index
    %68 = vector.load %arg7[%c104, %c0_19] : memref<256x512xbf16, #tpu.memory_space<vmem>>, vector<8x512xbf16>
    tpu.vector_store %arg7[%c104, %c0_19], %67 {strides = array<i32>} : memref<256x512xbf16, #tpu.memory_space<vmem>>, vector<8x512xbf16>,
    %69 = vector.extract_strided_slice %1 {offsets = [0, 129], sizes = [8, 512], strides = [1, 1]} : vector<8x768xbf16> to vector<8x512xbf16>
    %70 = vector.extract_strided_slice %2 {offsets = [5, 0], sizes = [1, 512], strides = [1, 1]} : vector<9x512xbf16> to vector<1x512xbf16>
    %71 = vector.broadcast %70 : vector<1x512xbf16> to vector<8x512xbf16>
    %72 = arith.mulf %69, %71 : vector<8x512xbf16>
    %c112 = arith.constant 112 : index
    %c0_20 = arith.constant 0 : index
    %73 = vector.load %arg7[%c112, %c0_20] : memref<256x512xbf16, #tpu.memory_space<vmem>>, vector<8x512xbf16>
    tpu.vector_store %arg7[%c112, %c0_20], %72 {strides = array<i32>} : memref<256x512xbf16, #tpu.memory_space<vmem>>, vector<8x512xbf16>,
    %74 = vector.extract_strided_slice %1 {offsets = [0, 135], sizes = [8, 512], strides = [1, 1]} : vector<8x768xbf16> to vector<8x512xbf16>
    %75 = vector.extract_strided_slice %2 {offsets = [6, 0], sizes = [1, 512], strides = [1, 1]} : vector<9x512xbf16> to vector<1x512xbf16>
    %76 = vector.broadcast %75 : vector<1x512xbf16> to vector<8x512xbf16>
    %77 = arith.mulf %74, %76 : vector<8x512xbf16>
    %c120 = arith.constant 120 : index
    %c0_21 = arith.constant 0 : index
    %78 = vector.load %arg7[%c120, %c0_21] : memref<256x512xbf16, #tpu.memory_space<vmem>>, vector<8x512xbf16>
    tpu.vector_store %arg7[%c120, %c0_21], %77 {strides = array<i32>} : memref<256x512xbf16, #tpu.memory_space<vmem>>, vector<8x512xbf16>,
    %79 = vector.extract_strided_slice %1 {offsets = [0, 136], sizes = [8, 512], strides = [1, 1]} : vector<8x768xbf16> to vector<8x512xbf16>
    %80 = vector.extract_strided_slice %2 {offsets = [7, 0], sizes = [1, 512], strides = [1, 1]} : vector<9x512xbf16> to vector<1x512xbf16>
    %81 = vector.broadcast %80 : vector<1x512xbf16> to vector<8x512xbf16>
    %82 = arith.mulf %79, %81 : vector<8x512xbf16>
    %c128 = arith.constant 128 : index
    %c0_22 = arith.constant 0 : index
    %83 = vector.load %arg7[%c128, %c0_22] : memref<256x512xbf16, #tpu.memory_space<vmem>>, vector<8x512xbf16>
    tpu.vector_store %arg7[%c128, %c0_22], %82 {strides = array<i32>} : memref<256x512xbf16, #tpu.memory_space<vmem>>, vector<8x512xbf16>,
    %84 = vector.extract_strided_slice %1 {offsets = [0, 137], sizes = [8, 512], strides = [1, 1]} : vector<8x768xbf16> to vector<8x512xbf16>
    %85 = vector.extract_strided_slice %2 {offsets = [8, 0], sizes = [1, 512], strides = [1, 1]} : vector<9x512xbf16> to vector<1x512xbf16>
    %86 = vector.broadcast %85 : vector<1x512xbf16> to vector<8x512xbf16>
    %87 = arith.mulf %84, %86 : vector<8x512xbf16>
    %c136 = arith.constant 136 : index
    %c0_23 = arith.constant 0 : index
    %88 = vector.load %arg7[%c136, %c0_23] : memref<256x512xbf16, #tpu.memory_space<vmem>>, vector<8x512xbf16>
    tpu.vector_store %arg7[%c136, %c0_23], %87 {strides = array<i32>} : memref<256x512xbf16, #tpu.memory_space<vmem>>, vector<8x512xbf16>,
    %89 = vector.extract_strided_slice %1 {offsets = [0, 183], sizes = [8, 512], strides = [1, 1]} : vector<8x768xbf16> to vector<8x512xbf16>
    %90 = vector.extract_strided_slice %2 {offsets = [0, 0], sizes = [1, 512], strides = [1, 1]} : vector<9x512xbf16> to vector<1x512xbf16>
    %91 = vector.broadcast %90 : vector<1x512xbf16> to vector<8x512xbf16>
    %92 = arith.mulf %89, %91 : vector<8x512xbf16>
    %c144 = arith.constant 144 : index
    %c0_24 = arith.constant 0 : index
    %93 = vector.load %arg7[%c144, %c0_24] : memref<256x512xbf16, #tpu.memory_space<vmem>>, vector<8x512xbf16>
    tpu.vector_store %arg7[%c144, %c0_24], %92 {strides = array<i32>} : memref<256x512xbf16, #tpu.memory_space<vmem>>, vector<8x512xbf16>,
    %94 = vector.extract_strided_slice %1 {offsets = [0, 184], sizes = [8, 512], strides = [1, 1]} : vector<8x768xbf16> to vector<8x512xbf16>
    %95 = vector.extract_strided_slice %2 {offsets = [1, 0], sizes = [1, 512], strides = [1, 1]} : vector<9x512xbf16> to vector<1x512xbf16>
    %96 = vector.broadcast %95 : vector<1x512xbf16> to vector<8x512xbf16>
    %97 = arith.mulf %94, %96 : vector<8x512xbf16>
    %c152 = arith.constant 152 : index
    %c0_25 = arith.constant 0 : index
    %98 = vector.load %arg7[%c152, %c0_25] : memref<256x512xbf16, #tpu.memory_space<vmem>>, vector<8x512xbf16>
    tpu.vector_store %arg7[%c152, %c0_25], %97 {strides = array<i32>} : memref<256x512xbf16, #tpu.memory_space<vmem>>, vector<8x512xbf16>,
    %99 = vector.extract_strided_slice %1 {offsets = [0, 185], sizes = [8, 512], strides = [1, 1]} : vector<8x768xbf16> to vector<8x512xbf16>
    %100 = vector.extract_strided_slice %2 {offsets = [2, 0], sizes = [1, 512], strides = [1, 1]} : vector<9x512xbf16> to vector<1x512xbf16>
    %101 = vector.broadcast %100 : vector<1x512xbf16> to vector<8x512xbf16>
    %102 = arith.mulf %99, %101 : vector<8x512xbf16>
    %c160 = arith.constant 160 : index
    %c0_26 = arith.constant 0 : index
    %103 = vector.load %arg7[%c160, %c0_26] : memref<256x512xbf16, #tpu.memory_space<vmem>>, vector<8x512xbf16>
    tpu.vector_store %arg7[%c160, %c0_26], %102 {strides = array<i32>} : memref<256x512xbf16, #tpu.memory_space<vmem>>, vector<8x512xbf16>,
    %104 = vector.extract_strided_slice %1 {offsets = [0, 191], sizes = [8, 512], strides = [1, 1]} : vector<8x768xbf16> to vector<8x512xbf16>
    %105 = vector.extract_strided_slice %2 {offsets = [3, 0], sizes = [1, 512], strides = [1, 1]} : vector<9x512xbf16> to vector<1x512xbf16>
    %106 = vector.broadcast %105 : vector<1x512xbf16> to vector<8x512xbf16>
    %107 = arith.mulf %104, %106 : vector<8x512xbf16>
    %c168 = arith.constant 168 : index
    %c0_27 = arith.constant 0 : index
    %108 = vector.load %arg7[%c168, %c0_27] : memref<256x512xbf16, #tpu.memory_space<vmem>>, vector<8x512xbf16>
    tpu.vector_store %arg7[%c168, %c0_27], %107 {strides = array<i32>} : memref<256x512xbf16, #tpu.memory_space<vmem>>, vector<8x512xbf16>,
    %109 = vector.extract_strided_slice %1 {offsets = [0, 192], sizes = [8, 512], strides = [1, 1]} : vector<8x768xbf16> to vector<8x512xbf16>
    %c176 = arith.constant 176 : index
    %c0_28 = arith.constant 0 : index
    %110 = vector.load %arg7[%c176, %c0_28] : memref<256x512xbf16, #tpu.memory_space<vmem>>, vector<8x512xbf16>
    tpu.vector_store %arg7[%c176, %c0_28], %109 {strides = array<i32>} : memref<256x512xbf16, #tpu.memory_space<vmem>>, vector<8x512xbf16>,
    %111 = vector.extract_strided_slice %1 {offsets = [0, 193], sizes = [8, 512], strides = [1, 1]} : vector<8x768xbf16> to vector<8x512xbf16>
    %112 = vector.extract_strided_slice %2 {offsets = [5, 0], sizes = [1, 512], strides = [1, 1]} : vector<9x512xbf16> to vector<1x512xbf16>
    %113 = vector.broadcast %112 : vector<1x512xbf16> to vector<8x512xbf16>
    %114 = arith.mulf %111, %113 : vector<8x512xbf16>
    %c184 = arith.constant 184 : index
    %c0_29 = arith.constant 0 : index
    %115 = vector.load %arg7[%c184, %c0_29] : memref<256x512xbf16, #tpu.memory_space<vmem>>, vector<8x512xbf16>
    tpu.vector_store %arg7[%c184, %c0_29], %114 {strides = array<i32>} : memref<256x512xbf16, #tpu.memory_space<vmem>>, vector<8x512xbf16>,
    %116 = vector.extract_strided_slice %1 {offsets = [0, 199], sizes = [8, 512], strides = [1, 1]} : vector<8x768xbf16> to vector<8x512xbf16>
    %117 = vector.extract_strided_slice %2 {offsets = [6, 0], sizes = [1, 512], strides = [1, 1]} : vector<9x512xbf16> to vector<1x512xbf16>
    %118 = vector.broadcast %117 : vector<1x512xbf16> to vector<8x512xbf16>
    %119 = arith.mulf %116, %118 : vector<8x512xbf16>
    %c192 = arith.constant 192 : index
    %c0_30 = arith.constant 0 : index
    %120 = vector.load %arg7[%c192, %c0_30] : memref<256x512xbf16, #tpu.memory_space<vmem>>, vector<8x512xbf16>
    tpu.vector_store %arg7[%c192, %c0_30], %119 {strides = array<i32>} : memref<256x512xbf16, #tpu.memory_space<vmem>>, vector<8x512xbf16>,
    %121 = vector.extract_strided_slice %1 {offsets = [0, 200], sizes = [8, 512], strides = [1, 1]} : vector<8x768xbf16> to vector<8x512xbf16>
    %122 = vector.extract_strided_slice %2 {offsets = [7, 0], sizes = [1, 512], strides = [1, 1]} : vector<9x512xbf16> to vector<1x512xbf16>
    %123 = vector.broadcast %122 : vector<1x512xbf16> to vector<8x512xbf16>
    %124 = arith.mulf %121, %123 : vector<8x512xbf16>
    %c200 = arith.constant 200 : index
    %c0_31 = arith.constant 0 : index
    %125 = vector.load %arg7[%c200, %c0_31] : memref<256x512xbf16, #tpu.memory_space<vmem>>, vector<8x512xbf16>
    tpu.vector_store %arg7[%c200, %c0_31], %124 {strides = array<i32>} : memref<256x512xbf16, #tpu.memory_space<vmem>>, vector<8x512xbf16>,
    %126 = vector.extract_strided_slice %1 {offsets = [0, 201], sizes = [8, 512], strides = [1, 1]} : vector<8x768xbf16> to vector<8x512xbf16>
    %127 = vector.extract_strided_slice %2 {offsets = [8, 0], sizes = [1, 512], strides = [1, 1]} : vector<9x512xbf16> to vector<1x512xbf16>
    %128 = vector.broadcast %127 : vector<1x512xbf16> to vector<8x512xbf16>
    %129 = arith.mulf %126, %128 : vector<8x512xbf16>
    %c208 = arith.constant 208 : index
    %c0_32 = arith.constant 0 : index
    %130 = vector.load %arg7[%c208, %c0_32] : memref<256x512xbf16, #tpu.memory_space<vmem>>, vector<8x512xbf16>
    tpu.vector_store %arg7[%c208, %c0_32], %129 {strides = array<i32>} : memref<256x512xbf16, #tpu.memory_space<vmem>>, vector<8x512xbf16>,
    %c0_33 = arith.constant 0 : index
    %c0_34 = arith.constant 0 : index
    %131 = vector.load %arg2[%c0_33, %c0_34] : memref<8x256xbf16, #tpu.memory_space<vmem>>, vector<8x256xbf16>
    %c0_35 = arith.constant 0 : index
    %c0_36 = arith.constant 0 : index
    %132 = vector.load %arg7[%c0_35, %c0_36] : memref<256x512xbf16, #tpu.memory_space<vmem>>, vector<256x512xbf16>
    %cst_37 = arith.constant dense<0.000000e+00> : vector<8x512xf32>
    %133 = tpu.matmul %131, %132, %cst_37 {dimension_numbers = #tpu.dot_dimension_numbers<[1], [0], [0], [1], [0, 0, 1, 1], [], []>} : vector<8x256xbf16>, vector<256x512xbf16>, vector<8x512xf32> -> vector<8x512xf32>
    %c0_38 = arith.constant 0 : index
    %c0_39 = arith.constant 0 : index
    %134 = vector.load %arg4[%c0_38, %c0_39] : memref<8x1xf32, #tpu.memory_space<vmem>>, vector<8x1xf32>
    %135 = vector.broadcast %134 : vector<8x1xf32> to vector<8x512xf32>
    %136 = arith.mulf %133, %135 : vector<8x512xf32>
    %c0_40 = arith.constant 0 : index
    %c0_41 = arith.constant 0 : index
    %137 = vector.load %arg5[%c0_40, %c0_41] : memref<8x1xf32, #tpu.memory_space<vmem>>, vector<8x1xf32>
    %138 = vector.broadcast %137 : vector<8x1xf32> to vector<8x512xf32>
    %139 = arith.addf %136, %138 : vector<8x512xf32>
    %cst_42 = arith.constant 0.000000e+00 : f32
    %140 = vector.broadcast %cst_42 : f32 to vector<8x512xf32>
    %141 = arith.maximumf %139, %140 : vector<8x512xf32>
    %c0_43 = arith.constant 0 : index
    %c0_44 = arith.constant 0 : index
    %c0_45 = arith.constant 0 : index
    %142 = vector.load %arg6[%c0_43, %c0_44, %c0_45] : memref<1x8x512xf32, #tpu.memory_space<vmem>>, vector<1x8x512xf32>
    %143 = vector.shape_cast %142 : vector<1x8x512xf32> to vector<8x512xf32>
    %144 = vector.shape_cast %141 : vector<8x512xf32> to vector<1x8x512xf32>
    tpu.vector_store %arg6[%c0_43, %c0_44, %c0_45], %144 {strides = array<i32>} : memref<1x8x512xf32, #tpu.memory_space<vmem>>, vector<1x8x512xf32>,
    return
  }
  func.func @transform_0(%arg0: i32) -> (i32, i32, i32) {
    %c0_i32 = arith.constant 0 : i32
    %c0_i32_0 = arith.constant 0 : i32
    %c0_i32_1 = arith.constant 0 : i32
    return %arg0, %c0_i32, %c0_i32_0 : i32, i32, i32
  }
  func.func @transform_1(%arg0: i32) -> (i32, i32) {
    %c0_i32 = arith.constant 0 : i32
    %c0_i32_0 = arith.constant 0 : i32
    %c0_i32_1 = arith.constant 0 : i32
    return %c0_i32, %c0_i32_0 : i32, i32
  }
  func.func @transform_2(%arg0: i32) -> (i32, i32) {
    %c0_i32 = arith.constant 0 : i32
    %c0_i32_0 = arith.constant 0 : i32
    %c0_i32_1 = arith.constant 0 : i32
    return %c0_i32, %c0_i32_0 : i32, i32
  }
  func.func @transform_3(%arg0: i32) -> (i32, i32) {
    %c0_i32 = arith.constant 0 : i32
    %c0_i32_0 = arith.constant 0 : i32
    %c0_i32_1 = arith.constant 0 : i32
    return %c0_i32, %c0_i32_0 : i32, i32
  }
  func.func @transform_4(%arg0: i32) -> (i32, i32) {
    %c0_i32 = arith.constant 0 : i32
    %c0_i32_0 = arith.constant 0 : i32
    %c0_i32_1 = arith.constant 0 : i32
    return %c0_i32, %c0_i32_0 : i32, i32
  }
  func.func @transform_5(%arg0: i32) -> (i32, i32, i32) {
    %c0_i32 = arith.constant 0 : i32
    %c0_i32_0 = arith.constant 0 : i32
    %c0_i32_1 = arith.constant 0 : i32
    return %arg0, %c0_i32, %c0_i32_0 : i32, i32, i32
  }
}

module attributes {stable_mosaic.version = 11 : i64} {
  func.func @_mlp_kernel(%arg0: i32, %arg1: memref<2x2048xbf16, #tpu.memory_space<vmem>>, %arg2: memref<2048x1024xbf16, #tpu.memory_space<vmem>>, %arg3: memref<1x1024xf32, #tpu.memory_space<vmem>>, %arg4: memref<1024x256xbf16, #tpu.memory_space<vmem>>, %arg5: memref<1x256xf32, #tpu.memory_space<vmem>>, %arg6: memref<256x10xbf16, #tpu.memory_space<vmem>>, %arg7: memref<1x10xf32, #tpu.memory_space<vmem>>, %arg8: memref<2x10xf32, #tpu.memory_space<vmem>>, %arg9: memref<2x1024xf32, #tpu.memory_space<vmem>>) attributes {dimension_semantics = [#tpu.dimension_semantics<arbitrary>], iteration_bounds = array<i64: 2>, scalar_prefetch = 0 : i64, scratch_operands = 1 : i64, tpu.core_type = #tpu.core_type<tc>, window_params = [{transform_indices = @transform_0, window_bounds = array<i64: 2, 2048>}, {transform_indices = @transform_1, window_bounds = array<i64: 2048, 1024>}, {pipeline_mode = #tpu.pipeline_mode<synchronous>, transform_indices = @transform_2, window_bounds = array<i64: 1, 1024>}, {pipeline_mode = #tpu.pipeline_mode<synchronous>, transform_indices = @transform_3, window_bounds = array<i64: 1024, 256>}, {pipeline_mode = #tpu.pipeline_mode<synchronous>, transform_indices = @transform_4, window_bounds = array<i64: 1, 256>}, {pipeline_mode = #tpu.pipeline_mode<synchronous>, transform_indices = @transform_5, window_bounds = array<i64: 256, 10>}, {pipeline_mode = #tpu.pipeline_mode<synchronous>, transform_indices = @transform_6, window_bounds = array<i64: 1, 10>}, {pipeline_mode = #tpu.pipeline_mode<synchronous>, transform_indices = @transform_7, window_bounds = array<i64: 2, 10>}]} {
    %c0_i32 = arith.constant 0 : i32
    %0 = arith.cmpi eq, %arg0, %c0_i32 : i32
    %1 = arith.extui %0 : i1 to i32
    %c0_i32_0 = arith.constant 0 : i32
    %2 = arith.cmpi ne, %1, %c0_i32_0 : i32
    scf.if %2 {
      %cst_9 = arith.constant 0.000000e+00 : f32
      %12 = vector.broadcast %cst_9 : f32 to vector<2x1024xf32>
      %c0_10 = arith.constant 0 : index
      %c0_11 = arith.constant 0 : index
      %13 = vector.load %arg9[%c0_10, %c0_11] : memref<2x1024xf32, #tpu.memory_space<vmem>>, vector<2x1024xf32>
      tpu.vector_store %arg9[%c0_10, %c0_11], %12 {strides = array<i32>} : memref<2x1024xf32, #tpu.memory_space<vmem>>, vector<2x1024xf32>,
    } else {
    }
    %c0 = arith.constant 0 : index
    %c0_1 = arith.constant 0 : index
    %3 = vector.load %arg9[%c0, %c0_1] : memref<2x1024xf32, #tpu.memory_space<vmem>>, vector<2x1024xf32>
    %c0_2 = arith.constant 0 : index
    %c0_3 = arith.constant 0 : index
    %4 = vector.load %arg1[%c0_2, %c0_3] : memref<2x2048xbf16, #tpu.memory_space<vmem>>, vector<2x2048xbf16>
    %c0_4 = arith.constant 0 : index
    %c0_5 = arith.constant 0 : index
    %5 = vector.load %arg2[%c0_4, %c0_5] : memref<2048x1024xbf16, #tpu.memory_space<vmem>>, vector<2048x1024xbf16>
    %cst = arith.constant dense<0.000000e+00> : vector<2x1024xf32>
    %6 = tpu.matmul %4, %5, %cst {dimension_numbers = #tpu.dot_dimension_numbers<[1], [0], [0], [1], [0, 0, 1, 1], [], []>} : vector<2x2048xbf16>, vector<2048x1024xbf16>, vector<2x1024xf32> -> vector<2x1024xf32>
    %7 = arith.addf %3, %6 : vector<2x1024xf32>
    %c0_6 = arith.constant 0 : index
    %c0_7 = arith.constant 0 : index
    %8 = vector.load %arg9[%c0_6, %c0_7] : memref<2x1024xf32, #tpu.memory_space<vmem>>, vector<2x1024xf32>
    tpu.vector_store %arg9[%c0_6, %c0_7], %7 {strides = array<i32>} : memref<2x1024xf32, #tpu.memory_space<vmem>>, vector<2x1024xf32>,
    %c1_i32 = arith.constant 1 : i32
    %9 = arith.cmpi eq, %arg0, %c1_i32 : i32
    %10 = arith.extui %9 : i1 to i32
    %c0_i32_8 = arith.constant 0 : i32
    %11 = arith.cmpi ne, %10, %c0_i32_8 : i32
    scf.if %11 {
      %c0_9 = arith.constant 0 : index
      %c0_10 = arith.constant 0 : index
      %12 = vector.load %arg9[%c0_9, %c0_10] : memref<2x1024xf32, #tpu.memory_space<vmem>>, vector<2x1024xf32>
      %c0_11 = arith.constant 0 : index
      %c0_12 = arith.constant 0 : index
      %13 = vector.load %arg3[%c0_11, %c0_12] : memref<1x1024xf32, #tpu.memory_space<vmem>>, vector<1x1024xf32>
      %14 = vector.broadcast %13 : vector<1x1024xf32> to vector<2x1024xf32>
      %15 = arith.addf %12, %14 : vector<2x1024xf32>
      %16 = arith.truncf %15 : vector<2x1024xf32> to vector<2x1024xbf16>
      %c0_13 = arith.constant 0 : index
      %c0_14 = arith.constant 0 : index
      %17 = vector.load %arg4[%c0_13, %c0_14] : memref<1024x256xbf16, #tpu.memory_space<vmem>>, vector<1024x256xbf16>
      %cst_15 = arith.constant dense<0.000000e+00> : vector<2x256xf32>
      %18 = tpu.matmul %16, %17, %cst_15 {dimension_numbers = #tpu.dot_dimension_numbers<[1], [0], [0], [1], [0, 0, 1, 1], [], []>} : vector<2x1024xbf16>, vector<1024x256xbf16>, vector<2x256xf32> -> vector<2x256xf32>
      %c0_16 = arith.constant 0 : index
      %c0_17 = arith.constant 0 : index
      %19 = vector.load %arg5[%c0_16, %c0_17] : memref<1x256xf32, #tpu.memory_space<vmem>>, vector<1x256xf32>
      %20 = vector.broadcast %19 : vector<1x256xf32> to vector<2x256xf32>
      %21 = arith.addf %18, %20 : vector<2x256xf32>
      %22 = arith.truncf %21 : vector<2x256xf32> to vector<2x256xbf16>
      %c0_18 = arith.constant 0 : index
      %c0_19 = arith.constant 0 : index
      %23 = vector.load %arg6[%c0_18, %c0_19] : memref<256x10xbf16, #tpu.memory_space<vmem>>, vector<256x10xbf16>
      %cst_20 = arith.constant dense<0.000000e+00> : vector<2x10xf32>
      %24 = tpu.matmul %22, %23, %cst_20 {dimension_numbers = #tpu.dot_dimension_numbers<[1], [0], [0], [1], [0, 0, 1, 1], [], []>} : vector<2x256xbf16>, vector<256x10xbf16>, vector<2x10xf32> -> vector<2x10xf32>
      %c0_21 = arith.constant 0 : index
      %c0_22 = arith.constant 0 : index
      %25 = vector.load %arg7[%c0_21, %c0_22] : memref<1x10xf32, #tpu.memory_space<vmem>>, vector<1x10xf32>
      %26 = vector.broadcast %25 : vector<1x10xf32> to vector<2x10xf32>
      %27 = arith.addf %24, %26 : vector<2x10xf32>
      %c0_23 = arith.constant 0 : index
      %c0_24 = arith.constant 0 : index
      %28 = vector.load %arg8[%c0_23, %c0_24] : memref<2x10xf32, #tpu.memory_space<vmem>>, vector<2x10xf32>
      tpu.vector_store %arg8[%c0_23, %c0_24], %27 {strides = array<i32>} : memref<2x10xf32, #tpu.memory_space<vmem>>, vector<2x10xf32>,
    } else {
    }
    return
  }
  func.func @transform_0(%arg0: i32) -> (i32, i32) {
    %c0_i32 = arith.constant 0 : i32
    %c0_i32_0 = arith.constant 0 : i32
    return %c0_i32, %arg0 : i32, i32
  }
  func.func @transform_1(%arg0: i32) -> (i32, i32) {
    %c0_i32 = arith.constant 0 : i32
    %c0_i32_0 = arith.constant 0 : i32
    return %arg0, %c0_i32 : i32, i32
  }
  func.func @transform_2(%arg0: i32) -> (i32, i32) {
    %c0_i32 = arith.constant 0 : i32
    %c0_i32_0 = arith.constant 0 : i32
    %c0_i32_1 = arith.constant 0 : i32
    return %c0_i32, %c0_i32_0 : i32, i32
  }
  func.func @transform_3(%arg0: i32) -> (i32, i32) {
    %c0_i32 = arith.constant 0 : i32
    %c0_i32_0 = arith.constant 0 : i32
    %c0_i32_1 = arith.constant 0 : i32
    return %c0_i32, %c0_i32_0 : i32, i32
  }
  func.func @transform_4(%arg0: i32) -> (i32, i32) {
    %c0_i32 = arith.constant 0 : i32
    %c0_i32_0 = arith.constant 0 : i32
    %c0_i32_1 = arith.constant 0 : i32
    return %c0_i32, %c0_i32_0 : i32, i32
  }
  func.func @transform_5(%arg0: i32) -> (i32, i32) {
    %c0_i32 = arith.constant 0 : i32
    %c0_i32_0 = arith.constant 0 : i32
    %c0_i32_1 = arith.constant 0 : i32
    return %c0_i32, %c0_i32_0 : i32, i32
  }
  func.func @transform_6(%arg0: i32) -> (i32, i32) {
    %c0_i32 = arith.constant 0 : i32
    %c0_i32_0 = arith.constant 0 : i32
    %c0_i32_1 = arith.constant 0 : i32
    return %c0_i32, %c0_i32_0 : i32, i32
  }
  func.func @transform_7(%arg0: i32) -> (i32, i32) {
    %c0_i32 = arith.constant 0 : i32
    %c0_i32_0 = arith.constant 0 : i32
    %c0_i32_1 = arith.constant 0 : i32
    return %c0_i32, %c0_i32_0 : i32, i32
  }
}

</mosaic_0001>

<bundles_post_ra>
// kernel: network_forward.3
= control target key start
LH: loop header
LB: loop body
LE: loop exit
PB: predicated region body
PF: predicated region fallthrough
CT: control target
= control target key end

     0   :  { %s2219_s18 = smov 0   ;;  %s2988_s0 = inlined_call_operand.vmem [shape: bf16[2,4,768], index: 0, kind: input, shape index: {}]   ;;  %s2989_s1 = inlined_call_operand.vmem [shape: bf16[8,128], index: 1, kind: input, shape index: {}]   ;;  %s2990_s2 = inlined_call_operand.vmem [shape: bf16[9,512], index: 2, kind: input, shape index: {}]   ;;  %s2991_s3 = inlined_call_operand.vmem [shape: f32[8,1], index: 3, kind: input, shape index: {}]   ;;  %s2992_s4 = inlined_call_operand.vmem [shape: f32[8,1], index: 4, kind: input, shape index: {}]   ;;  %s2993_s5 = inlined_call_operand.vmem [shape: bf16[2,8,768], index: 5, kind: output, shape index: {}]  }
   0x1 LB: > { %s2076_s19 = sadd.s32 4294967295, %s2168_s18   ;;  %p2080_p0 = scmp.ge.s32.totalorder %s2168_s18, 1  ;;  %s2168_s18 = sphi %s2219_s18, %s15_s18  }
   0x2   : > { %p187_p1 = scmp.lt.s32.totalorder %s2168_s18, 3 }
   0x4   : > { %p188_p2 = pnand %p2080_p0, %p187_p1 }
   0x5   : > { %v228_v0 = vld [vmem:[%s2990_s2] sm:$0xff] (!%p188_p2)  ;;  %v229_v1 = vld [vmem:[%s2990_s2 + $0x8] sm:$0xff] (!%p188_p2)  ;;  %v253_v2 = vlaneseq (!%p188_p2)  ;;  %v230_v7 = vld [vmem:[%s2990_s2 + $0x10] sm:$0x11] (!%p188_p2)  ;;  %v2170_v9 = vmov (!%p188_p2), 1983009808  }
   0x6   : > { %191 = sbr.rel (%p188_p2) target bundleno = 660 (0x294), region = 40  ;;  %v2083_v3 = vcombine.low (!%p188_p2), %v228_v0, %v228_v0  ;;  %v2084_v4 = vcombine.high (!%p188_p2), %v228_v0, %v228_v0  ;;  %v2085_v5 = vcombine.low (!%p188_p2), %v229_v1, %v229_v1  ;;  %v2086_v6 = vcombine.high (!%p188_p2), %v229_v1, %v229_v1  ;;  %p215_p3 = scmp.lt.s32.totalorder (!%p188_p2), %s2076_s19, 1  ;;  %v231_v49 = vld [vmem:[%s2990_s2 + $0x18] sm:$0x11] (!%p188_p2) }
   0x7   : > { %v2236_v8 = vshrl.u32 (!%p188_p2), %v253_v2, 7  ;;  %v285_v10 = vunpack.c.l.s4 (!%p188_p2), %v2170_v9  ;;  %v2238_v11 = vcombine.low (!%p188_p2), %v230_v7, %v230_v7  ;;  %v2240_v12 = vcombine.high (!%p188_p2), %v230_v7, %v230_v7  ;;  %s2171_s7 = smov (!%p188_p2), 57   ;;  %s2172_s8 = smov (!%p188_p2), 55  }
   0x8   : > { %v251_v13 = vpack.i.b16 (!%p188_p2), %v2083_v3, %v2083_v3  ;;  %v258_v14 = vpack.i.b16 (!%p188_p2), %v2084_v4, %v2084_v4  ;;  %v265_v15 = vpack.i.b16 (!%p188_p2), %v2085_v5, %v2085_v5  ;;  %v272_v16 = vpack.i.b16 (!%p188_p2), %v2086_v6, %v2086_v6  ;;  %s2173_s9 = smov (!%p188_p2), 71   ;;  %s2174_s10 = smov (!%p188_p2), 56  }
   0x9   : > { %v2243_v17 = vsub.s32 (!%p188_p2), 0, %v2236_v8  ;;  %v286_v18 = vunpack.c.0.s8 (!%p188_p2), %v285_v10  ;;  %v2246_v19 = vsub.s32 (!%p188_p2), 1, %v2236_v8  ;;  %v2249_v20 = vsub.s32 (!%p188_p2), 3, %v2236_v8  ;;  %s2175_s11 = smov (!%p188_p2), 73   ;;  %s2176_s12 = smov (!%p188_p2), 65  }
   0xa   : > { %v357_v21 = vshrl.u32 (!%p188_p2), %v2083_v3, 16  ;;  %v364_v22 = vshrl.u32 (!%p188_p2), %v2084_v4, 16  ;;  %v371_v23 = vshrl.u32 (!%p188_p2), %v2085_v5, 16  ;;  %v378_v24 = vshrl.u32 (!%p188_p2), %v2086_v6, 16  ;;  %s2177_s13 = smov (!%p188_p2), 63   ;;  %s2178_s14 = smov (!%p188_p2), 72  }
   0xb   : > { %v2252_v25 = vsub.s32 (!%p188_p2), %v286_v18, %v2236_v8  ;;  %v468_v26 = vrot.slane (!%p188_p2), %v251_v13, %v2246_v19  ;;  %v472_v27 = vrot.slane (!%p188_p2), %v258_v14, %v2246_v19  ;;  %v476_v28 = vrot.slane (!%p188_p2), %v265_v15, %v2246_v19  ;;  %s2179_s15 = smov (!%p188_p2), 120   ;;  %s2180_s16 = smov (!%p188_p2), 119  }
   0xc   : > { %v480_v29 = vrot.slane (!%p188_p2), %v272_v16, %v2246_v19  ;;  %v256_v30 = vrot.slane (!%p188_p2), %v251_v13, %v2243_v17  ;;  %v263_v31 = vrot.slane (!%p188_p2), %v258_v14, %v2243_v17  ;;  %v270_v32 = vrot.slane (!%p188_p2), %v265_v15, %v2243_v17  ;;  %s2181_s17 = smov (!%p188_p2), 127   ;;  %s2182_s20 = smov (!%p188_p2), 121  }
   0xd   : > { %v485_v33 = vcombine.low %v468_v26, %v472_v27  ;;  %v277_v34 = vrot.slane %v272_v16, %v2243_v17  ;;  %v804_v35 = vrot.slane %v251_v13, %v2249_v20  ;;  %v808_v36 = vrot.slane %v258_v14, %v2249_v20  ;;  %s2995_s19 = smov (!%p215_p3, %s2076_s19), 1  ;;  %s2183_s21 = smov 64  }
   0xe   : > { %v486_v37 = vcombine.low %v476_v28, %v480_v29  ;;  %v282_v38 = vcombine.low %v256_v30, %v263_v31  ;;  %v812_v39 = vrot.slane %v265_v15, %v2249_v20  ;;  %v816_v40 = vrot.slane %v272_v16, %v2249_v20  ;;  %s2123_s26 = smul.u32 12, %s2995_s19  ;;  %s2184_s22 = smov 9  }
   0xf   : > { %v493_v41 = vrot.slane %v485_v33, %v2252_v25  ;;  %v283_v42 = vcombine.low %v270_v32, %v277_v34  ;;  %v821_v43 = vcombine.low %v804_v35, %v808_v36  ;;  %v2273_v44 = vpack.i.b16 %v357_v21, %v357_v21  ;;  %s2185_s23 = smov 8   ;;  %s2186_s24 = smov 7  }
  0x10   : > { %v500_v45 = vrot.slane %v486_v37, %v2252_v25  ;;  %v290_v46 = vrot.slane %v282_v38, %v2252_v25  ;;  %v822_v47 = vcombine.low %v812_v39, %v816_v40  ;;  %v2278_v48 = vpack.i.b16 %v364_v22, %v364_v22  ;;  %s2292_s6 = scalar_lea.vmem %s2988_s0, %s2123_s26  ;;  %s2187_s25 = smov 1  }
  0x11   : > { %v297_v50 = vrot.slane %v283_v42, %v2252_v25  ;;  %v829_v51 = vrot.slane %v821_v43, %v2252_v25  ;;  %v363_v52 = vrot.slane %v2273_v44, %v2243_v17  ;;  %v2287_v53 = vpack.i.b16 %v371_v23, %v371_v23  ;;  %v2300_v58 = vld [vmem:[%s2292_s6] sm:$0xff] }
  0x12   : > { %v2294_v54 = vcombine.low %v493_v41, %v500_v45  ;;  %v836_v55 = vrot.slane %v822_v47, %v2252_v25  ;;  %v370_v56 = vrot.slane %v2278_v48, %v2243_v17  ;;  %v379_v57 = vpack.i.b16 %v378_v24, %v378_v24  ;;  %2091 = vst.sshfl [vmem:[#allocation2 + $0x68] sm:$0x30 pattern:$0x76325410] %v2300_v58 }
  0x13   : > { %v2302_v59 = vcombine.low %v290_v46, %v297_v50  ;;  %v377_v60 = vrot.slane %v2287_v53, %v2243_v17  ;;  %v2089_v61 = vcombine.low %v231_v49, %v231_v49  ;;  %v2090_v62 = vcombine.high %v231_v49, %v231_v49  ;;  %v2378_v50 = vld [vmem:[%s2292_s6 + $0x8] sm:$0xf] }
  0x14   : > { %502 = vrot.lane.b32.xlu1 %v2294_v54, %s2171_s7  ;;  %v2309_v63 = vcombine.low %v829_v51, %v836_v55  ;;  %v384_v0 = vrot.slane %v379_v57, %v2243_v17  ;;  %v389_v1 = vcombine.low %v363_v52, %v370_v56  ;;  %v1001_v2 = vpack.i.b16 %v2238_v11, %v2238_v11 }
  0x15   : > { %299 = vrot.lane.b32.xlu0 %v2302_v59, %s2172_s8  ;;  %v1008_v3 = vpack.i.b16 %v2240_v12, %v2240_v12  ;;  %v1015_v4 = vpack.i.b16 %v2089_v61, %v2089_v61  ;;  %v1022_v5 = vpack.i.b16 %v2090_v62, %v2090_v62  ;;  %v709_v6 = vsub.s32 2, %v2236_v8 }
  0x16   : > { %v390_v7 = vcombine.low %v377_v60, %v384_v0  ;;  %v397_v9 = vrot.slane %v389_v1, %v2252_v25  ;;  %v1006_v10 = vrot.slane %v1001_v2, %v2243_v17  ;;  %v564_v13 = vrot.slane %v2273_v44, %v2246_v19 }
  0x17   : > { %v1013_v11 = vrot.slane %v1008_v3, %v2243_v17  ;;  %v1020_v14 = vrot.slane %v1015_v4, %v2243_v17  ;;  %v1027_v15 = vrot.slane %v1022_v5, %v2243_v17  ;;  %v710_v12 = vrot.slane %v2273_v44, %v709_v6 }
  0x18   : > { %838 = vrot.lane.b32.xlu1 %v2309_v63, %s2173_s9  ;;  %v404_v8 = vrot.slane %v390_v7, %v2252_v25  ;;  %v714_v16 = vrot.slane %v2278_v48, %v709_v6  ;;  %v718_v18 = vrot.slane %v2287_v53, %v709_v6  ;;  %v722_v21 = vrot.slane %v379_v57, %v709_v6 }
  0x19   : > { %v1032_v22 = vcombine.low %v1006_v10, %v1013_v11  ;;  %v1033_v23 = vcombine.low %v1020_v14, %v1027_v15  ;;  %v568_v24 = vrot.slane %v2278_v48, %v2246_v19  ;;  %v572_v17 = vrot.slane %v2287_v53, %v2246_v19 }
  0x1a   : > { %v2336_v26 = vcombine.low %v397_v9, %v404_v8  ;;  %v727_v27 = vcombine.low %v710_v12, %v714_v16  ;;  %v728_v28 = vcombine.low %v718_v18, %v722_v21  ;;  %v576_v29 = vrot.slane %v379_v57, %v2246_v19 }
  0x1b   : > { %v1040_v30 = vrot.slane %v1032_v22, %v2252_v25  ;;  %v1047_v31 = vrot.slane %v1033_v23, %v2252_v25  ;;  %v581_v32 = vcombine.low %v564_v13, %v568_v24  ;;  %v898_v33 = vrot.slane %v2273_v44, %v2249_v20 }
  0x1c   : > { %406 = vrot.lane.b32.xlu0 %v2336_v26, %s2174_s10  ;;  %v735_v34 = vrot.slane %v727_v27, %v2252_v25  ;;  %v742_v35 = vrot.slane %v728_v28, %v2252_v25  ;;  %v582_v36 = vcombine.low %v572_v17, %v576_v29  ;;  %v902_v19 = vrot.slane %v2278_v48, %v2249_v20 }
  0x1d   : > { %v2349_v37 = vcombine.low %v1040_v30, %v1047_v31  ;;  %v589_v38 = vrot.slane %v581_v32, %v2252_v25  ;;  %v906_v39 = vrot.slane %v2287_v53, %v2249_v20  ;;  %v910_v40 = vrot.slane %v379_v57, %v2249_v20 }
  0x1e   : > { %v2355_v41 = vcombine.low %v735_v34, %v742_v35  ;;  %v596_v42 = vrot.slane %v582_v36, %v2252_v25  ;;  %v915_v43 = vcombine.low %v898_v33, %v902_v19  ;;  %v667_v44 = vrot.slane %v2300_v58, %v2252_v25 }
  0x1f   : > { %1049 = vrot.lane.b32.xlu1 %v2349_v37, %s2175_s11  ;;  %v916_v45 = vcombine.low %v906_v39, %v910_v40  ;;  %v660_v51 = vcombine.high %v2300_v58, %v2300_v58  ;;  %v2394_v53 = vrot.slane %v2378_v50, %v2252_v25  ;;  %vm505_vm0 = vcmask 465920  }
  0x20   : > { %744 = vrot.lane.b32.xlu0 %v2355_v41, %s2176_s12  ;;  %v2364_v46 = vcombine.low %v589_v38, %v596_v42  ;;  %v923_v20 = vrot.slane %v915_v43, %v2252_v25  ;;  %v675_v47 = vcombine.high %v667_v44, %v667_v44  ;;  %vm302_vm1 = vcmask 449536  }
  0x21   : > { %v930_v48 = vrot.slane %v916_v45, %v2252_v25  ;;  %v2388_v52 = vrot.slane %v660_v51, %v2252_v25  ;;  %vm548_vm2 = vcmask 580608   ;;  %vm601_vm3 = vcmask 515072  }
  0x22   : > { %1364 = vst [vmem:[#allocation2 + $0x70] sm:$0xc] %v675_v47  ;;  %vm452_vm4 = vcmask 588800   ;;  %vm409_vm5 = vcmask 457728   ;;  %vm1108_vm6 = vcmask 973824   ;;  %vm1286_vm7 = vcmask 1039360  }
  0x23   : > { %598 = vrot.lane.b32.xlu1 %v2364_v46, %s2177_s13  ;;  %v2370_v49 = vcombine.low %v923_v20, %v930_v48  ;;  %v676_v55 = vcombine.high %v2388_v52, %v2388_v52  ;;  %vm645_vm8 = vcmask 531456   ;;  %vm1374_vm9 = vcmask 1045504  }
  0x24   : > { %vm1376_vm10 = vcmask 1043456   ;;  %vm344_vm11 = vcmask 596992   ;;  %vm694_vm12 = vcmask 523264   ;;  %vm1226_vm13 = vcmask 990208  }
  0x25   : > { %932 = vrot.lane.b32.xlu0 %v2370_v49, %s2178_s14  ;;  %vm1167_vm14 = vcmask 982016   ;;  %vm1151_vm15 = vcmask 72704  }
  0x27   : > { %1164 = vrot.lane.b32.xlu1 %v2336_v26, %s2179_s15 }
  0x29   : > { %1105 = vrot.lane.b32.xlu0 %v2302_v59, %s2180_s16 }
  0x2b   : > { %1283 = vrot.lane.b32.xlu1 %v2364_v46, %s2181_s17 }
  0x2d   : > { %1223 = vrot.lane.b32.xlu0 %v2294_v54, %s2182_s20 }
  0x2f   : > { %1368 = vrot.lane.b32.xlu1 %v2378_v50, %s2181_s17 }
  0x31   : > { %1366 = vrot.lane.b32.xlu0 %v2300_v58, %s2181_s17 }
  0x33   : > { %1410 = vrot.lane.b32.xlu1 %v2378_v50, %s2182_s20 }
  0x35   : > { %1408 = vrot.lane.b32.xlu0 %v2300_v58, %s2182_s20 }
  0x37   : > { %688 = vrot.lane.b32.xlu1 %v2388_v52, %s2183_s21 }
  0x39   : > { %686 = vrot.lane.b32.xlu0 %v675_v47, %s2183_s21 }
  0x3b   : > { %692 = vrot.lane.b32.xlu1 %v2394_v53, %s2183_s21 }
  0x3d   : > { %690 = vrot.lane.b32.xlu0 %v676_v55, %s2183_s21 }
  0x3f   : > { %1450 = vrot.lane.b32.xlu1 %v2378_v50, %s2179_s15 }
  0x41   : > { %684 = vrot.lane.b32.xlu0 %v667_v44, %s2183_s21 }
  0x43   : > { %1490 = vrot.lane.b32.xlu1 %v2378_v50, %s2180_s16 }
  0x45   : > { %1448 = vrot.lane.b32.xlu0 %v2300_v58, %s2179_s15 }
  0x47   : > { %1530 = vrot.lane.b32.xlu1 %v2378_v50, %s2175_s11 }
  0x49   : > { %1488 = vrot.lane.b32.xlu0 %v2300_v58, %s2180_s16 }
  0x4b   : > { %1570 = vrot.lane.b32.xlu1 %v2378_v50, %s2178_s14 }
  0x4d   : > { %1528 = vrot.lane.b32.xlu0 %v2300_v58, %s2175_s11 }
  0x51   : > { %1568 = vrot.lane.b32.xlu0 %v2300_v58, %s2178_s14 }
  0x86   : > { %v503_v56 = vpop.permute.xlu1 %502 }
  0x87   : > { %v504_v57 = vrot.slane %v503_v56, 6  ;;  %v300_v60 = vpop.permute.xlu0 %299 }
  0x88   : > { %v301_v61 = vrot.slane %v300_v60, 6 }
  0x89   : > { %v506_v62 = vsel %vm505_vm0, %v504_v57, %v503_v56  ;;  %v510_v43 = vmul.bf16 %v504_v57, %v2378_v50 }
  0x8a   : > { %v2417_v0 = vmul.bf16 %v506_v62, %v2300_v58  ;;  %v303_v1 = vsel %vm302_vm1, %v301_v61, %v300_v60  ;;  %v307_v2 = vmul.bf16 %v301_v61, %v2378_v50  ;;  %v2421_v3 = vpop.permute.xlu1 %838 }
  0x8b   : > { %v840_v4 = vrot.slane %v2421_v3, 6  ;;  %v2425_v5 = vmul.bf16 %v303_v1, %v2300_v58  ;;  %v536_v1 = vrot.slane %v510_v43, %v2252_v25 }
  0x8c   : > { %v333_v6 = vrot.slane %v307_v2, %v2252_v25  ;;  %v2430_v7 = vrot.slane %v2417_v0, %v2252_v25  ;;  %v513_v55 = vcombine.high %v2417_v0, %v2417_v0 }
  0x8d   : > { %v841_v9 = vsel %vm548_vm2, %v840_v4, %v2421_v3  ;;  %v317_v11 = vrot.slane %v2425_v5, %v2252_v25 }
  0x8e   : > { %v2437_v10 = vmul.bf16 %v841_v9, %v2300_v58  ;;  %v2439_v13 = vpop.permute.xlu0 %406  ;;  %342 = vrot.lane.b32.xlu1 %v333_v6, %s2175_s11  ;;  %540 = vrot.lane.b32.xlu0 %v2430_v7, %s2173_s9  ;;  %v528_v3 = vcombine.low %v2430_v7, %v2430_v7 }
  0x8f   : > { %v408_v29 = vrot.slane %v2439_v13, 6  ;;  %v325_v51 = vcombine.high %v317_v11, %v317_v11 }
  0x90   : > { %v2454_v8 = vrot.slane %v2437_v10, %v2252_v25 }
  0x91   : > { %v2446_v14 = vpop.permute.xlu1 %1049  ;;  %v410_v36 = vsel %vm409_vm5, %v408_v29, %v2439_v13 }
  0x92   : > { %v1051_v15 = vrot.slane %v2446_v14, 6  ;;  %v2449_v12 = vpop.permute.xlu0 %744  ;;  %334 = vrot.lane.b32.xlu0 %v317_v11, %s2175_s11  ;;  %v2517_v44 = vmul.bf16 %v410_v36, %v2300_v58  ;;  %v845_v36 = vmul.bf16 %v840_v4, %v2378_v50 }
  0x93   : > { %v746_v47 = vrot.slane %v2449_v12, 6 }
  0x94   : > { %v1056_v16 = vmul.bf16 %v1051_v15, %v2378_v50  ;;  %v2538_v62 = vrot.slane %v2517_v44, %v2252_v25  ;;  %v1052_v7 = vsel %vm344_vm11, %v1051_v15, %v2446_v14 }
  0x95   : > { %v2459_v18 = vpop.permute.xlu1 %598  ;;  %v747_v0 = vsel %vm645_vm8, %v746_v47, %v2449_v12 }
  0x96   : > { %v600_v21 = vrot.slane %v2459_v18, 6  ;;  %875 = vrot.lane.b32.xlu0 %v2454_v8, %s2171_s7  ;;  %v1082_v22 = vrot.slane %v1056_v16, %v2252_v25 }
  0x97   : > { %v2465_v23 = vpop.permute.xlu0 %932 }
  0x98   : > { %v602_v24 = vsel %vm601_vm3, %v600_v21, %v2459_v18  ;;  %v934_v17 = vrot.slane %v2465_v23, 6  ;;  %1091 = vrot.lane.b32.xlu1 %v1082_v22, %s2172_s8  ;;  %v2550_v22 = vrot.slane %v513_v55, %v2252_v25 }
  0x99   : > { %v2474_v27 = vmul.bf16 %v602_v24, %v2300_v58  ;;  %v2476_v28 = vpop.permute.xlu1 %1164 }
  0x9a   : > { %v935_v30 = vsel %vm452_vm4, %v934_v17, %v2465_v23  ;;  %v1166_v18 = vrot.slane %v2476_v28, 6 }
  0x9b   : > { %v2484_v31 = vmul.bf16 %v935_v30, %v2300_v58  ;;  %v2486_v32 = vpop.permute.xlu0 %1105  ;;  %v2490_v33 = vrot.slane %v2474_v27, %v2252_v25 }
  0x9c   : > { %v1107_v34 = vrot.slane %v2486_v32, 6 }
  0x9d   : > { %641 = vrot.lane.b32.xlu0 %v2490_v33, %s2176_s12  ;;  %v2495_v35 = vpop.permute.xlu1 %1283  ;;  %v2510_v39 = vrot.slane %v2484_v31, %v2252_v25 }
  0x9e   : > { %v1109_v19 = vsel %vm1108_vm6, %v1107_v34, %v2486_v32  ;;  %v1285_v42 = vrot.slane %v2495_v35, 6  ;;  %v2595_v32 = vmul.bf16 %v1052_v7, %v2300_v58 }
  0x9f   : > { %v2506_v38 = vmul.bf16 %v1109_v19, %v2300_v58  ;;  %v2512_v40 = vpop.permute.xlu0 %1223 }
  0xa0   : > { %v2530_v48 = vsel %vm1286_vm7, %v1285_v42, %v2495_v35  ;;  %v2614_v7 = vrot.slane %v2595_v32, %v2252_v25 }
  0xa1   : > { %v2521_v45 = vrot.slane %v2506_v38, %v2252_v25  ;;  %974 = vrot.lane.b32.xlu0 %v2510_v39, %s2174_s10  ;;  %v1369_v20 = vpop.permute.xlu1 %1368 }
  0xa2   : > { %v1371_v61 = vrot.slane %v1369_v20, 2  ;;  %v1373_v2 = vrot.slane %v1369_v20, 4 }
  0xa3   : > { %1145 = vrot.lane.b32.xlu1 %v2521_v45, %s2184_s22  ;;  %v1367_v56 = vpop.permute.xlu0 %1366  ;;  %v1132_v12 = vcombine.high %v2521_v45, %v2521_v45 }
  0xa4   : > { %v1370_v57 = vrot.slane %v1367_v56, 2  ;;  %v1372_v60 = vrot.slane %v1367_v56, 4  ;;  %v537_v56 = vcombine.low %v536_v1, %v536_v1 }
  0xa5   : > { %336 = vrot.lane.b32.xlu0 %v325_v51, %s2175_s11  ;;  %v1411_v6 = vpop.permute.xlu1 %1410  ;;  %v2558_v51 = vmul.bf16 %v747_v0, %v2300_v58 }
  0xa6   : > { %v1375_v9 = vsel %vm1374_vm9, %v1370_v57, %v1371_v61  ;;  %v1413_v11 = vrot.slane %v1411_v6, 2  ;;  %v1415_v16 = vrot.slane %v1411_v6, 4  ;;  %v1377_v24 = vsel %vm1376_vm10, %v1372_v60, %v1373_v2 }
  0xa7   : > { %446 = vrot.lane.b32.xlu1 %v2538_v62, %s2178_s14  ;;  %v1409_v30 = vpop.permute.xlu0 %1408  ;;  %v1378_v19 = vsel %vm1286_vm7, %v1375_v9, %v1377_v24  ;;  %v848_v61 = vcombine.high %v2437_v10, %v2437_v10  ;;  %v871_v9 = vrot.slane %v845_v36, %v2252_v25  ;;  %v1113_v10 = vmul.bf16 %v1107_v34, %v2378_v50 }
  0xa8   : > { %v1412_v43 = vrot.slane %v1409_v30, 2  ;;  %v1414_v20 = vrot.slane %v1409_v30, 4  ;;  %v1381_v55 = vmul.bf16 %v1378_v19, %v2355_v41  ;;  %v2587_v24 = vrot.slane %v2558_v51, %v2252_v25 }
  0xa9   : > { %544 = vrot.lane.b32.xlu0 %v2550_v22, %s2173_s9  ;;  %v2563_v57 = vpop.permute.xlu1 %688  ;;  %v2600_v34 = vrot.slane %v848_v61, %v2252_v25  ;;  %vm1328_vm7 = vcmask 7168  }
  0xaa   : > { %v1416_v4 = vsel %vm1374_vm9, %v1412_v43, %v1413_v11  ;;  %v1417_v60 = vsel %vm1376_vm10, %v1414_v20, %v1415_v16  ;;  %v1383_v1 = vcombine.high %v1381_v55, %v1381_v55  ;;  %v1390_v2 = vrot.slane %v1381_v55, %v2252_v25  ;;  %2093 = vst.sshfl [vmem:[#allocation2 + $0x68] sm:$0xc pattern:$0x76325410] %v1381_v55 }
  0xab   : > { %546 = vrot.lane.b32.xlu1 %v537_v56, %s2173_s9  ;;  %v1418_v6 = vsel %vm1226_vm13, %v1416_v4, %v1417_v60  ;;  %v687_v0 = vpop.permute.xlu0 %686  ;;  %v1133_v60 = vcombine.low %v1113_v10, %v1113_v10 }
  0xac   : > { %v1421_v11 = vmul.bf16 %v1418_v6, %v2309_v63  ;;  %v696_v16 = vsel %vm694_vm12, %v687_v0, %v2563_v57  ;;  %v1397_v30 = vrot.slane %v1383_v1, %v2252_v25  ;;  %v1398_v14 = vcombine.low %v1390_v2, %v1390_v2  ;;  %2094 = vst.sshfl [vmem:[#allocation2 + $0x78] sm:$0xc pattern:$0x76325410] %v1383_v1 }
  0xad   : > { %538 = vrot.lane.b32.xlu0 %v528_v3, %s2173_s9  ;;  %704 = vst [vmem:[#allocation2 + $0x28] sm:$0x3] %v696_v16  ;;  %v2591_v15 = vpop.permute.xlu1 %692  ;;  %v872_v1 = vcombine.low %v871_v9, %v871_v9  ;;  %v863_v6 = vcombine.low %v2454_v8, %v2454_v8  ;;  %v414_v16 = vmul.bf16 %v408_v29, %v2378_v50 }
  0xae   : > { %v1423_v36 = vcombine.low %v1421_v11, %v1421_v11  ;;  %v1437_v19 = vrot.slane %v1421_v11, %v2252_v25  ;;  %2096 = vst.sshfl [vmem:[#allocation2 + $0x78] sm:$0xc0 pattern:$0x76325410] %v1421_v11  ;;  %v1399_v43 = vcombine.low %v1397_v30, %v1397_v30  ;;  %1404 = vst [vmem:[#allocation2 + $0x60] sm:$0x30] %v1398_v14 }
  0xaf   : > { %783 = vrot.lane.b32.xlu1 %v2587_v24, %s2177_s13  ;;  %v691_v20 = vpop.permute.xlu0 %690  ;;  %v1140_v10 = vrot.slane %v1133_v60, %v2252_v25  ;;  %v310_v8 = vcombine.high %v2425_v5, %v2425_v5  ;;  %v751_v29 = vmul.bf16 %v746_v47, %v2378_v50 }
  0xb0   : > { %v1430_v56 = vrot.slane %v1423_v36, %v2252_v25  ;;  %v1439_v55 = vcombine.low %v1437_v19, %v1437_v19  ;;  %2095 = vst.sshfl [vmem:[#allocation2 + $0x68] sm:$0xc0 pattern:$0x76325410] %v1423_v36  ;;  %v697_v3 = vsel %vm694_vm12, %v2563_v57, %v691_v20  ;;  %v698_v4 = vsel %vm694_vm12, %v691_v20, %v2591_v15 }
  0xb1   : > { %879 = vrot.lane.b32.xlu0 %v2600_v34, %s2171_s7  ;;  %1406 = vst [vmem:[#allocation2 + $0x70] sm:$0x30] %v1399_v43  ;;  %705 = vst [vmem:[#allocation2 + $0x30] sm:$0x3] %v697_v3  ;;  %v1451_v61 = vpop.permute.xlu1 %1450  ;;  %v2635_v5 = vrot.slane %v310_v8, %v2252_v25  ;;  %v434_v20 = vcombine.low %v414_v16, %v414_v16  ;;  %v771_v16 = vcombine.low %v751_v29, %v751_v29 }
  0xb2   : > { %706 = vst [vmem:[#allocation2 + $0x38] sm:$0x3] %v698_v4  ;;  %v1438_v2 = vcombine.low %v1430_v56, %v1430_v56  ;;  %1446 = vst [vmem:[#allocation2 + $0x70] sm:$0xc0] %v1439_v55  ;;  %v1453_v14 = vrot.slane %v1451_v61, 2  ;;  %v1455_v36 = vrot.slane %v1451_v61, 4 }
  0xb3   : > { %881 = vrot.lane.b32.xlu1 %v872_v1, %s2171_s7  ;;  %v2616_v11 = vpop.permute.xlu0 %684 }
  0xb4   : > { %1444 = vst [vmem:[#allocation2 + $0x60] sm:$0xc0] %v1438_v2  ;;  %v695_v9 = vsel %vm694_vm12, %v2616_v11, %v687_v0  ;;  %v1074_v0 = vcombine.high %v2614_v7, %v2614_v7 }
  0xb5   : > { %873 = vrot.lane.b32.xlu0 %v863_v6, %s2171_s7  ;;  %703 = vst [vmem:[#allocation2 + $0x20] sm:$0x3] %v695_v9  ;;  %v1491_v30 = vpop.permute.xlu1 %1490  ;;  %v441_v9 = vrot.slane %v434_v20, %v2252_v25 }
  0xb6   : > { %v1493_v4 = vrot.slane %v1491_v30, 2  ;;  %v1495_v60 = vrot.slane %v1491_v30, 4 }
  0xb7   : > { %1149 = vrot.lane.b32.xlu1 %v1140_v10, %s2184_s22  ;;  %v1449_v19 = vpop.permute.xlu0 %1448 }
  0xb8   : > { %v1452_v43 = vrot.slane %v1449_v19, 2  ;;  %v1454_v13 = vrot.slane %v1449_v19, 4  ;;  %v433_v19 = vcombine.high %v2538_v62, %v2538_v62 }
  0xb9   : > { %1085 = vrot.lane.b32.xlu0 %v1074_v0, %s2172_s8  ;;  %v1531_v56 = vpop.permute.xlu1 %1530  ;;  %v609_v0 = vcombine.low %v2474_v27, %v2474_v27  ;;  %v778_v27 = vrot.slane %v771_v16, %v2252_v25 }
  0xba   : > { %v1456_v55 = vsel %vm1374_vm9, %v1452_v43, %v1453_v14  ;;  %v1457_v3 = vsel %vm1376_vm10, %v1454_v13, %v1455_v36  ;;  %v1533_v10 = vrot.slane %v1531_v56, 2  ;;  %v1535_v13 = vrot.slane %v1531_v56, 4 }
  0xbb   : > { %338 = vrot.lane.b32.xlu1 %v2635_v5, %s2175_s11  ;;  %v1458_v47 = vsel %vm1167_vm14, %v1456_v55, %v1457_v3  ;;  %v1489_v1 = vpop.permute.xlu0 %1488 }
  0xbc   : > { %v1461_v61 = vmul.bf16 %v1458_v47, %v2370_v49  ;;  %v1492_v2 = vrot.slane %v1489_v1, 2  ;;  %v1494_v6 = vrot.slane %v1489_v1, 4 }
  0xbd   : > { %1147 = vrot.lane.b32.xlu0 %v1132_v12, %s2184_s22  ;;  %v1571_v36 = vpop.permute.xlu1 %1570 }
  0xbe   : > { %v1463_v8 = vcombine.high %v1461_v61, %v1461_v61  ;;  %v1470_v30 = vrot.slane %v1461_v61, %v2252_v25  ;;  %2097 = vst.sshfl [vmem:[#allocation2 + $0x80] sm:$0x3 pattern:$0x76325410] %v1461_v61  ;;  %v1496_v14 = vsel %vm1374_vm9, %v1492_v2, %v1493_v4  ;;  %v1497_v45 = vsel %vm1376_vm10, %v1494_v6, %v1495_v60 }
  0xbf   : > { %450 = vrot.lane.b32.xlu1 %v441_v9, %s2178_s14  ;;  %v1498_v43 = vsel %vm1108_vm6, %v1496_v14, %v1497_v45  ;;  %v1529_v29 = vpop.permute.xlu0 %1528  ;;  %v1059_v60 = vcombine.high %v2595_v32, %v2595_v32  ;;  %v1573_v62 = vrot.slane %v1571_v36, 2  ;;  %v2666_v2 = vrot.slane %v609_v0, %v2252_v25 }
  0xc0   : > { %v1477_v20 = vrot.slane %v1463_v8, %v2252_v25  ;;  %v1478_v55 = vcombine.high %v1470_v30, %v1470_v30  ;;  %2098 = vst.sshfl [vmem:[#allocation2 + $0x90] sm:$0x3 pattern:$0x76325410] %v1463_v8  ;;  %v1501_v3 = vmul.bf16 %v1498_v43, %v2349_v37  ;;  %v1532_v4 = vrot.slane %v1529_v29, 2 }
  0xc1   : > { %448 = vrot.lane.b32.xlu0 %v433_v19, %s2178_s14  ;;  %v1534_v12 = vrot.slane %v1529_v29, 4  ;;  %v1575_v9 = vrot.slane %v1571_v36, 4  ;;  %v770_v36 = vcombine.high %v2587_v24, %v2587_v24  ;;  %vm1270_vm6 = vcmask 56320  }
  0xc2   : > { %v1479_v47 = vcombine.high %v1477_v20, %v1477_v20  ;;  %1485 = vst [vmem:[#allocation2 + $0x88] sm:$0x3] %v1478_v55  ;;  %v1503_v56 = vcombine.low %v1501_v3, %v1501_v3  ;;  %v1517_v1 = vrot.slane %v1501_v3, %v2252_v25  ;;  %2100 = vst.sshfl [vmem:[#allocation2 + $0x90] sm:$0x30 pattern:$0x76325410] %v1501_v3 }
  0xc3   : > { %v1536_v61 = vsel %vm1374_vm9, %v1532_v4, %v1533_v10  ;;  %787 = vrot.lane.b32.xlu1 %v778_v27, %s2177_s13  ;;  %v1537_v6 = vsel %vm1376_vm10, %v1534_v12, %v1535_v13  ;;  %v1569_v16 = vpop.permute.xlu0 %1568  ;;  %v1073_v10 = vrot.slane %v1059_v60, %v2252_v25  ;;  %v942_v13 = vcombine.low %v2484_v31, %v2484_v31 }
  0xc4   : > { %1487 = vst [vmem:[#allocation2 + $0x98] sm:$0x3] %v1479_v47  ;;  %v1510_v32 = vrot.slane %v1503_v56, %v2252_v25  ;;  %v1519_v8 = vcombine.high %v1517_v1, %v1517_v1  ;;  %2099 = vst.sshfl [vmem:[#allocation2 + $0x80] sm:$0x30 pattern:$0x76325410] %v1503_v56  ;;  %v1538_v30 = vsel %vm344_vm11, %v1536_v61, %v1537_v6 }
  0xc5   : > { %v1572_v14 = vrot.slane %v1569_v16, 2  ;;  %637 = vrot.lane.b32.xlu0 %v2666_v2, %s2176_s12  ;;  %v1541_v45 = vmul.bf16 %v1538_v30, %v2302_v59  ;;  %v1574_v0 = vrot.slane %v1569_v16, 4  ;;  %v417_v59 = vcombine.low %v2517_v44, %v2517_v44 }
  0xc6   : > { %v1518_v19 = vcombine.high %v1510_v32, %v1510_v32  ;;  %1527 = vst [vmem:[#allocation2 + $0x98] sm:$0xc] %v1519_v8  ;;  %v625_v3 = vcombine.low %v2490_v33, %v2490_v33  ;;  %v2693_v60 = vrot.slane %v942_v13, %v2252_v25  ;;  %v1116_v56 = vcombine.low %v2506_v38, %v2506_v38 }
  0xc7   : > { %v1576_v43 = vsel %vm1374_vm9, %v1572_v14, %v1573_v62  ;;  %1087 = vrot.lane.b32.xlu1 %v1073_v10, %s2172_s8  ;;  %v1543_v29 = vcombine.high %v1541_v45, %v1541_v45  ;;  %v1550_v20 = vrot.slane %v1541_v45, %v2252_v25  ;;  %2101 = vst.sshfl [vmem:[#allocation2 + $0x88] sm:$0xc pattern:$0x76325410] %v1541_v45  ;;  %v1225_v45 = vrot.slane %v2512_v40, 6 }
  0xc8   : > { %v1577_v55 = vsel %vm1376_vm10, %v1574_v0, %v1575_v9  ;;  %1525 = vst [vmem:[#allocation2 + $0x88] sm:$0xc] %v1518_v19  ;;  %v424_v33 = vrot.slane %v417_v59, %v2252_v25  ;;  %v326_v1 = vcombine.high %v2635_v5, %v2635_v5  ;;  %v606_v6 = vmul.bf16 %v600_v21, %v2378_v50 }
  0xc9   : > { %v1578_v24 = vsel %vm452_vm4, %v1576_v43, %v1577_v55  ;;  %785 = vrot.lane.b32.xlu0 %v770_v36, %s2177_s13  ;;  %v1557_v4 = vrot.slane %v1543_v29, %v2252_v25  ;;  %v1558_v31 = vcombine.low %v1550_v20, %v1550_v20  ;;  %2102 = vst.sshfl [vmem:[#allocation2 + $0x98] sm:$0xc pattern:$0x76325410] %v1543_v29 }
  0xca   : > { %v1581_v27 = vmul.bf16 %v1578_v24, %v2336_v26  ;;  %v958_v9 = vcombine.low %v2510_v39, %v2510_v39  ;;  %v754_v16 = vcombine.low %v2558_v51, %v2558_v51  ;;  %v1075_v38 = vcombine.high %v1073_v10, %v1073_v10 }
  0xcb   : > { %639 = vrot.lane.b32.xlu1 %v625_v3, %s2176_s12  ;;  %v1559_v44 = vcombine.low %v1557_v4, %v1557_v4  ;;  %1564 = vst [vmem:[#allocation2 + $0x80] sm:$0x30] %v1558_v31  ;;  %v2715_v5 = vrot.slane %v1116_v56, %v2252_v25  ;;  %v626_v32 = vcombine.low %v606_v6, %v606_v6 }
  0xcc   : > { %v1583_v12 = vcombine.low %v1581_v27, %v1581_v27  ;;  %v1597_v62 = vrot.slane %v1581_v27, %v2252_v25  ;;  %2104 = vst.sshfl [vmem:[#allocation2 + $0x98] sm:$0xc0 pattern:$0x76325410] %v1581_v27  ;;  %v761_v8 = vrot.slane %v754_v16, %v2252_v25  ;;  %v939_v39 = vmul.bf16 %v934_v17, %v2378_v50 }
  0xcd   : > { %970 = vrot.lane.b32.xlu0 %v2693_v60, %s2174_s10  ;;  %1566 = vst [vmem:[#allocation2 + $0x90] sm:$0x30] %v1559_v44  ;;  %v1131_v21 = vcombine.high %v2715_v5, %v2715_v5  ;;  %v529_v51 = vcombine.low %v2550_v22, %v2550_v22  ;;  %v633_v30 = vrot.slane %v626_v32, %v2252_v25 }
  0xce   : > { %v1590_v47 = vrot.slane %v1583_v12, %v2252_v25  ;;  %v1599_v26 = vcombine.low %v1597_v62, %v1597_v62  ;;  %2103 = vst.sshfl [vmem:[#allocation2 + $0x88] sm:$0xc0 pattern:$0x76325410] %v1583_v12  ;;  %v1168_v14 = vsel %vm1167_vm14, %v1166_v18, %v2476_v28  ;;  %v432_v10 = vcombine.high %v424_v33, %v424_v33 }
  0xcf   : > { %442 = vrot.lane.b32.xlu1 %v424_v33, %s2178_s14  ;;  %v959_v0 = vcombine.low %v939_v39, %v939_v39  ;;  %v1171_v36 = vmul.bf16 %v1168_v14, %v2300_v58  ;;  %v634_v23 = vcombine.low %v633_v30, %v633_v30  ;;  %v769_v17 = vcombine.high %v761_v8, %v761_v8 }
  0xd0   : > { %v1598_v61 = vcombine.low %v1590_v47, %v1590_v47  ;;  %1606 = vst [vmem:[#allocation2 + $0x90] sm:$0xc0] %v1599_v26  ;;  %v1227_v22 = vsel %vm1226_vm13, %v1225_v45, %v2512_v40  ;;  %v864_v28 = vcombine.low %v2600_v34, %v2600_v34  ;;  %v624_v34 = vcombine.low %v2666_v2, %v2666_v2 }
  0xd1   : > { %340 = vrot.lane.b32.xlu0 %v326_v1, %s2175_s11  ;;  %v1175_v19 = vcombine.high %v1171_v36, %v1171_v36  ;;  %v966_v43 = vrot.slane %v959_v0, %v2252_v25  ;;  %v1182_v13 = vrot.slane %v1171_v36, %v2252_v25  ;;  %v1230_v29 = vmul.bf16 %v1227_v22, %v2300_v58 }
  0xd2   : > { %1604 = vst [vmem:[#allocation2 + $0x80] sm:$0xc0] %v1598_v61  ;;  %v1172_v24 = vmul.bf16 %v1166_v18, %v2378_v50  ;;  %v957_v3 = vcombine.low %v2693_v60, %v2693_v60  ;;  %v1231_v31 = vmul.bf16 %v1225_v45, %v2378_v50  ;;  %v1290_v26 = vmul.bf16 %v2530_v48, %v2300_v58 }
  0xd3   : > { %972 = vrot.lane.b32.xlu1 %v958_v9, %s2174_s10  ;;  %v967_v20 = vcombine.low %v966_v43, %v966_v43  ;;  %v1189_v55 = vrot.slane %v1175_v19, %v2252_v25  ;;  %v1234_v40 = vcombine.low %v1230_v29, %v1230_v29  ;;  %v1248_v4 = vrot.slane %v1230_v29, %v2252_v25 }
  0xd4   : > { %v1198_v27 = vrot.slane %v1172_v24, %v2252_v25  ;;  %v1251_v44 = vcombine.low %v1231_v31, %v1231_v31  ;;  %v1190_v60 = vcombine.low %v1182_v13, %v1182_v13  ;;  %v1301_v1 = vrot.slane %v1290_v26, %v2252_v25 }
  0xd5   : > { %1089 = vrot.lane.b32.xlu0 %v1075_v38, %s2172_s8  ;;  %v1241_v59 = vrot.slane %v1234_v40, %v2252_v25  ;;  %v1191_v2 = vcombine.low %v1189_v55, %v1189_v55  ;;  %v1250_v62 = vcombine.low %v1248_v4, %v1248_v4  ;;  %v1341_v18 = vcombine.low %v2300_v58, %v2300_v58 }
  0xd6   : > { %v1199_v12 = vcombine.low %v1198_v27, %v1198_v27  ;;  %v1258_v33 = vrot.slane %v1251_v44, %v2252_v25  ;;  %v1309_v48 = vcombine.high %v1301_v1, %v1301_v1  ;;  %v1291_v30 = vmul.bf16 %v1285_v42, %v2378_v50 }
  0xd7   : > { %779 = vrot.lane.b32.xlu1 %v761_v8, %s2177_s13  ;;  %v1249_v6 = vcombine.low %v1241_v59, %v1241_v59  ;;  %v1350_v42 = vcombine.low %v2378_v50, %v2378_v50 }
  0xd8   : > { %v1259_v47 = vcombine.low %v1258_v33, %v1258_v33  ;;  %v1317_v36 = vrot.slane %v1291_v30, %v2252_v25 }
  0xd9   : > { %1143 = vrot.lane.b32.xlu0 %v1131_v21, %s2184_s22  ;;  %v1348_v21 = vrot.slane %v1341_v18, %v2252_v25  ;;  %2092 = vst.sshfl [vmem:[#allocation2 + $0x78] sm:$0x30 pattern:$0x76325410] %v1350_v42 }
  0xdb   : > { %542 = vrot.lane.b32.xlu1 %v529_v51, %s2173_s9  ;;  %v1349_v51 = vcombine.high %v1348_v21, %v1348_v21 }
  0xdd   : > { %444 = vrot.lane.b32.xlu0 %v432_v10, %s2178_s14  ;;  %1362 = vst [vmem:[#allocation2 + $0x60] sm:$0xc] %v1349_v51 }
  0xdf   : > { %643 = vrot.lane.b32.xlu1 %v634_v23, %s2176_s12  ;;  %v1689_v23 = vcombine.low %v2394_v53, %v2394_v53 }
  0xe1   : > { %781 = vrot.lane.b32.xlu0 %v769_v17, %s2177_s13 }
  0xe3   : > { %877 = vrot.lane.b32.xlu1 %v864_v28, %s2171_s7 }
  0xe5   : > { %1202 = vrot.lane.b32.xlu0 %v1182_v13, %s2185_s23 }
  0xe7   : > { %976 = vrot.lane.b32.xlu1 %v967_v20, %s2174_s10  ;;  %v1688_v20 = vcombine.low %v2388_v52, %v2388_v52 }
  0xe9   : > { %1206 = vrot.lane.b32.xlu0 %v1189_v55, %s2185_s23 }
  0xeb   : > { %635 = vrot.lane.b32.xlu1 %v624_v34, %s2176_s12  ;;  %v2188_v34 = vmov 0  }
  0xec   : > { %233 = vst [vmem:[#allocation2 + $0xc8] sm:$0xc0] %v2188_v34  ;;  %232 = vst [vmem:[#allocation2 + $0xc0] sm:$0xc0] %v2188_v34  ;;  %1927 = vmatprep.mubr.bf16.mxu0 %v2188_v34  ;;  %1968 = vmatprep.mubr.bf16.mxu1 %v2188_v34 }
  0xed   : > { %1262 = vrot.lane.b32.xlu0 %v1241_v59, %s2186_s24  ;;  %234 = vst [vmem:[#allocation2 + $0xd0] sm:$0xc0] %v2188_v34  ;;  %235 = vst [vmem:[#allocation2 + $0xd8] sm:$0xc0] %v2188_v34  ;;  %2152 = vset.pattern.permute.xlu1 %v2188_v34 }
  0xee   : > { %2153 = vset.pattern.permute.xlu0 %v2188_v34 }
  0xef   : > { %968 = vrot.lane.b32.xlu1 %v957_v3, %s2174_s10 }
  0xf1   : > { %1266 = vrot.lane.b32.xlu0 %v1248_v4, %s2186_s24 }
  0xf3   : > { %1204 = vrot.lane.b32.xlu1 %v1191_v2, %s2185_s23 }
  0xf5   : > { %1083 = vrot.lane.b32.xlu0 %v2614_v7, %s2172_s8  ;;  %v1294_v7 = vcombine.high %v1290_v26, %v1290_v26 }
  0xf7   : > { %1208 = vrot.lane.b32.xlu1 %v1199_v12, %s2185_s23  ;;  %v1308_v9 = vrot.slane %v1294_v7, %v2252_v25 }
  0xf9   : > { %1200 = vrot.lane.b32.xlu0 %v1190_v60, %s2185_s23  ;;  %v1977_v60 = vld [vmem:[%s2991_s3] sm:$0xff] }
  0xfb   : > { %1264 = vrot.lane.b32.xlu1 %v1250_v62, %s2186_s24  ;;  %v1987_v62 = vld [vmem:[%s2992_s4] sm:$0xff] }
  0xfd   : > { %1608 = vrot.lane.b32.xlu0 %v2300_v58, %s2173_s9 }
  0xff   : > { %1268 = vrot.lane.b32.xlu1 %v1259_v47, %s2186_s24 }
 0x100   : > { %v2770_v56 = vpop.permute.xlu0 %540  ;;  %v2783_v38 = vpop.permute.xlu1 %342 }
 0x101   : > { %1648 = vrot.lane.b32.xlu0 %v2300_v58, %s2176_s12 }
 0x103   : > { %1141 = vrot.lane.b32.xlu1 %v2715_v5, %s2184_s22  ;;  %v1310_v5 = vcombine.high %v1308_v9, %v1308_v9 }
 0x104   : > { %v335_v61 = vpop.permute.xlu0 %334 }
 0x105   : > { %1706 = vrot.lane.b32.xlu0 %v2300_v58, %s2177_s13 }
 0x107   : > { %1260 = vrot.lane.b32.xlu1 %v1249_v6, %s2186_s24 }
 0x108   : > { %v2781_v16 = vpop.permute.xlu0 %875 }
 0x109   : > { %1320 = vrot.lane.b32.xlu0 %v1309_v48, %s2187_s25 }
 0x10a   : > { %v2789_v32 = vpop.permute.xlu1 %1091 }
 0x10b   : > { %1610 = vrot.lane.b32.xlu1 %v2378_v50, %s2173_s9 }
 0x10d   : > { %1324 = vrot.lane.b32.xlu0 %v1310_v5, %s2187_s25 }
 0x10f   : > { %1650 = vrot.lane.b32.xlu1 %v2378_v50, %s2176_s12  ;;  %v2791_v8 = vpop.permute.xlu0 %641 }
 0x111   : > { %1318 = vrot.lane.b32.xlu0 %v1301_v1, %s2187_s25 }
 0x113   : > { %1708 = vrot.lane.b32.xlu1 %v2378_v50, %s2177_s13  ;;  %v2798_v39 = vpop.permute.xlu0 %974 }
 0x115   : > { %v2803_v14 = vpop.permute.xlu1 %1145  ;;  %1747 = vrot.lane.b32.xlu0 %v2378_v50, %s2171_s7 }
 0x117   : > { %1322 = vrot.lane.b32.xlu1 %v1308_v9, %s2187_s25  ;;  %v337_v10 = vpop.permute.xlu0 %336 }
 0x118   : > { %v345_v45 = vsel %vm344_vm11, %v335_v61, %v337_v10 }
 0x119   : > { %v2808_v0 = vpop.permute.xlu1 %446  ;;  %353 = vst [vmem:[#allocation2] sm:$0x3] %v345_v45  ;;  %1786 = vrot.lane.b32.xlu0 %v2378_v50, %s2174_s10 }
 0x11b   : > { %1326 = vrot.lane.b32.xlu1 %v1317_v36, %s2187_s25  ;;  %v2813_v35 = vpop.permute.xlu0 %544 }
 0x11d   : > { %v547_v17 = vpop.permute.xlu1 %546  ;;  %1825 = vrot.lane.b32.xlu0 %v2378_v50, %s2172_s8 }
 0x11e   : > { %v552_v22 = vsel %vm548_vm2, %v2813_v35, %v547_v17 }
 0x11f   : > { %560 = vst [vmem:[#allocation2 + $0x18] sm:$0x30] %v552_v22  ;;  %1745 = vrot.lane.b32.xlu1 %v2300_v58, %s2171_s7  ;;  %v539_v19 = vpop.permute.xlu0 %538  ;;  %s2124_s7 = smul.u32 24, %s2995_s19 }
 0x120   : > { %v549_v28 = vsel %vm548_vm2, %v539_v19, %v2770_v56 }
 0x121   : > { %v2827_v43 = vpop.permute.xlu1 %783  ;;  %557 = vst [vmem:[#allocation2] sm:$0x30] %v549_v28  ;;  %1692 = vrot.lane.b32.xlu0 %v1689_v23, %s2183_s21 }
 0x123   : > { %1784 = vrot.lane.b32.xlu1 %v2300_v58, %s2174_s10  ;;  %v2832_v50 = vpop.permute.xlu0 %879  ;;  %s224_s10 = scalar_lea.vmem %s2993_s5, %s2124_s7 }
 0x124   : > { %2001 = vst [vmem:[%s224_s10] sm:$0xf] %v2188_v34  ;;  %2020 = vst [vmem:[%s224_s10 + $0x14] sm:$0xf] %v2188_v34 }
 0x125   : > { %v882_v53 = vpop.permute.xlu1 %881  ;;  %1990 = vperm.xlu0 %2153, %v1987_v62  }
 0x126   : > { %v886_v13 = vsel %vm505_vm0, %v2832_v50, %v882_v53 }
 0x127   : > { %894 = vst [vmem:[#allocation2 + $0x38] sm:$0x30] %v886_v13  ;;  %1823 = vrot.lane.b32.xlu1 %v2300_v58, %s2172_s8  ;;  %v874_v29 = vpop.permute.xlu0 %873 }
 0x128   : > { %v883_v55 = vsel %vm505_vm0, %v874_v29, %v2781_v16 }
 0x129   : > { %v1150_v40 = vpop.permute.xlu1 %1149  ;;  %891 = vst [vmem:[#allocation2 + $0x20] sm:$0x30] %v883_v55 }
 0x12b   : > { %1690 = vrot.lane.b32.xlu1 %v1688_v20, %s2183_s21  ;;  %v2849_v58 = vpop.permute.xlu0 %1085 }
 0x12d   : > { %v339_v52 = vpop.permute.xlu1 %338 }
 0x12e   : > { %v346_v59 = vsel %vm344_vm11, %v337_v10, %v339_v52 }
 0x12f   : > { %354 = vst [vmem:[#allocation2 + $0x8] sm:$0x3] %v346_v59  ;;  %v1148_v24 = vpop.permute.xlu0 %1147  ;;  %1980 = vperm.xlu1 %2152, %v1977_v60  }
 0x130   : > { %v1154_v3 = vsel %vm1151_vm15, %v2803_v14, %v1148_v24  ;;  %v1155_v4 = vsel %vm1151_vm15, %v1148_v24, %v1150_v40 }
 0x131   : > { %1162 = vst [vmem:[#allocation2 + $0x50] sm:$0xc] %v1154_v3  ;;  %1163 = vst [vmem:[#allocation2 + $0x58] sm:$0xc] %v1155_v4  ;;  %v451_v31 = vpop.permute.xlu1 %450 }
 0x133   : > { %v449_v2 = vpop.permute.xlu0 %448 }
 0x134   : > { %v455_v27 = vsel %vm452_vm4, %v2808_v0, %v449_v2  ;;  %v456_v44 = vsel %vm452_vm4, %v449_v2, %v451_v31 }
 0x135   : > { %463 = vst [vmem:[#allocation2 + $0x10] sm:$0xc] %v455_v27  ;;  %464 = vst [vmem:[#allocation2 + $0x18] sm:$0xc] %v456_v44  ;;  %v788_v12 = vpop.permute.xlu1 %787 }
 0x137   : > { %v2866_v33 = vpop.permute.xlu0 %637 }
 0x139   : > { %v1088_v47 = vpop.permute.xlu1 %1087 }
 0x13a   : > { %v1094_v26 = vsel %vm302_vm1, %v2849_v58, %v1088_v47 }
 0x13b   : > { %1102 = vst [vmem:[#allocation2 + $0x48] sm:$0x3] %v1094_v26  ;;  %v786_v7 = vpop.permute.xlu0 %785 }
 0x13c   : > { %v791_v1 = vsel %vm601_vm3, %v2827_v43, %v786_v7  ;;  %v792_v61 = vsel %vm601_vm3, %v786_v7, %v788_v12 }
 0x13d   : > { %799 = vst [vmem:[#allocation2 + $0x30] sm:$0xc] %v791_v1  ;;  %800 = vst [vmem:[#allocation2 + $0x38] sm:$0xc] %v792_v61  ;;  %v640_v6 = vpop.permute.xlu1 %639 }
 0x13e   : > { %v647_v48 = vsel %vm645_vm8, %v2866_v33, %v640_v6  ;;  %v648_v9 = vsel %vm645_vm8, %v640_v6, %v2791_v8 }
 0x13f   : > { %655 = vst [vmem:[#allocation2 + $0x8] sm:$0xc0] %v647_v48  ;;  %656 = vst [vmem:[#allocation2 + $0x10] sm:$0xc0] %v648_v9  ;;  %v971_v5 = vpop.permute.xlu0 %970 }
 0x141   : > { %v443_v18 = vpop.permute.xlu1 %442 }
 0x143   : > { %v341_v21 = vpop.permute.xlu0 %340 }
 0x144   : > { %v347_v51 = vsel %vm344_vm11, %v339_v52, %v341_v21  ;;  %v348_v30 = vsel %vm344_vm11, %v341_v21, %v2783_v38 }
 0x145   : > { %v973_v10 = vpop.permute.xlu1 %972  ;;  %355 = vst [vmem:[#allocation2 + $0x10] sm:$0x3] %v347_v51  ;;  %356 = vst [vmem:[#allocation2 + $0x18] sm:$0x3] %v348_v30 }
 0x146   : > { %v979_v45 = vsel %vm409_vm5, %v971_v5, %v973_v10  ;;  %v980_v36 = vsel %vm409_vm5, %v973_v10, %v2798_v39 }
 0x147   : > { %987 = vst [vmem:[#allocation2 + $0x28] sm:$0xc0] %v979_v45  ;;  %988 = vst [vmem:[#allocation2 + $0x30] sm:$0xc0] %v980_v36  ;;  %v1090_v42 = vpop.permute.xlu0 %1089 }
 0x148   : > { %v1095_v23 = vsel %vm302_vm1, %v1088_v47, %v1090_v42  ;;  %v1096_v17 = vsel %vm302_vm1, %v1090_v42, %v2789_v32 }
 0x149   : > { %v780_v22 = vpop.permute.xlu1 %779  ;;  %1103 = vst [vmem:[#allocation2 + $0x50] sm:$0x3] %v1095_v23  ;;  %1104 = vst [vmem:[#allocation2 + $0x58] sm:$0x3] %v1096_v17 }
 0x14b   : > { %v2886_v38 = vpop.permute.xlu0 %1143 }
 0x14c   : > { %v1153_v19 = vsel %vm1151_vm15, %v2886_v38, %v2803_v14 }
 0x14d   : > { %v543_v28 = vpop.permute.xlu1 %542  ;;  %1161 = vst [vmem:[#allocation2 + $0x48] sm:$0xc] %v1153_v19 }
 0x14e   : > { %v550_v53 = vsel %vm548_vm2, %v2770_v56, %v543_v28  ;;  %v551_v13 = vsel %vm548_vm2, %v543_v28, %v2813_v35 }
 0x14f   : > { %558 = vst [vmem:[#allocation2 + $0x8] sm:$0x30] %v550_v53  ;;  %559 = vst [vmem:[#allocation2 + $0x10] sm:$0x30] %v551_v13  ;;  %v445_v32 = vpop.permute.xlu0 %444 }
 0x150   : > { %v453_v29 = vsel %vm452_vm4, %v443_v18, %v445_v32  ;;  %v454_v20 = vsel %vm452_vm4, %v445_v32, %v2808_v0  ;;  %vm1210_vm4 = vcmask 64512  }
 0x151   : > { %v644_v55 = vpop.permute.xlu1 %643  ;;  %461 = vst [vmem:[#allocation2] sm:$0xc] %v453_v29  ;;  %462 = vst [vmem:[#allocation2 + $0x8] sm:$0xc] %v454_v20 }
 0x152   : > { %v649_v14 = vsel %vm645_vm8, %v2791_v8, %v644_v55 }
 0x153   : > { %657 = vst [vmem:[#allocation2 + $0x18] sm:$0xc0] %v649_v14  ;;  %v782_v40 = vpop.permute.xlu0 %781 }
 0x154   : > { %v789_v56 = vsel %vm601_vm3, %v780_v22, %v782_v40  ;;  %v790_v35 = vsel %vm601_vm3, %v782_v40, %v2827_v43 }
 0x155   : > { %v878_v52 = vpop.permute.xlu1 %877  ;;  %797 = vst [vmem:[#allocation2 + $0x20] sm:$0xc] %v789_v56  ;;  %798 = vst [vmem:[#allocation2 + $0x28] sm:$0xc] %v790_v35 }
 0x156   : > { %v884_v59 = vsel %vm505_vm0, %v2781_v16, %v878_v52  ;;  %v885_v0 = vsel %vm505_vm0, %v878_v52, %v2832_v50  ;;  %v1865_v43 = vld [vmem:[#allocation2 + $0x10] sm:$0xff] }
 0x157   : > { %892 = vst [vmem:[#allocation2 + $0x28] sm:$0x30] %v884_v59  ;;  %893 = vst [vmem:[#allocation2 + $0x30] sm:$0x30] %v885_v0  ;;  %v1203_v24 = vpop.permute.xlu0 %1202 }
 0x158   : > { %v1864_v8 = vld [vmem:[#allocation2 + $0x8] sm:$0xff] }
 0x159   : > { %v977_v3 = vpop.permute.xlu1 %976  ;;  %1895 = vmatprep.subr.bf16.mxu0 %v1864_v8 }
 0x15a   : > { %v981_v4 = vsel %vm409_vm5, %v2798_v39, %v977_v3  ;;  %v1866_v31 = vld [vmem:[#allocation2 + $0x18] sm:$0xff] }
 0x15b   : > { %989 = vst [vmem:[#allocation2 + $0x38] sm:$0xc0] %v981_v4  ;;  %1936 = vmatprep.subr.bf16.mxu1 %v1866_v31  ;;  %v1207_v2 = vpop.permute.xlu0 %1206 }
 0x15c   : > { %1937 = vmatpush1.bf16.msra.mxu1 %v1865_v43 }
 0x15d   : > { %v636_v27 = vpop.permute.xlu1 %635 }
 0x15e   : > { %v646_v16 = vsel %vm645_vm8, %v636_v27, %v2866_v33  ;;  %v1869_v62 = vld [vmem:[#allocation2 + $0x30] sm:$0xff]  ;;  %v1868_v33 = vld [vmem:[#allocation2 + $0x28] sm:$0xff] }
 0x15f   : > { %654 = vst [vmem:[#allocation2] sm:$0xc0] %v646_v16  ;;  %v1263_v50 = vpop.permute.xlu0 %1262 }
 0x161   : > { %v969_v44 = vpop.permute.xlu1 %968 }
 0x162   : > { %v978_v12 = vsel %vm409_vm5, %v969_v44, %v971_v5  ;;  %v1870_v60 = vld [vmem:[#allocation2 + $0x38] sm:$0xff] }
 0x163   : > { %986 = vst [vmem:[#allocation2 + $0x20] sm:$0xc0] %v978_v12  ;;  %1938 = vmatprep.subr.bf16.mxu1 %v1870_v60  ;;  %v1267_v39 = vpop.permute.xlu0 %1266 }
 0x164   : > { %1939 = vmatpush1.bf16.msra.mxu1 %v1869_v62 }
 0x165   : > { %v1205_v47 = vpop.permute.xlu1 %1204 }
 0x166   : > { %v1212_v26 = vsel %vm1210_vm4, %v1203_v24, %v1205_v47  ;;  %v1213_v7 = vsel %vm1210_vm4, %v1205_v47, %v1207_v2  ;;  %v1863_v1 = vld [vmem:[#allocation2] sm:$0xff] }
 0x167   : > { %1220 = vst [vmem:[#allocation2 + $0x48] sm:$0x30] %v1212_v26  ;;  %1221 = vst [vmem:[#allocation2 + $0x50] sm:$0x30] %v1213_v7  ;;  %1896 = vmatpush1.bf16.msra.mxu0 %v1863_v1  ;;  %v1084_v61 = vpop.permute.xlu0 %1083 }
 0x168   : > { %1897 = vmatprep.subr.bf16.mxu0 %v1868_v33  ;;  %v1093_v6 = vsel %vm302_vm1, %v1084_v61, %v2849_v58 }
 0x169   : > { %v1209_v48 = vpop.permute.xlu1 %1208  ;;  %1101 = vst [vmem:[#allocation2 + $0x40] sm:$0x3] %v1093_v6 }
 0x16a   : > { %v1214_v9 = vsel %vm1210_vm4, %v1207_v2, %v1209_v48  ;;  %v1867_v5 = vld [vmem:[#allocation2 + $0x20] sm:$0xff] }
 0x16b   : > { %1222 = vst [vmem:[#allocation2 + $0x58] sm:$0x30] %v1214_v9  ;;  %1898 = vmatpush1.bf16.msra.mxu0 %v1867_v5  ;;  %v1201_v18 = vpop.permute.xlu0 %1200 }
 0x16c   : > { %v1211_v21 = vsel %vm1210_vm4, %v1201_v18, %v1203_v24 }
 0x16d   : > { %v1265_v51 = vpop.permute.xlu1 %1264  ;;  %1219 = vst [vmem:[#allocation2 + $0x40] sm:$0x30] %v1211_v21 }
 0x16e   : > { %v1272_v30 = vsel %vm1270_vm6, %v1263_v50, %v1265_v51  ;;  %v1273_v10 = vsel %vm1270_vm6, %v1265_v51, %v1267_v39 }
 0x16f   : > { %1280 = vst [vmem:[#allocation2 + $0x48] sm:$0xc0] %v1272_v30  ;;  %1281 = vst [vmem:[#allocation2 + $0x50] sm:$0xc0] %v1273_v10  ;;  %v1609_v58 = vpop.permute.xlu0 %1608 }
 0x170   : > { %v1612_v55 = vrot.slane %v1609_v58, 2  ;;  %v1614_v14 = vrot.slane %v1609_v58, 4 }
 0x171   : > { %v1269_v45 = vpop.permute.xlu1 %1268 }
 0x172   : > { %v1274_v36 = vsel %vm1270_vm6, %v1267_v39, %v1269_v45 }
 0x173   : > { %1282 = vst [vmem:[#allocation2 + $0x58] sm:$0xc0] %v1274_v36  ;;  %v1649_v42 = vpop.permute.xlu0 %1648 }
 0x174   : > { %v1652_v59 = vrot.slane %v1649_v42, 2  ;;  %v1654_v8 = vrot.slane %v1649_v42, 4 }
 0x175   : > { %v1142_v23 = vpop.permute.xlu1 %1141 }
 0x176   : > { %v1152_v17 = vsel %vm1151_vm15, %v1142_v23, %v2886_v38  ;;  %v1872_v22 = vld [vmem:[#allocation2 + $0x48] sm:$0xff]  ;;  %v1873_v32 = vld [vmem:[#allocation2 + $0x50] sm:$0xff] }
 0x177   : > { %1160 = vst [vmem:[#allocation2 + $0x40] sm:$0xc] %v1152_v17  ;;  %1899 = vmatprep.subr.bf16.mxu0 %v1872_v22  ;;  %v1707_v19 = vpop.permute.xlu0 %1706 }
 0x178   : > { %v1710_v12 = vrot.slane %v1707_v19, 2  ;;  %v1712_v1 = vrot.slane %v1707_v19, 4 }
 0x179   : > { %v1261_v28 = vpop.permute.xlu1 %1260 }
 0x17a   : > { %v1271_v53 = vsel %vm1270_vm6, %v1261_v28, %v1263_v50  ;;  %v1874_v13 = vld [vmem:[#allocation2 + $0x58] sm:$0xff] }
 0x17b   : > { %1279 = vst [vmem:[#allocation2 + $0x40] sm:$0xc0] %v1271_v53  ;;  %1940 = vmatprep.subr.bf16.mxu1 %v1874_v13  ;;  %v1321_v29 = vpop.permute.xlu0 %1320 }
 0x17c   : > { %1941 = vmatpush1.bf16.msra.mxu1 %v1873_v32 }
 0x17d   : > { %v1611_v20 = vpop.permute.xlu1 %1610 }
 0x17e   : > { %v1613_v40 = vrot.slane %v1611_v20, 2  ;;  %v1615_v56 = vrot.slane %v1611_v20, 4 }
 0x17f   : > { %v1325_v35 = vpop.permute.xlu0 %1324 }
 0x180   : > { %v1616_v38 = vsel %vm1374_vm9, %v1612_v55, %v1613_v40  ;;  %v1617_v52 = vsel %vm1376_vm10, %v1614_v14, %v1615_v56 }
 0x181   : > { %v1618_v0 = vsel %vm548_vm2, %v1616_v38, %v1617_v52  ;;  %v1651_v24 = vpop.permute.xlu1 %1650 }
 0x182   : > { %v1621_v3 = vmul.bf16 %v1618_v0, %v2294_v54  ;;  %v1653_v4 = vrot.slane %v1651_v24, 2  ;;  %v1655_v31 = vrot.slane %v1651_v24, 4  ;;  %v1871_v43 = vld [vmem:[#allocation2 + $0x40] sm:$0xff]  ;;  %v1880_v24 = vld [vmem:[#allocation2 + $0x88] sm:$0xff] }
 0x183   : > { %1900 = vmatpush1.bf16.msra.mxu0 %v1871_v43  ;;  %v1319_v2 = vpop.permute.xlu0 %1318 }
 0x184   : > { %v1623_v27 = vcombine.high %v1621_v3, %v1621_v3  ;;  %v1630_v16 = vrot.slane %v1621_v3, %v2252_v25  ;;  %2105 = vst.sshfl [vmem:[#allocation2 + $0xa0] sm:$0x3 pattern:$0x76325410] %v1621_v3  ;;  %v1656_v50 = vsel %vm1374_vm9, %v1652_v59, %v1653_v4  ;;  %v1657_v44 = vsel %vm1376_vm10, %v1654_v8, %v1655_v31 }
 0x185   : > { %v1658_v60 = vsel %vm645_vm8, %v1656_v50, %v1657_v44  ;;  %v1709_v62 = vpop.permute.xlu1 %1708  ;;  %v1329_v39 = vsel %vm1328_vm7, %v1319_v2, %v1321_v29  ;;  %v1879_v44 = vld [vmem:[#allocation2 + $0x80] sm:$0xff] }
 0x186   : > { %v1637_v54 = vrot.slane %v1623_v27, %v2252_v25  ;;  %v1638_v47 = vcombine.high %v1630_v16, %v1630_v16  ;;  %2106 = vst.sshfl [vmem:[#allocation2 + $0xb0] sm:$0x3 pattern:$0x76325410] %v1623_v27  ;;  %v1661_v26 = vmul.bf16 %v1658_v60, %v2364_v46  ;;  %v1711_v7 = vrot.slane %v1709_v62, 2 }
 0x187   : > { %1337 = vst [vmem:[#allocation2 + $0x60] sm:$0x3] %v1329_v39  ;;  %v1713_v33 = vrot.slane %v1709_v62, 4  ;;  %v1748_v61 = vpop.permute.xlu0 %1747 }
 0x188   : > { %v1639_v6 = vcombine.high %v1637_v54, %v1637_v54  ;;  %1645 = vst [vmem:[#allocation2 + $0xa8] sm:$0x3] %v1638_v47  ;;  %v1663_v48 = vcombine.low %v1661_v26, %v1661_v26  ;;  %v1677_v9 = vrot.slane %v1661_v26, %v2252_v25  ;;  %2108 = vst.sshfl [vmem:[#allocation2 + $0xb0] sm:$0x30 pattern:$0x76325410] %v1661_v26 }
 0x189   : > { %v1714_v5 = vsel %vm1374_vm9, %v1710_v12, %v1711_v7  ;;  %v1715_v18 = vsel %vm1376_vm10, %v1712_v1, %v1713_v33  ;;  %v1323_v21 = vpop.permute.xlu1 %1322  ;;  %v1750_v13 = vrot.slane %v1748_v61, 2  ;;  %v1752_v32 = vrot.slane %v1748_v61, 4  ;;  %v1882_v26 = vld [vmem:[#allocation2 + $0x98] sm:$0xff] }
 0x18a   : > { %1647 = vst [vmem:[#allocation2 + $0xb8] sm:$0x3] %v1639_v6  ;;  %v1670_v51 = vrot.slane %v1663_v48, %v2252_v25  ;;  %v1679_v46 = vcombine.high %v1677_v9, %v1677_v9  ;;  %2107 = vst.sshfl [vmem:[#allocation2 + $0xa0] sm:$0x30 pattern:$0x76325410] %v1663_v48  ;;  %v1716_v30 = vsel %vm601_vm3, %v1714_v5, %v1715_v18 }
 0x18b   : > { %v1330_v10 = vsel %vm1328_vm7, %v1321_v29, %v1323_v21  ;;  %v1718_v58 = vmul.bf16 %v1716_v30, %v2355_v41  ;;  %v1331_v45 = vsel %vm1328_vm7, %v1323_v21, %v1325_v35  ;;  %v1787_v36 = vpop.permute.xlu0 %1786  ;;  %v1881_v21 = vld [vmem:[#allocation2 + $0x90] sm:$0xff] }
 0x18c   : > { %1338 = vst [vmem:[#allocation2 + $0x68] sm:$0x3] %v1330_v10  ;;  %v1678_v42 = vcombine.high %v1670_v51, %v1670_v51  ;;  %1687 = vst [vmem:[#allocation2 + $0xb8] sm:$0xc] %v1679_v46  ;;  %v1789_v56 = vrot.slane %v1787_v36, 2  ;;  %v1791_v38 = vrot.slane %v1787_v36, 4 }
 0x18d   : > { %1339 = vst [vmem:[#allocation2 + $0x70] sm:$0x3] %v1331_v45  ;;  %v1720_v23 = vcombine.low %v1718_v58, %v1718_v58  ;;  %v1734_v17 = vrot.slane %v1718_v58, %v2252_v25  ;;  %2110 = vst.sshfl [vmem:[#allocation2 + $0xb8] sm:$0xc0 pattern:$0x76325410] %v1718_v58  ;;  %v1327_v22 = vpop.permute.xlu1 %1326 }
 0x18e   : > { %1685 = vst [vmem:[#allocation2 + $0xa8] sm:$0xc] %v1678_v42  ;;  %v1332_v19 = vsel %vm1328_vm7, %v1325_v35, %v1327_v22  ;;  %v1875_v52 = vld [vmem:[#allocation2 + $0x60] sm:$0xff] }
 0x18f   : > { %v1727_v28 = vrot.slane %v1720_v23, %v2252_v25  ;;  %v1736_v53 = vcombine.low %v1734_v17, %v1734_v17  ;;  %2109 = vst.sshfl [vmem:[#allocation2 + $0xa8] sm:$0xc0 pattern:$0x76325410] %v1720_v23  ;;  %1340 = vst [vmem:[#allocation2 + $0x78] sm:$0x3] %v1332_v19  ;;  %v1826_v41 = vpop.permute.xlu0 %1825 }
 0x190   : > { %v1828_v50 = vrot.slane %v1826_v41, 2  ;;  %v1830_v54 = vrot.slane %v1826_v41, 4 }
 0x191   : > { %v1735_v29 = vcombine.low %v1727_v28, %v1727_v28  ;;  %1743 = vst [vmem:[#allocation2 + $0xb0] sm:$0xc0] %v1736_v53  ;;  %v1746_v20 = vpop.permute.xlu1 %1745 }
 0x192   : > { %v1749_v55 = vrot.slane %v1746_v20, 2  ;;  %v1751_v14 = vrot.slane %v1746_v20, 4 }
 0x193   : > { %v1876_v40 = vld [vmem:[#allocation2 + $0x68] sm:$0xff]  ;;  %1741 = vst [vmem:[#allocation2 + $0xa0] sm:$0xc0] %v1735_v29  ;;  %v1693_v35 = vpop.permute.xlu0 %1692 }
 0x194   : > { %1901 = vmatprep.subr.bf16.mxu0 %v1876_v40  ;;  %v1753_v59 = vsel %vm1374_vm9, %v1749_v55, %v1750_v13  ;;  %v1754_v0 = vsel %vm1376_vm10, %v1751_v14, %v1752_v32  ;;  %v1696_v8 = vsel %vm694_vm12, %v2563_v57, %v1693_v35  ;;  %v1697_v3 = vsel %vm694_vm12, %v1693_v35, %v2591_v15  ;;  %v1877_v39 = vld [vmem:[#allocation2 + $0x70] sm:$0xff] }
 0x195   : > { %1902 = vmatpush1.bf16.msra.mxu0 %v1875_v52  ;;  %v1755_v4 = vsel %vm505_vm0, %v1753_v59, %v1754_v0  ;;  %v1785_v31 = vpop.permute.xlu1 %1784  ;;  %1704 = vst [vmem:[#allocation2 + $0xb0] sm:$0x30] %v1696_v8  ;;  %1705 = vst [vmem:[#allocation2 + $0xb8] sm:$0x30] %v1697_v3 }
 0x196   : > { %1903 = vmatprep.subr.bf16.mxu0 %v1880_v24  ;;  %v1757_v43 = vmul.bf16 %v1755_v4, %v2309_v63  ;;  %v1788_v2 = vrot.slane %v1785_v31, 2  ;;  %v1790_v27 = vrot.slane %v1785_v31, 4  ;;  %v1878_v16 = vld [vmem:[#allocation2 + $0x78] sm:$0xff] }
 0x197   : > { %1942 = vmatprep.subr.bf16.mxu1 %v1878_v16 }
 0x198   : > { %v1759_v12 = vcombine.high %v1757_v43, %v1757_v43  ;;  %v1766_v60 = vrot.slane %v1757_v43, %v2252_v25  ;;  %2111 = vst.sshfl [vmem:[#allocation2 + $0xc0] sm:$0x3 pattern:$0x76325410] %v1757_v43  ;;  %v1792_v15 = vsel %vm1374_vm9, %v1788_v2, %v1789_v56  ;;  %v1793_v62 = vsel %vm1376_vm10, %v1790_v27, %v1791_v38 }
 0x199   : > { %1904 = vmatpush1.bf16.msra.mxu0 %v1879_v44  ;;  %v1794_v47 = vsel %vm409_vm5, %v1792_v15, %v1793_v62  ;;  %1943 = vmatpush1.bf16.msra.mxu1 %v1877_v39  ;;  %v1824_v63 = vpop.permute.xlu1 %1823 }
 0x19a   : > { %v1773_v7 = vrot.slane %v1759_v12, %v2252_v25  ;;  %v1774_v1 = vcombine.high %v1766_v60, %v1766_v60  ;;  %2112 = vst.sshfl [vmem:[#allocation2 + $0xd0] sm:$0x3 pattern:$0x76325410] %v1759_v12  ;;  %v1796_v33 = vmul.bf16 %v1794_v47, %v2370_v49  ;;  %v1827_v61 = vrot.slane %v1824_v63, 2  ;;  %1944 = vmatprep.subr.bf16.mxu1 %v1882_v26 }
 0x19b   : > { %v1829_v6 = vrot.slane %v1824_v63, 4 }
 0x19c   : > { %v1775_v48 = vcombine.high %v1773_v7, %v1773_v7  ;;  %1781 = vst [vmem:[#allocation2 + $0xc8] sm:$0x3] %v1774_v1  ;;  %v1798_v9 = vcombine.low %v1796_v33, %v1796_v33  ;;  %v1812_v5 = vrot.slane %v1796_v33, %v2252_v25  ;;  %2114 = vst.sshfl [vmem:[#allocation2 + $0xd0] sm:$0x30 pattern:$0x76325410] %v1796_v33 }
 0x19d   : > { %v1831_v18 = vsel %vm1374_vm9, %v1827_v61, %v1828_v50  ;;  %v1886_v51 = vld [vmem:[#allocation2 + $0xb8] sm:$0xff]  ;;  %v1832_v46 = vsel %vm1376_vm10, %v1829_v6, %v1830_v54  ;;  %1945 = vmatpush1.bf16.msra.mxu1 %v1881_v21  ;;  %v1691_v30 = vpop.permute.xlu1 %1690  ;;  %v1885_v36 = vld [vmem:[#allocation2 + $0xb0] sm:$0xff] }
 0x19e   : > { %1783 = vst [vmem:[#allocation2 + $0xd8] sm:$0x3] %v1775_v48  ;;  %v1805_v49 = vrot.slane %v1798_v9, %v2252_v25  ;;  %v1814_v10 = vcombine.high %v1812_v5, %v1812_v5  ;;  %2113 = vst.sshfl [vmem:[#allocation2 + $0xc0] sm:$0x30 pattern:$0x76325410] %v1798_v9  ;;  %v1833_v58 = vsel %vm302_vm1, %v1831_v18, %v1832_v46  ;;  %1946 = vmatprep.subr.bf16.mxu1 %v1886_v51 }
 0x19f   : > { %v1694_v45 = vsel %vm694_vm12, %v2616_v11, %v1691_v30  ;;  %v1835_v42 = vmul.bf16 %v1833_v58, %v2349_v37  ;;  %v1695_v23 = vsel %vm694_vm12, %v1691_v30, %v2563_v57 }
 0x1a0   : > { %1702 = vst [vmem:[#allocation2 + $0xa0] sm:$0x30] %v1694_v45  ;;  %v1813_v17 = vcombine.high %v1805_v49, %v1805_v49  ;;  %1822 = vst [vmem:[#allocation2 + $0xd8] sm:$0xc] %v1814_v10 }
 0x1a1   : > { %1703 = vst [vmem:[#allocation2 + $0xa8] sm:$0x30] %v1695_v23  ;;  %v1837_v22 = vcombine.high %v1835_v42, %v1835_v42  ;;  %v1844_v19 = vrot.slane %v1835_v42, %v2252_v25  ;;  %2115 = vst.sshfl [vmem:[#allocation2 + $0xc8] sm:$0xc pattern:$0x76325410] %v1835_v42  ;;  %1947 = vmatpush1.bf16.msra.mxu1 %v1885_v36 }
 0x1a2   : > { %1820 = vst [vmem:[#allocation2 + $0xc8] sm:$0xc] %v1813_v17 }
 0x1a3   : > { %v1851_v28 = vrot.slane %v1837_v22, %v2252_v25  ;;  %v1852_v11 = vcombine.low %v1844_v19, %v1844_v19  ;;  %2116 = vst.sshfl [vmem:[#allocation2 + $0xd8] sm:$0xc pattern:$0x76325410] %v1837_v22  ;;  %v1862_v25 = vld [vmem:[%s2989_s1] sm:$0xf] }
 0x1a4   : > { %v1991_v14 = vpop.permute.xlu0 %1990 }
 0x1a5   : > { %v1853_v53 = vcombine.low %v1851_v28, %v1851_v28  ;;  %1858 = vst [vmem:[#allocation2 + $0xc0] sm:$0x30] %v1852_v11 }
 0x1a7   : > { %v1883_v37 = vld [vmem:[#allocation2 + $0xa0] sm:$0xff]  ;;  %1860 = vst [vmem:[#allocation2 + $0xd0] sm:$0x30] %v1853_v53 }
 0x1a8   : > { %v1884_v41 = vld [vmem:[#allocation2 + $0xa8] sm:$0xff] }
 0x1a9   : > { %1905 = vmatprep.subr.bf16.mxu0 %v1884_v41  ;;  %v1888_v57 = vld [vmem:[#allocation2 + $0xc8] sm:$0xff] }
 0x1aa   : > { %1906 = vmatpush1.bf16.msra.mxu0 %v1883_v37  ;;  %v1890_v13 = vld [vmem:[#allocation2 + $0xd8] sm:$0xff] }
 0x1ab   : > { %1907 = vmatprep.subr.bf16.mxu0 %v1888_v57  ;;  %1948 = vmatprep.subr.bf16.mxu1 %v1890_v13 }
 0x1ac   : > { %v1887_v32 = vld [vmem:[#allocation2 + $0xc0] sm:$0xff] }
 0x1ae   : > { %1908 = vmatpush1.bf16.msra.mxu0 %v1887_v32  ;;  %v1889_v29 = vld [vmem:[#allocation2 + $0xd0] sm:$0xff]  ;;  %v1981_v20 = vpop.permute.xlu1 %1980 }
 0x1af   : > { %1909 = vmatprep.subr.bf16.mxu0 %v2188_v34  ;;  %1949 = vmatpush1.bf16.msra.mxu1 %v1889_v29 }
 0x1b0   : > { %1950 = vmatprep.subr.bf16.mxu1 %v2188_v34 }
 0x1b2   : > { %1910 = vmatpush1.bf16.msra.mxu0 %v2188_v34 }
 0x1b3   : > { %1951 = vmatpush1.bf16.msra.mxu1 %v2188_v34 }
 0x1b5   : > { %1928 = vmatmul.mubr.bf16.vlgmr.msra.gmra.mrb[0].mxu0 %v1862_v25 }
 0x1b6   : > { %1969 = vmatmul.mubr.bf16.vlgmr.msra.gmra.mrb[0].mxu1 %v1862_v25 }
 0x288   : > { %v1929_v55 = vpop.f32.mrb[0].mxu0 }
 0x289   : > { %v1931_v40 = vpop.f32.mrb[1].mxu0  ;;  %v1983_v56 = vmul.f32 %v1981_v20, %v1929_v55  ;;  %v1970_v35 = vpop.f32.mrb[0].mxu1 }
 0x28a   : > { %v1984_v38 = vmul.f32 %v1981_v20, %v1931_v40  ;;  %v1933_v52 = vpop.f32.mrb[2].mxu0  ;;  %v1985_v59 = vmul.f32 %v1981_v20, %v1970_v35  ;;  %v1972_v24 = vpop.f32.mrb[1].mxu1 }
 0x28b   : > { %v1934_v0 = vpop.f32.mrb[3].mxu0  ;;  %v1993_v8 = vadd.f32 %v1991_v14, %v1983_v56  ;;  %v1986_v3 = vmul.f32 %v1981_v20, %v1972_v24  ;;  %v1974_v4 = vpop.f32.mrb[2].mxu1 }
 0x28c   : > { %v1994_v31 = vadd.f32 %v1991_v14, %v1984_v38  ;;  %v1995_v43 = vadd.f32 %v1991_v14, %v1985_v59  ;;  %v1975_v27 = vpop.f32.mrb[3].mxu1 }
 0x28d   : > { %v1997_v2 = vmax.f32 %v1993_v8, 0.0  ;;  %v1996_v16 = vadd.f32 %v1991_v14, %v1986_v3 }
 0x28e   : > { %v1998_v34 = vmax.f32 %v1994_v31, 0.0  ;;  %v1999_v50 = vmax.f32 %v1995_v43, 0.0 }
 0x28f   : > { %v2000_v44 = vmax.f32 %v1996_v16, 0.0 }
 0x290   : > { %v2121_v12 = vpack.c.bf16 %v1998_v34, %v1997_v2 }
 0x291   : > { %v2122_v60 = vpack.c.bf16 %v2000_v44, %v1999_v50 }
 0x292   : > { %2018 = vst [vmem:[%s224_s10 + $0x4] sm:$0xff] %v2121_v12 }
 0x293   : > { %2019 = vst [vmem:[%s224_s10 + $0xc] sm:$0xff] %v2122_v60 }
 0x294 PF: > { %s15_s18 = sadd.s32 1, %s2168_s18  }
 0x295   : > { %p12_p4 = scmp.ge.s32.totalorder %s15_s18, 4  }
 0x297   :  { %14 = sbr.rel (!%p12_p4) target bundleno = 1 (0x1), region = 70 }

// kernel: network_forward.4
= control target key start
LH: loop header
LB: loop body
LE: loop exit
PB: predicated region body
PF: predicated region fallthrough
CT: control target
= control target key end

     0   :  { %s2105_s18 = smov 0   ;;  %s2865_s0 = inlined_call_operand.vmem [shape: bf16[2,8,768], index: 0, kind: input, shape index: {}]   ;;  %s2866_s1 = inlined_call_operand.vmem [shape: bf16[8,256], index: 1, kind: input, shape index: {}]   ;;  %s2867_s2 = inlined_call_operand.vmem [shape: bf16[9,512], index: 2, kind: input, shape index: {}]   ;;  %s2868_s3 = inlined_call_operand.vmem [shape: f32[8,1], index: 3, kind: input, shape index: {}]   ;;  %s2869_s4 = inlined_call_operand.vmem [shape: f32[8,1], index: 4, kind: input, shape index: {}]   ;;  %s2870_s5 = inlined_call_operand.vmem [shape: f32[2,8,512], index: 5, kind: output, shape index: {}]  }
   0x1 LB: > { %s1853_s19 = sadd.s32 4294967295, %s2055_s18   ;;  %p1857_p0 = scmp.ge.s32.totalorder %s2055_s18, 1  ;;  %s2055_s18 = sphi %s2105_s18, %s15_s18  }
   0x2   : > { %p187_p1 = scmp.lt.s32.totalorder %s2055_s18, 3 }
   0x4   : > { %p188_p2 = pnand %p1857_p0, %p187_p1 }
   0x5   : > { %v230_v0 = vld [vmem:[%s2867_s2 + $0x8] sm:$0xff] (!%p188_p2)  ;;  %v258_v1 = vlaneseq (!%p188_p2)  ;;  %v229_v2 = vld [vmem:[%s2867_s2] sm:$0xff] (!%p188_p2)  ;;  %p215_p3 = scmp.lt.s32.totalorder (!%p188_p2), %s1853_s19, 1  ;;  %s2057_s24 = smov (!%p188_p2), 57   ;;  %v232_v46 = vld [vmem:[%s2867_s2 + $0x18] sm:$0x11] (!%p188_p2) }
   0x6   : > { %191 = sbr.rel (%p188_p2) target bundleno = 707 (0x2c3), region = 40  ;;  %v1863_v3 = vcombine.low (!%p188_p2), %v230_v0, %v230_v0  ;;  %v1864_v4 = vcombine.high (!%p188_p2), %v230_v0, %v230_v0  ;;  %v1861_v5 = vcombine.low (!%p188_p2), %v229_v2, %v229_v2  ;;  %v1862_v6 = vcombine.high (!%p188_p2), %v229_v2, %v229_v2  ;;  %s2058_s25 = smov (!%p188_p2), 55   ;;  %v231_v55 = vld [vmem:[%s2867_s2 + $0x10] sm:$0x11] (!%p188_p2) }
   0x7   : > { %v259_v7 = vshrl.u32 (!%p188_p2), %v258_v1, 7  ;;  %s2059_s30 = smov (!%p188_p2), 56   ;;  %v1921_v56 = vcombine.low (!%p188_p2), %v232_v46, %v232_v46  ;;  %v1922_v57 = vcombine.high (!%p188_p2), %v232_v46, %v232_v46  ;;  %v1919_v2 = vcombine.low (!%p188_p2), %v231_v55, %v231_v55  ;;  %s2060_s10 = smov (!%p188_p2), 63  }
   0x8   : > { %v2119_v8 = vpack.i.b16 (!%p188_p2), %v1863_v3, %v1863_v3  ;;  %v2121_v9 = vpack.i.b16 (!%p188_p2), %v1864_v4, %v1864_v4  ;;  %v2123_v10 = vpack.i.b16 (!%p188_p2), %v1861_v5, %v1861_v5  ;;  %v2125_v11 = vpack.i.b16 (!%p188_p2), %v1862_v6, %v1862_v6  ;;  %s2061_s11 = smov (!%p188_p2), 65   ;;  %s2062_s12 = smov (!%p188_p2), 71  }
   0x9   : > { %v2127_v12 = vsub.s32 (!%p188_p2), 0, %v259_v7  ;;  %v438_v13 = vsub.s32 (!%p188_p2), 1, %v259_v7  ;;  %v346_v14 = vshrl.u32 (!%p188_p2), %v1861_v5, 16  ;;  %v353_v15 = vshrl.u32 (!%p188_p2), %v1862_v6, 16  ;;  %s2063_s13 = smov (!%p188_p2), 72   ;;  %s2064_s14 = smov (!%p188_p2), 73  }
   0xa   : > { %v360_v16 = vshrl.u32 (!%p188_p2), %v1863_v3, 16  ;;  %v367_v17 = vshrl.u32 (!%p188_p2), %v1864_v4, 16  ;;  %v630_v41 = vsub.s32 (!%p188_p2), 2, %v259_v7  ;;  %v706_v45 = vsub.s32 (!%p188_p2), 3, %v259_v7  ;;  %s2065_s15 = smov (!%p188_p2), 119   ;;  %s2066_s16 = smov (!%p188_p2), 120  }
   0xb   : > { %v447_v18 = vrot.slane (!%p188_p2), %v2119_v8, %v438_v13  ;;  %v451_v19 = vrot.slane (!%p188_p2), %v2121_v9, %v438_v13  ;;  %v261_v20 = vrot.slane (!%p188_p2), %v2123_v10, %v2127_v12  ;;  %v268_v21 = vrot.slane (!%p188_p2), %v2125_v11, %v2127_v12  ;;  %s2067_s17 = smov (!%p188_p2), 121   ;;  %s2068_s20 = smov (!%p188_p2), 127  }
   0xc   : > { %v2137_v22 = vpack.i.b16 (!%p188_p2), %v346_v14, %v346_v14  ;;  %v2139_v23 = vpack.i.b16 (!%p188_p2), %v353_v15, %v353_v15  ;;  %v275_v24 = vrot.slane (!%p188_p2), %v2119_v8, %v2127_v12  ;;  %v282_v25 = vrot.slane (!%p188_p2), %v2121_v9, %v2127_v12  ;;  %s2069_s21 = smov (!%p188_p2), 64   ;;  %s2070_s22 = smov (!%p188_p2), 9  }
   0xd   : > { %v2145_v26 = vcombine.low %v447_v18, %v451_v19  ;;  %v2147_v27 = vcombine.low %v261_v20, %v268_v21  ;;  %v2149_v28 = vpack.i.b16 %v360_v16, %v360_v16  ;;  %v2151_v29 = vpack.i.b16 %v367_v17, %v367_v17  ;;  %s2876_s19 = smov (!%p215_p3, %s1853_s19), 1  ;;  %s2071_s23 = smov 8  }
   0xe   : > { %v352_v30 = vrot.slane %v2137_v22, %v2127_v12  ;;  %v359_v31 = vrot.slane %v2139_v23, %v2127_v12  ;;  %v2161_v32 = vcombine.low %v275_v24, %v282_v25  ;;  %v439_v33 = vrot.slane %v2123_v10, %v438_v13  ;;  %s2004_s26 = smul.u32 24, %s2876_s19  ;;  %s2073_s27 = smov 1  }
   0xf   : > { %464 = vrot.lane.b32.xlu1 %v2145_v26, %s2057_s24  ;;  %293 = vrot.lane.b32.xlu0 %v2147_v27, %s2058_s25  ;;  %v366_v34 = vrot.slane %v2149_v28, %v2127_v12  ;;  %v373_v35 = vrot.slane %v2151_v29, %v2127_v12  ;;  %v443_v36 = vrot.slane %v2125_v11, %v438_v13  ;;  %vm299_vm0 = vcmask 449536   ;;  %s2003_s7 = sshll.u32 %s2876_s19, 5 }
  0x10   : > { %v2174_v37 = vcombine.low %v352_v30, %v359_v31  ;;  %v525_v38 = vrot.slane %v2149_v28, %v438_v13  ;;  %v529_v39 = vrot.slane %v2151_v29, %v438_v13  ;;  %v517_v40 = vrot.slane %v2137_v22, %v438_v13  ;;  %s219_s29 = scalar_lea.vmem %s2865_s0, %s2004_s26  ;;  %s2072_s26 = smov 7  }
  0x11   : > { %v2186_v42 = vcombine.low %v366_v34, %v373_v35  ;;  %v2188_v43 = vcombine.low %v439_v33, %v443_v36  ;;  %v521_v44 = vrot.slane %v2139_v23, %v438_v13  ;;  %v2194_v47 = vld [vmem:[%s219_s29] sm:$0xff]  ;;  %v639_v49 = vrot.slane %v2149_v28, %v630_v41  ;;  %v2200_v51 = vld [vmem:[%s219_s29 + $0x8] sm:$0xff]  ;;  %v2221_v63 = vld [vmem:[%s219_s29 + $0x10] sm:$0xff] }
  0x12   : > { %v2196_v48 = vcombine.low %v525_v38, %v529_v39  ;;  %v643_v50 = vrot.slane %v2151_v29, %v630_v41  ;;  %v631_v53 = vrot.slane %v2137_v22, %v630_v41  ;;  %v635_v54 = vrot.slane %v2139_v23, %v630_v41 }
  0x13   : > { %384 = vrot.lane.b32.xlu1 %v2174_v37, %s2059_s30  ;;  %295 = vrot.lane.b32.xlu0 %v2161_v32, %s2058_s25  ;;  %v2206_v52 = vcombine.low %v517_v40, %v521_v44  ;;  %v1894_v58 = vcombine.high %v2194_v47, %v2194_v47  ;;  %v715_v59 = vrot.slane %v2119_v8, %v706_v45  ;;  %vm468_vm1 = vcmask 465920  }
  0x14   : > { %v719_v60 = vrot.slane %v2121_v9, %v706_v45  ;;  %v1895_v61 = vcombine.low %v2200_v51, %v2200_v51  ;;  %v1896_v62 = vcombine.high %v2200_v51, %v2200_v51  ;;  %v707_v0 = vrot.slane %v2123_v10, %v706_v45 }
  0x15   : > { %v711_v1 = vrot.slane %v2125_v11, %v706_v45  ;;  %1166 = vst [vmem:[#allocation2 + $0xc0] sm:$0xf0] %v1894_v58  ;;  %v1897_v3 = vcombine.low %v2221_v63, %v2221_v63  ;;  %v2231_v4 = vcombine.low %v639_v49, %v643_v50  ;;  %v2233_v5 = vcombine.low %v631_v53, %v635_v54 }
  0x16   : > { %v1920_v6 = vcombine.high %v231_v55, %v231_v55  ;;  %1167 = vst [vmem:[#allocation2 + $0xc8] sm:$0xf0] %v1895_v61  ;;  %1168 = vst [vmem:[#allocation2 + $0xd0] sm:$0xf0] %v1896_v62  ;;  %v2235_v7 = vcombine.low %v715_v59, %v719_v60  ;;  %v791_v8 = vrot.slane %v2149_v28, %v706_v45  ;;  %vm501_vm2 = vcmask 580608  }
  0x17   : > { %386 = vrot.lane.b32.xlu1 %v2186_v42, %s2059_s30  ;;  %462 = vrot.lane.b32.xlu0 %v2188_v43, %s2057_s24  ;;  %1169 = vst [vmem:[#allocation2 + $0xd8] sm:$0xf0] %v1897_v3  ;;  %v795_v9 = vrot.slane %v2151_v29, %v706_v45  ;;  %v2239_v10 = vcombine.low %v707_v0, %v711_v1  ;;  %vm301_vm3 = vcmask 1043456   ;;  %vm333_vm4 = vcmask 596992  }
  0x18   : > { %v783_v11 = vrot.slane %v2137_v22, %v706_v45  ;;  %v787_v13 = vrot.slane %v2139_v23, %v706_v45  ;;  %v881_v14 = vpack.i.b16 %v1921_v56, %v1921_v56  ;;  %v888_v15 = vpack.i.b16 %v1922_v57, %v1922_v57 }
  0x19   : > { %v867_v16 = vpack.i.b16 %v1919_v2, %v1919_v2  ;;  %v874_v17 = vpack.i.b16 %v1920_v6, %v1920_v6  ;;  %v2247_v18 = vcombine.low %v791_v8, %v795_v9  ;;  %vm390_vm5 = vcmask 457728  }
  0x1a   : > { %v2249_v19 = vcombine.low %v783_v11, %v787_v13  ;;  %v886_v20 = vrot.slane %v881_v14, %v2127_v12  ;;  %v893_v21 = vrot.slane %v888_v15, %v2127_v12  ;;  %vm546_vm6 = vcmask 515072  }
  0x1b   : > { %542 = vrot.lane.b32.xlu1 %v2196_v48, %s2060_s10  ;;  %540 = vrot.lane.b32.xlu0 %v2206_v52, %s2060_s10  ;;  %v872_v22 = vrot.slane %v867_v16, %v2127_v12  ;;  %v879_v23 = vrot.slane %v874_v17, %v2127_v12  ;;  %v1893_v12 = vcombine.low %v2194_v47, %v2194_v47  ;;  %vm579_vm7 = vcmask 531456  }
  0x1c   : > { %v2263_v24 = vcombine.low %v886_v20, %v893_v21  ;;  %vm615_vm8 = vcmask 523264   ;;  %vm423_vm9 = vcmask 588800   ;;  %vm960_vm10 = vcmask 973824  }
  0x1d   : > { %v2265_v25 = vcombine.low %v872_v22, %v879_v23  ;;  %vm1012_vm11 = vcmask 982016   ;;  %vm1064_vm12 = vcmask 990208   ;;  %vm1116_vm13 = vcmask 1039360  }
  0x1e   : > { %vm993_vm14 = vcmask 72704   ;;  %vm1045_vm15 = vcmask 64512  }
  0x1f   : > { %656 = vrot.lane.b32.xlu1 %v2231_v4, %s2061_s11  ;;  %654 = vrot.lane.b32.xlu0 %v2233_v5, %s2061_s11 }
  0x23   : > { %732 = vrot.lane.b32.xlu1 %v2235_v7, %s2062_s12  ;;  %730 = vrot.lane.b32.xlu0 %v2239_v10, %s2062_s12 }
  0x27   : > { %808 = vrot.lane.b32.xlu1 %v2247_v18, %s2063_s13  ;;  %806 = vrot.lane.b32.xlu0 %v2249_v19, %s2063_s13 }
  0x2b   : > { %906 = vrot.lane.b32.xlu1 %v2263_v24, %s2064_s14  ;;  %904 = vrot.lane.b32.xlu0 %v2265_v25, %s2064_s14 }
  0x2f   : > { %954 = vrot.lane.b32.xlu0 %v2147_v27, %s2065_s15  ;;  %956 = vrot.lane.b32.xlu1 %v2161_v32, %s2065_s15 }
  0x33   : > { %1006 = vrot.lane.b32.xlu0 %v2174_v37, %s2066_s16  ;;  %1008 = vrot.lane.b32.xlu1 %v2186_v42, %s2066_s16 }
  0x37   : > { %1058 = vrot.lane.b32.xlu0 %v2188_v43, %s2067_s17  ;;  %1060 = vrot.lane.b32.xlu1 %v2145_v26, %s2067_s17 }
  0x3b   : > { %1110 = vrot.lane.b32.xlu0 %v2206_v52, %s2068_s20  ;;  %1112 = vrot.lane.b32.xlu1 %v2196_v48, %s2068_s20 }
  0x3f   : > { %607 = vrot.lane.b32.xlu0 %v1894_v58, %s2069_s21  ;;  %609 = vrot.lane.b32.xlu1 %v1895_v61, %s2069_s21 }
  0x43   : > { %611 = vrot.lane.b32.xlu0 %v1896_v62, %s2069_s21  ;;  %613 = vrot.lane.b32.xlu1 %v1897_v3, %s2069_s21 }
  0x47   : > { %605 = vrot.lane.b32.xlu0 %v1893_v12, %s2069_s21 }
  0x81   : > { %v2294_v28 = vpop.permute.xlu1 %464  ;;  %v294_v29 = vpop.permute.xlu0 %293 }
  0x82   : > { %v297_v30 = vrot.slane %v294_v29, 4  ;;  %v467_v36 = vrot.slane %v2294_v28, 4 }
  0x84   : > { %v300_v31 = vsel %vm299_vm0, %v297_v30, %v294_v29  ;;  %v477_v50 = vmul.bf16 %v467_v36, %v2221_v63 }
  0x85   : > { %v307_v33 = vmul.bf16 %v300_v31, %v2194_v47  ;;  %v2298_v34 = vpop.permute.xlu1 %384  ;;  %v296_v35 = vpop.permute.xlu0 %295 }
  0x86   : > { %v298_v38 = vrot.slane %v296_v35, 4  ;;  %v1885_v57 = vcombine.low %v477_v50, %v477_v50  ;;  %v388_v12 = vrot.slane %v2298_v34, 4 }
  0x87   : > { %v1868_v39 = vcombine.high %v307_v33, %v307_v33  ;;  %v1867_v45 = vcombine.low %v307_v33, %v307_v33 }
  0x88   : > { %v309_v40 = vmul.bf16 %v298_v38, %v2221_v63  ;;  %v302_v15 = vsel %vm301_vm3, %v297_v30, %v298_v38  ;;  %v391_v50 = vsel %vm390_vm5, %v388_v12, %v2298_v34 }
  0x89   : > { %v2302_v41 = vpop.permute.xlu1 %386  ;;  %v463_v44 = vpop.permute.xlu0 %462  ;;  %325 = vrot.lane.b32.xlu0 %v1868_v39, %s2064_s14  ;;  %v303_v29 = vsel %vm299_vm0, %v302_v15, %v296_v35 }
  0x8a   : > { %v466_v46 = vrot.slane %v463_v44, 4  ;;  %v1871_v49 = vcombine.low %v309_v40, %v309_v40  ;;  %v389_v21 = vrot.slane %v2302_v41, 4 }
  0x8c   : > { %v469_v53 = vsel %vm468_vm1, %v466_v46, %v463_v44  ;;  %331 = vrot.lane.b32.xlu1 %v1871_v49, %s2064_s14  ;;  %v399_v44 = vmul.bf16 %v389_v21, %v2221_v63 }
  0x8d   : > { %v475_v54 = vmul.bf16 %v469_v53, %v2194_v47  ;;  %v2311_v55 = vpop.permute.xlu1 %542  ;;  %v2313_v56 = vpop.permute.xlu0 %540  ;;  %323 = vrot.lane.b32.xlu0 %v1867_v45, %s2064_s14  ;;  %v2373_v45 = vmul.bf16 %v303_v29, %v2200_v51  ;;  %v470_v53 = vsel %vm301_vm3, %v466_v46, %v467_v36 }
  0x8e   : > { %v545_v35 = vrot.slane %v2311_v55, 4  ;;  %v471_v36 = vsel %vm468_vm1, %v470_v53, %v2294_v28 }
  0x8f   : > { %v1882_v58 = vcombine.high %v475_v54, %v475_v54  ;;  %v1881_v61 = vcombine.low %v475_v54, %v475_v54  ;;  %v476_v28 = vmul.bf16 %v471_v36, %v2200_v51 }
  0x90   : > { %499 = vrot.lane.b32.xlu1 %v1885_v57, %s2062_s12 }
  0x91   : > { %v2317_v59 = vpop.permute.xlu1 %656  ;;  %v2319_v60 = vpop.permute.xlu0 %654  ;;  %493 = vrot.lane.b32.xlu0 %v1882_v58, %s2062_s12 }
  0x92   : > { %v2872_v58 = vrot.slane %v2317_v59, 4 }
  0x94   : > { %v668_v29 = vmul.bf16 %v2872_v58, %v2221_v63 }
  0x95   : > { %v2322_v62 = vpop.permute.xlu1 %732  ;;  %v2324_v0 = vpop.permute.xlu0 %730  ;;  %491 = vrot.lane.b32.xlu0 %v1881_v61, %s2062_s12  ;;  %v1878_v61 = vcombine.low %v399_v44, %v399_v44 }
  0x96   : > { %v735_v1 = vrot.slane %v2322_v62, 4  ;;  %v734_v2 = vrot.slane %v2324_v0, 4 }
  0x98   : > { %v736_v3 = vsel %vm501_vm2, %v734_v2, %v2324_v0  ;;  %v744_v6 = vmul.bf16 %v735_v1, %v2221_v63  ;;  %v737_v36 = vsel %vm301_vm3, %v734_v2, %v735_v1 }
  0x99   : > { %v742_v8 = vmul.bf16 %v736_v3, %v2194_v47  ;;  %v2337_v9 = vpop.permute.xlu1 %808  ;;  %v2339_v11 = vpop.permute.xlu0 %806  ;;  %v555_v3 = vmul.bf16 %v545_v35, %v2221_v63 }
  0x9a   : > { %v1911_v13 = vcombine.low %v744_v6, %v744_v6  ;;  %v2395_v6 = vmul.bf16 %v391_v50, %v2194_v47  ;;  %v2871_v15 = vrot.slane %v2337_v9, 4  ;;  %v1904_v50 = vcombine.low %v668_v29, %v668_v29 }
  0x9b   : > { %v1908_v14 = vcombine.high %v742_v8, %v742_v8  ;;  %v1907_v20 = vcombine.low %v742_v8, %v742_v8  ;;  %v1870_v8 = vcombine.high %v2373_v45, %v2373_v45  ;;  %v810_v2 = vrot.slane %v2339_v11, 4 }
  0x9c   : > { %766 = vrot.lane.b32.xlu1 %v1911_v13, %s2057_s24  ;;  %v820_v53 = vmul.bf16 %v2871_v15, %v2221_v63 }
  0x9d   : > { %v2343_v16 = vpop.permute.xlu1 %906  ;;  %v2345_v17 = vpop.permute.xlu0 %904  ;;  %760 = vrot.lane.b32.xlu0 %v1908_v14, %s2057_s24  ;;  %v544_v14 = vrot.slane %v2313_v56, 4 }
  0x9e   : > { %v909_v22 = vrot.slane %v2343_v16, 4  ;;  %v908_v23 = vrot.slane %v2345_v17, 4 }
  0xa0   : > { %v910_v30 = vsel %vm333_vm4, %v908_v23, %v2345_v17  ;;  %v918_v31 = vmul.bf16 %v909_v22, %v2221_v63  ;;  %v392_v17 = vsel %vm301_vm3, %v388_v12, %v389_v21 }
  0xa1   : > { %v2361_v33 = vmul.bf16 %v910_v30, %v2194_v47  ;;  %758 = vrot.lane.b32.xlu0 %v1907_v20, %s2057_s24  ;;  %v2364_v38 = vpop.permute.xlu0 %954  ;;  %v2366_v39 = vpop.permute.xlu1 %956  ;;  %v1892_v20 = vcombine.low %v555_v3, %v555_v3  ;;  %v1875_v30 = vcombine.high %v2395_v6, %v2395_v6  ;;  %v1884_v3 = vcombine.high %v476_v28, %v476_v28 }
  0xa2   : > { %v1929_v40 = vcombine.low %v918_v31, %v918_v31  ;;  %v547_v31 = vsel %vm546_vm6, %v544_v14, %v2313_v56 }
  0xa3   : > { %v1926_v49 = vcombine.high %v2361_v33, %v2361_v33 }
  0xa4   : > { %940 = vrot.lane.b32.xlu1 %v1929_v40, %s2058_s25 }
  0xa5   : > { %934 = vrot.lane.b32.xlu0 %v1926_v49, %s2058_s25  ;;  %v2386_v54 = vpop.permute.xlu0 %1006  ;;  %v2388_v57 = vpop.permute.xlu1 %1008  ;;  %v658_v49 = vrot.slane %v2319_v60, 4 }
  0xa8   : > { %421 = vrot.lane.b32.xlu1 %v1878_v61, %s2063_s13  ;;  %v553_v61 = vmul.bf16 %v547_v31, %v2194_v47 }
  0xa9   : > { %329 = vrot.lane.b32.xlu0 %v1870_v8, %s2064_s14  ;;  %v2403_v46 = vpop.permute.xlu0 %1058  ;;  %v2405_v13 = vpop.permute.xlu1 %1060  ;;  %v660_v8 = vsel %vm579_vm7, %v658_v49, %v2319_v60  ;;  %v738_v60 = vsel %vm501_vm2, %v737_v36, %v2322_v62  ;;  %v812_v62 = vsel %vm423_vm9, %v810_v2, %v2339_v11  ;;  %v1874_v36 = vcombine.low %v2395_v6, %v2395_v6 }
  0xaa   : > { %v666_v15 = vmul.bf16 %v660_v8, %v2194_v47  ;;  %v1889_v58 = vcombine.high %v553_v61, %v553_v61  ;;  %v1888_v34 = vcombine.low %v553_v61, %v553_v61  ;;  %v2874_v61 = vrot.slane %v2337_v9, 4 }
  0xac   : > { %577 = vrot.lane.b32.xlu1 %v1892_v20, %s2061_s11  ;;  %v1901_v8 = vcombine.high %v666_v15, %v666_v15  ;;  %v1900_v56 = vcombine.low %v666_v15, %v666_v15 }
  0xad   : > { %415 = vrot.lane.b32.xlu0 %v1875_v30, %s2063_s13  ;;  %v2421_v40 = vpop.permute.xlu0 %1110  ;;  %v2423_v44 = vpop.permute.xlu1 %1112  ;;  %v1918_v30 = vcombine.low %v820_v53, %v820_v53 }
  0xb0   : > { %690 = vrot.lane.b32.xlu1 %v1904_v50, %s2060_s10  ;;  %v1869_v50 = vcombine.low %v2373_v45, %v2373_v45  ;;  %v911_v45 = vsel %vm301_vm3, %v908_v23, %v909_v22  ;;  %v1883_v22 = vcombine.low %v476_v28, %v476_v28 }
  0xb1   : > { %497 = vrot.lane.b32.xlu0 %v1884_v3, %s2062_s12  ;;  %v608_v20 = vpop.permute.xlu0 %607  ;;  %v610_v29 = vpop.permute.xlu1 %609  ;;  %v912_v11 = vsel %vm333_vm4, %v911_v45, %v2343_v16  ;;  %v548_v16 = vsel %vm301_vm3, %v544_v14, %v545_v35 }
  0xb2   : > { %v617_v31 = vsel %vm615_vm8, %v608_v20, %v610_v29  ;;  %v917_v6 = vmul.bf16 %v912_v11, %v2200_v51  ;;  %v549_v28 = vsel %vm546_vm6, %v548_v16, %v2311_v55 }
  0xb3   : > { %625 = vst [vmem:[#allocation2 + $0x48] sm:$0xf] %v617_v31  ;;  %1472 = vst [vmem:[#allocation2 + $0x160] sm:$0xf] %v617_v31  ;;  %v818_v31 = vmul.bf16 %v812_v62, %v2194_v47  ;;  %v554_v35 = vmul.bf16 %v549_v28, %v2200_v51  ;;  %v1925_v28 = vcombine.low %v2361_v33, %v2361_v33 }
  0xb4   : > { %842 = vrot.lane.b32.xlu1 %v1918_v30, %s2059_s30  ;;  %v743_v30 = vmul.bf16 %v738_v60, %v2200_v51  ;;  %v1928_v12 = vcombine.high %v917_v6, %v917_v6 }
  0xb5   : > { %571 = vrot.lane.b32.xlu0 %v1889_v58, %s2061_s11  ;;  %v612_v0 = vpop.permute.xlu0 %611  ;;  %v2445_v1 = vpop.permute.xlu1 %613  ;;  %v1915_v23 = vcombine.high %v818_v31, %v818_v31  ;;  %v1914_v62 = vcombine.low %v818_v31, %v818_v31 }
  0xb6   : > { %v618_v53 = vsel %vm615_vm8, %v610_v29, %v612_v0  ;;  %v619_v3 = vsel %vm615_vm8, %v612_v0, %v2445_v1  ;;  %v1910_v60 = vcombine.high %v743_v30, %v743_v30  ;;  %v1909_v55 = vcombine.low %v743_v30, %v743_v30 }
  0xb7   : > { %626 = vst [vmem:[#allocation2 + $0x50] sm:$0xf] %v618_v53  ;;  %1473 = vst [vmem:[#allocation2 + $0x168] sm:$0xf] %v618_v53  ;;  %v813_v53 = vsel %vm301_vm3, %v810_v2, %v2874_v61 }
  0xb8   : > { %627 = vst [vmem:[#allocation2 + $0x58] sm:$0xf] %v619_v3  ;;  %1474 = vst [vmem:[#allocation2 + $0x170] sm:$0xf] %v619_v3  ;;  %327 = vrot.lane.b32.xlu1 %v1869_v50, %s2064_s14  ;;  %v1891_v3 = vcombine.high %v554_v35, %v554_v35 }
  0xb9   : > { %684 = vrot.lane.b32.xlu0 %v1901_v8, %s2060_s10  ;;  %v606_v58 = vpop.permute.xlu0 %605  ;;  %v959_v8 = vrot.slane %v2366_v39, 4 }
  0xba   : > { %v616_v29 = vsel %vm615_vm8, %v606_v58, %v608_v20  ;;  %v393_v20 = vsel %vm390_vm5, %v392_v17, %v2302_v41  ;;  %v2873_v41 = vrot.slane %v2317_v59, 4  ;;  %v1010_v17 = vrot.slane %v2386_v54, 4 }
  0xbb   : > { %624 = vst [vmem:[#allocation2 + $0x40] sm:$0xf] %v616_v29  ;;  %v398_v21 = vmul.bf16 %v393_v20, %v2200_v51  ;;  %v1927_v29 = vcombine.low %v917_v6, %v917_v6 }
  0xbc   : > { %413 = vrot.lane.b32.xlu1 %v1874_v36, %s2063_s13  ;;  %v661_v0 = vsel %vm301_vm3, %v658_v49, %v2873_v41  ;;  %v958_v49 = vrot.slane %v2364_v38, 4  ;;  %v1013_v6 = vsel %vm1012_vm11, %v1010_v17, %v2386_v54  ;;  %v1063_v54 = vrot.slane %v2405_v13, 4 }
  0xbd   : > { %764 = vrot.lane.b32.xlu0 %v1910_v60, %s2057_s24  ;;  %v1877_v50 = vcombine.high %v398_v21, %v398_v21  ;;  %v662_v14 = vsel %vm579_vm7, %v661_v0, %v2317_v59  ;;  %v814_v59 = vsel %vm423_vm9, %v813_v53, %v2337_v9  ;;  %v1876_v11 = vcombine.low %v398_v21, %v398_v21 }
  0xbe   : > { %v667_v15 = vmul.bf16 %v662_v14, %v2200_v51  ;;  %v961_v2 = vsel %vm960_vm10, %v958_v49, %v2364_v38  ;;  %v962_v45 = vsel %vm301_vm3, %v958_v49, %v959_v8  ;;  %v819_v58 = vmul.bf16 %v814_v59, %v2200_v51 }
  0xbf   : > { %v967_v36 = vmul.bf16 %v961_v2, %v2194_v47  ;;  %v963_v9 = vsel %vm960_vm10, %v962_v45, %v2366_v39  ;;  %v1019_v16 = vmul.bf16 %v1013_v6, %v2194_v47  ;;  %v969_v53 = vmul.bf16 %v959_v8, %v2221_v63 }
  0xc0   : > { %495 = vrot.lane.b32.xlu1 %v1883_v22, %s2062_s12  ;;  %v1903_v30 = vcombine.high %v667_v15, %v667_v15  ;;  %v1917_v60 = vcombine.high %v819_v58, %v819_v58  ;;  %v968_v38 = vmul.bf16 %v963_v9, %v2200_v51  ;;  %v1011_v22 = vrot.slane %v2388_v57, 4 }
  0xc1   : > { %836 = vrot.lane.b32.xlu0 %v1915_v23, %s2059_s30  ;;  %v1931_v31 = vcombine.high %v967_v36, %v967_v36  ;;  %v1890_v23 = vcombine.low %v554_v35, %v554_v35  ;;  %v1902_v21 = vcombine.low %v667_v15, %v667_v15  ;;  %v1936_v0 = vcombine.high %v1019_v16, %v1019_v16 }
  0xc2   : > { %v1933_v39 = vcombine.high %v968_v38, %v968_v38  ;;  %v1014_v20 = vsel %vm301_vm3, %v1010_v17, %v1011_v22  ;;  %v1932_v61 = vcombine.low %v968_v38, %v968_v38  ;;  %v1934_v49 = vcombine.low %v969_v53, %v969_v53 }
  0xc3   : > { %v1930_v15 = vcombine.low %v967_v36, %v967_v36  ;;  %v1021_v8 = vmul.bf16 %v1011_v22, %v2221_v63  ;;  %v1935_v59 = vcombine.low %v1019_v16, %v1019_v16  ;;  %v1073_v36 = vmul.bf16 %v1063_v54, %v2221_v63 }
  0xc4   : > { %569 = vrot.lane.b32.xlu1 %v1888_v34, %s2061_s11  ;;  %v1015_v34 = vsel %vm1012_vm11, %v1014_v20, %v2388_v57 }
  0xc5   : > { %938 = vrot.lane.b32.xlu0 %v1928_v12, %s2058_s25  ;;  %v1062_v12 = vrot.slane %v2403_v46, 4  ;;  %v1020_v41 = vmul.bf16 %v1015_v34, %v2200_v51  ;;  %v1939_v2 = vcombine.low %v1021_v8, %v1021_v8  ;;  %v1944_v38 = vcombine.low %v1073_v36, %v1073_v36 }
  0xc7   : > { %v1065_v57 = vsel %vm1064_vm12, %v1062_v12, %v2403_v46  ;;  %v1938_v35 = vcombine.high %v1020_v41, %v1020_v41 }
  0xc8   : > { %682 = vrot.lane.b32.xlu1 %v1900_v56, %s2060_s10  ;;  %v1916_v56 = vcombine.low %v819_v58, %v819_v58  ;;  %v1071_v33 = vmul.bf16 %v1065_v57, %v2194_v47 }
  0xc9   : > { %419 = vrot.lane.b32.xlu0 %v1877_v50, %s2063_s13  ;;  %v1066_v50 = vsel %vm301_vm3, %v1062_v12, %v1063_v54 }
  0xca   : > { %v1067_v14 = vsel %vm1064_vm12, %v1066_v50, %v2405_v13  ;;  %v1941_v46 = vcombine.high %v1071_v33, %v1071_v33  ;;  %v1937_v13 = vcombine.low %v1020_v41, %v1020_v41  ;;  %v1940_v22 = vcombine.low %v1071_v33, %v1071_v33 }
  0xcc   : > { %762 = vrot.lane.b32.xlu1 %v1909_v55, %s2057_s24  ;;  %v1072_v55 = vmul.bf16 %v1067_v14, %v2200_v51 }
  0xcd   : > { %575 = vrot.lane.b32.xlu0 %v1891_v3, %s2061_s11 }
  0xce   : > { %v1943_v3 = vcombine.high %v1072_v55, %v1072_v55  ;;  %v1942_v58 = vcombine.low %v1072_v55, %v1072_v55 }
  0xd0   : > { %834 = vrot.lane.b32.xlu1 %v1914_v62, %s2059_s30  ;;  %v1114_v62 = vrot.slane %v2421_v40, 4 }
  0xd1   : > { %688 = vrot.lane.b32.xlu0 %v1903_v30, %s2060_s10  ;;  %v1115_v30 = vrot.slane %v2423_v44, 4 }
  0xd2   : > { %v1117_v45 = vsel %vm1116_vm13, %v1114_v62, %v2421_v40 }
  0xd3   : > { %v1125_v41 = vmul.bf16 %v1115_v30, %v2221_v63 }
  0xd4   : > { %936 = vrot.lane.b32.xlu1 %v1927_v29, %s2058_s25  ;;  %v1123_v29 = vmul.bf16 %v1117_v45, %v2194_v47 }
  0xd5   : > { %840 = vrot.lane.b32.xlu0 %v1917_v60, %s2059_s30  ;;  %v1118_v60 = vsel %vm301_vm3, %v1114_v62, %v1115_v30  ;;  %v1949_v50 = vcombine.low %v1125_v41, %v1125_v41 }
  0xd6   : > { %v1946_v17 = vcombine.high %v1123_v29, %v1123_v29  ;;  %v1945_v34 = vcombine.low %v1123_v29, %v1123_v29 }
  0xd8   : > { %417 = vrot.lane.b32.xlu1 %v1876_v11, %s2063_s13  ;;  %v1119_v11 = vsel %vm1116_vm13, %v1118_v60, %v2423_v44 }
  0xd9   : > { %985 = vrot.lane.b32.xlu0 %v1931_v31, %s2070_s22 }
  0xdc   : > { %573 = vrot.lane.b32.xlu1 %v1890_v23, %s2061_s11 }
  0xdd   : > { %989 = vrot.lane.b32.xlu0 %v1933_v39, %s2070_s22  ;;  %v1124_v39 = vmul.bf16 %v1119_v11, %v2200_v51 }
  0xdf   : > { %v1948_v44 = vcombine.high %v1124_v39, %v1124_v39  ;;  %v1947_v54 = vcombine.low %v1124_v39, %v1124_v39 }
  0xe0   : > { %686 = vrot.lane.b32.xlu1 %v1902_v21, %s2060_s10 }
  0xe1   : > { %932 = vrot.lane.b32.xlu0 %v1925_v28, %s2058_s25 }
  0xe4   : > { %838 = vrot.lane.b32.xlu1 %v1916_v56, %s2059_s30 }
  0xe5   : > { %1037 = vrot.lane.b32.xlu0 %v1936_v0, %s2071_s23 }
  0xe8   : > { %987 = vrot.lane.b32.xlu1 %v1932_v61, %s2070_s22 }
  0xe9   : > { %1041 = vrot.lane.b32.xlu0 %v1938_v35, %s2071_s23 }
  0xec   : > { %991 = vrot.lane.b32.xlu1 %v1934_v49, %s2070_s22 }
  0xed   : > { %1089 = vrot.lane.b32.xlu0 %v1941_v46, %s2072_s26 }
  0xf0   : > { %983 = vrot.lane.b32.xlu1 %v1930_v15, %s2070_s22 }
  0xf1   : > { %1093 = vrot.lane.b32.xlu0 %v1943_v3, %s2072_s26 }
  0xf4   : > { %1039 = vrot.lane.b32.xlu1 %v1937_v13, %s2071_s23 }
  0xf5   : > { %1035 = vrot.lane.b32.xlu0 %v1935_v59, %s2071_s23 }
  0xf8   : > { %1043 = vrot.lane.b32.xlu1 %v1939_v2, %s2071_s23 }
  0xf9   : > { %1170 = vrot.lane.b32.xlu0 %v2194_v47, %s2068_s20 }
  0xfb   : > { %v2562_v9 = vpop.permute.xlu0 %325 }
  0xfc   : > { %1091 = vrot.lane.b32.xlu1 %v1942_v58, %s2072_s26 }
  0xfd   : > { %1174 = vrot.lane.b32.xlu0 %v2221_v63, %s2068_s20 }
  0xfe   : > { %v332_v20 = vpop.permute.xlu1 %331 }
  0xff   : > { %v324_v31 = vpop.permute.xlu0 %323 }
 0x100   : > { %1095 = vrot.lane.b32.xlu1 %v1944_v38, %s2072_s26  ;;  %v334_v40 = vsel %vm333_vm4, %v324_v31, %v2562_v9 }
 0x101   : > { %1209 = vrot.lane.b32.xlu0 %v2200_v51, %s2067_s17  ;;  %342 = vst [vmem:[#allocation2] sm:$0xf] %v334_v40 }
 0x102   : > { %v500_v21 = vpop.permute.xlu1 %499 }
 0x103   : > { %v2577_v23 = vpop.permute.xlu0 %493 }
 0x104   : > { %1087 = vrot.lane.b32.xlu1 %v1940_v22, %s2072_s26 }
 0x105   : > { %1141 = vrot.lane.b32.xlu0 %v1946_v17, %s2073_s27 }
 0x107   : > { %v492_v6 = vpop.permute.xlu0 %491 }
 0x108   : > { %1172 = vrot.lane.b32.xlu1 %v2200_v51, %s2068_s20  ;;  %v502_v16 = vsel %vm501_vm2, %v492_v6, %v2577_v23 }
 0x109   : > { %1145 = vrot.lane.b32.xlu0 %v1948_v44, %s2073_s27  ;;  %510 = vst [vmem:[#allocation2 + $0x20] sm:$0xf] %v502_v16 }
 0x10c   : > { %1207 = vrot.lane.b32.xlu1 %v2194_v47, %s2067_s17 }
 0x10d   : > { %1139 = vrot.lane.b32.xlu0 %v1945_v34, %s2073_s27 }
 0x10e   : > { %v767_v28 = vpop.permute.xlu1 %766 }
 0x10f   : > { %v2586_v12 = vpop.permute.xlu0 %760 }
 0x110   : > { %1211 = vrot.lane.b32.xlu1 %v2221_v63, %s2067_s17 }
 0x111   : > { %1246 = vrot.lane.b32.xlu0 %v2200_v51, %s2066_s16 }
 0x113   : > { %v759_v0 = vpop.permute.xlu0 %758 }
 0x114   : > { %v768_v56 = vsel %vm468_vm1, %v759_v0, %v2586_v12  ;;  %1143 = vrot.lane.b32.xlu1 %v1947_v54, %s2073_s27 }
 0x115   : > { %776 = vst [vmem:[#allocation2 + $0x60] sm:$0xf] %v768_v56  ;;  %1281 = vrot.lane.b32.xlu0 %v2194_v47, %s2065_s15 }
 0x116   : > { %v941_v57 = vpop.permute.xlu1 %940 }
 0x117   : > { %v2597_v33 = vpop.permute.xlu0 %934 }
 0x118   : > { %1147 = vrot.lane.b32.xlu1 %v1949_v50, %s2073_s27 }
 0x119   : > { %1285 = vrot.lane.b32.xlu0 %v2221_v63, %s2065_s15 }
 0x11a   : > { %v422_v35 = vpop.permute.xlu1 %421 }
 0x11b   : > { %v330_v14 = vpop.permute.xlu0 %329 }
 0x11c   : > { %v337_v61 = vsel %vm333_vm4, %v330_v14, %v332_v20  ;;  %1244 = vrot.lane.b32.xlu1 %v2194_v47, %s2066_s16 }
 0x11d   : > { %345 = vst [vmem:[#allocation2 + $0x18] sm:$0xf] %v337_v61  ;;  %1320 = vrot.lane.b32.xlu0 %v2200_v51, %s2064_s14 }
 0x11e   : > { %v578_v53 = vpop.permute.xlu1 %577 }
 0x11f   : > { %v2606_v55 = vpop.permute.xlu0 %415 }
 0x120   : > { %1248 = vrot.lane.b32.xlu1 %v2221_v63, %s2066_s16 }
 0x121   : > { %1355 = vrot.lane.b32.xlu0 %v2194_v47, %s2063_s13 }
 0x122   : > { %v2612_v46 = vpop.permute.xlu1 %690 }
 0x123   : > { %v498_v49 = vpop.permute.xlu0 %497 }
 0x124   : > { %v505_v3 = vsel %vm501_vm2, %v498_v49, %v500_v21  ;;  %1283 = vrot.lane.b32.xlu1 %v2200_v51, %s2065_s15 }
 0x125   : > { %513 = vst [vmem:[#allocation2 + $0x38] sm:$0xf] %v505_v3  ;;  %1359 = vrot.lane.b32.xlu0 %v2221_v63, %s2063_s13 }
 0x126   : > { %v2619_v15 = vpop.permute.xlu1 %842 }
 0x127   : > { %v2621_v13 = vpop.permute.xlu0 %571 }
 0x128   : > { %1318 = vrot.lane.b32.xlu1 %v2194_v47, %s2064_s14 }
 0x129   : > { %1394 = vrot.lane.b32.xlu0 %v2200_v51, %s2062_s12 }
 0x12a   : > { %v328_v8 = vpop.permute.xlu1 %327 }
 0x12b   : > { %v335_v59 = vsel %vm333_vm4, %v2562_v9, %v328_v8  ;;  %v336_v62 = vsel %vm333_vm4, %v328_v8, %v330_v14  ;;  %v2630_v2 = vpop.permute.xlu0 %684 }
 0x12c   : > { %343 = vst [vmem:[#allocation2 + $0x8] sm:$0xf] %v335_v59  ;;  %344 = vst [vmem:[#allocation2 + $0x10] sm:$0xf] %v336_v62  ;;  %1322 = vrot.lane.b32.xlu1 %v2221_v63, %s2064_s14  ;;  %v2074_v62 = vmov 0  }
 0x12d   : > { %1429 = vrot.lane.b32.xlu0 %v2194_v47, %s2061_s11  ;;  %234 = vst [vmem:[#allocation2 + $0x1a8] sm:$0xf0] %v2074_v62  ;;  %233 = vst [vmem:[#allocation2 + $0x1a0] sm:$0xf0] %v2074_v62  ;;  %2032 = vset.pattern.permute.xlu1 %v2074_v62 }
 0x12e   : > { %v414_v30 = vpop.permute.xlu1 %413  ;;  %235 = vst [vmem:[#allocation2 + $0x1b0] sm:$0xf0] %v2074_v62  ;;  %236 = vst [vmem:[#allocation2 + $0x1b8] sm:$0xf0] %v2074_v62  ;;  %2031 = vset.pattern.permute.xlu0 %v2074_v62 }
 0x12f   : > { %v424_v45 = vsel %vm423_vm9, %v414_v30, %v2606_v55  ;;  %v765_v58 = vpop.permute.xlu0 %764 }
 0x130   : > { %432 = vst [vmem:[#allocation2] sm:$0xf0] %v424_v45  ;;  %v771_v36 = vsel %vm468_vm1, %v765_v58, %v767_v28  ;;  %1357 = vrot.lane.b32.xlu1 %v2200_v51, %s2063_s13  ;;  %v1982_v28 = vcombine.high %v2221_v63, %v2221_v63 }
 0x131   : > { %779 = vst [vmem:[#allocation2 + $0x78] sm:$0xf] %v771_v36  ;;  %1433 = vrot.lane.b32.xlu0 %v2221_v63, %s2061_s11 }
 0x132   : > { %v496_v9 = vpop.permute.xlu1 %495 }
 0x133   : > { %v503_v29 = vsel %vm501_vm2, %v2577_v23, %v496_v9  ;;  %v504_v60 = vsel %vm501_vm2, %v496_v9, %v498_v49  ;;  %v2646_v38 = vpop.permute.xlu0 %836 }
 0x134   : > { %511 = vst [vmem:[#allocation2 + $0x28] sm:$0xf] %v503_v29  ;;  %512 = vst [vmem:[#allocation2 + $0x30] sm:$0xf] %v504_v60  ;;  %1392 = vrot.lane.b32.xlu1 %v2194_v47, %s2062_s12 }
 0x135   : > { %1478 = vrot.lane.b32.xlu0 %v2200_v51, %s2060_s10 }
 0x136   : > { %v570_v31 = vpop.permute.xlu1 %569 }
 0x137   : > { %v580_v11 = vsel %vm579_vm7, %v570_v31, %v2621_v13  ;;  %v939_v40 = vpop.permute.xlu0 %938  ;;  %v1617_v29 = vld [vmem:[#allocation2] sm:$0xff] }
 0x138   : > { %588 = vst [vmem:[#allocation2 + $0x20] sm:$0xf0] %v580_v11  ;;  %v945_v17 = vsel %vm299_vm0, %v939_v40, %v941_v57  ;;  %1396 = vrot.lane.b32.xlu1 %v2221_v63, %s2062_s12 }
 0x139   : > { %953 = vst [vmem:[#allocation2 + $0x98] sm:$0xf] %v945_v17  ;;  %1511 = vrot.lane.b32.xlu0 %v2194_v47, %s2057_s24 }
 0x13a   : > { %v683_v22 = vpop.permute.xlu1 %682 }
 0x13b   : > { %v692_v39 = vsel %vm546_vm6, %v683_v22, %v2630_v2  ;;  %v420_v23 = vpop.permute.xlu0 %419 }
 0x13c   : > { %700 = vst [vmem:[#allocation2 + $0x40] sm:$0xf0] %v692_v39  ;;  %v427_v44 = vsel %vm423_vm9, %v420_v23, %v422_v35  ;;  %1431 = vrot.lane.b32.xlu1 %v2200_v51, %s2061_s11 }
 0x13d   : > { %435 = vst [vmem:[#allocation2 + $0x18] sm:$0xf0] %v427_v44  ;;  %1515 = vrot.lane.b32.xlu0 %v2221_v63, %s2057_s24 }
 0x13e   : > { %v763_v6 = vpop.permute.xlu1 %762 }
 0x13f   : > { %v769_v20 = vsel %vm468_vm1, %v2586_v12, %v763_v6  ;;  %v770_v16 = vsel %vm468_vm1, %v763_v6, %v765_v58  ;;  %v576_v34 = vpop.permute.xlu0 %575 }
 0x140   : > { %777 = vst [vmem:[#allocation2 + $0x68] sm:$0xf] %v769_v20  ;;  %778 = vst [vmem:[#allocation2 + $0x70] sm:$0xf] %v770_v16  ;;  %v583_v21 = vsel %vm579_vm7, %v576_v34, %v578_v53  ;;  %1476 = vrot.lane.b32.xlu1 %v2194_v47, %s2060_s10 }
 0x141   : > { %591 = vst [vmem:[#allocation2 + $0x38] sm:$0xf0] %v583_v21  ;;  %1548 = vrot.lane.b32.xlu0 %v2200_v51, %s2059_s30 }
 0x142   : > { %v835_v54 = vpop.permute.xlu1 %834 }
 0x143   : > { %v844_v12 = vsel %vm390_vm5, %v835_v54, %v2646_v38  ;;  %v689_v41 = vpop.permute.xlu0 %688 }
 0x144   : > { %852 = vst [vmem:[#allocation2 + $0x60] sm:$0xf0] %v844_v12  ;;  %v695_v0 = vsel %vm546_vm6, %v689_v41, %v2612_v46  ;;  %1480 = vrot.lane.b32.xlu1 %v2221_v63, %s2060_s10  ;;  %v1620_v56 = vld [vmem:[#allocation2 + $0x18] sm:$0xff]  ;;  %s224_s10 = scalar_lea.vmem %s2870_s5, %s2003_s7 }
 0x145   : > { %703 = vst [vmem:[#allocation2 + $0x58] sm:$0xf0] %v695_v0  ;;  %1468 = vrot.lane.b32.xlu0 %v1982_v28, %s2069_s21  ;;  %1729 = vmatprep.subr.bf16.mxu1 %v1620_v56  ;;  %v2729_v0 = vld [vmem:[%s2866_s1] sm:$0xff] }
 0x146   : > { %v937_v57 = vpop.permute.xlu1 %936  ;;  %v2000_v56 = vcombine.high %v2729_v0, %v2729_v0 }
 0x147   : > { %v943_v50 = vsel %vm299_vm0, %v2597_v33, %v937_v57  ;;  %v944_v35 = vsel %vm299_vm0, %v937_v57, %v939_v40  ;;  %v841_v14 = vpop.permute.xlu0 %840 }
 0x148   : > { %951 = vst [vmem:[#allocation2 + $0x88] sm:$0xf] %v943_v50  ;;  %952 = vst [vmem:[#allocation2 + $0x90] sm:$0xf] %v944_v35  ;;  %v847_v61 = vsel %vm390_vm5, %v841_v14, %v2619_v15  ;;  %1513 = vrot.lane.b32.xlu1 %v2200_v51, %s2057_s24  ;;  %v1624_v60 = vld [vmem:[#allocation2 + $0x38] sm:$0xff]  ;;  %1720 = vmatprep.mubr.bf16.mxu0 %v2000_v56 }
 0x149   : > { %855 = vst [vmem:[#allocation2 + $0x78] sm:$0xf0] %v847_v61  ;;  %1583 = vrot.lane.b32.xlu0 %v2200_v51, %s2058_s25  ;;  %1761 = vmatprep.mubr.bf16.mxu1 %v2000_v56 }
 0x14a   : > { %v418_v53 = vpop.permute.xlu1 %417 }
 0x14b   : > { %v425_v46 = vsel %vm423_vm9, %v2606_v55, %v418_v53  ;;  %v426_v49 = vsel %vm423_vm9, %v418_v53, %v420_v23  ;;  %v2695_v3 = vpop.permute.xlu0 %985 }
 0x14c   : > { %433 = vst [vmem:[#allocation2 + $0x8] sm:$0xf0] %v425_v46  ;;  %434 = vst [vmem:[#allocation2 + $0x10] sm:$0xf0] %v426_v49  ;;  %1546 = vrot.lane.b32.xlu1 %v2194_v47, %s2059_s30 }
 0x14e   : > { %v574_v15 = vpop.permute.xlu1 %573 }
 0x14f   : > { %v581_v8 = vsel %vm579_vm7, %v2621_v13, %v574_v15  ;;  %v582_v59 = vsel %vm579_vm7, %v574_v15, %v576_v34  ;;  %v990_v51 = vpop.permute.xlu0 %989 }
 0x150   : > { %589 = vst [vmem:[#allocation2 + $0x28] sm:$0xf0] %v581_v8  ;;  %590 = vst [vmem:[#allocation2 + $0x30] sm:$0xf0] %v582_v59  ;;  %1550 = vrot.lane.b32.xlu1 %v2221_v63, %s2059_s30  ;;  %v1632_v16 = vld [vmem:[#allocation2 + $0x78] sm:$0xff]  ;;  %v1770_v8 = vld [vmem:[%s2868_s3] sm:$0xff] }
 0x151   : > { %1773 = vperm.xlu0 %2031, %v1770_v8  }
 0x152   : > { %v687_v55 = vpop.permute.xlu1 %686 }
 0x153   : > { %v693_v13 = vsel %vm546_vm6, %v2630_v2, %v687_v55  ;;  %v694_v30 = vsel %vm546_vm6, %v687_v55, %v689_v41  ;;  %v933_v45 = vpop.permute.xlu0 %932  ;;  %v1618_v58 = vld [vmem:[#allocation2 + $0x8] sm:$0xff]  ;;  %v1619_v36 = vld [vmem:[#allocation2 + $0x10] sm:$0xff]  ;;  %v1629_v41 = vld [vmem:[#allocation2 + $0x60] sm:$0xff] }
 0x154   : > { %701 = vst [vmem:[#allocation2 + $0x48] sm:$0xf0] %v693_v13  ;;  %702 = vst [vmem:[#allocation2 + $0x50] sm:$0xf0] %v694_v30  ;;  %v942_v9 = vsel %vm299_vm0, %v933_v45, %v2597_v33  ;;  %1581 = vrot.lane.b32.xlu1 %v2194_v47, %s2058_s25  ;;  %1688 = vmatprep.subr.bf16.mxu0 %v1618_v58  ;;  %v1621_v47 = vld [vmem:[#allocation2 + $0x20] sm:$0xff]  ;;  %v1628_v33 = vld [vmem:[#allocation2 + $0x58] sm:$0xff] }
 0x155   : > { %950 = vst [vmem:[#allocation2 + $0x80] sm:$0xf] %v942_v9  ;;  %1730 = vmatpush1.bf16.msra.mxu1 %v1619_v36  ;;  %1689 = vmatpush1.bf16.msra.mxu0 %v1617_v29 }
 0x156   : > { %1731 = vmatprep.subr.bf16.mxu1 %v1624_v60  ;;  %v839_v2 = vpop.permute.xlu1 %838 }
 0x157   : > { %v845_v31 = vsel %vm390_vm5, %v2646_v38, %v839_v2  ;;  %v846_v11 = vsel %vm390_vm5, %v839_v2, %v841_v14  ;;  %v1038_v40 = vpop.permute.xlu0 %1037  ;;  %v1622_v17 = vld [vmem:[#allocation2 + $0x28] sm:$0xff]  ;;  %v1623_v22 = vld [vmem:[#allocation2 + $0x30] sm:$0xff] }
 0x158   : > { %853 = vst [vmem:[#allocation2 + $0x68] sm:$0xf0] %v845_v31  ;;  %854 = vst [vmem:[#allocation2 + $0x70] sm:$0xf0] %v846_v11  ;;  %1585 = vrot.lane.b32.xlu1 %v2221_v63, %s2058_s25  ;;  %1690 = vmatprep.subr.bf16.mxu0 %v1622_v17  ;;  %v1625_v63 = vld [vmem:[#allocation2 + $0x40] sm:$0xff] }
 0x159   : > { %1732 = vmatpush1.bf16.msra.mxu1 %v1623_v22  ;;  %1691 = vmatpush1.bf16.msra.mxu0 %v1621_v47 }
 0x15a   : > { %1733 = vmatprep.subr.bf16.mxu1 %v1628_v33  ;;  %v988_v39 = vpop.permute.xlu1 %987 }
 0x15b   : > { %v995_v38 = vsel %vm993_vm14, %v2695_v3, %v988_v39  ;;  %v996_v23 = vsel %vm993_vm14, %v988_v39, %v990_v51  ;;  %v1042_v44 = vpop.permute.xlu0 %1041  ;;  %v1626_v6 = vld [vmem:[#allocation2 + $0x48] sm:$0xff]  ;;  %v1627_v20 = vld [vmem:[#allocation2 + $0x50] sm:$0xff] }
 0x15c   : > { %1003 = vst [vmem:[#allocation2 + $0x88] sm:$0xf0] %v995_v38  ;;  %1004 = vst [vmem:[#allocation2 + $0x90] sm:$0xf0] %v996_v23  ;;  %1692 = vmatprep.subr.bf16.mxu0 %v1626_v6 }
 0x15d   : > { %1734 = vmatpush1.bf16.msra.mxu1 %v1627_v20  ;;  %1693 = vmatpush1.bf16.msra.mxu0 %v1625_v63 }
 0x15e   : > { %1735 = vmatprep.subr.bf16.mxu1 %v1632_v16  ;;  %v992_v34 = vpop.permute.xlu1 %991 }
 0x15f   : > { %v997_v21 = vsel %vm993_vm14, %v990_v51, %v992_v34  ;;  %v1090_v28 = vpop.permute.xlu0 %1089  ;;  %v1630_v54 = vld [vmem:[#allocation2 + $0x68] sm:$0xff]  ;;  %v1631_v12 = vld [vmem:[#allocation2 + $0x70] sm:$0xff] }
 0x160   : > { %1005 = vst [vmem:[#allocation2 + $0x98] sm:$0xf0] %v997_v21  ;;  %1694 = vmatprep.subr.bf16.mxu0 %v1630_v54 }
 0x161   : > { %1736 = vmatpush1.bf16.msra.mxu1 %v1631_v12  ;;  %1695 = vmatpush1.bf16.msra.mxu0 %v1629_v41 }
 0x162   : > { %v984_v57 = vpop.permute.xlu1 %983 }
 0x163   : > { %v994_v50 = vsel %vm993_vm14, %v984_v57, %v2695_v3  ;;  %v1094_v35 = vpop.permute.xlu0 %1093  ;;  %v1634_v14 = vld [vmem:[#allocation2 + $0x88] sm:$0xff]  ;;  %v1780_v3 = vld [vmem:[%s2869_s4] sm:$0xff]  ;;  %v1635_v51 = vld [vmem:[#allocation2 + $0x90] sm:$0xff]  ;;  %vm1097_vm14 = vcmask 56320  }
 0x164   : > { %1002 = vst [vmem:[#allocation2 + $0x80] sm:$0xf0] %v994_v50  ;;  %1696 = vmatprep.subr.bf16.mxu0 %v1634_v14  ;;  %1783 = vperm.xlu1 %2032, %v1780_v3  }
 0x166   : > { %v1040_v61 = vpop.permute.xlu1 %1039 }
 0x167   : > { %v1047_v53 = vsel %vm1045_vm15, %v1038_v40, %v1040_v61  ;;  %v1048_v46 = vsel %vm1045_vm15, %v1040_v61, %v1042_v44  ;;  %v1036_v49 = vpop.permute.xlu0 %1035  ;;  %v1636_v15 = vld [vmem:[#allocation2 + $0x98] sm:$0xff] }
 0x168   : > { %1055 = vst [vmem:[#allocation2 + $0xa8] sm:$0xf] %v1047_v53  ;;  %1056 = vst [vmem:[#allocation2 + $0xb0] sm:$0xf] %v1048_v46  ;;  %v1046_v59 = vsel %vm1045_vm15, %v1036_v49, %v1038_v40  ;;  %1737 = vmatprep.subr.bf16.mxu1 %v1636_v15 }
 0x169   : > { %1054 = vst [vmem:[#allocation2 + $0xa0] sm:$0xf] %v1046_v59  ;;  %1738 = vmatpush1.bf16.msra.mxu1 %v1635_v51 }
 0x16a   : > { %v1044_v55 = vpop.permute.xlu1 %1043 }
 0x16b   : > { %v1049_v13 = vsel %vm1045_vm15, %v1042_v44, %v1044_v55  ;;  %v1171_v30 = vpop.permute.xlu0 %1170  ;;  %v1633_v45 = vld [vmem:[#allocation2 + $0x80] sm:$0xff]  ;;  %vm1149_vm15 = vcmask 7168  }
 0x16c   : > { %1057 = vst [vmem:[#allocation2 + $0xb8] sm:$0xf] %v1049_v13  ;;  %1697 = vmatpush1.bf16.msra.mxu0 %v1633_v45  ;;  %v1176_v47 = vrot.slane %v1171_v30, 4 }
 0x16e   : > { %v1092_v58 = vpop.permute.xlu1 %1091 }
 0x16f   : > { %v1099_v36 = vsel %vm1097_vm14, %v1090_v28, %v1092_v58  ;;  %v1100_v9 = vsel %vm1097_vm14, %v1092_v58, %v1094_v35  ;;  %v1175_v29 = vpop.permute.xlu0 %1174 }
 0x170   : > { %1107 = vst [vmem:[#allocation2 + $0xa8] sm:$0xf0] %v1099_v36  ;;  %1108 = vst [vmem:[#allocation2 + $0xb0] sm:$0xf0] %v1100_v9  ;;  %v1178_v33 = vrot.slane %v1175_v29, 4 }
 0x172   : > { %v1096_v60 = vpop.permute.xlu1 %1095 }
 0x173   : > { %v1101_v2 = vsel %vm1097_vm14, %v1094_v35, %v1096_v60  ;;  %v1210_v31 = vpop.permute.xlu0 %1209 }
 0x174   : > { %1109 = vst [vmem:[#allocation2 + $0xb8] sm:$0xf0] %v1101_v2  ;;  %v1214_v16 = vrot.slane %v1210_v31, 4 }
 0x176   : > { %v1088_v11 = vpop.permute.xlu1 %1087 }
 0x177   : > { %v1098_v40 = vsel %vm1097_vm14, %v1088_v11, %v1090_v28  ;;  %v1142_v17 = vpop.permute.xlu0 %1141  ;;  %v1638_v22 = vld [vmem:[#allocation2 + $0xa8] sm:$0xff]  ;;  %v1639_v6 = vld [vmem:[#allocation2 + $0xb0] sm:$0xff] }
 0x178   : > { %1106 = vst [vmem:[#allocation2 + $0xa0] sm:$0xf0] %v1098_v40  ;;  %1698 = vmatprep.subr.bf16.mxu0 %v1638_v22 }
 0x17a   : > { %v1173_v39 = vpop.permute.xlu1 %1172 }
 0x17b   : > { %v1177_v38 = vrot.slane %v1173_v39, 4  ;;  %v1146_v23 = vpop.permute.xlu0 %1145  ;;  %v1640_v44 = vld [vmem:[#allocation2 + $0xb8] sm:$0xff] }
 0x17c   : > { %1739 = vmatprep.subr.bf16.mxu1 %v1640_v44 }
 0x17d   : > { %v1179_v20 = vsel %vm301_vm3, %v1176_v47, %v1177_v38  ;;  %v1181_v63 = vsel %vm301_vm3, %v1177_v38, %v1178_v33  ;;  %1740 = vmatpush1.bf16.msra.mxu1 %v1639_v6 }
 0x17e   : > { %v1180_v34 = vsel %vm1116_vm13, %v1179_v20, %v1173_v39  ;;  %v1182_v21 = vsel %vm1116_vm13, %v1181_v63, %v1175_v29  ;;  %v1208_v28 = vpop.permute.xlu1 %1207 }
 0x17f   : > { %v1187_v54 = vmul.bf16 %v2233_v5, %v1180_v34  ;;  %v1188_v12 = vmul.bf16 %v2231_v4, %v1182_v21  ;;  %v1213_v41 = vrot.slane %v1208_v28, 4  ;;  %v1140_v56 = vpop.permute.xlu0 %1139  ;;  %v1637_v57 = vld [vmem:[#allocation2 + $0xa0] sm:$0xff] }
 0x180   : > { %v1150_v50 = vsel %vm1149_vm15, %v1140_v56, %v1142_v17  ;;  %1699 = vmatpush1.bf16.msra.mxu0 %v1637_v57 }
 0x181   : > { %v1950_v35 = vcombine.low %v1187_v54, %v1187_v54  ;;  %v1951_v14 = vcombine.high %v1187_v54, %v1187_v54  ;;  %v1952_v61 = vcombine.low %v1188_v12, %v1188_v12  ;;  %v1953_v53 = vcombine.high %v1188_v12, %v1188_v12  ;;  %1158 = vst [vmem:[#allocation2 + $0xc0] sm:$0xf] %v1150_v50 }
 0x182   : > { %v1216_v46 = vsel %vm301_vm3, %v1213_v41, %v1214_v16  ;;  %v1212_v49 = vpop.permute.xlu1 %1211 }
 0x183   : > { %1203 = vst [vmem:[#allocation2 + $0xe0] sm:$0xf] %v1950_v35  ;;  %1204 = vst [vmem:[#allocation2 + $0xe8] sm:$0xf] %v1951_v14  ;;  %v1217_v15 = vsel %vm1064_vm12, %v1216_v46, %v1210_v31  ;;  %v1215_v8 = vrot.slane %v1212_v49, 4  ;;  %v1247_v3 = vpop.permute.xlu0 %1246 }
 0x184   : > { %1205 = vst [vmem:[#allocation2 + $0xf0] sm:$0xf] %v1952_v61  ;;  %1206 = vst [vmem:[#allocation2 + $0xf8] sm:$0xf] %v1953_v53  ;;  %v1224_v59 = vmul.bf16 %v2239_v10, %v1217_v15  ;;  %v1251_v22 = vrot.slane %v1247_v3, 4 }
 0x185   : > { %v1218_v51 = vsel %vm301_vm3, %v1214_v16, %v1215_v8 }
 0x186   : > { %v1954_v55 = vcombine.low %v1224_v59, %v1224_v59  ;;  %v1955_v13 = vcombine.high %v1224_v59, %v1224_v59  ;;  %v1219_v30 = vsel %vm1064_vm12, %v1218_v51, %v1212_v49  ;;  %v1144_v45 = vpop.permute.xlu1 %1143 }
 0x187   : > { %v1225_v58 = vmul.bf16 %v2235_v7, %v1219_v30  ;;  %v1151_v36 = vsel %vm1149_vm15, %v1142_v17, %v1144_v45  ;;  %v1152_v9 = vsel %vm1149_vm15, %v1144_v45, %v1146_v23  ;;  %v1282_v29 = vpop.permute.xlu0 %1281 }
 0x188   : > { %1240 = vst [vmem:[#allocation2 + $0xe0] sm:$0xf0] %v1954_v55  ;;  %1241 = vst [vmem:[#allocation2 + $0xe8] sm:$0xf0] %v1955_v13  ;;  %v1641_v38 = vld [vmem:[#allocation2 + $0xc0] sm:$0xff]  ;;  %v1287_v28 = vrot.slane %v1282_v29, 4 }
 0x189   : > { %1159 = vst [vmem:[#allocation2 + $0xc8] sm:$0xf] %v1151_v36  ;;  %1160 = vst [vmem:[#allocation2 + $0xd0] sm:$0xf] %v1152_v9  ;;  %v1956_v60 = vcombine.low %v1225_v58, %v1225_v58  ;;  %v1957_v2 = vcombine.high %v1225_v58, %v1225_v58 }
 0x18a   : > { %v1148_v31 = vpop.permute.xlu1 %1147 }
 0x18b   : > { %1242 = vst [vmem:[#allocation2 + $0xf0] sm:$0xf0] %v1956_v60  ;;  %1243 = vst [vmem:[#allocation2 + $0xf8] sm:$0xf0] %v1957_v2  ;;  %v1153_v11 = vsel %vm1149_vm15, %v1146_v23, %v1148_v31  ;;  %v1286_v40 = vpop.permute.xlu0 %1285 }
 0x18c   : > { %1161 = vst [vmem:[#allocation2 + $0xd8] sm:$0xf] %v1153_v11  ;;  %v1289_v41 = vrot.slane %v1286_v40, 4 }
 0x18e   : > { %v1245_v47 = vpop.permute.xlu1 %1244 }
 0x18f   : > { %v1250_v33 = vrot.slane %v1245_v47, 4  ;;  %v2761_v17 = vpop.permute.xlu0 %1320  ;;  %v1646_v6 = vld [vmem:[#allocation2 + $0xe8] sm:$0xff]  ;;  %v1645_v54 = vld [vmem:[#allocation2 + $0xe0] sm:$0xff] }
 0x190   : > { %v1642_v39 = vld [vmem:[#allocation2 + $0xc8] sm:$0xff]  ;;  %v1643_v12 = vld [vmem:[#allocation2 + $0xd0] sm:$0xff]  ;;  %v1325_v55 = vrot.slane %v2761_v17, 4 }
 0x191   : > { %1700 = vmatprep.subr.bf16.mxu0 %v1642_v39  ;;  %v1253_v44 = vsel %vm301_vm3, %v1250_v33, %v1251_v22 }
 0x192   : > { %1701 = vmatpush1.bf16.msra.mxu0 %v1641_v38  ;;  %v1254_v20 = vsel %vm1012_vm11, %v1253_v44, %v1247_v3  ;;  %v1249_v63 = vpop.permute.xlu1 %1248  ;;  %v1648_v35 = vld [vmem:[#allocation2 + $0xf8] sm:$0xff]  ;;  %v1647_v15 = vld [vmem:[#allocation2 + $0xf0] sm:$0xff] }
 0x193   : > { %1702 = vmatprep.subr.bf16.mxu0 %v1646_v6  ;;  %v1261_v23 = vmul.bf16 %v2249_v19, %v1254_v20  ;;  %v1252_v16 = vrot.slane %v1249_v63, 4  ;;  %v2766_v34 = vpop.permute.xlu0 %1355  ;;  %v1644_v21 = vld [vmem:[#allocation2 + $0xd8] sm:$0xff] }
 0x194   : > { %1741 = vmatprep.subr.bf16.mxu1 %v1644_v21  ;;  %v1361_v44 = vrot.slane %v2766_v34, 4 }
 0x195   : > { %v1958_v56 = vcombine.low %v1261_v23, %v1261_v23  ;;  %v1959_v57 = vcombine.high %v1261_v23, %v1261_v23  ;;  %v1255_v50 = vsel %vm301_vm3, %v1251_v22, %v1252_v16  ;;  %1742 = vmatpush1.bf16.msra.mxu1 %v1643_v12 }
 0x196   : > { %1703 = vmatpush1.bf16.msra.mxu0 %v1645_v54  ;;  %v1256_v14 = vsel %vm1012_vm11, %v1255_v50, %v1249_v63  ;;  %v1284_v61 = vpop.permute.xlu1 %1283  ;;  %1743 = vmatprep.subr.bf16.mxu1 %v1648_v35 }
 0x197   : > { %1277 = vst [vmem:[#allocation2 + $0x100] sm:$0xf] %v1958_v56  ;;  %1278 = vst [vmem:[#allocation2 + $0x108] sm:$0xf] %v1959_v57  ;;  %v1262_v53 = vmul.bf16 %v2247_v18, %v1256_v14  ;;  %v1288_v46 = vrot.slane %v1284_v61, 4  ;;  %v1360_v49 = vpop.permute.xlu0 %1359 }
 0x198   : > { %v1363_v6 = vrot.slane %v1360_v49, 4 }
 0x199   : > { %v1960_v8 = vcombine.low %v1262_v53, %v1262_v53  ;;  %v1961_v3 = vcombine.high %v1262_v53, %v1262_v53  ;;  %v1290_v59 = vsel %vm301_vm3, %v1287_v28, %v1288_v46  ;;  %v1292_v51 = vsel %vm301_vm3, %v1288_v46, %v1289_v41  ;;  %1744 = vmatpush1.bf16.msra.mxu1 %v1647_v15 }
 0x19a   : > { %v1291_v13 = vsel %vm960_vm10, %v1290_v59, %v1284_v61  ;;  %v1293_v30 = vsel %vm960_vm10, %v1292_v51, %v1286_v40  ;;  %v1319_v45 = vpop.permute.xlu1 %1318 }
 0x19b   : > { %1279 = vst [vmem:[#allocation2 + $0x110] sm:$0xf] %v1960_v8  ;;  %1280 = vst [vmem:[#allocation2 + $0x118] sm:$0xf] %v1961_v3  ;;  %v1298_v58 = vmul.bf16 %v2265_v25, %v1291_v13  ;;  %v1299_v36 = vmul.bf16 %v2263_v24, %v1293_v30  ;;  %v1324_v9 = vrot.slane %v1319_v45, 4  ;;  %v2778_v29 = vpop.permute.xlu0 %1394 }
 0x19c   : > { %v1399_v56 = vrot.slane %v2778_v29, 4 }
 0x19d   : > { %v1962_v60 = vcombine.low %v1298_v58, %v1298_v58  ;;  %v1963_v2 = vcombine.high %v1298_v58, %v1298_v58  ;;  %v1964_v31 = vcombine.low %v1299_v36, %v1299_v36  ;;  %v1965_v11 = vcombine.high %v1299_v36, %v1299_v36 }
 0x19e   : > { %v1327_v22 = vsel %vm301_vm3, %v1324_v9, %v1325_v55  ;;  %v1323_v47 = vpop.permute.xlu1 %1322 }
 0x19f   : > { %1314 = vst [vmem:[#allocation2 + $0x100] sm:$0xf0] %v1962_v60  ;;  %1315 = vst [vmem:[#allocation2 + $0x108] sm:$0xf0] %v1963_v2  ;;  %v1328_v40 = vsel %vm333_vm4, %v1327_v22, %v2761_v17  ;;  %v1326_v33 = vrot.slane %v1323_v47, 4  ;;  %v2783_v39 = vpop.permute.xlu0 %1429 }
 0x1a0   : > { %1316 = vst [vmem:[#allocation2 + $0x110] sm:$0xf0] %v1964_v31  ;;  %1317 = vst [vmem:[#allocation2 + $0x118] sm:$0xf0] %v1965_v11  ;;  %v1335_v38 = vmul.bf16 %v2147_v27, %v1328_v40  ;;  %v1435_v36 = vrot.slane %v2783_v39, 4 }
 0x1a1   : > { %v1329_v20 = vsel %vm301_vm3, %v1325_v55, %v1326_v33 }
 0x1a2   : > { %v1966_v63 = vcombine.low %v1335_v38, %v1335_v38  ;;  %v1967_v23 = vcombine.high %v1335_v38, %v1335_v38  ;;  %v1330_v16 = vsel %vm333_vm4, %v1329_v20, %v1323_v47  ;;  %v1358_v21 = vpop.permute.xlu1 %1357 }
 0x1a3   : > { %v1336_v28 = vmul.bf16 %v2161_v32, %v1330_v16  ;;  %v1362_v54 = vrot.slane %v1358_v21, 4  ;;  %v1434_v12 = vpop.permute.xlu0 %1433 }
 0x1a4   : > { %1351 = vst [vmem:[#allocation2 + $0x120] sm:$0xf] %v1966_v63  ;;  %1352 = vst [vmem:[#allocation2 + $0x128] sm:$0xf] %v1967_v23  ;;  %v1437_v9 = vrot.slane %v1434_v12, 4 }
 0x1a5   : > { %v1968_v17 = vcombine.low %v1336_v28, %v1336_v28  ;;  %v1969_v41 = vcombine.high %v1336_v28, %v1336_v28  ;;  %v1364_v27 = vsel %vm301_vm3, %v1361_v44, %v1362_v54  ;;  %v1366_v34 = vsel %vm301_vm3, %v1362_v54, %v1363_v6 }
 0x1a6   : > { %v1365_v57 = vsel %vm423_vm9, %v1364_v27, %v1358_v21  ;;  %v1367_v50 = vsel %vm423_vm9, %v1366_v34, %v1360_v49  ;;  %v1393_v35 = vpop.permute.xlu1 %1392  ;;  %v1650_v14 = vld [vmem:[#allocation2 + $0x108] sm:$0xff]  ;;  %v1649_v32 = vld [vmem:[#allocation2 + $0x100] sm:$0xff] }
 0x1a7   : > { %v1652_v61 = vld [vmem:[#allocation2 + $0x118] sm:$0xff]  ;;  %1353 = vst [vmem:[#allocation2 + $0x130] sm:$0xf] %v1968_v17  ;;  %1354 = vst [vmem:[#allocation2 + $0x138] sm:$0xf] %v1969_v41  ;;  %v1372_v53 = vmul.bf16 %v2174_v37, %v1365_v57  ;;  %v1373_v46 = vmul.bf16 %v2186_v42, %v1367_v50  ;;  %v1398_v15 = vrot.slane %v1393_v35, 4  ;;  %1704 = vmatprep.subr.bf16.mxu0 %v1650_v14  ;;  %v2797_v8 = vpop.permute.xlu0 %1478 }
 0x1a8   : > { %1745 = vmatprep.subr.bf16.mxu1 %v1652_v61  ;;  %v1651_v3 = vld [vmem:[#allocation2 + $0x110] sm:$0xff]  ;;  %1705 = vmatpush1.bf16.msra.mxu0 %v1649_v32  ;;  %v1483_v44 = vrot.slane %v2797_v8, 4 }
 0x1a9   : > { %1746 = vmatpush1.bf16.msra.mxu1 %v1651_v3  ;;  %v1970_v59 = vcombine.low %v1372_v53, %v1372_v53  ;;  %v1971_v49 = vcombine.high %v1372_v53, %v1372_v53  ;;  %v1972_v51 = vcombine.low %v1373_v46, %v1373_v46  ;;  %v1973_v55 = vcombine.high %v1373_v46, %v1373_v46 }
 0x1aa   : > { %v1401_v13 = vsel %vm301_vm3, %v1398_v15, %v1399_v56  ;;  %v1397_v30 = vpop.permute.xlu1 %1396 }
 0x1ab   : > { %1388 = vst [vmem:[#allocation2 + $0x120] sm:$0xf0] %v1970_v59  ;;  %1389 = vst [vmem:[#allocation2 + $0x128] sm:$0xf0] %v1971_v49  ;;  %v1402_v37 = vsel %vm501_vm2, %v1401_v13, %v2778_v29  ;;  %v1400_v42 = vrot.slane %v1397_v30, 4  ;;  %v2802_v45 = vpop.permute.xlu0 %1511 }
 0x1ac   : > { %1390 = vst [vmem:[#allocation2 + $0x130] sm:$0xf0] %v1972_v51  ;;  %1391 = vst [vmem:[#allocation2 + $0x138] sm:$0xf0] %v1973_v55  ;;  %v1409_v58 = vmul.bf16 %v2188_v43, %v1402_v37  ;;  %v1517_v32 = vrot.slane %v2802_v45, 4 }
 0x1ad   : > { %v1403_v60 = vsel %vm301_vm3, %v1399_v56, %v1400_v42 }
 0x1ae   : > { %v1974_v2 = vcombine.low %v1409_v58, %v1409_v58  ;;  %v1975_v31 = vcombine.high %v1409_v58, %v1409_v58  ;;  %v1404_v11 = vsel %vm501_vm2, %v1403_v60, %v1397_v30  ;;  %v1432_v22 = vpop.permute.xlu1 %1431 }
 0x1af   : > { %v1410_v47 = vmul.bf16 %v2145_v26, %v1404_v11  ;;  %v1436_v40 = vrot.slane %v1432_v22, 4  ;;  %v1516_v33 = vpop.permute.xlu0 %1515 }
 0x1b0   : > { %1425 = vst [vmem:[#allocation2 + $0x140] sm:$0xf] %v1974_v2  ;;  %1426 = vst [vmem:[#allocation2 + $0x148] sm:$0xf] %v1975_v31  ;;  %v1519_v53 = vrot.slane %v1516_v33, 4 }
 0x1b1   : > { %v1976_v29 = vcombine.low %v1410_v47, %v1410_v47  ;;  %v1977_v38 = vcombine.high %v1410_v47, %v1410_v47  ;;  %v1438_v43 = vsel %vm301_vm3, %v1435_v36, %v1436_v40  ;;  %v1440_v39 = vsel %vm301_vm3, %v1436_v40, %v1437_v9 }
 0x1b2   : > { %v1439_v6 = vsel %vm579_vm7, %v1438_v43, %v1432_v22  ;;  %v1441_v20 = vsel %vm579_vm7, %v1440_v39, %v1434_v12  ;;  %v1477_v63 = vpop.permute.xlu1 %1476  ;;  %v1654_v23 = vld [vmem:[#allocation2 + $0x128] sm:$0xff]  ;;  %v1653_v26 = vld [vmem:[#allocation2 + $0x120] sm:$0xff] }
 0x1b3   : > { %v1656_v16 = vld [vmem:[#allocation2 + $0x138] sm:$0xff]  ;;  %1427 = vst [vmem:[#allocation2 + $0x150] sm:$0xf] %v1976_v29  ;;  %1428 = vst [vmem:[#allocation2 + $0x158] sm:$0xf] %v1977_v38  ;;  %v1446_v21 = vmul.bf16 %v2206_v52, %v1439_v6  ;;  %v1447_v28 = vmul.bf16 %v2196_v48, %v1441_v20  ;;  %v1482_v54 = vrot.slane %v1477_v63, 4  ;;  %1706 = vmatprep.subr.bf16.mxu0 %v1654_v23  ;;  %v2816_v17 = vpop.permute.xlu0 %1548 }
 0x1b4   : > { %1747 = vmatprep.subr.bf16.mxu1 %v1656_v16  ;;  %v1655_v41 = vld [vmem:[#allocation2 + $0x130] sm:$0xff]  ;;  %1707 = vmatpush1.bf16.msra.mxu0 %v1653_v26  ;;  %v1553_v30 = vrot.slane %v2816_v17, 4 }
 0x1b5   : > { %1748 = vmatpush1.bf16.msra.mxu1 %v1655_v41  ;;  %v1978_v27 = vcombine.low %v1446_v21, %v1446_v21  ;;  %v1979_v12 = vcombine.high %v1446_v21, %v1446_v21  ;;  %v1980_v34 = vcombine.low %v1447_v28, %v1447_v28  ;;  %v1981_v56 = vcombine.high %v1447_v28, %v1447_v28 }
 0x1b6   : > { %v1485_v57 = vsel %vm301_vm3, %v1482_v54, %v1483_v44  ;;  %v1481_v50 = vpop.permute.xlu1 %1480 }
 0x1b7   : > { %1462 = vst [vmem:[#allocation2 + $0x140] sm:$0xf0] %v1978_v27  ;;  %1463 = vst [vmem:[#allocation2 + $0x148] sm:$0xf0] %v1979_v12  ;;  %v1486_v48 = vsel %vm546_vm6, %v1485_v57, %v2797_v8  ;;  %v1484_v52 = vrot.slane %v1481_v50, 4  ;;  %v1469_v35 = vpop.permute.xlu0 %1468 }
 0x1b8   : > { %1464 = vst [vmem:[#allocation2 + $0x150] sm:$0xf0] %v1980_v34  ;;  %1465 = vst [vmem:[#allocation2 + $0x158] sm:$0xf0] %v1981_v56  ;;  %v1491_v14 = vmul.bf16 %v2233_v5, %v1486_v48  ;;  %v1470_v61 = vsel %vm615_vm8, %v2445_v1, %v1469_v35 }
 0x1b9   : > { %v1487_v46 = vsel %vm301_vm3, %v1483_v44, %v1484_v52  ;;  %1475 = vst [vmem:[#allocation2 + $0x178] sm:$0xf] %v1470_v61 }
 0x1ba   : > { %v1983_v15 = vcombine.low %v1491_v14, %v1491_v14  ;;  %v1984_v3 = vcombine.high %v1491_v14, %v1491_v14  ;;  %v1488_v59 = vsel %vm546_vm6, %v1487_v46, %v1481_v50  ;;  %v1514_v49 = vpop.permute.xlu1 %1513 }
 0x1bb   : > { %v1492_v8 = vmul.bf16 %v2231_v4, %v1488_v59  ;;  %v1518_v51 = vrot.slane %v1514_v49, 4  ;;  %v1584_v38 = vpop.permute.xlu0 %1583 }
 0x1bc   : > { %1507 = vst [vmem:[#allocation2 + $0x160] sm:$0xf0] %v1983_v15  ;;  %1508 = vst [vmem:[#allocation2 + $0x168] sm:$0xf0] %v1984_v3  ;;  %v1588_v20 = vrot.slane %v1584_v38, 4 }
 0x1bd   : > { %v1985_v5 = vcombine.low %v1492_v8, %v1492_v8  ;;  %v1986_v55 = vcombine.high %v1492_v8, %v1492_v8  ;;  %v1520_v1 = vsel %vm301_vm3, %v1517_v32, %v1518_v51  ;;  %v1522_v13 = vsel %vm301_vm3, %v1518_v51, %v1519_v53 }
 0x1be   : > { %v1521_v37 = vsel %vm468_vm1, %v1520_v1, %v1514_v49  ;;  %v1523_v42 = vsel %vm468_vm1, %v1522_v13, %v1516_v33  ;;  %v1547_v45 = vpop.permute.xlu1 %1546  ;;  %v1658_v58 = vld [vmem:[#allocation2 + $0x148] sm:$0xff]  ;;  %v1657_v9 = vld [vmem:[#allocation2 + $0x140] sm:$0xff]  ;;  %v1999_v49 = vcombine.low %v2729_v0, %v2729_v0 }
 0x1bf   : > { %v1660_v36 = vld [vmem:[#allocation2 + $0x158] sm:$0xff]  ;;  %1509 = vst [vmem:[#allocation2 + $0x170] sm:$0xf0] %v1985_v5  ;;  %1510 = vst [vmem:[#allocation2 + $0x178] sm:$0xf0] %v1986_v55  ;;  %v1526_v4 = vmul.bf16 %v2239_v10, %v1521_v37  ;;  %v1527_v60 = vmul.bf16 %v2235_v7, %v1523_v42  ;;  %v1552_v2 = vrot.slane %v1547_v45, 4  ;;  %1708 = vmatprep.subr.bf16.mxu0 %v1658_v58 }
 0x1c0   : > { %1749 = vmatprep.subr.bf16.mxu1 %v1660_v36  ;;  %v1659_v31 = vld [vmem:[#allocation2 + $0x150] sm:$0xff]  ;;  %1709 = vmatpush1.bf16.msra.mxu0 %v1657_v9 }
 0x1c1   : > { %1750 = vmatpush1.bf16.msra.mxu1 %v1659_v31  ;;  %v1987_v11 = vcombine.low %v1526_v4, %v1526_v4  ;;  %v1988_v22 = vcombine.high %v1526_v4, %v1526_v4  ;;  %v1989_v47 = vcombine.low %v1527_v60, %v1527_v60  ;;  %v1990_v40 = vcombine.high %v1527_v60, %v1527_v60 }
 0x1c2   : > { %v1555_v33 = vsel %vm301_vm3, %v1552_v2, %v1553_v30  ;;  %v1551_v29 = vpop.permute.xlu1 %1550 }
 0x1c3   : > { %1542 = vst [vmem:[#allocation2 + $0x180] sm:$0xf] %v1987_v11  ;;  %1543 = vst [vmem:[#allocation2 + $0x188] sm:$0xf] %v1988_v22  ;;  %v1556_v7 = vsel %vm390_vm5, %v1555_v33, %v2816_v17  ;;  %v1554_v10 = vrot.slane %v1551_v29, 4  ;;  %v1662_v43 = vld [vmem:[#allocation2 + $0x168] sm:$0xff] }
 0x1c4   : > { %1544 = vst [vmem:[#allocation2 + $0x190] sm:$0xf] %v1989_v47  ;;  %1545 = vst [vmem:[#allocation2 + $0x198] sm:$0xf] %v1990_v40  ;;  %v1661_v39 = vld [vmem:[#allocation2 + $0x160] sm:$0xff]  ;;  %v1561_v44 = vmul.bf16 %v2249_v19, %v1556_v7  ;;  %1710 = vmatprep.subr.bf16.mxu0 %v1662_v43 }
 0x1c5   : > { %v1557_v6 = vsel %vm301_vm3, %v1553_v30, %v1554_v10  ;;  %1711 = vmatpush1.bf16.msra.mxu0 %v1661_v39 }
 0x1c6   : > { %v1991_v63 = vcombine.low %v1561_v44, %v1561_v44  ;;  %v1992_v23 = vcombine.high %v1561_v44, %v1561_v44  ;;  %v1558_v16 = vsel %vm390_vm5, %v1557_v6, %v1551_v29  ;;  %v1582_v26 = vpop.permute.xlu1 %1581  ;;  %v1664_v21 = vld [vmem:[#allocation2 + $0x178] sm:$0xff]  ;;  %v1663_v28 = vld [vmem:[#allocation2 + $0x170] sm:$0xff] }
 0x1c7   : > { %v1562_v54 = vmul.bf16 %v2247_v18, %v1558_v16  ;;  %v1587_v17 = vrot.slane %v1582_v26, 4  ;;  %1751 = vmatprep.subr.bf16.mxu1 %v1664_v21 }
 0x1c8   : > { %1577 = vst [vmem:[#allocation2 + $0x180] sm:$0xf0] %v1991_v63  ;;  %1578 = vst [vmem:[#allocation2 + $0x188] sm:$0xf0] %v1992_v23  ;;  %1752 = vmatpush1.bf16.msra.mxu1 %v1663_v28 }
 0x1c9   : > { %v1993_v19 = vcombine.low %v1562_v54, %v1562_v54  ;;  %v1994_v41 = vcombine.high %v1562_v54, %v1562_v54  ;;  %v1590_v27 = vsel %vm301_vm3, %v1587_v17, %v1588_v20 }
 0x1ca   : > { %v1591_v12 = vsel %vm299_vm0, %v1590_v27, %v1584_v38  ;;  %v1586_v34 = vpop.permute.xlu1 %1585 }
 0x1cb   : > { %1579 = vst [vmem:[#allocation2 + $0x190] sm:$0xf0] %v1993_v19  ;;  %1580 = vst [vmem:[#allocation2 + $0x198] sm:$0xf0] %v1994_v41  ;;  %v1596_v56 = vmul.bf16 %v2265_v25, %v1591_v12  ;;  %v1589_v57 = vrot.slane %v1586_v34, 4 }
 0x1cd   : > { %v1995_v50 = vcombine.low %v1596_v56, %v1596_v56  ;;  %v1996_v48 = vcombine.high %v1596_v56, %v1596_v56  ;;  %v1592_v18 = vsel %vm301_vm3, %v1588_v20, %v1589_v57 }
 0x1ce   : > { %v1593_v52 = vsel %vm299_vm0, %v1592_v18, %v1586_v34 }
 0x1cf   : > { %1612 = vst [vmem:[#allocation2 + $0x1a0] sm:$0xf] %v1995_v50  ;;  %1613 = vst [vmem:[#allocation2 + $0x1a8] sm:$0xf] %v1996_v48  ;;  %v1597_v35 = vmul.bf16 %v2263_v24, %v1593_v52  ;;  %v1666_v14 = vld [vmem:[#allocation2 + $0x188] sm:$0xff]  ;;  %v1665_v61 = vld [vmem:[#allocation2 + $0x180] sm:$0xff] }
 0x1d0   : > { %1712 = vmatprep.subr.bf16.mxu0 %v1666_v14  ;;  %v1774_v8 = vpop.permute.xlu0 %1773 }
 0x1d1   : > { %v1997_v32 = vcombine.low %v1597_v35, %v1597_v35  ;;  %v1998_v53 = vcombine.high %v1597_v35, %v1597_v35  ;;  %1713 = vmatpush1.bf16.msra.mxu0 %v1665_v61 }
 0x1d2   : > { %v1668_v46 = vld [vmem:[#allocation2 + $0x198] sm:$0xff]  ;;  %v1667_v15 = vld [vmem:[#allocation2 + $0x190] sm:$0xff] }
 0x1d3   : > { %1614 = vst [vmem:[#allocation2 + $0x1b0] sm:$0xf] %v1997_v32  ;;  %1615 = vst [vmem:[#allocation2 + $0x1b8] sm:$0xf] %v1998_v53  ;;  %1753 = vmatprep.subr.bf16.mxu1 %v1668_v46 }
 0x1d4   : > { %1754 = vmatpush1.bf16.msra.mxu1 %v1667_v15 }
 0x1d6   : > { %v1670_v25 = vld [vmem:[#allocation2 + $0x1a8] sm:$0xff]  ;;  %v1669_v3 = vld [vmem:[#allocation2 + $0x1a0] sm:$0xff] }
 0x1d7   : > { %1714 = vmatprep.subr.bf16.mxu0 %v1670_v25 }
 0x1d8   : > { %1715 = vmatpush1.bf16.msra.mxu0 %v1669_v3 }
 0x1d9   : > { %1716 = vmatprep.subr.bf16.mxu0 %v2074_v62 }
 0x1da   : > { %v1672_v59 = vld [vmem:[#allocation2 + $0x1b8] sm:$0xff]  ;;  %v1671_v24 = vld [vmem:[#allocation2 + $0x1b0] sm:$0xff] }
 0x1db   : > { %1755 = vmatprep.subr.bf16.mxu1 %v1672_v59 }
 0x1dc   : > { %1756 = vmatpush1.bf16.msra.mxu1 %v1671_v24  ;;  %1717 = vmatpush1.bf16.msra.mxu0 %v2074_v62 }
 0x1dd   : > { %1757 = vmatprep.subr.bf16.mxu1 %v2074_v62  ;;  %1718 = vmatprep.subr.bf16.mxu0 %v2074_v62 }
 0x1e0   : > { %1758 = vmatpush1.bf16.msra.mxu1 %v2074_v62  ;;  %1719 = vmatpush1.bf16.msra.mxu0 %v2074_v62 }
 0x1e1   : > { %1759 = vmatprep.subr.bf16.mxu1 %v2074_v62 }
 0x1e3   : > { %1721 = vmatmul.mubr.bf16.vlgmr.msra.gmra.mrb[0].mxu0 %v1999_v49  ;;  %v1784_v5 = vpop.permute.xlu1 %1783 }
 0x1e4   : > { %1760 = vmatpush1.bf16.msra.mxu1 %v2074_v62 }
 0x1e7   : > { %1762 = vmatmul.mubr.bf16.vlgmr.msra.gmra.mrb[0].mxu1 %v1999_v49 }
 0x2b6   : > { %v1722_v51 = vpop.f32.mrb[0].mxu0 }
 0x2b7   : > { %v1724_v55 = vpop.f32.mrb[1].mxu0  ;;  %v1776_v1 = vmul.f32 %v1774_v8, %v1722_v51 }
 0x2b8   : > { %v1726_v13 = vpop.f32.mrb[2].mxu0  ;;  %v1777_v30 = vmul.f32 %v1774_v8, %v1724_v55 }
 0x2b9   : > { %v1727_v37 = vpop.f32.mrb[3].mxu0  ;;  %v1786_v0 = vadd.f32 %v1784_v5, %v1776_v1 }
 0x2ba   : > { %v1763_v42 = vpop.f32.mrb[0].mxu1  ;;  %v1787_v45 = vadd.f32 %v1784_v5, %v1777_v30 }
 0x2bb   : > { %v1778_v58 = vmul.f32 %v1774_v8, %v1763_v42  ;;  %v1765_v36 = vpop.f32.mrb[1].mxu1  ;;  %v1790_v62 = vmax.f32 %v1786_v0, 0.0 }
 0x2bc   : > { %v1779_v9 = vmul.f32 %v1774_v8, %v1765_v36  ;;  %v1791_v4 = vmax.f32 %v1787_v45, 0.0  ;;  %v1767_v60 = vpop.f32.mrb[2].mxu1 }
 0x2bd   : > { %v1788_v2 = vadd.f32 %v1784_v5, %v1778_v58  ;;  %1794 = vst [vmem:[%s224_s10] sm:$0xff] %v1790_v62  ;;  %v1768_v31 = vpop.f32.mrb[3].mxu1 }
 0x2be   : > { %v1789_v11 = vadd.f32 %v1784_v5, %v1779_v9  ;;  %1795 = vst [vmem:[%s224_s10 + $0x8] sm:$0xff] %v1791_v4 }
 0x2bf   : > { %v1792_v22 = vmax.f32 %v1788_v2, 0.0 }
 0x2c0   : > { %v1793_v47 = vmax.f32 %v1789_v11, 0.0 }
 0x2c1   : > { %1796 = vst [vmem:[%s224_s10 + $0x10] sm:$0xff] %v1792_v22 }
 0x2c2   : > { %1797 = vst [vmem:[%s224_s10 + $0x18] sm:$0xff] %v1793_v47 }
 0x2c3 PF: > { %s15_s18 = sadd.s32 1, %s2055_s18  }
 0x2c4   : > { %p12_p4 = scmp.ge.s32.totalorder %s15_s18, 4  }
 0x2c6   :  { %14 = sbr.rel (!%p12_p4) target bundleno = 1 (0x1), region = 70 }

// kernel: network_forward.5
= control target key start
LH: loop header
LB: loop body
LE: loop exit
PB: predicated region body
PF: predicated region fallthrough
CT: control target
= control target key end

     0   :  { %12 = vsyncpa [#allocation4], 0  ;;  %s12788_s0 = inlined_call_operand.vmem [shape: bf16[2,4096], index: 0, kind: input, shape index: {}]   ;;  %s12789_s1 = inlined_call_operand.hbm [shape: bf16[4096,1024], index: 1, kind: input, shape index: {}]   ;;  %s12790_s2 = inlined_call_operand.hbm [shape: f32[1,1024], index: 2, kind: input, shape index: {}]   ;;  %s12791_s3 = inlined_call_operand.hbm [shape: bf16[1024,256], index: 3, kind: input, shape index: {}]   ;;  %s12792_s4 = inlined_call_operand.hbm [shape: f32[1,256], index: 4, kind: input, shape index: {}]   ;;  %s12793_s5 = inlined_call_operand.vmem [shape: bf16[256,10], index: 5, kind: input, shape index: {}]   ;;  %s12794_s6 = inlined_call_operand.hbm [shape: f32[1,10], index: 6, kind: input, shape index: {}]   ;;  %s12795_s7 = inlined_call_operand.hbm [shape: f32[2,10], index: 7, kind: output, shape index: {}]  }
   0x1   :  { %14 = vsyncpa [#allocation4 + $0x1], 0 }
   0x2   :  { %15 = vsyncpa [#allocation7], 0 }
   0x3   :  { %16 = vsyncpa [#allocation10], 0 }
   0x4   :  { %17 = vsyncpa [#allocation5], 0  ;;  %s11260_s24 = smov 0   ;;  %s11262_s25 = smov 0  }
   0x5   :  { %s11264_s26 = smov 0   ;;  %s11266_s27 = smov 0  }
   0x6 LB: > { %s11279_s28 = sadd.s32 4294967295, %s11205_s27   ;;  %p69_p0 = scmp.ne.s32.totalorder %s11197_s25, %s11193_s24  ;;  %s11205_s27 = sphi %s11266_s27, %s12814_s27   ;;  %s11201_s26 = sphi %s11264_s26, %s12813_s26   ;;  %s11197_s25 = sphi %s11262_s25, %s12812_s25   ;;  %s11193_s24 = sphi %s11260_s24, %s12811_s24  }
   0x7   : > { %p12796_p1 = scmp.eq.s32.totalorder %s11279_s28, 0  ;;  %p9347_p2 = scmp.ge.s32.totalorder %s11205_s27, 1 }
   0x8   : > { %p206_p3 = scmp.lt.s32.totalorder %s11205_s27, 3  ;;  %s11207_s8 = smov [#allocation6]  }
   0x9   : > { %p11288_p5 = por %p12796_p1, %p69_p0  ;;  %s219_s9 = sshll.u32 %s11207_s8, 4  ;;  %s220_s9 = int_to_ptr.vmem [resolvable:$true] %s219_s9 }
   0xa   : > { %p11292_p6 = pnand %p9347_p2, %p206_p3  ;;  %s11208_s10 = smov [#allocation9]  }
   0xb   : > { %s12799_s29 = scalar_select %p11288_p5, 1, 0 }
   0xc   : > { %s12800_s30 = scalar_select %p11292_p6, 1, 0 }
   0xd   : > { %p10709_p7 = pneg %p11292_p6  ;;  %s243_s11 = sshll.u32 %s11208_s10, 4  ;;  %s11304_s11 = int_to_ptr.vmem [resolvable:$true] %s243_s11 }
   0xe   : > { %s11209_s13 = smov [#allocation8]   ;;  %s10991_s17 = scalar_lea.hbm %s12790_s2, 128 }
   0xf   : > { %p11300_p8 = pnand %p10709_p7, %p12796_p1  ;;  %s229_s14 = sshll.u32 %s11209_s13, 4  ;;  %s11306_s14 = int_to_ptr.vmem [resolvable:$true] %s229_s14 }
  0x10   : > { %p10992_p9 = scmp.ne.s32.totalorder %s12790_s2, %s10991_s17  ;;  %p10998_p13 = scmp.lt.u32.totalorder %s10991_s17, %s12790_s2 }
  0x11   : > { %p11316_p10 = pneg %p11300_p8 }
  0x13   : > { %p10994_p11 = pnand %p11316_p10, %p10992_p9 }
  0x15   : > { %p10995_p12 = pneg %p10994_p11 }
  0x17   : > { %p11000_p0 = pnand %p10998_p13, %p10995_p12 }
  0x19   : > { %11003 = shalt.err (!%p11000_p0)
}
  0x1a   : > { %s11004_s23 = scalar_lea.vmem %s220_s9, 128  ;;  %p11012_p4 = scmp.lt.s32.totalorder %s220_s9, %s220_s9 }
  0x1b   : > { %p11005_p2 = scmp.ne.s32.totalorder %s220_s9, %s11004_s23  ;;  %p11013_p1 = scmp.lt.s32.totalorder %s11004_s23, %s11004_s23 }
  0x1d   : > { %p11007_p3 = pnand %p11005_p2, %p11316_p10  ;;  %p11014_p5 = por %p11013_p1, %p11012_p4 }
  0x1f   : > { %p11008_p7 = pneg %p11007_p3 }
  0x21   : > { %p11015_p6 = pnand %p11014_p5, %p11008_p7 }
  0x23   : > { %11018 = shalt.err (!%p11015_p6)
}
  0x24   : > { %10712 = dma.hbm_to_vmem [thread:$0]  (!%p11300_p8), %s12790_s2, 128, %s220_s9, [#allocation7]  }
  0x25   : > { %s11019_s15 = scalar_lea.hbm %s12792_s4, 32 }
  0x26   : > { %p11020_p9 = scmp.ne.s32.totalorder %s12792_s4, %s11019_s15  ;;  %p11026_p4 = scmp.lt.u32.totalorder %s11019_s15, %s12792_s4 }
  0x28   : > { %p11022_p11 = pnand %p11020_p9, %p11316_p10 }
  0x2a   : > { %p11023_p1 = pneg %p11022_p11 }
  0x2c   : > { %p11028_p5 = pnand %p11026_p4, %p11023_p1 }
  0x2e   : > { %11031 = shalt.err (!%p11028_p5)
}
  0x2f   : > { %s11032_s9 = scalar_lea.vmem %s11304_s11, 32  ;;  %p11040_p0 = scmp.lt.s32.totalorder %s11304_s11, %s11304_s11 }
  0x30   : > { %p11033_p6 = scmp.ne.s32.totalorder %s11304_s11, %s11032_s9  ;;  %p11041_p2 = scmp.lt.s32.totalorder %s11032_s9, %s11032_s9 }
  0x32   : > { %p11035_p12 = pnand %p11033_p6, %p11316_p10  ;;  %p11042_p3 = por %p11041_p2, %p11040_p0 }
  0x34   : > { %p11036_p13 = pneg %p11035_p12 }
  0x36   : > { %p11043_p7 = pnand %p11042_p3, %p11036_p13 }
  0x38   : > { %11046 = shalt.err (!%p11043_p7)
}
  0x39   : > { %10718 = dma.hbm_to_vmem [thread:$0]  (!%p11300_p8), %s12792_s4, 32, %s11304_s11, [#allocation10]  }
  0x3a   : > { %s11047_s8 = scalar_lea.hbm %s12791_s3, 16384 }
  0x3b   : > { %p11048_p9 = scmp.ne.s32.totalorder %s12791_s3, %s11047_s8  ;;  %p11054_p4 = scmp.lt.u32.totalorder %s11047_s8, %s12791_s3 }
  0x3d   : > { %p11050_p11 = pnand %p11048_p9, %p11316_p10 }
  0x3f   : > { %p11051_p1 = pneg %p11050_p11 }
  0x41   : > { %p11056_p5 = pnand %p11054_p4, %p11051_p1 }
  0x43   : > { %11059 = shalt.err (!%p11056_p5)
}
  0x44   : > { %s11060_s11 = scalar_lea.vmem %s11306_s14, 16384  ;;  %p11068_p0 = scmp.lt.s32.totalorder %s11306_s14, %s11306_s14 }
  0x45   : > { %p11061_p6 = scmp.ne.s32.totalorder %s11306_s14, %s11060_s11  ;;  %p11069_p2 = scmp.lt.s32.totalorder %s11060_s11, %s11060_s11 }
  0x47   : > { %p11063_p12 = pnand %p11061_p6, %p11316_p10  ;;  %p11070_p3 = por %p11069_p2, %p11068_p0 }
  0x49   : > { %p11064_p13 = pneg %p11063_p12 }
  0x4b   : > { %p11071_p7 = pnand %p11070_p3, %p11064_p13 }
  0x4d   : > { %11074 = shalt.err (!%p11071_p7)
}
  0x4e   : > { %s11210_s17 = smov 128   ;;  %s11211_s18 = smov 8  }
  0x4f   : > { %10715 = dma.hbm_to_vmem [thread:$0]  (!%p11300_p8), %s12791_s3, 16384, %s11306_s14, [#allocation7], %s11210_s17, %s11210_s17, %s11211_s18  }
  0x50   : > { %s11212_s21 = smov [#allocation11]   ;;  %s11075_s8 = scalar_lea.hbm %s12794_s6, 16 }
  0x51   : > { %s257_s22 = sshll.u32 %s11212_s21, 4  ;;  %p11076_p9 = scmp.ne.s32.totalorder %s12794_s6, %s11075_s8  ;;  %s258_s22 = int_to_ptr.vmem [resolvable:$true] %s257_s22 }
  0x52   : > { %p11082_p4 = scmp.lt.u32.totalorder %s11075_s8, %s12794_s6 }
  0x53   : > { %p11078_p11 = pnand %p11076_p9, %p11316_p10 }
  0x55   : > { %p11079_p1 = pneg %p11078_p11 }
  0x57   : > { %p11084_p5 = pnand %p11082_p4, %p11079_p1 }
  0x59   : > { %11087 = shalt.err (!%p11084_p5)
}
  0x5a   : > { %s11088_s14 = scalar_lea.vmem %s258_s22, 16  ;;  %s11095_s11 = scalar_lea.vmem %s258_s22, 32 }
  0x5b   : > { %p11089_p6 = scmp.ne.s32.totalorder %s258_s22, %s11088_s14  ;;  %p11096_p0 = scmp.lt.s32.totalorder %s258_s22, %s258_s22 }
  0x5c   : > { %p11097_p2 = scmp.lt.s32.totalorder %s11095_s11, %s11088_s14 }
  0x5d   : > { %p11091_p12 = pnand %p11089_p6, %p11316_p10 }
  0x5e   : > { %p11098_p3 = por %p11097_p2, %p11096_p0 }
  0x5f   : > { %p11092_p13 = pneg %p11091_p12 }
  0x61   : > { %p11099_p7 = pnand %p11098_p3, %p11092_p13 }
  0x63   : > { %11102 = shalt.err (!%p11099_p7)
}
  0x64   : > { %10721 = dma.hbm_to_vmem [thread:$0]  (!%p11300_p8), %s12794_s6, 16, %s258_s22, [#allocation10]  }
  0x65   : > { %s11397_s20 = sadd.s32 1, %s11205_s27   ;;  %s56_s19 = sadd.s32 1, %s11201_s26 }
  0x66   : > { %s53_s9 = ssub.s32 %s11205_s27, %s11397_s20  ;;  %p63_p10 = scmp.ne.s32.totalorder %s11201_s26, %s11197_s25 }
  0x67   : > { %p54_p9 = scmp.eq.s32.totalorder %s53_s9, 0  ;;  %p64_p11 = scmp.eq.s32.totalorder %s11205_s27, 0 }
  0x68   : > { %p10730_p1 = scmp.lt.s32.totalorder %s11205_s27, 2  ;;  %s276_s12 = sand.u32 1, %s11201_s26  }
  0x69   : > { %s11408_s21 = scalar_select %p54_p9, %s11201_s26, %s56_s19  }
  0x6a   : > { %p65_p4 = por %p64_p11, %p63_p10  ;;  %s9353_s23 = sshll.u32 %s276_s12, 13 }
  0x6b   : > { %s10540_s24 = sshll.u32 %s11205_s27, 17  ;;  %s280_s22 = scalar_lea.vmem [#allocation3], %s9353_s23 }
  0x6c   : > { %s11414_s13 = scalar_lea.hbm %s12789_s1, %s10540_s24  ;;  %s288_s15 = sshll.u32 %s280_s22, 4  ;;  %s11420_s15 = int_to_ptr.vmem [resolvable:$true] %s288_s15 }
  0x6d   : > { %p11416_p8 = pnand %p10730_p1, %p65_p4  ;;  %s11422_s27 = scalar_lea.sflag [#allocation4], %s276_s12 }
  0x6e   : > { %s11103_s14 = scalar_lea.hbm %s11414_s13, 131072  ;;  %s11108_s18 = scalar_lea.hbm %s12789_s1, 262144 }
  0x6f   : > { %p11104_p5 = scmp.ne.s32.totalorder %s11414_s13, %s11103_s14  ;;  %p11105_p6 = pneg %p11416_p8 }
  0x70   : > { %p11109_p0 = scmp.lt.u32.totalorder %s11414_s13, %s12789_s1  ;;  %p11110_p2 = scmp.lt.u32.totalorder %s11108_s18, %s11103_s14 }
  0x71   : > { %p11106_p12 = pnand %p11105_p6, %p11104_p5  ;;  %p11112_p7 = scmp.lt.u32.totalorder %s11103_s14, %s11414_s13 }
  0x72   : > { %p11111_p3 = por %p11110_p2, %p11109_p0 }
  0x73   : > { %p11107_p13 = pneg %p11106_p12 }
  0x74   : > { %p11113_p10 = por %p11112_p7, %p11111_p3 }
  0x76   : > { %p11114_p9 = pnand %p11113_p10, %p11107_p13 }
  0x78   : > { %11117 = shalt.err (!%p11114_p9)
}
  0x79   : > { %s11118_s12 = scalar_lea.vmem %s11420_s15, 131072  ;;  %s11213_s23 = smov [#allocation3]  }
  0x7a   : > { %p11119_p11 = scmp.ne.s32.totalorder %s11420_s15, %s11118_s12  ;;  %s11123_s24 = sshll.u32 %s11213_s23, 4  ;;  %s11124_s24 = int_to_ptr.vmem [resolvable:$false] %s11123_s24 }
  0x7b   : > { %s11125_s8 = scalar_lea.vmem %s11124_s24, 262144  ;;  %p11126_p5 = scmp.lt.s32.totalorder %s11420_s15, %s11124_s24 }
  0x7c   : > { %p11121_p1 = pnand %p11119_p11, %p11105_p6  ;;  %p11127_p12 = scmp.lt.s32.totalorder %s11125_s8, %s11118_s12 }
  0x7e   : > { %p11122_p4 = pneg %p11121_p1  ;;  %p11128_p0 = por %p11127_p12, %p11126_p5 }
  0x80   : > { %p11129_p2 = pnand %p11128_p0, %p11122_p4 }
  0x82   : > { %11132 = shalt.err (!%p11129_p2)
}
  0x83   : > { %s11214_s10 = smov 512   ;;  %s11215_s22 = smov 32  }
  0x84   : > { %10725 = dma.hbm_to_vmem [thread:$0]  (!%p11416_p8), %s11414_s13, 131072, %s11420_s15, %s11422_s27, %s11214_s10, %s11214_s10, %s11215_s22  }
  0x85   : > { %p12804_p6 = scmp.ne.s32.totalorder %s12800_s30, 0 }
  0x86   : > { %s302_s14 = sand.u32 (!%p12804_p6), 1, %s11197_s25   ;;  %p12805_p13 = scmp.ne.s32.totalorder (!%p12804_p6), %s12799_s29, 0 }
  0x87   : > { %300 = sbr.rel (%p12804_p6) target bundleno = 1949 (0x79d), region = 48  ;;  %s9358_s11 = sshll.u32 (!%p12804_p6), %s302_s14, 13 }
  0x88   : > { %s303_s17 = scalar_lea.sflag (!%p12804_p6), [#allocation4], %s302_s14  ;;  %s11453_s18 = scalar_lea.vmem (!%p12804_p6), [#allocation3], %s9358_s11 }
  0x8e   : > { %11176 = dma.done.wait (%p12805_p13), %s303_s17, 131072  }
  0x8f   : > { %11178 = vsyncadd (%p12805_p13), %s303_s17, 4294836224  ;;  %p12806_p3 = scmp.eq.s32.totalorder %s11279_s28, 0 }
  0x91   : > { %11180 = dma.done.wait (%p12806_p3), [#allocation7], 16512   ;;  %p12807_p8 = pmov %p12806_p3 }
  0x92   : > { %p12808_p7 = pmov %p12806_p3 }
  0x93   : > { %11182 = vsyncadd (%p12807_p8), [#allocation7], 4294950784 }
  0x94   : > { %11184 = dma.done.wait (%p12808_p7), [#allocation10], 48   ;;  %p12809_p10 = pmov %p12806_p3 }
  0x95   : > { %s9363_s30 = sshll.u32 %s11279_s28, 4  ;;  %p12810_p11 = scmp.ne.s32.totalorder %s11279_s28, 0 }
  0x96   : > { %11186 = vsyncadd (%p12809_p10), [#allocation10], 4294967248  ;;  %p353_p9 = scmp.lt.s32.totalorder %s9363_s30, 31  ;;  %v11216_v0 = vmov (!%p12810_p11), 0.0  }
  0x97   : > { %362 = sbr.rel (%p12810_p11) target bundleno = 158 (0x9e), region = 72  ;;  %363 = vst [vmem:[#allocation2] sm:$0xff] (!%p12810_p11), %v11216_v0  ;;  %364 = vst [vmem:[#allocation2 + $0x8] sm:$0xff] (!%p12810_p11), %v11216_v0 }
  0x98   : > { %s12816_s30 = smov (!%p353_p9, %s9363_s30), 31 }
  0x99   : > { %s11471_s29 = scalar_lea.vmem %s12788_s0, %s12816_s30 }
  0x9e PF: > { %v369_v1 = vld [vmem:[%s11453_s18] sm:$0xff]  ;;  %v370_v3 = vld [vmem:[%s11453_s18 + $0x8] sm:$0xff]  ;;  %v11217_v33 = vmov 1966171168   ;;  %v1399_v35 = vlaneseq  ;;  %v11509_v60 = vld [vmem:[%s11471_s29] sm:$0xff]  ;;  %p10389_p1 = scmp.ne.s32.totalorder %s11279_s28, 1 }
  0x9f   : > { %v373_v2 = vld [vmem:[%s11453_s18 + $0x20] sm:$0xff]  ;;  %v374_v5 = vld [vmem:[%s11453_s18 + $0x28] sm:$0xff]  ;;  %v1397_v34 = vunpack.c.l.s4 %v11217_v33  ;;  %vm9240_vm0 = vcmask (!%p10389_p1), 74752  }
  0xa0   : > { %v9366_v4 = vcombine.high %v369_v1, %v373_v2  ;;  %v9365_v6 = vcombine.low %v369_v1, %v373_v2  ;;  %v377_v7 = vld [vmem:[%s11453_s18 + $0x40] sm:$0xff]  ;;  %v9368_v9 = vcombine.high %v370_v3, %v374_v5  ;;  %v9367_v10 = vcombine.low %v370_v3, %v374_v5  ;;  %v378_v12 = vld [vmem:[%s11453_s18 + $0x48] sm:$0xff] }
  0xa1   : > { %v381_v8 = vld [vmem:[%s11453_s18 + $0x60] sm:$0xff]  ;;  %v382_v13 = vld [vmem:[%s11453_s18 + $0x68] sm:$0xff]  ;;  %v1398_v44 = vunpack.c.0.s8 %v1397_v34  ;;  %v11497_v45 = vshrl.u32 %v1399_v35, 7 }
  0xa2   : > { %v9374_v11 = vcombine.high %v377_v7, %v381_v8  ;;  %v385_v14 = vld [vmem:[%s11453_s18 + $0x80] sm:$0xff]  ;;  %6629 = vmatprep.subr.bf16.mxu0 %v9366_v4  ;;  %v9376_v15 = vcombine.high %v378_v12, %v382_v13  ;;  %v386_v17 = vld [vmem:[%s11453_s18 + $0x88] sm:$0xff]  ;;  %6957 = vmatprep.subr.bf16.mxu1 %v9368_v9  ;;  %v9373_v19 = vcombine.low %v377_v7, %v381_v8 }
  0xa3   : > { %v389_v16 = vld [vmem:[%s11453_s18 + $0xa0] sm:$0xff]  ;;  %v390_v18 = vld [vmem:[%s11453_s18 + $0xa8] sm:$0xff]  ;;  %6630 = vmatpush1.bf16.msra.mxu0 %v9365_v6  ;;  %6958 = vmatpush1.bf16.msra.mxu1 %v9367_v10  ;;  %v9375_v20 = vcombine.low %v378_v12, %v382_v13  ;;  %v11504_v54 = vsub.s32 %v1398_v44, %v11497_v45 }
  0xa4   : > { %6631 = vmatprep.subr.bf16.mxu0 %v9374_v11  ;;  %v9382_v21 = vcombine.high %v385_v14, %v389_v16  ;;  %6959 = vmatprep.subr.bf16.mxu1 %v9376_v15  ;;  %v9384_v22 = vcombine.high %v386_v17, %v390_v18  ;;  %v393_v23 = vld [vmem:[%s11453_s18 + $0xc0] sm:$0xff]  ;;  %v394_v25 = vld [vmem:[%s11453_s18 + $0xc8] sm:$0xff]  ;;  %v9381_v27 = vcombine.low %v385_v14, %v389_v16 }
  0xa5   : > { %v397_v24 = vld [vmem:[%s11453_s18 + $0xe0] sm:$0xff]  ;;  %v398_v26 = vld [vmem:[%s11453_s18 + $0xe8] sm:$0xff]  ;;  %v9383_v28 = vcombine.low %v386_v17, %v390_v18  ;;  %v11515_v0 = vrot.slane %v11509_v60, %v11504_v54 }
  0xa6   : > { %v9390_v29 = vcombine.high %v393_v23, %v397_v24  ;;  %v9392_v30 = vcombine.high %v394_v25, %v398_v26  ;;  %v401_v31 = vld [vmem:[%s11453_s18 + $0x100] sm:$0xff]  ;;  %v402_v36 = vld [vmem:[%s11453_s18 + $0x108] sm:$0xff]  ;;  %v9389_v38 = vcombine.low %v393_v23, %v397_v24  ;;  %v9391_v39 = vcombine.low %v394_v25, %v398_v26 }
  0xa7   : > { %6632 = vmatpush1.bf16.msra.mxu0 %v9373_v19  ;;  %6960 = vmatpush1.bf16.msra.mxu1 %v9375_v20  ;;  %v405_v32 = vld [vmem:[%s11453_s18 + $0x120] sm:$0xff]  ;;  %v406_v37 = vld [vmem:[%s11453_s18 + $0x128] sm:$0xff]  ;;  %v1410_v4 = vcombine.high %v11515_v0, %v11515_v0 }
  0xa8   : > { %6633 = vmatprep.subr.bf16.mxu0 %v9382_v21  ;;  %6961 = vmatprep.subr.bf16.mxu1 %v9384_v22  ;;  %v9398_v40 = vcombine.high %v401_v31, %v405_v32  ;;  %v9400_v41 = vcombine.high %v402_v36, %v406_v37  ;;  %v409_v42 = vld [vmem:[%s11453_s18 + $0x140] sm:$0xff]  ;;  %v410_v46 = vld [vmem:[%s11453_s18 + $0x148] sm:$0xff]  ;;  %v9397_v48 = vcombine.low %v401_v31, %v405_v32 }
  0xa9   : > { %v413_v43 = vld [vmem:[%s11453_s18 + $0x160] sm:$0xff]  ;;  %v414_v47 = vld [vmem:[%s11453_s18 + $0x168] sm:$0xff]  ;;  %v9399_v49 = vcombine.low %v402_v36, %v406_v37  ;;  %v11524_v10 = vrot.slane %v1410_v4, %v11504_v54 }
  0xaa   : > { %v9406_v50 = vcombine.high %v409_v42, %v413_v43  ;;  %v9408_v51 = vcombine.high %v410_v46, %v414_v47  ;;  %v417_v52 = vld [vmem:[%s11453_s18 + $0x180] sm:$0xff]  ;;  %v418_v55 = vld [vmem:[%s11453_s18 + $0x188] sm:$0xff]  ;;  %v9405_v57 = vcombine.low %v409_v42, %v413_v43  ;;  %v9407_v58 = vcombine.low %v410_v46, %v414_v47 }
  0xab   : > { %6634 = vmatpush1.bf16.msra.mxu0 %v9381_v27  ;;  %6962 = vmatpush1.bf16.msra.mxu1 %v9383_v28  ;;  %v421_v53 = vld [vmem:[%s11453_s18 + $0x1a0] sm:$0xff]  ;;  %v422_v56 = vld [vmem:[%s11453_s18 + $0x1a8] sm:$0xff] }
  0xac   : > { %6635 = vmatprep.subr.bf16.mxu0 %v9390_v29  ;;  %6963 = vmatprep.subr.bf16.mxu1 %v9392_v30  ;;  %v9414_v59 = vcombine.high %v417_v52, %v421_v53  ;;  %v9416_v61 = vcombine.high %v418_v55, %v422_v56  ;;  %v425_v62 = vld [vmem:[%s11453_s18 + $0x1c0] sm:$0xff]  ;;  %v426_v1 = vld [vmem:[%s11453_s18 + $0x1c8] sm:$0xff]  ;;  %v9413_v3 = vcombine.low %v417_v52, %v421_v53 }
  0xad   : > { %v429_v63 = vld [vmem:[%s11453_s18 + $0x1e0] sm:$0xff]  ;;  %v430_v2 = vld [vmem:[%s11453_s18 + $0x1e8] sm:$0xff]  ;;  %v9415_v5 = vcombine.low %v418_v55, %v422_v56  ;;  %6661 = vmatprep.mubr.bf16.mxu0 %v11524_v10  ;;  %6989 = vmatprep.mubr.bf16.mxu1 %v11524_v10 }
  0xae   : > { %v9422_v6 = vcombine.high %v425_v62, %v429_v63  ;;  %v9424_v7 = vcombine.high %v426_v1, %v430_v2  ;;  %v433_v8 = vld [vmem:[%s11453_s18 + $0x200] sm:$0xff]  ;;  %v434_v11 = vld [vmem:[%s11453_s18 + $0x208] sm:$0xff]  ;;  %v9421_v13 = vcombine.low %v425_v62, %v429_v63  ;;  %v9423_v14 = vcombine.low %v426_v1, %v430_v2 }
  0xaf   : > { %6636 = vmatpush1.bf16.msra.mxu0 %v9389_v38  ;;  %6964 = vmatpush1.bf16.msra.mxu1 %v9391_v39  ;;  %v437_v9 = vld [vmem:[%s11453_s18 + $0x220] sm:$0xff]  ;;  %v438_v12 = vld [vmem:[%s11453_s18 + $0x228] sm:$0xff] }
  0xb0   : > { %6637 = vmatprep.subr.bf16.mxu0 %v9398_v40  ;;  %6965 = vmatprep.subr.bf16.mxu1 %v9400_v41  ;;  %v9430_v15 = vcombine.high %v433_v8, %v437_v9  ;;  %v9432_v16 = vcombine.high %v434_v11, %v438_v12  ;;  %v441_v17 = vld [vmem:[%s11453_s18 + $0x240] sm:$0xff]  ;;  %v442_v19 = vld [vmem:[%s11453_s18 + $0x248] sm:$0xff]  ;;  %v9429_v21 = vcombine.low %v433_v8, %v437_v9 }
  0xb1   : > { %v445_v18 = vld [vmem:[%s11453_s18 + $0x260] sm:$0xff]  ;;  %v446_v20 = vld [vmem:[%s11453_s18 + $0x268] sm:$0xff]  ;;  %v9431_v22 = vcombine.low %v434_v11, %v438_v12 }
  0xb2   : > { %v9438_v23 = vcombine.high %v441_v17, %v445_v18  ;;  %v9440_v24 = vcombine.high %v442_v19, %v446_v20  ;;  %v449_v25 = vld [vmem:[%s11453_s18 + $0x280] sm:$0xff]  ;;  %v450_v27 = vld [vmem:[%s11453_s18 + $0x288] sm:$0xff]  ;;  %v9437_v29 = vcombine.low %v441_v17, %v445_v18  ;;  %v9439_v30 = vcombine.low %v442_v19, %v446_v20 }
  0xb3   : > { %6638 = vmatpush1.bf16.msra.mxu0 %v9397_v48  ;;  %6966 = vmatpush1.bf16.msra.mxu1 %v9399_v49  ;;  %v453_v26 = vld [vmem:[%s11453_s18 + $0x2a0] sm:$0xff]  ;;  %v454_v28 = vld [vmem:[%s11453_s18 + $0x2a8] sm:$0xff] }
  0xb4   : > { %6639 = vmatprep.subr.bf16.mxu0 %v9406_v50  ;;  %6967 = vmatprep.subr.bf16.mxu1 %v9408_v51  ;;  %v9446_v31 = vcombine.high %v449_v25, %v453_v26  ;;  %v9448_v32 = vcombine.high %v450_v27, %v454_v28  ;;  %v457_v33 = vld [vmem:[%s11453_s18 + $0x2c0] sm:$0xff]  ;;  %v458_v35 = vld [vmem:[%s11453_s18 + $0x2c8] sm:$0xff]  ;;  %v9445_v37 = vcombine.low %v449_v25, %v453_v26 }
  0xb5   : > { %v461_v34 = vld [vmem:[%s11453_s18 + $0x2e0] sm:$0xff]  ;;  %v462_v36 = vld [vmem:[%s11453_s18 + $0x2e8] sm:$0xff]  ;;  %v9447_v38 = vcombine.low %v450_v27, %v454_v28 }
  0xb6   : > { %v9454_v39 = vcombine.high %v457_v33, %v461_v34  ;;  %v9456_v40 = vcombine.high %v458_v35, %v462_v36  ;;  %v465_v41 = vld [vmem:[%s11453_s18 + $0x300] sm:$0xff]  ;;  %v466_v43 = vld [vmem:[%s11453_s18 + $0x308] sm:$0xff]  ;;  %v9453_v46 = vcombine.low %v457_v33, %v461_v34  ;;  %v9455_v47 = vcombine.low %v458_v35, %v462_v36 }
  0xb7   : > { %6640 = vmatpush1.bf16.msra.mxu0 %v9405_v57  ;;  %6968 = vmatpush1.bf16.msra.mxu1 %v9407_v58  ;;  %v469_v42 = vld [vmem:[%s11453_s18 + $0x320] sm:$0xff]  ;;  %v470_v44 = vld [vmem:[%s11453_s18 + $0x328] sm:$0xff]  ;;  %v11574_v33 = vcombine.high %v11524_v10, %v11524_v10 }
  0xb8   : > { %6641 = vmatprep.subr.bf16.mxu0 %v9414_v59  ;;  %6969 = vmatprep.subr.bf16.mxu1 %v9416_v61  ;;  %v9462_v48 = vcombine.high %v465_v41, %v469_v42  ;;  %v9464_v49 = vcombine.high %v466_v43, %v470_v44  ;;  %v473_v50 = vld [vmem:[%s11453_s18 + $0x340] sm:$0xff]  ;;  %v474_v52 = vld [vmem:[%s11453_s18 + $0x348] sm:$0xff]  ;;  %v9461_v55 = vcombine.low %v465_v41, %v469_v42 }
  0xb9   : > { %v477_v51 = vld [vmem:[%s11453_s18 + $0x360] sm:$0xff]  ;;  %v478_v53 = vld [vmem:[%s11453_s18 + $0x368] sm:$0xff]  ;;  %v9463_v56 = vcombine.low %v466_v43, %v470_v44 }
  0xba   : > { %v9470_v57 = vcombine.high %v473_v50, %v477_v51  ;;  %v9472_v58 = vcombine.high %v474_v52, %v478_v53  ;;  %v481_v59 = vld [vmem:[%s11453_s18 + $0x380] sm:$0xff]  ;;  %v482_v62 = vld [vmem:[%s11453_s18 + $0x388] sm:$0xff]  ;;  %v9469_v1 = vcombine.low %v473_v50, %v477_v51  ;;  %v9471_v2 = vcombine.low %v474_v52, %v478_v53 }
  0xbb   : > { %6642 = vmatpush1.bf16.msra.mxu0 %v9413_v3  ;;  %6970 = vmatpush1.bf16.msra.mxu1 %v9415_v5  ;;  %v485_v61 = vld [vmem:[%s11453_s18 + $0x3a0] sm:$0xff]  ;;  %v486_v63 = vld [vmem:[%s11453_s18 + $0x3a8] sm:$0xff] }
  0xbc   : > { %6643 = vmatprep.subr.bf16.mxu0 %v9422_v6  ;;  %6971 = vmatprep.subr.bf16.mxu1 %v9424_v7  ;;  %v9478_v3 = vcombine.high %v481_v59, %v485_v61  ;;  %v9480_v4 = vcombine.high %v482_v62, %v486_v63  ;;  %v489_v5 = vld [vmem:[%s11453_s18 + $0x3c0] sm:$0xff]  ;;  %v490_v7 = vld [vmem:[%s11453_s18 + $0x3c8] sm:$0xff]  ;;  %v9477_v9 = vcombine.low %v481_v59, %v485_v61 }
  0xbd   : > { %v493_v6 = vld [vmem:[%s11453_s18 + $0x3e0] sm:$0xff]  ;;  %v494_v8 = vld [vmem:[%s11453_s18 + $0x3e8] sm:$0xff]  ;;  %v9479_v11 = vcombine.low %v482_v62, %v486_v63 }
  0xbe   : > { %v9486_v12 = vcombine.high %v489_v5, %v493_v6  ;;  %v502_v17 = vld [vmem:[%s11453_s18 + $0x428] sm:$0xff]  ;;  %v9485_v18 = vcombine.low %v489_v5, %v493_v6  ;;  %v9487_v19 = vcombine.low %v490_v7, %v494_v8 }
  0xbf   : > { %6644 = vmatpush1.bf16.msra.mxu0 %v9421_v13  ;;  %6972 = vmatpush1.bf16.msra.mxu1 %v9423_v14  ;;  %v9488_v13 = vcombine.high %v490_v7, %v494_v8  ;;  %v497_v14 = vld [vmem:[%s11453_s18 + $0x400] sm:$0xff]  ;;  %v506_v25 = vld [vmem:[%s11453_s18 + $0x448] sm:$0xff] }
  0xc0   : > { %6645 = vmatprep.subr.bf16.mxu0 %v9430_v15  ;;  %6973 = vmatprep.subr.bf16.mxu1 %v9432_v16  ;;  %v501_v15 = vld [vmem:[%s11453_s18 + $0x420] sm:$0xff]  ;;  %v498_v16 = vld [vmem:[%s11453_s18 + $0x408] sm:$0xff] }
  0xc1   : > { %v9494_v20 = vcombine.high %v497_v14, %v501_v15  ;;  %v510_v26 = vld [vmem:[%s11453_s18 + $0x468] sm:$0xff]  ;;  %v9493_v27 = vcombine.low %v497_v14, %v501_v15  ;;  %v9495_v28 = vcombine.low %v498_v16, %v502_v17 }
  0xc2   : > { %v518_v34 = vld [vmem:[%s11453_s18 + $0x4a8] sm:$0xff]  ;;  %v9503_v36 = vcombine.low %v506_v25, %v510_v26 }
  0xc3   : > { %6646 = vmatpush1.bf16.msra.mxu0 %v9429_v21  ;;  %6974 = vmatpush1.bf16.msra.mxu1 %v9431_v22  ;;  %v9496_v21 = vcombine.high %v498_v16, %v502_v17  ;;  %v505_v22 = vld [vmem:[%s11453_s18 + $0x440] sm:$0xff]  ;;  %v522_v41 = vld [vmem:[%s11453_s18 + $0x4c8] sm:$0xff] }
  0xc4   : > { %6647 = vmatprep.subr.bf16.mxu0 %v9438_v23  ;;  %6975 = vmatprep.subr.bf16.mxu1 %v9440_v24  ;;  %v509_v23 = vld [vmem:[%s11453_s18 + $0x460] sm:$0xff]  ;;  %v11566_v24 = vrot.slane %v11515_v0, %v11504_v54  ;;  %v514_v0 = vld [vmem:[%s11453_s18 + $0x488] sm:$0xff] }
  0xc5   : > { %v9501_v35 = vcombine.low %v505_v22, %v509_v23  ;;  %v526_v42 = vld [vmem:[%s11453_s18 + $0x4e8] sm:$0xff]  ;;  %v9511_v44 = vcombine.low %v514_v0, %v518_v34 }
  0xc6   : > { %v530_v50 = vld [vmem:[%s11453_s18 + $0x508] sm:$0xff]  ;;  %v9519_v53 = vcombine.low %v522_v41, %v526_v42 }
  0xc7   : > { %6648 = vmatpush1.bf16.msra.mxu0 %v9437_v29  ;;  %6976 = vmatpush1.bf16.msra.mxu1 %v9439_v30  ;;  %v9502_v29 = vcombine.high %v505_v22, %v509_v23  ;;  %v9504_v30 = vcombine.high %v506_v25, %v510_v26  ;;  %v534_v51 = vld [vmem:[%s11453_s18 + $0x528] sm:$0xff] }
  0xc8   : > { %6649 = vmatprep.subr.bf16.mxu0 %v9446_v31  ;;  %6977 = vmatprep.subr.bf16.mxu1 %v9448_v32  ;;  %v513_v31 = vld [vmem:[%s11453_s18 + $0x480] sm:$0xff]  ;;  %v538_v59 = vld [vmem:[%s11453_s18 + $0x548] sm:$0xff]  ;;  %v9527_v63 = vcombine.low %v530_v50, %v534_v51 }
  0xc9   : > { %v517_v32 = vld [vmem:[%s11453_s18 + $0x4a0] sm:$0xff]  ;;  %v542_v61 = vld [vmem:[%s11453_s18 + $0x568] sm:$0xff] }
  0xca   : > { %v9509_v43 = vcombine.low %v513_v31, %v517_v32  ;;  %v546_v5 = vld [vmem:[%s11453_s18 + $0x588] sm:$0xff]  ;;  %v9535_v8 = vcombine.low %v538_v59, %v542_v61 }
  0xcb   : > { %6650 = vmatpush1.bf16.msra.mxu0 %v9445_v37  ;;  %6978 = vmatpush1.bf16.msra.mxu1 %v9447_v38  ;;  %v9510_v37 = vcombine.high %v513_v31, %v517_v32  ;;  %v9512_v38 = vcombine.high %v514_v0, %v518_v34  ;;  %v550_v6 = vld [vmem:[%s11453_s18 + $0x5a8] sm:$0xff] }
  0xcc   : > { %6651 = vmatprep.subr.bf16.mxu0 %v9454_v39  ;;  %6979 = vmatprep.subr.bf16.mxu1 %v9456_v40  ;;  %v521_v39 = vld [vmem:[%s11453_s18 + $0x4c0] sm:$0xff]  ;;  %v554_v14 = vld [vmem:[%s11453_s18 + $0x5c8] sm:$0xff]  ;;  %v9543_v17 = vcombine.low %v546_v5, %v550_v6 }
  0xcd   : > { %v525_v40 = vld [vmem:[%s11453_s18 + $0x4e0] sm:$0xff]  ;;  %v558_v15 = vld [vmem:[%s11453_s18 + $0x5e8] sm:$0xff] }
  0xce   : > { %v9517_v52 = vcombine.low %v521_v39, %v525_v40  ;;  %v562_v22 = vld [vmem:[%s11453_s18 + $0x608] sm:$0xff]  ;;  %v9551_v26 = vcombine.low %v554_v14, %v558_v15 }
  0xcf   : > { %6652 = vmatpush1.bf16.msra.mxu0 %v9453_v46  ;;  %6980 = vmatpush1.bf16.msra.mxu1 %v9455_v47  ;;  %v9518_v46 = vcombine.high %v521_v39, %v525_v40  ;;  %v9520_v47 = vcombine.high %v522_v41, %v526_v42  ;;  %v566_v23 = vld [vmem:[%s11453_s18 + $0x628] sm:$0xff] }
  0xd0   : > { %6653 = vmatprep.subr.bf16.mxu0 %v9462_v48  ;;  %6981 = vmatprep.subr.bf16.mxu1 %v9464_v49  ;;  %v529_v48 = vld [vmem:[%s11453_s18 + $0x500] sm:$0xff]  ;;  %v570_v31 = vld [vmem:[%s11453_s18 + $0x648] sm:$0xff]  ;;  %v9559_v34 = vcombine.low %v562_v22, %v566_v23 }
  0xd1   : > { %v533_v49 = vld [vmem:[%s11453_s18 + $0x520] sm:$0xff]  ;;  %v574_v32 = vld [vmem:[%s11453_s18 + $0x668] sm:$0xff] }
  0xd2   : > { %v9525_v62 = vcombine.low %v529_v48, %v533_v49  ;;  %v578_v39 = vld [vmem:[%s11453_s18 + $0x688] sm:$0xff]  ;;  %v9567_v42 = vcombine.low %v570_v31, %v574_v32 }
  0xd3   : > { %6654 = vmatpush1.bf16.msra.mxu0 %v9461_v55  ;;  %6982 = vmatpush1.bf16.msra.mxu1 %v9463_v56  ;;  %v9526_v55 = vcombine.high %v529_v48, %v533_v49  ;;  %v9528_v56 = vcombine.high %v530_v50, %v534_v51  ;;  %v582_v40 = vld [vmem:[%s11453_s18 + $0x6a8] sm:$0xff] }
  0xd4   : > { %6655 = vmatprep.subr.bf16.mxu0 %v9470_v57  ;;  %6983 = vmatprep.subr.bf16.mxu1 %v9472_v58  ;;  %v537_v57 = vld [vmem:[%s11453_s18 + $0x540] sm:$0xff]  ;;  %v586_v48 = vld [vmem:[%s11453_s18 + $0x6c8] sm:$0xff]  ;;  %v9575_v51 = vcombine.low %v578_v39, %v582_v40 }
  0xd5   : > { %v541_v58 = vld [vmem:[%s11453_s18 + $0x560] sm:$0xff]  ;;  %v590_v49 = vld [vmem:[%s11453_s18 + $0x6e8] sm:$0xff] }
  0xd6   : > { %v9533_v7 = vcombine.low %v537_v57, %v541_v58 }
  0xd7   : > { %6656 = vmatpush1.bf16.msra.mxu0 %v9469_v1  ;;  %6984 = vmatpush1.bf16.msra.mxu1 %v9471_v2  ;;  %v9534_v1 = vcombine.high %v537_v57, %v541_v58  ;;  %v9536_v2 = vcombine.high %v538_v59, %v542_v61  ;;  %v594_v57 = vld [vmem:[%s11453_s18 + $0x708] sm:$0xff]  ;;  %v9583_v61 = vcombine.low %v586_v48, %v590_v49 }
  0xd8   : > { %6657 = vmatprep.subr.bf16.mxu0 %v9478_v3  ;;  %6985 = vmatprep.subr.bf16.mxu1 %v9480_v4  ;;  %v545_v3 = vld [vmem:[%s11453_s18 + $0x580] sm:$0xff]  ;;  %v598_v58 = vld [vmem:[%s11453_s18 + $0x728] sm:$0xff] }
  0xd9   : > { %v549_v4 = vld [vmem:[%s11453_s18 + $0x5a0] sm:$0xff] }
  0xda   : > { %v9541_v16 = vcombine.low %v545_v3, %v549_v4 }
  0xdb   : > { %6658 = vmatpush1.bf16.msra.mxu0 %v9477_v9  ;;  %6986 = vmatpush1.bf16.msra.mxu1 %v9479_v11  ;;  %v9542_v9 = vcombine.high %v545_v3, %v549_v4  ;;  %v9544_v11 = vcombine.high %v546_v5, %v550_v6  ;;  %v602_v3 = vld [vmem:[%s11453_s18 + $0x748] sm:$0xff]  ;;  %v9591_v6 = vcombine.low %v594_v57, %v598_v58 }
  0xdc   : > { %6659 = vmatprep.subr.bf16.mxu0 %v9486_v12  ;;  %6987 = vmatprep.subr.bf16.mxu1 %v9488_v13  ;;  %v553_v12 = vld [vmem:[%s11453_s18 + $0x5c0] sm:$0xff]  ;;  %v606_v4 = vld [vmem:[%s11453_s18 + $0x768] sm:$0xff] }
  0xdd   : > { %v557_v13 = vld [vmem:[%s11453_s18 + $0x5e0] sm:$0xff] }
  0xde   : > { %v9549_v25 = vcombine.low %v553_v12, %v557_v13 }
  0xdf   : > { %6660 = vmatpush1.bf16.msra.mxu0 %v9485_v18  ;;  %6988 = vmatpush1.bf16.msra.mxu1 %v9487_v19  ;;  %v9550_v18 = vcombine.high %v553_v12, %v557_v13  ;;  %v9552_v19 = vcombine.high %v554_v14, %v558_v15  ;;  %v610_v12 = vld [vmem:[%s11453_s18 + $0x788] sm:$0xff]  ;;  %v9599_v15 = vcombine.low %v602_v3, %v606_v4 }
  0xe0   : > { %6670 = vmatprep.subr.bf16.mxu0 %v9494_v20  ;;  %6998 = vmatprep.subr.bf16.mxu1 %v9496_v21  ;;  %v561_v20 = vld [vmem:[%s11453_s18 + $0x600] sm:$0xff]  ;;  %v614_v13 = vld [vmem:[%s11453_s18 + $0x7a8] sm:$0xff] }
  0xe1   : > { %v565_v21 = vld [vmem:[%s11453_s18 + $0x620] sm:$0xff] }
  0xe2   : > { %6662 = vmatmul.mubr.bf16.vlgmr.msra.gmra.mrb[0].mxu0 %v11566_v24  ;;  %6990 = vmatmul.mubr.bf16.vlgmr.msra.gmra.mrb[0].mxu1 %v11566_v24  ;;  %v9557_v0 = vcombine.low %v561_v20, %v565_v21 }
  0xe3   : > { %6671 = vmatpush1.bf16.msra.mxu0 %v9493_v27  ;;  %6999 = vmatpush1.bf16.msra.mxu1 %v9495_v28  ;;  %v9558_v27 = vcombine.high %v561_v20, %v565_v21  ;;  %v9560_v28 = vcombine.high %v562_v22, %v566_v23  ;;  %v1395_v20 = vcombine.high %v11509_v60, %v11509_v60  ;;  %v618_v21 = vld [vmem:[%s11453_s18 + $0x7c8] sm:$0xff] }
  0xe4   : > { %6672 = vmatprep.subr.bf16.mxu0 %v9502_v29  ;;  %7000 = vmatprep.subr.bf16.mxu1 %v9504_v30  ;;  %v569_v29 = vld [vmem:[%s11453_s18 + $0x640] sm:$0xff]  ;;  %v622_v22 = vld [vmem:[%s11453_s18 + $0x7e8] sm:$0xff] }
  0xe5   : > { %6702 = vmatprep.mubr.bf16.mxu0 %v11574_v33  ;;  %7030 = vmatprep.mubr.bf16.mxu1 %v11574_v33  ;;  %v573_v30 = vld [vmem:[%s11453_s18 + $0x660] sm:$0xff]  ;;  %v626_v60 = vld [vmem:[%s11453_s18 + $0x808] sm:$0xff] }
  0xe6   : > { %v9565_v41 = vcombine.low %v569_v29, %v573_v30 }
  0xe7   : > { %6673 = vmatpush1.bf16.msra.mxu0 %v9501_v35  ;;  %7001 = vmatpush1.bf16.msra.mxu1 %v9503_v36  ;;  %v9566_v35 = vcombine.high %v569_v29, %v573_v30  ;;  %v9568_v36 = vcombine.high %v570_v31, %v574_v32  ;;  %v629_v29 = vld [vmem:[%s11453_s18 + $0x820] sm:$0xff]  ;;  %v11639_v30 = vrot.slane %v1395_v20, %v11504_v54  ;;  %v630_v31 = vld [vmem:[%s11453_s18 + $0x828] sm:$0xff] }
  0xe8   : > { %6674 = vmatprep.subr.bf16.mxu0 %v9510_v37  ;;  %7002 = vmatprep.subr.bf16.mxu1 %v9512_v38  ;;  %v577_v37 = vld [vmem:[%s11453_s18 + $0x680] sm:$0xff] }
  0xe9   : > { %v581_v38 = vld [vmem:[%s11453_s18 + $0x6a0] sm:$0xff] }
  0xea   : > { %v9573_v50 = vcombine.low %v577_v37, %v581_v38  ;;  %v673_v20 = vld [vmem:[%s11453_s18 + $0x980] sm:$0xff] }
  0xeb   : > { %6675 = vmatpush1.bf16.msra.mxu0 %v9509_v43  ;;  %7003 = vmatpush1.bf16.msra.mxu1 %v9511_v44  ;;  %v9574_v43 = vcombine.high %v577_v37, %v581_v38  ;;  %v9576_v44 = vcombine.high %v578_v39, %v582_v40  ;;  %v637_v37 = vld [vmem:[%s11453_s18 + $0x860] sm:$0xff]  ;;  %v1411_v38 = vcombine.high %v11639_v30, %v11639_v30  ;;  %v634_v40 = vld [vmem:[%s11453_s18 + $0x848] sm:$0xff] }
  0xec   : > { %6676 = vmatprep.subr.bf16.mxu0 %v9518_v46  ;;  %7004 = vmatprep.subr.bf16.mxu1 %v9520_v47  ;;  %v585_v46 = vld [vmem:[%s11453_s18 + $0x6c0] sm:$0xff]  ;;  %v11649_v39 = vcombine.high %v11566_v24, %v11566_v24 }
  0xed   : > { %v589_v47 = vld [vmem:[%s11453_s18 + $0x6e0] sm:$0xff] }
  0xee   : > { %v9581_v59 = vcombine.low %v585_v46, %v589_v47 }
  0xef   : > { %6677 = vmatpush1.bf16.msra.mxu0 %v9517_v52  ;;  %7005 = vmatpush1.bf16.msra.mxu1 %v9519_v53  ;;  %v9582_v52 = vcombine.high %v585_v46, %v589_v47  ;;  %v9584_v53 = vcombine.high %v586_v48, %v590_v49  ;;  %v641_v47 = vld [vmem:[%s11453_s18 + $0x880] sm:$0xff]  ;;  %v11656_v49 = vrot.slane %v1411_v38, %v11504_v54 }
  0xf0   : > { %6678 = vmatprep.subr.bf16.mxu0 %v9526_v55  ;;  %7006 = vmatprep.subr.bf16.mxu1 %v9528_v56  ;;  %v593_v55 = vld [vmem:[%s11453_s18 + $0x700] sm:$0xff] }
  0xf1   : > { %v597_v56 = vld [vmem:[%s11453_s18 + $0x720] sm:$0xff] }
  0xf2   : > { %v9589_v5 = vcombine.low %v593_v55, %v597_v56  ;;  %v645_v48 = vld [vmem:[%s11453_s18 + $0x8a0] sm:$0xff] }
  0xf3   : > { %6679 = vmatpush1.bf16.msra.mxu0 %v9525_v62  ;;  %7007 = vmatpush1.bf16.msra.mxu1 %v9527_v63  ;;  %v9590_v62 = vcombine.high %v593_v55, %v597_v56  ;;  %v9592_v63 = vcombine.high %v594_v57, %v598_v58  ;;  %v9638_v55 = vcombine.high %v641_v47, %v645_v48  ;;  %v649_v57 = vld [vmem:[%s11453_s18 + $0x8c0] sm:$0xff] }
  0xf4   : > { %6680 = vmatprep.subr.bf16.mxu0 %v9534_v1  ;;  %7008 = vmatprep.subr.bf16.mxu1 %v9536_v2  ;;  %v601_v1 = vld [vmem:[%s11453_s18 + $0x740] sm:$0xff] }
  0xf5   : > { %v605_v2 = vld [vmem:[%s11453_s18 + $0x760] sm:$0xff] }
  0xf6   : > { %v9597_v14 = vcombine.low %v601_v1, %v605_v2  ;;  %v653_v58 = vld [vmem:[%s11453_s18 + $0x8e0] sm:$0xff] }
  0xf7   : > { %6681 = vmatpush1.bf16.msra.mxu0 %v9533_v7  ;;  %7009 = vmatpush1.bf16.msra.mxu1 %v9535_v8  ;;  %v9598_v7 = vcombine.high %v601_v1, %v605_v2  ;;  %v9600_v8 = vcombine.high %v602_v3, %v606_v4  ;;  %v9646_v1 = vcombine.high %v649_v57, %v653_v58  ;;  %v657_v3 = vld [vmem:[%s11453_s18 + $0x900] sm:$0xff] }
  0xf8   : > { %6682 = vmatprep.subr.bf16.mxu0 %v9542_v9  ;;  %7010 = vmatprep.subr.bf16.mxu1 %v9544_v11  ;;  %v609_v9 = vld [vmem:[%s11453_s18 + $0x780] sm:$0xff] }
  0xf9   : > { %v613_v11 = vld [vmem:[%s11453_s18 + $0x7a0] sm:$0xff] }
  0xfa   : > { %v9605_v23 = vcombine.low %v609_v9, %v613_v11  ;;  %v661_v4 = vld [vmem:[%s11453_s18 + $0x920] sm:$0xff] }
  0xfb   : > { %6683 = vmatpush1.bf16.msra.mxu0 %v9541_v16  ;;  %7011 = vmatpush1.bf16.msra.mxu1 %v9543_v17  ;;  %v9606_v16 = vcombine.high %v609_v9, %v613_v11  ;;  %v9608_v17 = vcombine.high %v610_v12, %v614_v13  ;;  %v9654_v9 = vcombine.high %v657_v3, %v661_v4  ;;  %v693_v38 = vld [vmem:[%s11453_s18 + $0xa20] sm:$0xff] }
  0xfc   : > { %6684 = vmatprep.subr.bf16.mxu0 %v9550_v18  ;;  %7012 = vmatprep.subr.bf16.mxu1 %v9552_v19  ;;  %v617_v18 = vld [vmem:[%s11453_s18 + $0x7c0] sm:$0xff] }
  0xfd   : > { %v621_v19 = vld [vmem:[%s11453_s18 + $0x7e0] sm:$0xff] }
  0xfe   : > { %v9613_v32 = vcombine.low %v617_v18, %v621_v19 }
  0xff   : > { %6685 = vmatpush1.bf16.msra.mxu0 %v9549_v25  ;;  %7013 = vmatpush1.bf16.msra.mxu1 %v9551_v26  ;;  %v9607_v25 = vcombine.low %v610_v12, %v614_v13  ;;  %v9614_v26 = vcombine.high %v617_v18, %v621_v19  ;;  %v665_v12 = vld [vmem:[%s11453_s18 + $0x940] sm:$0xff] }
 0x100   : > { %6686 = vmatprep.subr.bf16.mxu0 %v9558_v27  ;;  %7014 = vmatprep.subr.bf16.mxu1 %v9560_v28  ;;  %v9616_v27 = vcombine.high %v618_v21, %v622_v22  ;;  %v625_v28 = vld [vmem:[%s11453_s18 + $0x800] sm:$0xff] }
 0x101   : > { %v669_v13 = vld [vmem:[%s11453_s18 + $0x960] sm:$0xff] }
 0x102   : > { %v9662_v18 = vcombine.high %v665_v12, %v669_v13 }
 0x103   : > { %6687 = vmatpush1.bf16.msra.mxu0 %v9557_v0  ;;  %7015 = vmatpush1.bf16.msra.mxu1 %v9559_v34  ;;  %v9615_v0 = vcombine.low %v618_v21, %v622_v22  ;;  %v9622_v34 = vcombine.high %v625_v28, %v629_v29  ;;  %v677_v21 = vld [vmem:[%s11453_s18 + $0x9a0] sm:$0xff]  ;;  %v674_v22 = vld [vmem:[%s11453_s18 + $0x988] sm:$0xff] }
 0x104   : > { %6688 = vmatprep.subr.bf16.mxu0 %v9566_v35  ;;  %7016 = vmatprep.subr.bf16.mxu1 %v9568_v36  ;;  %v9624_v35 = vcombine.high %v626_v60, %v630_v31  ;;  %v633_v36 = vld [vmem:[%s11453_s18 + $0x840] sm:$0xff] }
 0x107   : > { %6689 = vmatpush1.bf16.msra.mxu0 %v9565_v41  ;;  %7017 = vmatpush1.bf16.msra.mxu1 %v9567_v42  ;;  %v638_v41 = vld [vmem:[%s11453_s18 + $0x868] sm:$0xff]  ;;  %v9621_v42 = vcombine.low %v625_v28, %v629_v29  ;;  %v681_v29 = vld [vmem:[%s11453_s18 + $0x9c0] sm:$0xff] }
 0x108   : > { %6690 = vmatprep.subr.bf16.mxu0 %v9574_v43  ;;  %7018 = vmatprep.subr.bf16.mxu1 %v9576_v44  ;;  %v9623_v43 = vcombine.low %v626_v60, %v630_v31  ;;  %v9630_v44 = vcombine.high %v633_v36, %v637_v37  ;;  %v9632_v46 = vcombine.high %v634_v40, %v638_v41  ;;  %v685_v60 = vld [vmem:[%s11453_s18 + $0x9e0] sm:$0xff]  ;;  %v682_v31 = vld [vmem:[%s11453_s18 + $0x9c8] sm:$0xff] }
 0x10b   : > { %6691 = vmatpush1.bf16.msra.mxu0 %v9573_v50  ;;  %7019 = vmatpush1.bf16.msra.mxu1 %v9575_v51  ;;  %v642_v50 = vld [vmem:[%s11453_s18 + $0x888] sm:$0xff] }
 0x10c   : > { %6692 = vmatprep.subr.bf16.mxu0 %v9582_v52  ;;  %7020 = vmatprep.subr.bf16.mxu1 %v9584_v53  ;;  %v646_v51 = vld [vmem:[%s11453_s18 + $0x8a8] sm:$0xff]  ;;  %v9629_v52 = vcombine.low %v633_v36, %v637_v37  ;;  %v9631_v53 = vcombine.low %v634_v40, %v638_v41  ;;  %v689_v37 = vld [vmem:[%s11453_s18 + $0xa00] sm:$0xff] }
 0x10d   : > { %v9640_v56 = vcombine.high %v642_v50, %v646_v51  ;;  %v690_v40 = vld [vmem:[%s11453_s18 + $0xa08] sm:$0xff] }
 0x10e   : > { %v694_v41 = vld [vmem:[%s11453_s18 + $0xa28] sm:$0xff] }
 0x10f   : > { %6693 = vmatpush1.bf16.msra.mxu0 %v9581_v59  ;;  %7021 = vmatpush1.bf16.msra.mxu1 %v9583_v61  ;;  %v650_v59 = vld [vmem:[%s11453_s18 + $0x8c8] sm:$0xff] }
 0x110   : > { %6694 = vmatprep.subr.bf16.mxu0 %v9590_v62  ;;  %7022 = vmatprep.subr.bf16.mxu1 %v9592_v63  ;;  %v654_v61 = vld [vmem:[%s11453_s18 + $0x8e8] sm:$0xff]  ;;  %v9637_v62 = vcombine.low %v641_v47, %v645_v48  ;;  %v9639_v63 = vcombine.low %v642_v50, %v646_v51  ;;  %v697_v47 = vld [vmem:[%s11453_s18 + $0xa40] sm:$0xff] }
 0x111   : > { %v9648_v2 = vcombine.high %v650_v59, %v654_v61  ;;  %v701_v48 = vld [vmem:[%s11453_s18 + $0xa60] sm:$0xff]  ;;  %v698_v50 = vld [vmem:[%s11453_s18 + $0xa48] sm:$0xff] }
 0x112   : > { %v702_v51 = vld [vmem:[%s11453_s18 + $0xa68] sm:$0xff] }
 0x113   : > { %6695 = vmatpush1.bf16.msra.mxu0 %v9589_v5  ;;  %7023 = vmatpush1.bf16.msra.mxu1 %v9591_v6  ;;  %v658_v5 = vld [vmem:[%s11453_s18 + $0x908] sm:$0xff] }
 0x114   : > { %6696 = vmatprep.subr.bf16.mxu0 %v9598_v7  ;;  %7024 = vmatprep.subr.bf16.mxu1 %v9600_v8  ;;  %v662_v6 = vld [vmem:[%s11453_s18 + $0x928] sm:$0xff]  ;;  %v9645_v7 = vcombine.low %v649_v57, %v653_v58  ;;  %v9647_v8 = vcombine.low %v650_v59, %v654_v61  ;;  %v705_v57 = vld [vmem:[%s11453_s18 + $0xa80] sm:$0xff] }
 0x115   : > { %v9656_v11 = vcombine.high %v658_v5, %v662_v6  ;;  %v709_v58 = vld [vmem:[%s11453_s18 + $0xaa0] sm:$0xff]  ;;  %v706_v59 = vld [vmem:[%s11453_s18 + $0xa88] sm:$0xff] }
 0x116   : > { %v710_v61 = vld [vmem:[%s11453_s18 + $0xaa8] sm:$0xff] }
 0x117   : > { %6697 = vmatpush1.bf16.msra.mxu0 %v9597_v14  ;;  %7025 = vmatpush1.bf16.msra.mxu1 %v9599_v15  ;;  %v666_v14 = vld [vmem:[%s11453_s18 + $0x948] sm:$0xff] }
 0x118   : > { %6698 = vmatprep.subr.bf16.mxu0 %v9606_v16  ;;  %7026 = vmatprep.subr.bf16.mxu1 %v9608_v17  ;;  %v670_v15 = vld [vmem:[%s11453_s18 + $0x968] sm:$0xff]  ;;  %v9653_v16 = vcombine.low %v657_v3, %v661_v4  ;;  %v9655_v17 = vcombine.low %v658_v5, %v662_v6  ;;  %v713_v3 = vld [vmem:[%s11453_s18 + $0xac0] sm:$0xff] }
 0x119   : > { %v9664_v19 = vcombine.high %v666_v14, %v670_v15  ;;  %v717_v4 = vld [vmem:[%s11453_s18 + $0xae0] sm:$0xff]  ;;  %v714_v5 = vld [vmem:[%s11453_s18 + $0xac8] sm:$0xff] }
 0x11a   : > { %v718_v6 = vld [vmem:[%s11453_s18 + $0xae8] sm:$0xff] }
 0x11b   : > { %6699 = vmatpush1.bf16.msra.mxu0 %v9605_v23  ;;  %7027 = vmatpush1.bf16.msra.mxu1 %v9607_v25  ;;  %v678_v23 = vld [vmem:[%s11453_s18 + $0x9a8] sm:$0xff]  ;;  %v9661_v25 = vcombine.low %v665_v12, %v669_v13  ;;  %v721_v12 = vld [vmem:[%s11453_s18 + $0xb00] sm:$0xff] }
 0x11c   : > { %6700 = vmatprep.subr.bf16.mxu0 %v9614_v26  ;;  %7028 = vmatprep.subr.bf16.mxu1 %v9616_v27  ;;  %v9663_v26 = vcombine.low %v666_v14, %v670_v15  ;;  %v9670_v27 = vcombine.high %v673_v20, %v677_v21  ;;  %v9672_v28 = vcombine.high %v674_v22, %v678_v23  ;;  %v725_v13 = vld [vmem:[%s11453_s18 + $0xb20] sm:$0xff]  ;;  %v722_v14 = vld [vmem:[%s11453_s18 + $0xb08] sm:$0xff] }
 0x11d   : > { %v726_v15 = vld [vmem:[%s11453_s18 + $0xb28] sm:$0xff] }
 0x11f   : > { %6701 = vmatpush1.bf16.msra.mxu0 %v9613_v32  ;;  %7029 = vmatpush1.bf16.msra.mxu1 %v9615_v0  ;;  %v686_v32 = vld [vmem:[%s11453_s18 + $0x9e8] sm:$0xff]  ;;  %v9669_v0 = vcombine.low %v673_v20, %v677_v21  ;;  %v729_v20 = vld [vmem:[%s11453_s18 + $0xb40] sm:$0xff] }
 0x120   : > { %6711 = vmatprep.subr.bf16.mxu0 %v9622_v34  ;;  %7039 = vmatprep.subr.bf16.mxu1 %v9624_v35  ;;  %v9671_v34 = vcombine.low %v674_v22, %v678_v23  ;;  %v9678_v35 = vcombine.high %v681_v29, %v685_v60  ;;  %v9680_v36 = vcombine.high %v682_v31, %v686_v32  ;;  %v733_v21 = vld [vmem:[%s11453_s18 + $0xb60] sm:$0xff]  ;;  %v730_v22 = vld [vmem:[%s11453_s18 + $0xb48] sm:$0xff] }
 0x121   : > { %v734_v23 = vld [vmem:[%s11453_s18 + $0xb68] sm:$0xff] }
 0x122   : > { %6703 = vmatmul.mubr.bf16.vlgmr.msra.gmra.mrb[0].mxu0 %v11649_v39  ;;  %7031 = vmatmul.mubr.bf16.vlgmr.msra.gmra.mrb[0].mxu1 %v11649_v39 }
 0x123   : > { %6712 = vmatpush1.bf16.msra.mxu0 %v9621_v42  ;;  %7040 = vmatpush1.bf16.msra.mxu1 %v9623_v43  ;;  %v9677_v42 = vcombine.low %v681_v29, %v685_v60  ;;  %v9679_v43 = vcombine.low %v682_v31, %v686_v32  ;;  %v737_v29 = vld [vmem:[%s11453_s18 + $0xb80] sm:$0xff]  ;;  %v738_v31 = vld [vmem:[%s11453_s18 + $0xb88] sm:$0xff] }
 0x124   : > { %6713 = vmatprep.subr.bf16.mxu0 %v9630_v44  ;;  %7041 = vmatprep.subr.bf16.mxu1 %v9632_v46  ;;  %v9686_v44 = vcombine.high %v689_v37, %v693_v38  ;;  %v9688_v46 = vcombine.high %v690_v40, %v694_v41  ;;  %v741_v60 = vld [vmem:[%s11453_s18 + $0xba0] sm:$0xff]  ;;  %v742_v32 = vld [vmem:[%s11453_s18 + $0xba8] sm:$0xff] }
 0x125   : > { %6743 = vmatprep.mubr.bf16.mxu0 %v11656_v49  ;;  %7071 = vmatprep.mubr.bf16.mxu1 %v11656_v49 }
 0x127   : > { %6714 = vmatpush1.bf16.msra.mxu0 %v9629_v52  ;;  %7042 = vmatpush1.bf16.msra.mxu1 %v9631_v53  ;;  %v9685_v52 = vcombine.low %v689_v37, %v693_v38  ;;  %v9687_v53 = vcombine.low %v690_v40, %v694_v41  ;;  %v745_v37 = vld [vmem:[%s11453_s18 + $0xbc0] sm:$0xff]  ;;  %v746_v40 = vld [vmem:[%s11453_s18 + $0xbc8] sm:$0xff] }
 0x128   : > { %6715 = vmatprep.subr.bf16.mxu0 %v9638_v55  ;;  %7043 = vmatprep.subr.bf16.mxu1 %v9640_v56  ;;  %v9694_v55 = vcombine.high %v697_v47, %v701_v48  ;;  %v9696_v56 = vcombine.high %v698_v50, %v702_v51  ;;  %v749_v38 = vld [vmem:[%s11453_s18 + $0xbe0] sm:$0xff]  ;;  %v750_v41 = vld [vmem:[%s11453_s18 + $0xbe8] sm:$0xff] }
 0x12b   : > { %6716 = vmatpush1.bf16.msra.mxu0 %v9637_v62  ;;  %7044 = vmatpush1.bf16.msra.mxu1 %v9639_v63  ;;  %v9693_v62 = vcombine.low %v697_v47, %v701_v48  ;;  %v9695_v63 = vcombine.low %v698_v50, %v702_v51  ;;  %v753_v47 = vld [vmem:[%s11453_s18 + $0xc00] sm:$0xff]  ;;  %v754_v50 = vld [vmem:[%s11453_s18 + $0xc08] sm:$0xff] }
 0x12c   : > { %6717 = vmatprep.subr.bf16.mxu0 %v9646_v1  ;;  %7045 = vmatprep.subr.bf16.mxu1 %v9648_v2  ;;  %v9702_v1 = vcombine.high %v705_v57, %v709_v58  ;;  %v9704_v2 = vcombine.high %v706_v59, %v710_v61  ;;  %v757_v48 = vld [vmem:[%s11453_s18 + $0xc20] sm:$0xff]  ;;  %v758_v51 = vld [vmem:[%s11453_s18 + $0xc28] sm:$0xff] }
 0x12f   : > { %6718 = vmatpush1.bf16.msra.mxu0 %v9645_v7  ;;  %7046 = vmatpush1.bf16.msra.mxu1 %v9647_v8  ;;  %v9701_v7 = vcombine.low %v705_v57, %v709_v58  ;;  %v9703_v8 = vcombine.low %v706_v59, %v710_v61  ;;  %v761_v57 = vld [vmem:[%s11453_s18 + $0xc40] sm:$0xff]  ;;  %v11724_v59 = vrot.slane %v11639_v30, %v11504_v54  ;;  %v762_v61 = vld [vmem:[%s11453_s18 + $0xc48] sm:$0xff] }
 0x130   : > { %6719 = vmatprep.subr.bf16.mxu0 %v9654_v9  ;;  %7047 = vmatprep.subr.bf16.mxu1 %v9656_v11  ;;  %v9710_v9 = vcombine.high %v713_v3, %v717_v4  ;;  %v9712_v11 = vcombine.high %v714_v5, %v718_v6  ;;  %v765_v58 = vld [vmem:[%s11453_s18 + $0xc60] sm:$0xff]  ;;  %v770_v30 = vld [vmem:[%s11453_s18 + $0xc88] sm:$0xff] }
 0x133   : > { %6720 = vmatpush1.bf16.msra.mxu0 %v9653_v16  ;;  %7048 = vmatpush1.bf16.msra.mxu1 %v9655_v17  ;;  %v9709_v16 = vcombine.low %v713_v3, %v717_v4  ;;  %v9711_v17 = vcombine.low %v714_v5, %v718_v6  ;;  %v769_v4 = vld [vmem:[%s11453_s18 + $0xc80] sm:$0xff]  ;;  %v11732_v6 = vcombine.high %v11656_v49, %v11656_v49 }
 0x134   : > { %6721 = vmatprep.subr.bf16.mxu0 %v9662_v18  ;;  %7049 = vmatprep.subr.bf16.mxu1 %v9664_v19  ;;  %v9718_v18 = vcombine.high %v721_v12, %v725_v13  ;;  %v9720_v19 = vcombine.high %v722_v14, %v726_v15  ;;  %v773_v5 = vld [vmem:[%s11453_s18 + $0xca0] sm:$0xff] }
 0x137   : > { %6722 = vmatpush1.bf16.msra.mxu0 %v9661_v25  ;;  %7050 = vmatpush1.bf16.msra.mxu1 %v9663_v26  ;;  %v9717_v25 = vcombine.low %v721_v12, %v725_v13  ;;  %v9719_v26 = vcombine.low %v722_v14, %v726_v15  ;;  %v777_v13 = vld [vmem:[%s11453_s18 + $0xcc0] sm:$0xff]  ;;  %v778_v15 = vld [vmem:[%s11453_s18 + $0xcc8] sm:$0xff] }
 0x138   : > { %6723 = vmatprep.subr.bf16.mxu0 %v9670_v27  ;;  %7051 = vmatprep.subr.bf16.mxu1 %v9672_v28  ;;  %v9726_v27 = vcombine.high %v729_v20, %v733_v21  ;;  %v9728_v28 = vcombine.high %v730_v22, %v734_v23  ;;  %v781_v14 = vld [vmem:[%s11453_s18 + $0xce0] sm:$0xff] }
 0x13b   : > { %6724 = vmatpush1.bf16.msra.mxu0 %v9669_v0  ;;  %7052 = vmatpush1.bf16.msra.mxu1 %v9671_v34  ;;  %v9725_v0 = vcombine.low %v729_v20, %v733_v21  ;;  %v9727_v34 = vcombine.low %v730_v22, %v734_v23  ;;  %v785_v21 = vld [vmem:[%s11453_s18 + $0xd00] sm:$0xff]  ;;  %v786_v23 = vld [vmem:[%s11453_s18 + $0xd08] sm:$0xff] }
 0x13c   : > { %6725 = vmatprep.subr.bf16.mxu0 %v9678_v35  ;;  %7053 = vmatprep.subr.bf16.mxu1 %v9680_v36  ;;  %v9734_v35 = vcombine.high %v737_v29, %v741_v60  ;;  %v9736_v36 = vcombine.high %v738_v31, %v742_v32  ;;  %v789_v22 = vld [vmem:[%s11453_s18 + $0xd20] sm:$0xff] }
 0x13f   : > { %6726 = vmatpush1.bf16.msra.mxu0 %v9677_v42  ;;  %7054 = vmatpush1.bf16.msra.mxu1 %v9679_v43  ;;  %v9733_v42 = vcombine.low %v737_v29, %v741_v60  ;;  %v9735_v43 = vcombine.low %v738_v31, %v742_v32  ;;  %v793_v60 = vld [vmem:[%s11453_s18 + $0xd40] sm:$0xff]  ;;  %v794_v32 = vld [vmem:[%s11453_s18 + $0xd48] sm:$0xff] }
 0x140   : > { %6727 = vmatprep.subr.bf16.mxu0 %v9686_v44  ;;  %7055 = vmatprep.subr.bf16.mxu1 %v9688_v46  ;;  %v9742_v44 = vcombine.high %v745_v37, %v749_v38  ;;  %v9744_v46 = vcombine.high %v746_v40, %v750_v41  ;;  %v797_v31 = vld [vmem:[%s11453_s18 + $0xd60] sm:$0xff] }
 0x143   : > { %6728 = vmatpush1.bf16.msra.mxu0 %v9685_v52  ;;  %7056 = vmatpush1.bf16.msra.mxu1 %v9687_v53  ;;  %v9741_v52 = vcombine.low %v745_v37, %v749_v38  ;;  %v9743_v53 = vcombine.low %v746_v40, %v750_v41  ;;  %v801_v38 = vld [vmem:[%s11453_s18 + $0xd80] sm:$0xff]  ;;  %v802_v41 = vld [vmem:[%s11453_s18 + $0xd88] sm:$0xff] }
 0x144   : > { %6729 = vmatprep.subr.bf16.mxu0 %v9694_v55  ;;  %7057 = vmatprep.subr.bf16.mxu1 %v9696_v56  ;;  %v9750_v55 = vcombine.high %v753_v47, %v757_v48  ;;  %v9752_v56 = vcombine.high %v754_v50, %v758_v51  ;;  %v805_v40 = vld [vmem:[%s11453_s18 + $0xda0] sm:$0xff] }
 0x147   : > { %6730 = vmatpush1.bf16.msra.mxu0 %v9693_v62  ;;  %7058 = vmatpush1.bf16.msra.mxu1 %v9695_v63  ;;  %v766_v62 = vld [vmem:[%s11453_s18 + $0xc68] sm:$0xff]  ;;  %v9749_v63 = vcombine.low %v753_v47, %v757_v48  ;;  %v809_v48 = vld [vmem:[%s11453_s18 + $0xdc0] sm:$0xff] }
 0x148   : > { %6731 = vmatprep.subr.bf16.mxu0 %v9702_v1  ;;  %7059 = vmatprep.subr.bf16.mxu1 %v9704_v2  ;;  %v9751_v1 = vcombine.low %v754_v50, %v758_v51  ;;  %v9758_v2 = vcombine.high %v761_v57, %v765_v58  ;;  %v9760_v3 = vcombine.high %v762_v61, %v766_v62  ;;  %v813_v50 = vld [vmem:[%s11453_s18 + $0xde0] sm:$0xff]  ;;  %v810_v51 = vld [vmem:[%s11453_s18 + $0xdc8] sm:$0xff] }
 0x14b   : > { %6732 = vmatpush1.bf16.msra.mxu0 %v9701_v7  ;;  %7060 = vmatpush1.bf16.msra.mxu1 %v9703_v8  ;;  %v774_v7 = vld [vmem:[%s11453_s18 + $0xca8] sm:$0xff]  ;;  %v9757_v8 = vcombine.low %v761_v57, %v765_v58  ;;  %v817_v58 = vld [vmem:[%s11453_s18 + $0xe00] sm:$0xff] }
 0x14c   : > { %6733 = vmatprep.subr.bf16.mxu0 %v9710_v9  ;;  %7061 = vmatprep.subr.bf16.mxu1 %v9712_v11  ;;  %v9759_v9 = vcombine.low %v762_v61, %v766_v62  ;;  %v9766_v11 = vcombine.high %v769_v4, %v773_v5  ;;  %v9768_v12 = vcombine.high %v770_v30, %v774_v7  ;;  %v821_v61 = vld [vmem:[%s11453_s18 + $0xe20] sm:$0xff]  ;;  %v818_v62 = vld [vmem:[%s11453_s18 + $0xe08] sm:$0xff] }
 0x14f   : > { %6734 = vmatpush1.bf16.msra.mxu0 %v9709_v16  ;;  %7062 = vmatpush1.bf16.msra.mxu1 %v9711_v17  ;;  %v782_v16 = vld [vmem:[%s11453_s18 + $0xce8] sm:$0xff]  ;;  %v9765_v17 = vcombine.low %v769_v4, %v773_v5  ;;  %v825_v5 = vld [vmem:[%s11453_s18 + $0xe40] sm:$0xff] }
 0x150   : > { %6735 = vmatprep.subr.bf16.mxu0 %v9718_v18  ;;  %7063 = vmatprep.subr.bf16.mxu1 %v9720_v19  ;;  %v9767_v18 = vcombine.low %v770_v30, %v774_v7  ;;  %v9774_v19 = vcombine.high %v777_v13, %v781_v14  ;;  %v9776_v20 = vcombine.high %v778_v15, %v782_v16  ;;  %v829_v30 = vld [vmem:[%s11453_s18 + $0xe60] sm:$0xff]  ;;  %v826_v7 = vld [vmem:[%s11453_s18 + $0xe48] sm:$0xff] }
 0x153   : > { %6736 = vmatpush1.bf16.msra.mxu0 %v9717_v25  ;;  %7064 = vmatpush1.bf16.msra.mxu1 %v9719_v26  ;;  %v790_v25 = vld [vmem:[%s11453_s18 + $0xd28] sm:$0xff]  ;;  %v9773_v26 = vcombine.low %v777_v13, %v781_v14  ;;  %v833_v14 = vld [vmem:[%s11453_s18 + $0xe80] sm:$0xff] }
 0x154   : > { %6737 = vmatprep.subr.bf16.mxu0 %v9726_v27  ;;  %7065 = vmatprep.subr.bf16.mxu1 %v9728_v28  ;;  %v9775_v27 = vcombine.low %v778_v15, %v782_v16  ;;  %v9782_v28 = vcombine.high %v785_v21, %v789_v22  ;;  %v9784_v29 = vcombine.high %v786_v23, %v790_v25  ;;  %v837_v15 = vld [vmem:[%s11453_s18 + $0xea0] sm:$0xff]  ;;  %v834_v16 = vld [vmem:[%s11453_s18 + $0xe88] sm:$0xff] }
 0x157   : > { %6738 = vmatpush1.bf16.msra.mxu0 %v9725_v0  ;;  %7066 = vmatpush1.bf16.msra.mxu1 %v9727_v34  ;;  %v798_v0 = vld [vmem:[%s11453_s18 + $0xd68] sm:$0xff]  ;;  %v9781_v34 = vcombine.low %v785_v21, %v789_v22  ;;  %v841_v22 = vld [vmem:[%s11453_s18 + $0xec0] sm:$0xff] }
 0x158   : > { %6739 = vmatprep.subr.bf16.mxu0 %v9734_v35  ;;  %7067 = vmatprep.subr.bf16.mxu1 %v9736_v36  ;;  %v9783_v35 = vcombine.low %v786_v23, %v790_v25  ;;  %v9790_v36 = vcombine.high %v793_v60, %v797_v31  ;;  %v9792_v37 = vcombine.high %v794_v32, %v798_v0  ;;  %v845_v23 = vld [vmem:[%s11453_s18 + $0xee0] sm:$0xff]  ;;  %v842_v25 = vld [vmem:[%s11453_s18 + $0xec8] sm:$0xff] }
 0x15b   : > { %6740 = vmatpush1.bf16.msra.mxu0 %v9733_v42  ;;  %7068 = vmatpush1.bf16.msra.mxu1 %v9735_v43  ;;  %v806_v42 = vld [vmem:[%s11453_s18 + $0xda8] sm:$0xff]  ;;  %v9789_v43 = vcombine.low %v793_v60, %v797_v31  ;;  %v849_v31 = vld [vmem:[%s11453_s18 + $0xf00] sm:$0xff] }
 0x15c   : > { %6741 = vmatprep.subr.bf16.mxu0 %v9742_v44  ;;  %7069 = vmatprep.subr.bf16.mxu1 %v9744_v46  ;;  %v9791_v44 = vcombine.low %v794_v32, %v798_v0  ;;  %v9798_v46 = vcombine.high %v801_v38, %v805_v40  ;;  %v9800_v47 = vcombine.high %v802_v41, %v806_v42  ;;  %v853_v32 = vld [vmem:[%s11453_s18 + $0xf20] sm:$0xff]  ;;  %v850_v0 = vld [vmem:[%s11453_s18 + $0xf08] sm:$0xff] }
 0x15f   : > { %6742 = vmatpush1.bf16.msra.mxu0 %v9741_v52  ;;  %7070 = vmatpush1.bf16.msra.mxu1 %v9743_v53  ;;  %v814_v52 = vld [vmem:[%s11453_s18 + $0xde8] sm:$0xff]  ;;  %v9797_v53 = vcombine.low %v801_v38, %v805_v40  ;;  %v857_v40 = vld [vmem:[%s11453_s18 + $0xf40] sm:$0xff] }
 0x160   : > { %6752 = vmatprep.subr.bf16.mxu0 %v9750_v55  ;;  %7080 = vmatprep.subr.bf16.mxu1 %v9752_v56  ;;  %v9799_v55 = vcombine.low %v802_v41, %v806_v42  ;;  %v9806_v56 = vcombine.high %v809_v48, %v813_v50  ;;  %v9808_v57 = vcombine.high %v810_v51, %v814_v52  ;;  %v861_v41 = vld [vmem:[%s11453_s18 + $0xf60] sm:$0xff]  ;;  %v858_v42 = vld [vmem:[%s11453_s18 + $0xf48] sm:$0xff] }
 0x162   : > { %6744 = vmatmul.mubr.bf16.vlgmr.msra.gmra.mrb[0].mxu0 %v11724_v59  ;;  %7072 = vmatmul.mubr.bf16.vlgmr.msra.gmra.mrb[0].mxu1 %v11724_v59 }
 0x163   : > { %6753 = vmatpush1.bf16.msra.mxu0 %v9749_v63  ;;  %7081 = vmatpush1.bf16.msra.mxu1 %v9751_v1  ;;  %v822_v63 = vld [vmem:[%s11453_s18 + $0xe28] sm:$0xff]  ;;  %v9805_v1 = vcombine.low %v809_v48, %v813_v50  ;;  %v865_v50 = vld [vmem:[%s11453_s18 + $0xf80] sm:$0xff] }
 0x164   : > { %6754 = vmatprep.subr.bf16.mxu0 %v9758_v2  ;;  %7082 = vmatprep.subr.bf16.mxu1 %v9760_v3  ;;  %v9807_v2 = vcombine.low %v810_v51, %v814_v52  ;;  %v9814_v3 = vcombine.high %v817_v58, %v821_v61  ;;  %v9816_v4 = vcombine.high %v818_v62, %v822_v63  ;;  %v869_v51 = vld [vmem:[%s11453_s18 + $0xfa0] sm:$0xff]  ;;  %v866_v52 = vld [vmem:[%s11453_s18 + $0xf88] sm:$0xff] }
 0x165   : > { %6784 = vmatprep.mubr.bf16.mxu0 %v11732_v6  ;;  %7112 = vmatprep.mubr.bf16.mxu1 %v11732_v6 }
 0x167   : > { %6755 = vmatpush1.bf16.msra.mxu0 %v9757_v8  ;;  %7083 = vmatpush1.bf16.msra.mxu1 %v9759_v9  ;;  %v830_v8 = vld [vmem:[%s11453_s18 + $0xe68] sm:$0xff]  ;;  %v9813_v9 = vcombine.low %v817_v58, %v821_v61  ;;  %v873_v61 = vld [vmem:[%s11453_s18 + $0xfc0] sm:$0xff] }
 0x168   : > { %6756 = vmatprep.subr.bf16.mxu0 %v9766_v11  ;;  %7084 = vmatprep.subr.bf16.mxu1 %v9768_v12  ;;  %v9815_v11 = vcombine.low %v818_v62, %v822_v63  ;;  %v9822_v12 = vcombine.high %v825_v5, %v829_v30  ;;  %v9824_v13 = vcombine.high %v826_v7, %v830_v8  ;;  %v877_v62 = vld [vmem:[%s11453_s18 + $0xfe0] sm:$0xff]  ;;  %v874_v63 = vld [vmem:[%s11453_s18 + $0xfc8] sm:$0xff] }
 0x16b   : > { %6757 = vmatpush1.bf16.msra.mxu0 %v9765_v17  ;;  %7085 = vmatpush1.bf16.msra.mxu1 %v9767_v18  ;;  %v838_v17 = vld [vmem:[%s11453_s18 + $0xea8] sm:$0xff]  ;;  %v9821_v18 = vcombine.low %v825_v5, %v829_v30  ;;  %v9870_v5 = vcombine.high %v873_v61, %v877_v62 }
 0x16c   : > { %6758 = vmatprep.subr.bf16.mxu0 %v9774_v19  ;;  %7086 = vmatprep.subr.bf16.mxu1 %v9776_v20  ;;  %v9823_v19 = vcombine.low %v826_v7, %v830_v8  ;;  %v9830_v20 = vcombine.high %v833_v14, %v837_v15  ;;  %v9832_v21 = vcombine.high %v834_v16, %v838_v17  ;;  %v881_v7 = vld [vmem:[%s11453_s18 + $0x1000] sm:$0xff] }
 0x16d   : > { %v885_v8 = vld [vmem:[%s11453_s18 + $0x1020] sm:$0xff] }
 0x16f   : > { %6759 = vmatpush1.bf16.msra.mxu0 %v9773_v26  ;;  %7087 = vmatpush1.bf16.msra.mxu1 %v9775_v27  ;;  %v846_v26 = vld [vmem:[%s11453_s18 + $0xee8] sm:$0xff]  ;;  %v9829_v27 = vcombine.low %v833_v14, %v837_v15  ;;  %v9878_v15 = vcombine.high %v881_v7, %v885_v8 }
 0x170   : > { %6760 = vmatprep.subr.bf16.mxu0 %v9782_v28  ;;  %7088 = vmatprep.subr.bf16.mxu1 %v9784_v29  ;;  %v9831_v28 = vcombine.low %v834_v16, %v838_v17  ;;  %v9838_v29 = vcombine.high %v841_v22, %v845_v23  ;;  %v9840_v60 = vcombine.high %v842_v25, %v846_v26  ;;  %v889_v17 = vld [vmem:[%s11453_s18 + $0x1040] sm:$0xff] }
 0x173   : > { %6761 = vmatpush1.bf16.msra.mxu0 %v9781_v34  ;;  %7089 = vmatpush1.bf16.msra.mxu1 %v9783_v35  ;;  %v854_v34 = vld [vmem:[%s11453_s18 + $0xf28] sm:$0xff]  ;;  %v9837_v35 = vcombine.low %v841_v22, %v845_v23  ;;  %v9877_v23 = vcombine.low %v881_v7, %v885_v8 }
 0x174   : > { %6762 = vmatprep.subr.bf16.mxu0 %v9790_v36  ;;  %7090 = vmatprep.subr.bf16.mxu1 %v9792_v37  ;;  %v9839_v36 = vcombine.low %v842_v25, %v846_v26  ;;  %v9846_v37 = vcombine.high %v849_v31, %v853_v32  ;;  %v9848_v38 = vcombine.high %v850_v0, %v854_v34  ;;  %v894_v22 = vld [vmem:[%s11453_s18 + $0x1068] sm:$0xff] }
 0x175   : > { %v930_v7 = vld [vmem:[%s11453_s18 + $0x1188] sm:$0xff] }
 0x176   : > { %v934_v8 = vld [vmem:[%s11453_s18 + $0x11a8] sm:$0xff] }
 0x177   : > { %6763 = vmatpush1.bf16.msra.mxu0 %v9789_v43  ;;  %7091 = vmatpush1.bf16.msra.mxu1 %v9791_v44  ;;  %v862_v43 = vld [vmem:[%s11453_s18 + $0xf68] sm:$0xff]  ;;  %v9845_v44 = vcombine.low %v849_v31, %v853_v32 }
 0x178   : > { %6764 = vmatprep.subr.bf16.mxu0 %v9798_v46  ;;  %7092 = vmatprep.subr.bf16.mxu1 %v9800_v47  ;;  %v9847_v46 = vcombine.low %v850_v0, %v854_v34  ;;  %v9854_v47 = vcombine.high %v857_v40, %v861_v41  ;;  %v9856_v48 = vcombine.high %v858_v42, %v862_v43  ;;  %v898_v31 = vld [vmem:[%s11453_s18 + $0x1088] sm:$0xff] }
 0x179   : > { %v902_v32 = vld [vmem:[%s11453_s18 + $0x10a8] sm:$0xff] }
 0x17b   : > { %6765 = vmatpush1.bf16.msra.mxu0 %v9797_v53  ;;  %7093 = vmatpush1.bf16.msra.mxu1 %v9799_v55  ;;  %v870_v53 = vld [vmem:[%s11453_s18 + $0xfa8] sm:$0xff]  ;;  %v9853_v55 = vcombine.low %v857_v40, %v861_v41 }
 0x17c   : > { %6766 = vmatprep.subr.bf16.mxu0 %v9806_v56  ;;  %7094 = vmatprep.subr.bf16.mxu1 %v9808_v57  ;;  %v9855_v56 = vcombine.low %v858_v42, %v862_v43  ;;  %v9862_v57 = vcombine.high %v865_v50, %v869_v51  ;;  %v9864_v58 = vcombine.high %v866_v52, %v870_v53  ;;  %v906_v40 = vld [vmem:[%s11453_s18 + $0x10c8] sm:$0xff] }
 0x17d   : > { %v910_v41 = vld [vmem:[%s11453_s18 + $0x10e8] sm:$0xff]  ;;  %v9895_v43 = vcombine.low %v898_v31, %v902_v32 }
 0x17f   : > { %6767 = vmatpush1.bf16.msra.mxu0 %v9805_v1  ;;  %7095 = vmatpush1.bf16.msra.mxu1 %v9807_v2  ;;  %v878_v1 = vld [vmem:[%s11453_s18 + $0xfe8] sm:$0xff]  ;;  %v11793_v2 = vld [vmem:[%s11471_s29 + $0x8] sm:$0xff] }
 0x180   : > { %6768 = vmatprep.subr.bf16.mxu0 %v9814_v3  ;;  %7096 = vmatprep.subr.bf16.mxu1 %v9816_v4  ;;  %v9861_v3 = vcombine.low %v865_v50, %v869_v51  ;;  %v9863_v4 = vcombine.low %v866_v52, %v870_v53  ;;  %v9872_v30 = vcombine.high %v874_v63, %v878_v1  ;;  %v914_v50 = vld [vmem:[%s11453_s18 + $0x1108] sm:$0xff] }
 0x181   : > { %v9871_v14 = vcombine.low %v874_v63, %v878_v1  ;;  %v918_v51 = vld [vmem:[%s11453_s18 + $0x1128] sm:$0xff]  ;;  %v9903_v53 = vcombine.low %v906_v40, %v910_v41 }
 0x182   : > { %v9911_v1 = vcombine.low %v914_v50, %v918_v51 }
 0x183   : > { %6769 = vmatpush1.bf16.msra.mxu0 %v9813_v9  ;;  %7097 = vmatpush1.bf16.msra.mxu1 %v9815_v11  ;;  %v11799_v9 = vrot.slane %v11793_v2, %v11504_v54  ;;  %v882_v11 = vld [vmem:[%s11453_s18 + $0x1008] sm:$0xff] }
 0x184   : > { %6770 = vmatprep.subr.bf16.mxu0 %v9822_v12  ;;  %7098 = vmatprep.subr.bf16.mxu1 %v9824_v13  ;;  %v886_v12 = vld [vmem:[%s11453_s18 + $0x1028] sm:$0xff]  ;;  %v9869_v13 = vcombine.low %v873_v61, %v877_v62 }
 0x185   : > { %v9880_v16 = vcombine.high %v882_v11, %v886_v12  ;;  %v9879_v25 = vcombine.low %v882_v11, %v886_v12  ;;  %v922_v61 = vld [vmem:[%s11453_s18 + $0x1148] sm:$0xff] }
 0x186   : > { %v926_v62 = vld [vmem:[%s11453_s18 + $0x1168] sm:$0xff] }
 0x187   : > { %6771 = vmatpush1.bf16.msra.mxu0 %v9821_v18  ;;  %7099 = vmatpush1.bf16.msra.mxu1 %v9823_v19  ;;  %v893_v18 = vld [vmem:[%s11453_s18 + $0x1060] sm:$0xff]  ;;  %v1459_v19 = vcombine.high %v11799_v9, %v11799_v9  ;;  %v9919_v12 = vcombine.low %v922_v61, %v926_v62 }
 0x188   : > { %6772 = vmatprep.subr.bf16.mxu0 %v9830_v20  ;;  %7100 = vmatprep.subr.bf16.mxu1 %v9832_v21  ;;  %v11809_v20 = vcombine.high %v11724_v59, %v11724_v59  ;;  %v890_v21 = vld [vmem:[%s11453_s18 + $0x1048] sm:$0xff]  ;;  %v9886_v26 = vcombine.high %v889_v17, %v893_v18  ;;  %v9885_v0 = vcombine.low %v889_v17, %v893_v18 }
 0x189   : > { %v9887_v34 = vcombine.low %v890_v21, %v894_v22  ;;  %v938_v17 = vld [vmem:[%s11453_s18 + $0x11c8] sm:$0xff] }
 0x18a   : > { %v942_v18 = vld [vmem:[%s11453_s18 + $0x11e8] sm:$0xff] }
 0x18b   : > { %6773 = vmatpush1.bf16.msra.mxu0 %v9829_v27  ;;  %7101 = vmatpush1.bf16.msra.mxu1 %v9831_v28  ;;  %v9888_v27 = vcombine.high %v890_v21, %v894_v22  ;;  %v897_v28 = vld [vmem:[%s11453_s18 + $0x1080] sm:$0xff]  ;;  %v9927_v21 = vcombine.low %v930_v7, %v934_v8 }
 0x18c   : > { %6774 = vmatprep.subr.bf16.mxu0 %v9838_v29  ;;  %7102 = vmatprep.subr.bf16.mxu1 %v9840_v60  ;;  %v901_v29 = vld [vmem:[%s11453_s18 + $0x10a0] sm:$0xff]  ;;  %v11816_v60 = vrot.slane %v1459_v19, %v11504_v54 }
 0x18d   : > { %v9893_v42 = vcombine.low %v897_v28, %v901_v29 }
 0x18f   : > { %6775 = vmatpush1.bf16.msra.mxu0 %v9837_v35  ;;  %7103 = vmatpush1.bf16.msra.mxu1 %v9839_v36  ;;  %v9894_v35 = vcombine.high %v897_v28, %v901_v29  ;;  %v9896_v36 = vcombine.high %v898_v31, %v902_v32  ;;  %v950_v28 = vld [vmem:[%s11453_s18 + $0x1228] sm:$0xff]  ;;  %v9935_v31 = vcombine.low %v938_v17, %v942_v18 }
 0x190   : > { %6776 = vmatprep.subr.bf16.mxu0 %v9846_v37  ;;  %7104 = vmatprep.subr.bf16.mxu1 %v9848_v38  ;;  %v905_v37 = vld [vmem:[%s11453_s18 + $0x10c0] sm:$0xff] }
 0x191   : > { %v909_v38 = vld [vmem:[%s11453_s18 + $0x10e0] sm:$0xff] }
 0x192   : > { %v9901_v52 = vcombine.low %v905_v37, %v909_v38 }
 0x193   : > { %6777 = vmatpush1.bf16.msra.mxu0 %v9845_v44  ;;  %7105 = vmatpush1.bf16.msra.mxu1 %v9847_v46  ;;  %v9902_v44 = vcombine.high %v905_v37, %v909_v38  ;;  %v9904_v46 = vcombine.high %v906_v40, %v910_v41  ;;  %v958_v37 = vld [vmem:[%s11453_s18 + $0x1268] sm:$0xff] }
 0x194   : > { %6778 = vmatprep.subr.bf16.mxu0 %v9854_v47  ;;  %7106 = vmatprep.subr.bf16.mxu1 %v9856_v48  ;;  %v913_v47 = vld [vmem:[%s11453_s18 + $0x1100] sm:$0xff] }
 0x195   : > { %v917_v48 = vld [vmem:[%s11453_s18 + $0x1120] sm:$0xff] }
 0x196   : > { %v9909_v63 = vcombine.low %v913_v47, %v917_v48 }
 0x197   : > { %6779 = vmatpush1.bf16.msra.mxu0 %v9853_v55  ;;  %7107 = vmatpush1.bf16.msra.mxu1 %v9855_v56  ;;  %v9910_v55 = vcombine.high %v913_v47, %v917_v48  ;;  %v9912_v56 = vcombine.high %v914_v50, %v918_v51  ;;  %v966_v47 = vld [vmem:[%s11453_s18 + $0x12a8] sm:$0xff] }
 0x198   : > { %6780 = vmatprep.subr.bf16.mxu0 %v9862_v57  ;;  %7108 = vmatprep.subr.bf16.mxu1 %v9864_v58  ;;  %v921_v57 = vld [vmem:[%s11453_s18 + $0x1140] sm:$0xff] }
 0x199   : > { %v925_v58 = vld [vmem:[%s11453_s18 + $0x1160] sm:$0xff] }
 0x19a   : > { %v9917_v11 = vcombine.low %v921_v57, %v925_v58 }
 0x19b   : > { %6781 = vmatpush1.bf16.msra.mxu0 %v9861_v3  ;;  %7109 = vmatpush1.bf16.msra.mxu1 %v9863_v4  ;;  %v9918_v3 = vcombine.high %v921_v57, %v925_v58  ;;  %v9920_v4 = vcombine.high %v922_v61, %v926_v62  ;;  %v974_v57 = vld [vmem:[%s11453_s18 + $0x12e8] sm:$0xff] }
 0x19c   : > { %6782 = vmatprep.subr.bf16.mxu0 %v9870_v5  ;;  %7110 = vmatprep.subr.bf16.mxu1 %v9872_v30  ;;  %v929_v5 = vld [vmem:[%s11453_s18 + $0x1180] sm:$0xff] }
 0x19d   : > { %v933_v30 = vld [vmem:[%s11453_s18 + $0x11a0] sm:$0xff] }
 0x19e   : > { %v9925_v19 = vcombine.low %v929_v5, %v933_v30 }
 0x19f   : > { %6783 = vmatpush1.bf16.msra.mxu0 %v9869_v13  ;;  %7111 = vmatpush1.bf16.msra.mxu1 %v9871_v14  ;;  %v9926_v13 = vcombine.high %v929_v5, %v933_v30  ;;  %v9928_v14 = vcombine.high %v930_v7, %v934_v8  ;;  %v982_v5 = vld [vmem:[%s11453_s18 + $0x1328] sm:$0xff] }
 0x1a0   : > { %6793 = vmatprep.subr.bf16.mxu0 %v9878_v15  ;;  %7121 = vmatprep.subr.bf16.mxu1 %v9880_v16  ;;  %v937_v15 = vld [vmem:[%s11453_s18 + $0x11c0] sm:$0xff] }
 0x1a1   : > { %v941_v16 = vld [vmem:[%s11453_s18 + $0x11e0] sm:$0xff] }
 0x1a2   : > { %6785 = vmatmul.mubr.bf16.vlgmr.msra.gmra.mrb[0].mxu0 %v11809_v20  ;;  %7113 = vmatmul.mubr.bf16.vlgmr.msra.gmra.mrb[0].mxu1 %v11809_v20  ;;  %v9934_v22 = vcombine.high %v937_v15, %v941_v16  ;;  %v9933_v29 = vcombine.low %v937_v15, %v941_v16  ;;  %v990_v15 = vld [vmem:[%s11453_s18 + $0x1368] sm:$0xff] }
 0x1a3   : > { %6794 = vmatpush1.bf16.msra.mxu0 %v9877_v23  ;;  %7122 = vmatpush1.bf16.msra.mxu1 %v9879_v25  ;;  %v9936_v23 = vcombine.high %v938_v17, %v942_v18  ;;  %v945_v25 = vld [vmem:[%s11453_s18 + $0x1200] sm:$0xff] }
 0x1a4   : > { %6795 = vmatprep.subr.bf16.mxu0 %v9886_v26  ;;  %7123 = vmatprep.subr.bf16.mxu1 %v9888_v27  ;;  %v949_v26 = vld [vmem:[%s11453_s18 + $0x1220] sm:$0xff]  ;;  %v946_v27 = vld [vmem:[%s11453_s18 + $0x1208] sm:$0xff] }
 0x1a5   : > { %6825 = vmatprep.mubr.bf16.mxu0 %v11816_v60  ;;  %7153 = vmatprep.mubr.bf16.mxu1 %v11816_v60  ;;  %v9942_v32 = vcombine.high %v945_v25, %v949_v26  ;;  %v9941_v38 = vcombine.low %v945_v25, %v949_v26  ;;  %v9943_v40 = vcombine.low %v946_v27, %v950_v28  ;;  %v998_v25 = vld [vmem:[%s11453_s18 + $0x13a8] sm:$0xff] }
 0x1a7   : > { %6796 = vmatpush1.bf16.msra.mxu0 %v9885_v0  ;;  %7124 = vmatpush1.bf16.msra.mxu1 %v9887_v34  ;;  %v9944_v0 = vcombine.high %v946_v27, %v950_v28  ;;  %v953_v34 = vld [vmem:[%s11453_s18 + $0x1240] sm:$0xff] }
 0x1a8   : > { %6797 = vmatprep.subr.bf16.mxu0 %v9894_v35  ;;  %7125 = vmatprep.subr.bf16.mxu1 %v9896_v36  ;;  %v957_v35 = vld [vmem:[%s11453_s18 + $0x1260] sm:$0xff]  ;;  %v954_v36 = vld [vmem:[%s11453_s18 + $0x1248] sm:$0xff] }
 0x1a9   : > { %v9950_v41 = vcombine.high %v953_v34, %v957_v35  ;;  %v9949_v48 = vcombine.low %v953_v34, %v957_v35  ;;  %v9951_v50 = vcombine.low %v954_v36, %v958_v37  ;;  %v1006_v34 = vld [vmem:[%s11453_s18 + $0x13e8] sm:$0xff] }
 0x1ab   : > { %6798 = vmatpush1.bf16.msra.mxu0 %v9893_v42  ;;  %7126 = vmatpush1.bf16.msra.mxu1 %v9895_v43  ;;  %v9952_v42 = vcombine.high %v954_v36, %v958_v37  ;;  %v961_v43 = vld [vmem:[%s11453_s18 + $0x1280] sm:$0xff] }
 0x1ac   : > { %6799 = vmatprep.subr.bf16.mxu0 %v9902_v44  ;;  %7127 = vmatprep.subr.bf16.mxu1 %v9904_v46  ;;  %v965_v44 = vld [vmem:[%s11453_s18 + $0x12a0] sm:$0xff]  ;;  %v962_v46 = vld [vmem:[%s11453_s18 + $0x1288] sm:$0xff] }
 0x1ad   : > { %v9958_v51 = vcombine.high %v961_v43, %v965_v44  ;;  %v9957_v58 = vcombine.low %v961_v43, %v965_v44  ;;  %v9959_v61 = vcombine.low %v962_v46, %v966_v47  ;;  %v1014_v43 = vld [vmem:[%s11453_s18 + $0x1428] sm:$0xff] }
 0x1af   : > { %6800 = vmatpush1.bf16.msra.mxu0 %v9901_v52  ;;  %7128 = vmatpush1.bf16.msra.mxu1 %v9903_v53  ;;  %v9960_v52 = vcombine.high %v962_v46, %v966_v47  ;;  %v969_v53 = vld [vmem:[%s11453_s18 + $0x12c0] sm:$0xff] }
 0x1b0   : > { %6801 = vmatprep.subr.bf16.mxu0 %v9910_v55  ;;  %7129 = vmatprep.subr.bf16.mxu1 %v9912_v56  ;;  %v973_v55 = vld [vmem:[%s11453_s18 + $0x12e0] sm:$0xff]  ;;  %v970_v56 = vld [vmem:[%s11453_s18 + $0x12c8] sm:$0xff] }
 0x1b1   : > { %v9966_v62 = vcombine.high %v969_v53, %v973_v55  ;;  %v9965_v30 = vcombine.low %v969_v53, %v973_v55  ;;  %v9967_v7 = vcombine.low %v970_v56, %v974_v57  ;;  %v1018_v53 = vld [vmem:[%s11453_s18 + $0x1448] sm:$0xff] }
 0x1b2   : > { %v1022_v55 = vld [vmem:[%s11453_s18 + $0x1468] sm:$0xff] }
 0x1b3   : > { %6802 = vmatpush1.bf16.msra.mxu0 %v9909_v63  ;;  %7130 = vmatpush1.bf16.msra.mxu1 %v9911_v1  ;;  %v9968_v63 = vcombine.high %v970_v56, %v974_v57  ;;  %v977_v1 = vld [vmem:[%s11453_s18 + $0x1300] sm:$0xff] }
 0x1b4   : > { %6803 = vmatprep.subr.bf16.mxu0 %v9918_v3  ;;  %7131 = vmatprep.subr.bf16.mxu1 %v9920_v4  ;;  %v981_v3 = vld [vmem:[%s11453_s18 + $0x1320] sm:$0xff]  ;;  %v978_v4 = vld [vmem:[%s11453_s18 + $0x1308] sm:$0xff] }
 0x1b5   : > { %v9974_v8 = vcombine.high %v977_v1, %v981_v3  ;;  %v9973_v16 = vcombine.low %v977_v1, %v981_v3  ;;  %v9975_v17 = vcombine.low %v978_v4, %v982_v5  ;;  %v11892_v1 = vcombine.high %v11816_v60, %v11816_v60  ;;  %v1030_v3 = vld [vmem:[%s11453_s18 + $0x14a8] sm:$0xff] }
 0x1b7   : > { %6804 = vmatpush1.bf16.msra.mxu0 %v9917_v11  ;;  %7132 = vmatpush1.bf16.msra.mxu1 %v9919_v12  ;;  %v9976_v11 = vcombine.high %v978_v4, %v982_v5  ;;  %v985_v12 = vld [vmem:[%s11453_s18 + $0x1340] sm:$0xff]  ;;  %v10015_v5 = vcombine.low %v1018_v53, %v1022_v55 }
 0x1b8   : > { %6805 = vmatprep.subr.bf16.mxu0 %v9926_v13  ;;  %7133 = vmatprep.subr.bf16.mxu1 %v9928_v14  ;;  %v989_v13 = vld [vmem:[%s11453_s18 + $0x1360] sm:$0xff]  ;;  %v986_v14 = vld [vmem:[%s11453_s18 + $0x1348] sm:$0xff] }
 0x1b9   : > { %v9982_v18 = vcombine.high %v985_v12, %v989_v13  ;;  %v9981_v26 = vcombine.low %v985_v12, %v989_v13  ;;  %v9983_v27 = vcombine.low %v986_v14, %v990_v15  ;;  %v1034_v12 = vld [vmem:[%s11453_s18 + $0x14c8] sm:$0xff] }
 0x1ba   : > { %v1038_v13 = vld [vmem:[%s11453_s18 + $0x14e8] sm:$0xff] }
 0x1bb   : > { %6806 = vmatpush1.bf16.msra.mxu0 %v9925_v19  ;;  %7134 = vmatpush1.bf16.msra.mxu1 %v9927_v21  ;;  %v9984_v19 = vcombine.high %v986_v14, %v990_v15  ;;  %v993_v21 = vld [vmem:[%s11453_s18 + $0x1380] sm:$0xff] }
 0x1bc   : > { %6807 = vmatprep.subr.bf16.mxu0 %v9934_v22  ;;  %7135 = vmatprep.subr.bf16.mxu1 %v9936_v23  ;;  %v997_v22 = vld [vmem:[%s11453_s18 + $0x13a0] sm:$0xff]  ;;  %v994_v23 = vld [vmem:[%s11453_s18 + $0x1388] sm:$0xff] }
 0x1bd   : > { %v9990_v28 = vcombine.high %v993_v21, %v997_v22  ;;  %v9989_v35 = vcombine.low %v993_v21, %v997_v22  ;;  %v9991_v36 = vcombine.low %v994_v23, %v998_v25  ;;  %v1042_v21 = vld [vmem:[%s11453_s18 + $0x1508] sm:$0xff] }
 0x1be   : > { %v1046_v22 = vld [vmem:[%s11453_s18 + $0x1528] sm:$0xff] }
 0x1bf   : > { %6808 = vmatpush1.bf16.msra.mxu0 %v9933_v29  ;;  %7136 = vmatpush1.bf16.msra.mxu1 %v9935_v31  ;;  %v9992_v29 = vcombine.high %v994_v23, %v998_v25  ;;  %v1001_v31 = vld [vmem:[%s11453_s18 + $0x13c0] sm:$0xff]  ;;  %v10031_v25 = vcombine.low %v1034_v12, %v1038_v13 }
 0x1c0   : > { %6809 = vmatprep.subr.bf16.mxu0 %v9942_v32  ;;  %7137 = vmatprep.subr.bf16.mxu1 %v9944_v0  ;;  %v1005_v32 = vld [vmem:[%s11453_s18 + $0x13e0] sm:$0xff]  ;;  %v1002_v0 = vld [vmem:[%s11453_s18 + $0x13c8] sm:$0xff] }
 0x1c1   : > { %v9998_v37 = vcombine.high %v1001_v31, %v1005_v32  ;;  %v9997_v44 = vcombine.low %v1001_v31, %v1005_v32  ;;  %v9999_v46 = vcombine.low %v1002_v0, %v1006_v34  ;;  %v1050_v31 = vld [vmem:[%s11453_s18 + $0x1548] sm:$0xff] }
 0x1c2   : > { %v1054_v32 = vld [vmem:[%s11453_s18 + $0x1568] sm:$0xff] }
 0x1c3   : > { %6810 = vmatpush1.bf16.msra.mxu0 %v9941_v38  ;;  %7138 = vmatpush1.bf16.msra.mxu1 %v9943_v40  ;;  %v10000_v38 = vcombine.high %v1002_v0, %v1006_v34  ;;  %v1009_v40 = vld [vmem:[%s11453_s18 + $0x1400] sm:$0xff]  ;;  %v10039_v34 = vcombine.low %v1042_v21, %v1046_v22 }
 0x1c4   : > { %6811 = vmatprep.subr.bf16.mxu0 %v9950_v41  ;;  %7139 = vmatprep.subr.bf16.mxu1 %v9952_v42  ;;  %v1013_v41 = vld [vmem:[%s11453_s18 + $0x1420] sm:$0xff]  ;;  %v1010_v42 = vld [vmem:[%s11453_s18 + $0x1408] sm:$0xff] }
 0x1c5   : > { %v10006_v47 = vcombine.high %v1009_v40, %v1013_v41  ;;  %v10005_v56 = vcombine.low %v1009_v40, %v1013_v41  ;;  %v10007_v57 = vcombine.low %v1010_v42, %v1014_v43  ;;  %v1058_v40 = vld [vmem:[%s11453_s18 + $0x1588] sm:$0xff] }
 0x1c6   : > { %v1062_v41 = vld [vmem:[%s11453_s18 + $0x15a8] sm:$0xff] }
 0x1c7   : > { %6812 = vmatpush1.bf16.msra.mxu0 %v9949_v48  ;;  %7140 = vmatpush1.bf16.msra.mxu1 %v9951_v50  ;;  %v10008_v48 = vcombine.high %v1010_v42, %v1014_v43  ;;  %v1017_v50 = vld [vmem:[%s11453_s18 + $0x1440] sm:$0xff]  ;;  %v10047_v43 = vcombine.low %v1050_v31, %v1054_v32 }
 0x1c8   : > { %6813 = vmatprep.subr.bf16.mxu0 %v9958_v51  ;;  %7141 = vmatprep.subr.bf16.mxu1 %v9960_v52  ;;  %v1021_v51 = vld [vmem:[%s11453_s18 + $0x1460] sm:$0xff]  ;;  %v11884_v52 = vrot.slane %v11799_v9, %v11504_v54  ;;  %v1026_v9 = vld [vmem:[%s11453_s18 + $0x1488] sm:$0xff] }
 0x1c9   : > { %v10013_v4 = vcombine.low %v1017_v50, %v1021_v51  ;;  %v10023_v15 = vcombine.low %v1026_v9, %v1030_v3 }
 0x1cb   : > { %6814 = vmatpush1.bf16.msra.mxu0 %v9957_v58  ;;  %7142 = vmatpush1.bf16.msra.mxu1 %v9959_v61  ;;  %v10014_v58 = vcombine.high %v1017_v50, %v1021_v51  ;;  %v10016_v61 = vcombine.high %v1018_v53, %v1022_v55  ;;  %v1066_v50 = vld [vmem:[%s11453_s18 + $0x15c8] sm:$0xff]  ;;  %v10055_v55 = vcombine.low %v1058_v40, %v1062_v41 }
 0x1cc   : > { %6815 = vmatprep.subr.bf16.mxu0 %v9966_v62  ;;  %7143 = vmatprep.subr.bf16.mxu1 %v9968_v63  ;;  %v1025_v62 = vld [vmem:[%s11453_s18 + $0x1480] sm:$0xff]  ;;  %v1070_v51 = vld [vmem:[%s11453_s18 + $0x15e8] sm:$0xff] }
 0x1cd   : > { %v1029_v63 = vld [vmem:[%s11453_s18 + $0x14a0] sm:$0xff] }
 0x1ce   : > { %v10021_v14 = vcombine.low %v1025_v62, %v1029_v63 }
 0x1cf   : > { %6816 = vmatpush1.bf16.msra.mxu0 %v9965_v30  ;;  %7144 = vmatpush1.bf16.msra.mxu1 %v9967_v7  ;;  %v10022_v30 = vcombine.high %v1025_v62, %v1029_v63  ;;  %v10024_v7 = vcombine.high %v1026_v9, %v1030_v3  ;;  %v1074_v62 = vld [vmem:[%s11453_s18 + $0x1608] sm:$0xff]  ;;  %v10063_v3 = vcombine.low %v1066_v50, %v1070_v51 }
 0x1d0   : > { %6817 = vmatprep.subr.bf16.mxu0 %v9974_v8  ;;  %7145 = vmatprep.subr.bf16.mxu1 %v9976_v11  ;;  %v1033_v8 = vld [vmem:[%s11453_s18 + $0x14c0] sm:$0xff]  ;;  %v1078_v63 = vld [vmem:[%s11453_s18 + $0x1628] sm:$0xff] }
 0x1d1   : > { %v1037_v11 = vld [vmem:[%s11453_s18 + $0x14e0] sm:$0xff] }
 0x1d2   : > { %v10029_v23 = vcombine.low %v1033_v8, %v1037_v11 }
 0x1d3   : > { %6818 = vmatpush1.bf16.msra.mxu0 %v9973_v16  ;;  %7146 = vmatpush1.bf16.msra.mxu1 %v9975_v17  ;;  %v10030_v16 = vcombine.high %v1033_v8, %v1037_v11  ;;  %v10032_v17 = vcombine.high %v1034_v12, %v1038_v13  ;;  %v1082_v8 = vld [vmem:[%s11453_s18 + $0x1648] sm:$0xff]  ;;  %v10071_v13 = vcombine.low %v1074_v62, %v1078_v63 }
 0x1d4   : > { %6819 = vmatprep.subr.bf16.mxu0 %v9982_v18  ;;  %7147 = vmatprep.subr.bf16.mxu1 %v9984_v19  ;;  %v1041_v18 = vld [vmem:[%s11453_s18 + $0x1500] sm:$0xff]  ;;  %v1086_v11 = vld [vmem:[%s11453_s18 + $0x1668] sm:$0xff] }
 0x1d5   : > { %v1045_v19 = vld [vmem:[%s11453_s18 + $0x1520] sm:$0xff] }
 0x1d6   : > { %v10037_v0 = vcombine.low %v1041_v18, %v1045_v19 }
 0x1d7   : > { %6820 = vmatpush1.bf16.msra.mxu0 %v9981_v26  ;;  %7148 = vmatpush1.bf16.msra.mxu1 %v9983_v27  ;;  %v10038_v26 = vcombine.high %v1041_v18, %v1045_v19  ;;  %v10040_v27 = vcombine.high %v1042_v21, %v1046_v22  ;;  %v1090_v18 = vld [vmem:[%s11453_s18 + $0x1688] sm:$0xff]  ;;  %v10079_v22 = vcombine.low %v1082_v8, %v1086_v11 }
 0x1d8   : > { %6821 = vmatprep.subr.bf16.mxu0 %v9990_v28  ;;  %7149 = vmatprep.subr.bf16.mxu1 %v9992_v29  ;;  %v1049_v28 = vld [vmem:[%s11453_s18 + $0x1540] sm:$0xff]  ;;  %v1094_v19 = vld [vmem:[%s11453_s18 + $0x16a8] sm:$0xff] }
 0x1d9   : > { %v1053_v29 = vld [vmem:[%s11453_s18 + $0x1560] sm:$0xff] }
 0x1da   : > { %v10045_v42 = vcombine.low %v1049_v28, %v1053_v29 }
 0x1db   : > { %6822 = vmatpush1.bf16.msra.mxu0 %v9989_v35  ;;  %7150 = vmatpush1.bf16.msra.mxu1 %v9991_v36  ;;  %v10046_v35 = vcombine.high %v1049_v28, %v1053_v29  ;;  %v10048_v36 = vcombine.high %v1050_v31, %v1054_v32  ;;  %v1098_v28 = vld [vmem:[%s11453_s18 + $0x16c8] sm:$0xff]  ;;  %v10087_v32 = vcombine.low %v1090_v18, %v1094_v19 }
 0x1dc   : > { %6823 = vmatprep.subr.bf16.mxu0 %v9998_v37  ;;  %7151 = vmatprep.subr.bf16.mxu1 %v10000_v38  ;;  %v1057_v37 = vld [vmem:[%s11453_s18 + $0x1580] sm:$0xff]  ;;  %v1102_v29 = vld [vmem:[%s11453_s18 + $0x16e8] sm:$0xff] }
 0x1dd   : > { %v1061_v38 = vld [vmem:[%s11453_s18 + $0x15a0] sm:$0xff] }
 0x1de   : > { %v10053_v53 = vcombine.low %v1057_v37, %v1061_v38 }
 0x1df   : > { %6824 = vmatpush1.bf16.msra.mxu0 %v9997_v44  ;;  %7152 = vmatpush1.bf16.msra.mxu1 %v9999_v46  ;;  %v10054_v44 = vcombine.high %v1057_v37, %v1061_v38  ;;  %v10056_v46 = vcombine.high %v1058_v40, %v1062_v41  ;;  %v1106_v37 = vld [vmem:[%s11453_s18 + $0x1708] sm:$0xff]  ;;  %v10095_v41 = vcombine.low %v1098_v28, %v1102_v29 }
 0x1e0   : > { %6834 = vmatprep.subr.bf16.mxu0 %v10006_v47  ;;  %7162 = vmatprep.subr.bf16.mxu1 %v10008_v48  ;;  %v1065_v47 = vld [vmem:[%s11453_s18 + $0x15c0] sm:$0xff]  ;;  %v1110_v38 = vld [vmem:[%s11453_s18 + $0x1728] sm:$0xff] }
 0x1e1   : > { %v1069_v48 = vld [vmem:[%s11453_s18 + $0x15e0] sm:$0xff] }
 0x1e2   : > { %6826 = vmatmul.mubr.bf16.vlgmr.msra.gmra.mrb[0].mxu0 %v11884_v52  ;;  %7154 = vmatmul.mubr.bf16.vlgmr.msra.gmra.mrb[0].mxu1 %v11884_v52  ;;  %v10061_v9 = vcombine.low %v1065_v47, %v1069_v48 }
 0x1e3   : > { %6835 = vmatpush1.bf16.msra.mxu0 %v10005_v56  ;;  %7163 = vmatpush1.bf16.msra.mxu1 %v10007_v57  ;;  %v10062_v56 = vcombine.high %v1065_v47, %v1069_v48  ;;  %v10064_v57 = vcombine.high %v1066_v50, %v1070_v51  ;;  %v1114_v47 = vld [vmem:[%s11453_s18 + $0x1748] sm:$0xff]  ;;  %v10103_v51 = vcombine.low %v1106_v37, %v1110_v38 }
 0x1e4   : > { %6836 = vmatprep.subr.bf16.mxu0 %v10014_v58  ;;  %7164 = vmatprep.subr.bf16.mxu1 %v10016_v61  ;;  %v1073_v58 = vld [vmem:[%s11453_s18 + $0x1600] sm:$0xff]  ;;  %v1118_v48 = vld [vmem:[%s11453_s18 + $0x1768] sm:$0xff] }
 0x1e5   : > { %6866 = vmatprep.mubr.bf16.mxu0 %v11892_v1  ;;  %7194 = vmatprep.mubr.bf16.mxu1 %v11892_v1  ;;  %v1077_v61 = vld [vmem:[%s11453_s18 + $0x1620] sm:$0xff] }
 0x1e6   : > { %v10069_v12 = vcombine.low %v1073_v58, %v1077_v61 }
 0x1e7   : > { %6837 = vmatpush1.bf16.msra.mxu0 %v10013_v4  ;;  %7165 = vmatpush1.bf16.msra.mxu1 %v10015_v5  ;;  %v10070_v4 = vcombine.high %v1073_v58, %v1077_v61  ;;  %v10072_v5 = vcombine.high %v1074_v62, %v1078_v63  ;;  %v1122_v58 = vld [vmem:[%s11453_s18 + $0x1788] sm:$0xff]  ;;  %v10111_v63 = vcombine.low %v1114_v47, %v1118_v48 }
 0x1e8   : > { %6838 = vmatprep.subr.bf16.mxu0 %v10022_v30  ;;  %7166 = vmatprep.subr.bf16.mxu1 %v10024_v7  ;;  %v1081_v30 = vld [vmem:[%s11453_s18 + $0x1640] sm:$0xff]  ;;  %v1126_v61 = vld [vmem:[%s11453_s18 + $0x17a8] sm:$0xff] }
 0x1e9   : > { %v1085_v7 = vld [vmem:[%s11453_s18 + $0x1660] sm:$0xff] }
 0x1ea   : > { %v10077_v21 = vcombine.low %v1081_v30, %v1085_v7 }
 0x1eb   : > { %6839 = vmatpush1.bf16.msra.mxu0 %v10021_v14  ;;  %7167 = vmatpush1.bf16.msra.mxu1 %v10023_v15  ;;  %v10078_v14 = vcombine.high %v1081_v30, %v1085_v7  ;;  %v10080_v15 = vcombine.high %v1082_v8, %v1086_v11  ;;  %v1444_v30 = vcombine.high %v11793_v2, %v11793_v2  ;;  %v1130_v7 = vld [vmem:[%s11453_s18 + $0x17c8] sm:$0xff] }
 0x1ec   : > { %6840 = vmatprep.subr.bf16.mxu0 %v10030_v16  ;;  %7168 = vmatprep.subr.bf16.mxu1 %v10032_v17  ;;  %v1089_v16 = vld [vmem:[%s11453_s18 + $0x1680] sm:$0xff]  ;;  %v1134_v8 = vld [vmem:[%s11453_s18 + $0x17e8] sm:$0xff] }
 0x1ed   : > { %v1093_v17 = vld [vmem:[%s11453_s18 + $0x16a0] sm:$0xff]  ;;  %v1138_v2 = vld [vmem:[%s11453_s18 + $0x1808] sm:$0xff] }
 0x1ee   : > { %v10085_v31 = vcombine.low %v1089_v16, %v1093_v17 }
 0x1ef   : > { %6841 = vmatpush1.bf16.msra.mxu0 %v10029_v23  ;;  %7169 = vmatpush1.bf16.msra.mxu1 %v10031_v25  ;;  %v10086_v23 = vcombine.high %v1089_v16, %v1093_v17  ;;  %v10088_v25 = vcombine.high %v1090_v18, %v1094_v19  ;;  %v1141_v16 = vld [vmem:[%s11453_s18 + $0x1820] sm:$0xff]  ;;  %v11957_v17 = vrot.slane %v1444_v30, %v11504_v54  ;;  %v1142_v18 = vld [vmem:[%s11453_s18 + $0x1828] sm:$0xff] }
 0x1f0   : > { %6842 = vmatprep.subr.bf16.mxu0 %v10038_v26  ;;  %7170 = vmatprep.subr.bf16.mxu1 %v10040_v27  ;;  %v1097_v26 = vld [vmem:[%s11453_s18 + $0x16c0] sm:$0xff] }
 0x1f1   : > { %v1101_v27 = vld [vmem:[%s11453_s18 + $0x16e0] sm:$0xff] }
 0x1f2   : > { %v10093_v40 = vcombine.low %v1097_v26, %v1101_v27  ;;  %v1177_v30 = vld [vmem:[%s11453_s18 + $0x1940] sm:$0xff] }
 0x1f3   : > { %6843 = vmatpush1.bf16.msra.mxu0 %v10037_v0  ;;  %7171 = vmatpush1.bf16.msra.mxu1 %v10039_v34  ;;  %v10094_v0 = vcombine.high %v1097_v26, %v1101_v27  ;;  %v10096_v34 = vcombine.high %v1098_v28, %v1102_v29  ;;  %v1149_v26 = vld [vmem:[%s11453_s18 + $0x1860] sm:$0xff]  ;;  %v1460_v27 = vcombine.high %v11957_v17, %v11957_v17  ;;  %v1146_v29 = vld [vmem:[%s11453_s18 + $0x1848] sm:$0xff] }
 0x1f4   : > { %6844 = vmatprep.subr.bf16.mxu0 %v10046_v35  ;;  %7172 = vmatprep.subr.bf16.mxu1 %v10048_v36  ;;  %v1105_v35 = vld [vmem:[%s11453_s18 + $0x1700] sm:$0xff]  ;;  %v11967_v28 = vcombine.high %v11884_v52, %v11884_v52 }
 0x1f5   : > { %v1109_v36 = vld [vmem:[%s11453_s18 + $0x1720] sm:$0xff] }
 0x1f6   : > { %v10101_v50 = vcombine.low %v1105_v35, %v1109_v36 }
 0x1f7   : > { %6845 = vmatpush1.bf16.msra.mxu0 %v10045_v42  ;;  %7173 = vmatpush1.bf16.msra.mxu1 %v10047_v43  ;;  %v10102_v42 = vcombine.high %v1105_v35, %v1109_v36  ;;  %v10104_v43 = vcombine.high %v1106_v37, %v1110_v38  ;;  %v1153_v36 = vld [vmem:[%s11453_s18 + $0x1880] sm:$0xff]  ;;  %v11974_v38 = vrot.slane %v1460_v27, %v11504_v54 }
 0x1f8   : > { %6846 = vmatprep.subr.bf16.mxu0 %v10054_v44  ;;  %7174 = vmatprep.subr.bf16.mxu1 %v10056_v46  ;;  %v1113_v44 = vld [vmem:[%s11453_s18 + $0x1740] sm:$0xff] }
 0x1f9   : > { %v1117_v46 = vld [vmem:[%s11453_s18 + $0x1760] sm:$0xff] }
 0x1fa   : > { %v10109_v62 = vcombine.low %v1113_v44, %v1117_v46  ;;  %v1157_v37 = vld [vmem:[%s11453_s18 + $0x18a0] sm:$0xff] }
 0x1fb   : > { %6847 = vmatpush1.bf16.msra.mxu0 %v10053_v53  ;;  %7175 = vmatpush1.bf16.msra.mxu1 %v10055_v55  ;;  %v10110_v53 = vcombine.high %v1113_v44, %v1117_v46  ;;  %v10112_v55 = vcombine.high %v1114_v47, %v1118_v48  ;;  %v10150_v44 = vcombine.high %v1153_v36, %v1157_v37  ;;  %v1161_v47 = vld [vmem:[%s11453_s18 + $0x18c0] sm:$0xff] }
 0x1fc   : > { %6848 = vmatprep.subr.bf16.mxu0 %v10062_v56  ;;  %7176 = vmatprep.subr.bf16.mxu1 %v10064_v57  ;;  %v1121_v56 = vld [vmem:[%s11453_s18 + $0x1780] sm:$0xff] }
 0x1fd   : > { %v1125_v57 = vld [vmem:[%s11453_s18 + $0x17a0] sm:$0xff] }
 0x1fe   : > { %v10117_v11 = vcombine.low %v1121_v56, %v1125_v57  ;;  %v1165_v48 = vld [vmem:[%s11453_s18 + $0x18e0] sm:$0xff] }
 0x1ff   : > { %6849 = vmatpush1.bf16.msra.mxu0 %v10061_v9  ;;  %7177 = vmatpush1.bf16.msra.mxu1 %v10063_v3  ;;  %v10118_v9 = vcombine.high %v1121_v56, %v1125_v57  ;;  %v10120_v3 = vcombine.high %v1122_v58, %v1126_v61  ;;  %v10158_v56 = vcombine.high %v1161_v47, %v1165_v48  ;;  %v1197_v27 = vld [vmem:[%s11453_s18 + $0x19e0] sm:$0xff] }
 0x200   : > { %6850 = vmatprep.subr.bf16.mxu0 %v10070_v4  ;;  %7178 = vmatprep.subr.bf16.mxu1 %v10072_v5  ;;  %v1129_v4 = vld [vmem:[%s11453_s18 + $0x17c0] sm:$0xff] }
 0x201   : > { %v1133_v5 = vld [vmem:[%s11453_s18 + $0x17e0] sm:$0xff] }
 0x202   : > { %v10125_v19 = vcombine.low %v1129_v4, %v1133_v5 }
 0x203   : > { %6851 = vmatpush1.bf16.msra.mxu0 %v10069_v12  ;;  %7179 = vmatpush1.bf16.msra.mxu1 %v10071_v13  ;;  %v10119_v12 = vcombine.low %v1122_v58, %v1126_v61  ;;  %v10126_v13 = vcombine.high %v1129_v4, %v1133_v5  ;;  %v1169_v58 = vld [vmem:[%s11453_s18 + $0x1900] sm:$0xff] }
 0x204   : > { %6852 = vmatprep.subr.bf16.mxu0 %v10078_v14  ;;  %7180 = vmatprep.subr.bf16.mxu1 %v10080_v15  ;;  %v10128_v14 = vcombine.high %v1130_v7, %v1134_v8  ;;  %v1137_v15 = vld [vmem:[%s11453_s18 + $0x1800] sm:$0xff] }
 0x205   : > { %v1173_v61 = vld [vmem:[%s11453_s18 + $0x1920] sm:$0xff] }
 0x206   : > { %v10166_v4 = vcombine.high %v1169_v58, %v1173_v61 }
 0x207   : > { %6853 = vmatpush1.bf16.msra.mxu0 %v10077_v21  ;;  %7181 = vmatpush1.bf16.msra.mxu1 %v10079_v22  ;;  %v10127_v21 = vcombine.low %v1130_v7, %v1134_v8  ;;  %v10134_v22 = vcombine.high %v1137_v15, %v1141_v16  ;;  %v1181_v7 = vld [vmem:[%s11453_s18 + $0x1960] sm:$0xff]  ;;  %v1178_v8 = vld [vmem:[%s11453_s18 + $0x1948] sm:$0xff] }
 0x208   : > { %6854 = vmatprep.subr.bf16.mxu0 %v10086_v23  ;;  %7182 = vmatprep.subr.bf16.mxu1 %v10088_v25  ;;  %v10136_v23 = vcombine.high %v1138_v2, %v1142_v18  ;;  %v1145_v25 = vld [vmem:[%s11453_s18 + $0x1840] sm:$0xff] }
 0x20b   : > { %6855 = vmatpush1.bf16.msra.mxu0 %v10085_v31  ;;  %7183 = vmatpush1.bf16.msra.mxu1 %v10087_v32  ;;  %v1150_v31 = vld [vmem:[%s11453_s18 + $0x1868] sm:$0xff]  ;;  %v10133_v32 = vcombine.low %v1137_v15, %v1141_v16  ;;  %v1185_v16 = vld [vmem:[%s11453_s18 + $0x1980] sm:$0xff] }
 0x20c   : > { %6856 = vmatprep.subr.bf16.mxu0 %v10094_v0  ;;  %7184 = vmatprep.subr.bf16.mxu1 %v10096_v34  ;;  %v10135_v0 = vcombine.low %v1138_v2, %v1142_v18  ;;  %v10142_v34 = vcombine.high %v1145_v25, %v1149_v26  ;;  %v10144_v35 = vcombine.high %v1146_v29, %v1150_v31  ;;  %v1189_v2 = vld [vmem:[%s11453_s18 + $0x19a0] sm:$0xff]  ;;  %v1186_v18 = vld [vmem:[%s11453_s18 + $0x1988] sm:$0xff] }
 0x20f   : > { %6857 = vmatpush1.bf16.msra.mxu0 %v10093_v40  ;;  %7185 = vmatpush1.bf16.msra.mxu1 %v10095_v41  ;;  %v1154_v40 = vld [vmem:[%s11453_s18 + $0x1888] sm:$0xff] }
 0x210   : > { %6858 = vmatprep.subr.bf16.mxu0 %v10102_v42  ;;  %7186 = vmatprep.subr.bf16.mxu1 %v10104_v43  ;;  %v1158_v41 = vld [vmem:[%s11453_s18 + $0x18a8] sm:$0xff]  ;;  %v10141_v42 = vcombine.low %v1145_v25, %v1149_v26  ;;  %v10143_v43 = vcombine.low %v1146_v29, %v1150_v31  ;;  %v1193_v26 = vld [vmem:[%s11453_s18 + $0x19c0] sm:$0xff] }
 0x211   : > { %v10152_v46 = vcombine.high %v1154_v40, %v1158_v41  ;;  %v1194_v29 = vld [vmem:[%s11453_s18 + $0x19c8] sm:$0xff] }
 0x212   : > { %v1198_v31 = vld [vmem:[%s11453_s18 + $0x19e8] sm:$0xff] }
 0x213   : > { %6859 = vmatpush1.bf16.msra.mxu0 %v10101_v50  ;;  %7187 = vmatpush1.bf16.msra.mxu1 %v10103_v51  ;;  %v1162_v50 = vld [vmem:[%s11453_s18 + $0x18c8] sm:$0xff] }
 0x214   : > { %6860 = vmatprep.subr.bf16.mxu0 %v10110_v53  ;;  %7188 = vmatprep.subr.bf16.mxu1 %v10112_v55  ;;  %v1166_v51 = vld [vmem:[%s11453_s18 + $0x18e8] sm:$0xff]  ;;  %v10149_v53 = vcombine.low %v1153_v36, %v1157_v37  ;;  %v10151_v55 = vcombine.low %v1154_v40, %v1158_v41  ;;  %v1201_v36 = vld [vmem:[%s11453_s18 + $0x1a00] sm:$0xff] }
 0x215   : > { %v10160_v57 = vcombine.high %v1162_v50, %v1166_v51  ;;  %v1205_v37 = vld [vmem:[%s11453_s18 + $0x1a20] sm:$0xff]  ;;  %v1202_v40 = vld [vmem:[%s11453_s18 + $0x1a08] sm:$0xff] }
 0x216   : > { %v1206_v41 = vld [vmem:[%s11453_s18 + $0x1a28] sm:$0xff] }
 0x217   : > { %6861 = vmatpush1.bf16.msra.mxu0 %v10109_v62  ;;  %7189 = vmatpush1.bf16.msra.mxu1 %v10111_v63  ;;  %v1170_v62 = vld [vmem:[%s11453_s18 + $0x1908] sm:$0xff] }
 0x218   : > { %6862 = vmatprep.subr.bf16.mxu0 %v10118_v9  ;;  %7190 = vmatprep.subr.bf16.mxu1 %v10120_v3  ;;  %v1174_v63 = vld [vmem:[%s11453_s18 + $0x1928] sm:$0xff]  ;;  %v10157_v9 = vcombine.low %v1161_v47, %v1165_v48  ;;  %v10159_v3 = vcombine.low %v1162_v50, %v1166_v51  ;;  %v1209_v47 = vld [vmem:[%s11453_s18 + $0x1a40] sm:$0xff] }
 0x219   : > { %v10168_v5 = vcombine.high %v1170_v62, %v1174_v63  ;;  %v1213_v48 = vld [vmem:[%s11453_s18 + $0x1a60] sm:$0xff]  ;;  %v1210_v50 = vld [vmem:[%s11453_s18 + $0x1a48] sm:$0xff] }
 0x21a   : > { %v1214_v51 = vld [vmem:[%s11453_s18 + $0x1a68] sm:$0xff] }
 0x21b   : > { %6863 = vmatpush1.bf16.msra.mxu0 %v10117_v11  ;;  %7191 = vmatpush1.bf16.msra.mxu1 %v10119_v12  ;;  %v1182_v11 = vld [vmem:[%s11453_s18 + $0x1968] sm:$0xff]  ;;  %v10165_v12 = vcombine.low %v1169_v58, %v1173_v61  ;;  %v1217_v58 = vld [vmem:[%s11453_s18 + $0x1a80] sm:$0xff] }
 0x21c   : > { %6864 = vmatprep.subr.bf16.mxu0 %v10126_v13  ;;  %7192 = vmatprep.subr.bf16.mxu1 %v10128_v14  ;;  %v10167_v13 = vcombine.low %v1170_v62, %v1174_v63  ;;  %v10174_v14 = vcombine.high %v1177_v30, %v1181_v7  ;;  %v10176_v15 = vcombine.high %v1178_v8, %v1182_v11  ;;  %v1221_v61 = vld [vmem:[%s11453_s18 + $0x1aa0] sm:$0xff]  ;;  %v1218_v62 = vld [vmem:[%s11453_s18 + $0x1a88] sm:$0xff] }
 0x21d   : > { %v1222_v63 = vld [vmem:[%s11453_s18 + $0x1aa8] sm:$0xff] }
 0x21f   : > { %6865 = vmatpush1.bf16.msra.mxu0 %v10125_v19  ;;  %7193 = vmatpush1.bf16.msra.mxu1 %v10127_v21  ;;  %v1190_v19 = vld [vmem:[%s11453_s18 + $0x19a8] sm:$0xff]  ;;  %v10173_v21 = vcombine.low %v1177_v30, %v1181_v7  ;;  %v1225_v30 = vld [vmem:[%s11453_s18 + $0x1ac0] sm:$0xff] }
 0x220   : > { %6875 = vmatprep.subr.bf16.mxu0 %v10134_v22  ;;  %7203 = vmatprep.subr.bf16.mxu1 %v10136_v23  ;;  %v10175_v22 = vcombine.low %v1178_v8, %v1182_v11  ;;  %v10182_v23 = vcombine.high %v1185_v16, %v1189_v2  ;;  %v10184_v25 = vcombine.high %v1186_v18, %v1190_v19  ;;  %v1229_v7 = vld [vmem:[%s11453_s18 + $0x1ae0] sm:$0xff]  ;;  %v1226_v8 = vld [vmem:[%s11453_s18 + $0x1ac8] sm:$0xff] }
 0x221   : > { %v1230_v11 = vld [vmem:[%s11453_s18 + $0x1ae8] sm:$0xff] }
 0x222   : > { %6867 = vmatmul.mubr.bf16.vlgmr.msra.gmra.mrb[0].mxu0 %v11967_v28  ;;  %7195 = vmatmul.mubr.bf16.vlgmr.msra.gmra.mrb[0].mxu1 %v11967_v28 }
 0x223   : > { %6876 = vmatpush1.bf16.msra.mxu0 %v10133_v32  ;;  %7204 = vmatpush1.bf16.msra.mxu1 %v10135_v0  ;;  %v10181_v32 = vcombine.low %v1185_v16, %v1189_v2  ;;  %v10183_v0 = vcombine.low %v1186_v18, %v1190_v19  ;;  %v1233_v16 = vld [vmem:[%s11453_s18 + $0x1b00] sm:$0xff]  ;;  %v1234_v18 = vld [vmem:[%s11453_s18 + $0x1b08] sm:$0xff] }
 0x224   : > { %6877 = vmatprep.subr.bf16.mxu0 %v10142_v34  ;;  %7205 = vmatprep.subr.bf16.mxu1 %v10144_v35  ;;  %v10190_v34 = vcombine.high %v1193_v26, %v1197_v27  ;;  %v10192_v35 = vcombine.high %v1194_v29, %v1198_v31  ;;  %v1237_v2 = vld [vmem:[%s11453_s18 + $0x1b20] sm:$0xff]  ;;  %v1238_v19 = vld [vmem:[%s11453_s18 + $0x1b28] sm:$0xff] }
 0x225   : > { %6907 = vmatprep.mubr.bf16.mxu0 %v11974_v38  ;;  %7235 = vmatprep.mubr.bf16.mxu1 %v11974_v38 }
 0x227   : > { %6878 = vmatpush1.bf16.msra.mxu0 %v10141_v42  ;;  %7206 = vmatpush1.bf16.msra.mxu1 %v10143_v43  ;;  %v10189_v42 = vcombine.low %v1193_v26, %v1197_v27  ;;  %v10191_v43 = vcombine.low %v1194_v29, %v1198_v31  ;;  %v1241_v26 = vld [vmem:[%s11453_s18 + $0x1b40] sm:$0xff]  ;;  %v1242_v29 = vld [vmem:[%s11453_s18 + $0x1b48] sm:$0xff] }
 0x228   : > { %6879 = vmatprep.subr.bf16.mxu0 %v10150_v44  ;;  %7207 = vmatprep.subr.bf16.mxu1 %v10152_v46  ;;  %v10198_v44 = vcombine.high %v1201_v36, %v1205_v37  ;;  %v10200_v46 = vcombine.high %v1202_v40, %v1206_v41  ;;  %v1245_v27 = vld [vmem:[%s11453_s18 + $0x1b60] sm:$0xff]  ;;  %v1246_v31 = vld [vmem:[%s11453_s18 + $0x1b68] sm:$0xff] }
 0x22b   : > { %6880 = vmatpush1.bf16.msra.mxu0 %v10149_v53  ;;  %7208 = vmatpush1.bf16.msra.mxu1 %v10151_v55  ;;  %v10197_v53 = vcombine.low %v1201_v36, %v1205_v37  ;;  %v10199_v55 = vcombine.low %v1202_v40, %v1206_v41  ;;  %v1249_v36 = vld [vmem:[%s11453_s18 + $0x1b80] sm:$0xff]  ;;  %v1250_v40 = vld [vmem:[%s11453_s18 + $0x1b88] sm:$0xff] }
 0x22c   : > { %6881 = vmatprep.subr.bf16.mxu0 %v10158_v56  ;;  %7209 = vmatprep.subr.bf16.mxu1 %v10160_v57  ;;  %v10206_v56 = vcombine.high %v1209_v47, %v1213_v48  ;;  %v10208_v57 = vcombine.high %v1210_v50, %v1214_v51  ;;  %v1253_v37 = vld [vmem:[%s11453_s18 + $0x1ba0] sm:$0xff]  ;;  %v1254_v41 = vld [vmem:[%s11453_s18 + $0x1ba8] sm:$0xff] }
 0x22f   : > { %6882 = vmatpush1.bf16.msra.mxu0 %v10157_v9  ;;  %7210 = vmatpush1.bf16.msra.mxu1 %v10159_v3  ;;  %v10205_v9 = vcombine.low %v1209_v47, %v1213_v48  ;;  %v10207_v3 = vcombine.low %v1210_v50, %v1214_v51  ;;  %v1257_v47 = vld [vmem:[%s11453_s18 + $0x1bc0] sm:$0xff]  ;;  %v1258_v50 = vld [vmem:[%s11453_s18 + $0x1bc8] sm:$0xff] }
 0x230   : > { %6883 = vmatprep.subr.bf16.mxu0 %v10166_v4  ;;  %7211 = vmatprep.subr.bf16.mxu1 %v10168_v5  ;;  %v10214_v4 = vcombine.high %v1217_v58, %v1221_v61  ;;  %v10216_v5 = vcombine.high %v1218_v62, %v1222_v63  ;;  %v1261_v48 = vld [vmem:[%s11453_s18 + $0x1be0] sm:$0xff]  ;;  %v1262_v51 = vld [vmem:[%s11453_s18 + $0x1be8] sm:$0xff] }
 0x233   : > { %6884 = vmatpush1.bf16.msra.mxu0 %v10165_v12  ;;  %7212 = vmatpush1.bf16.msra.mxu1 %v10167_v13  ;;  %v10213_v12 = vcombine.low %v1217_v58, %v1221_v61  ;;  %v10215_v13 = vcombine.low %v1218_v62, %v1222_v63  ;;  %v1265_v58 = vld [vmem:[%s11453_s18 + $0x1c00] sm:$0xff]  ;;  %v1266_v62 = vld [vmem:[%s11453_s18 + $0x1c08] sm:$0xff] }
 0x234   : > { %6885 = vmatprep.subr.bf16.mxu0 %v10174_v14  ;;  %7213 = vmatprep.subr.bf16.mxu1 %v10176_v15  ;;  %v10222_v14 = vcombine.high %v1225_v30, %v1229_v7  ;;  %v10224_v15 = vcombine.high %v1226_v8, %v1230_v11  ;;  %v1269_v61 = vld [vmem:[%s11453_s18 + $0x1c20] sm:$0xff]  ;;  %v1270_v63 = vld [vmem:[%s11453_s18 + $0x1c28] sm:$0xff] }
 0x237   : > { %6886 = vmatpush1.bf16.msra.mxu0 %v10173_v21  ;;  %7214 = vmatpush1.bf16.msra.mxu1 %v10175_v22  ;;  %v10221_v21 = vcombine.low %v1225_v30, %v1229_v7  ;;  %v10223_v22 = vcombine.low %v1226_v8, %v1230_v11  ;;  %v1273_v30 = vld [vmem:[%s11453_s18 + $0x1c40] sm:$0xff]  ;;  %v12042_v8 = vrot.slane %v11957_v17, %v11504_v54  ;;  %v1274_v11 = vld [vmem:[%s11453_s18 + $0x1c48] sm:$0xff] }
 0x238   : > { %6887 = vmatprep.subr.bf16.mxu0 %v10182_v23  ;;  %7215 = vmatprep.subr.bf16.mxu1 %v10184_v25  ;;  %v10230_v23 = vcombine.high %v1233_v16, %v1237_v2  ;;  %v10232_v25 = vcombine.high %v1234_v18, %v1238_v19  ;;  %v1277_v7 = vld [vmem:[%s11453_s18 + $0x1c60] sm:$0xff]  ;;  %v1282_v54 = vld [vmem:[%s11453_s18 + $0x1c88] sm:$0xff] }
 0x239   : > { %v1286_v17 = vld [vmem:[%s11453_s18 + $0x1ca8] sm:$0xff] }
 0x23b   : > { %6888 = vmatpush1.bf16.msra.mxu0 %v10181_v32  ;;  %7216 = vmatpush1.bf16.msra.mxu1 %v10183_v0  ;;  %v10229_v32 = vcombine.low %v1233_v16, %v1237_v2  ;;  %v10231_v0 = vcombine.low %v1234_v18, %v1238_v19  ;;  %v1281_v2 = vld [vmem:[%s11453_s18 + $0x1c80] sm:$0xff]  ;;  %v12050_v19 = vcombine.high %v11974_v38, %v11974_v38 }
 0x23c   : > { %6889 = vmatprep.subr.bf16.mxu0 %v10190_v34  ;;  %7217 = vmatprep.subr.bf16.mxu1 %v10192_v35  ;;  %v10238_v34 = vcombine.high %v1241_v26, %v1245_v27  ;;  %v10240_v35 = vcombine.high %v1242_v29, %v1246_v31  ;;  %v1285_v18 = vld [vmem:[%s11453_s18 + $0x1ca0] sm:$0xff] }
 0x23f   : > { %6890 = vmatpush1.bf16.msra.mxu0 %v10189_v42  ;;  %7218 = vmatpush1.bf16.msra.mxu1 %v10191_v43  ;;  %v10237_v42 = vcombine.low %v1241_v26, %v1245_v27  ;;  %v10239_v43 = vcombine.low %v1242_v29, %v1246_v31  ;;  %v1289_v26 = vld [vmem:[%s11453_s18 + $0x1cc0] sm:$0xff]  ;;  %v1290_v29 = vld [vmem:[%s11453_s18 + $0x1cc8] sm:$0xff] }
 0x240   : > { %6891 = vmatprep.subr.bf16.mxu0 %v10198_v44  ;;  %7219 = vmatprep.subr.bf16.mxu1 %v10200_v46  ;;  %v10246_v44 = vcombine.high %v1249_v36, %v1253_v37  ;;  %v10248_v46 = vcombine.high %v1250_v40, %v1254_v41  ;;  %v1293_v27 = vld [vmem:[%s11453_s18 + $0x1ce0] sm:$0xff]  ;;  %v1294_v31 = vld [vmem:[%s11453_s18 + $0x1ce8] sm:$0xff] }
 0x243   : > { %6892 = vmatpush1.bf16.msra.mxu0 %v10197_v53  ;;  %7220 = vmatpush1.bf16.msra.mxu1 %v10199_v55  ;;  %v10245_v53 = vcombine.low %v1249_v36, %v1253_v37  ;;  %v10247_v55 = vcombine.low %v1250_v40, %v1254_v41  ;;  %v1297_v36 = vld [vmem:[%s11453_s18 + $0x1d00] sm:$0xff]  ;;  %v1298_v40 = vld [vmem:[%s11453_s18 + $0x1d08] sm:$0xff] }
 0x244   : > { %6893 = vmatprep.subr.bf16.mxu0 %v10206_v56  ;;  %7221 = vmatprep.subr.bf16.mxu1 %v10208_v57  ;;  %v10254_v56 = vcombine.high %v1257_v47, %v1261_v48  ;;  %v10256_v57 = vcombine.high %v1258_v50, %v1262_v51  ;;  %v1301_v37 = vld [vmem:[%s11453_s18 + $0x1d20] sm:$0xff]  ;;  %v1302_v41 = vld [vmem:[%s11453_s18 + $0x1d28] sm:$0xff] }
 0x247   : > { %6894 = vmatpush1.bf16.msra.mxu0 %v10205_v9  ;;  %7222 = vmatpush1.bf16.msra.mxu1 %v10207_v3  ;;  %v10253_v9 = vcombine.low %v1257_v47, %v1261_v48  ;;  %v10255_v3 = vcombine.low %v1258_v50, %v1262_v51  ;;  %v1305_v47 = vld [vmem:[%s11453_s18 + $0x1d40] sm:$0xff]  ;;  %v1306_v50 = vld [vmem:[%s11453_s18 + $0x1d48] sm:$0xff] }
 0x248   : > { %6895 = vmatprep.subr.bf16.mxu0 %v10214_v4  ;;  %7223 = vmatprep.subr.bf16.mxu1 %v10216_v5  ;;  %v10262_v4 = vcombine.high %v1265_v58, %v1269_v61  ;;  %v10264_v5 = vcombine.high %v1266_v62, %v1270_v63  ;;  %v1309_v48 = vld [vmem:[%s11453_s18 + $0x1d60] sm:$0xff]  ;;  %v1310_v51 = vld [vmem:[%s11453_s18 + $0x1d68] sm:$0xff] }
 0x24b   : > { %6896 = vmatpush1.bf16.msra.mxu0 %v10213_v12  ;;  %7224 = vmatpush1.bf16.msra.mxu1 %v10215_v13  ;;  %v1278_v12 = vld [vmem:[%s11453_s18 + $0x1c68] sm:$0xff]  ;;  %v10261_v13 = vcombine.low %v1265_v58, %v1269_v61  ;;  %v1313_v58 = vld [vmem:[%s11453_s18 + $0x1d80] sm:$0xff] }
 0x24c   : > { %6897 = vmatprep.subr.bf16.mxu0 %v10222_v14  ;;  %7225 = vmatprep.subr.bf16.mxu1 %v10224_v15  ;;  %v10263_v14 = vcombine.low %v1266_v62, %v1270_v63  ;;  %v10270_v15 = vcombine.high %v1273_v30, %v1277_v7  ;;  %v10272_v16 = vcombine.high %v1274_v11, %v1278_v12  ;;  %v1317_v61 = vld [vmem:[%s11453_s18 + $0x1da0] sm:$0xff]  ;;  %v1314_v62 = vld [vmem:[%s11453_s18 + $0x1d88] sm:$0xff] }
 0x24d   : > { %v1318_v63 = vld [vmem:[%s11453_s18 + $0x1da8] sm:$0xff] }
 0x24f   : > { %6898 = vmatpush1.bf16.msra.mxu0 %v10221_v21  ;;  %7226 = vmatpush1.bf16.msra.mxu1 %v10223_v22  ;;  %v10269_v21 = vcombine.low %v1273_v30, %v1277_v7  ;;  %v10271_v22 = vcombine.low %v1274_v11, %v1278_v12  ;;  %v1321_v30 = vld [vmem:[%s11453_s18 + $0x1dc0] sm:$0xff]  ;;  %v1322_v11 = vld [vmem:[%s11453_s18 + $0x1dc8] sm:$0xff] }
 0x250   : > { %6899 = vmatprep.subr.bf16.mxu0 %v10230_v23  ;;  %7227 = vmatprep.subr.bf16.mxu1 %v10232_v25  ;;  %v10278_v23 = vcombine.high %v1281_v2, %v1285_v18  ;;  %v10280_v25 = vcombine.high %v1282_v54, %v1286_v17  ;;  %v1325_v7 = vld [vmem:[%s11453_s18 + $0x1de0] sm:$0xff]  ;;  %v1326_v12 = vld [vmem:[%s11453_s18 + $0x1de8] sm:$0xff] }
 0x253   : > { %6900 = vmatpush1.bf16.msra.mxu0 %v10229_v32  ;;  %7228 = vmatpush1.bf16.msra.mxu1 %v10231_v0  ;;  %v10277_v32 = vcombine.low %v1281_v2, %v1285_v18  ;;  %v10279_v0 = vcombine.low %v1282_v54, %v1286_v17  ;;  %v1329_v2 = vld [vmem:[%s11453_s18 + $0x1e00] sm:$0xff]  ;;  %v1330_v54 = vld [vmem:[%s11453_s18 + $0x1e08] sm:$0xff] }
 0x254   : > { %6901 = vmatprep.subr.bf16.mxu0 %v10238_v34  ;;  %7229 = vmatprep.subr.bf16.mxu1 %v10240_v35  ;;  %v10286_v34 = vcombine.high %v1289_v26, %v1293_v27  ;;  %v10288_v35 = vcombine.high %v1290_v29, %v1294_v31  ;;  %v1333_v18 = vld [vmem:[%s11453_s18 + $0x1e20] sm:$0xff]  ;;  %v1334_v17 = vld [vmem:[%s11453_s18 + $0x1e28] sm:$0xff] }
 0x257   : > { %6902 = vmatpush1.bf16.msra.mxu0 %v10237_v42  ;;  %7230 = vmatpush1.bf16.msra.mxu1 %v10239_v43  ;;  %v10285_v42 = vcombine.low %v1289_v26, %v1293_v27  ;;  %v10287_v43 = vcombine.low %v1290_v29, %v1294_v31  ;;  %v1337_v26 = vld [vmem:[%s11453_s18 + $0x1e40] sm:$0xff]  ;;  %v1338_v29 = vld [vmem:[%s11453_s18 + $0x1e48] sm:$0xff] }
 0x258   : > { %6903 = vmatprep.subr.bf16.mxu0 %v10246_v44  ;;  %7231 = vmatprep.subr.bf16.mxu1 %v10248_v46  ;;  %v10294_v44 = vcombine.high %v1297_v36, %v1301_v37  ;;  %v10296_v46 = vcombine.high %v1298_v40, %v1302_v41  ;;  %v1341_v27 = vld [vmem:[%s11453_s18 + $0x1e60] sm:$0xff]  ;;  %v1342_v31 = vld [vmem:[%s11453_s18 + $0x1e68] sm:$0xff] }
 0x25b   : > { %6904 = vmatpush1.bf16.msra.mxu0 %v10245_v53  ;;  %7232 = vmatpush1.bf16.msra.mxu1 %v10247_v55  ;;  %v10293_v53 = vcombine.low %v1297_v36, %v1301_v37  ;;  %v10295_v55 = vcombine.low %v1298_v40, %v1302_v41  ;;  %v1345_v36 = vld [vmem:[%s11453_s18 + $0x1e80] sm:$0xff]  ;;  %v1346_v40 = vld [vmem:[%s11453_s18 + $0x1e88] sm:$0xff] }
 0x25c   : > { %6905 = vmatprep.subr.bf16.mxu0 %v10254_v56  ;;  %7233 = vmatprep.subr.bf16.mxu1 %v10256_v57  ;;  %v10302_v56 = vcombine.high %v1305_v47, %v1309_v48  ;;  %v10304_v57 = vcombine.high %v1306_v50, %v1310_v51  ;;  %v1349_v37 = vld [vmem:[%s11453_s18 + $0x1ea0] sm:$0xff]  ;;  %v1350_v41 = vld [vmem:[%s11453_s18 + $0x1ea8] sm:$0xff] }
 0x25f   : > { %6906 = vmatpush1.bf16.msra.mxu0 %v10253_v9  ;;  %7234 = vmatpush1.bf16.msra.mxu1 %v10255_v3  ;;  %v10301_v9 = vcombine.low %v1305_v47, %v1309_v48  ;;  %v10303_v3 = vcombine.low %v1306_v50, %v1310_v51  ;;  %v1353_v47 = vld [vmem:[%s11453_s18 + $0x1ec0] sm:$0xff]  ;;  %v1354_v50 = vld [vmem:[%s11453_s18 + $0x1ec8] sm:$0xff] }
 0x260   : > { %6916 = vmatprep.subr.bf16.mxu0 %v10262_v4  ;;  %7244 = vmatprep.subr.bf16.mxu1 %v10264_v5  ;;  %v10310_v4 = vcombine.high %v1313_v58, %v1317_v61  ;;  %v10312_v5 = vcombine.high %v1314_v62, %v1318_v63  ;;  %v1357_v48 = vld [vmem:[%s11453_s18 + $0x1ee0] sm:$0xff]  ;;  %v1358_v51 = vld [vmem:[%s11453_s18 + $0x1ee8] sm:$0xff] }
 0x262   : > { %6908 = vmatmul.mubr.bf16.vlgmr.msra.gmra.mrb[0].mxu0 %v12042_v8  ;;  %7236 = vmatmul.mubr.bf16.vlgmr.msra.gmra.mrb[0].mxu1 %v12042_v8 }
 0x263   : > { %6917 = vmatpush1.bf16.msra.mxu0 %v10261_v13  ;;  %7245 = vmatpush1.bf16.msra.mxu1 %v10263_v14  ;;  %v10309_v13 = vcombine.low %v1313_v58, %v1317_v61  ;;  %v10311_v14 = vcombine.low %v1314_v62, %v1318_v63  ;;  %v1361_v58 = vld [vmem:[%s11453_s18 + $0x1f00] sm:$0xff]  ;;  %v1362_v62 = vld [vmem:[%s11453_s18 + $0x1f08] sm:$0xff] }
 0x264   : > { %6918 = vmatprep.subr.bf16.mxu0 %v10270_v15  ;;  %7246 = vmatprep.subr.bf16.mxu1 %v10272_v16  ;;  %v10318_v15 = vcombine.high %v1321_v30, %v1325_v7  ;;  %v10320_v16 = vcombine.high %v1322_v11, %v1326_v12  ;;  %v1365_v61 = vld [vmem:[%s11453_s18 + $0x1f20] sm:$0xff]  ;;  %v1366_v63 = vld [vmem:[%s11453_s18 + $0x1f28] sm:$0xff] }
 0x265   : > { %6948 = vmatprep.mubr.bf16.mxu0 %v12050_v19  ;;  %7276 = vmatprep.mubr.bf16.mxu1 %v12050_v19 }
 0x267   : > { %6919 = vmatpush1.bf16.msra.mxu0 %v10269_v21  ;;  %7247 = vmatpush1.bf16.msra.mxu1 %v10271_v22  ;;  %v10317_v21 = vcombine.low %v1321_v30, %v1325_v7  ;;  %v10319_v22 = vcombine.low %v1322_v11, %v1326_v12  ;;  %v1369_v30 = vld [vmem:[%s11453_s18 + $0x1f40] sm:$0xff]  ;;  %v1370_v11 = vld [vmem:[%s11453_s18 + $0x1f48] sm:$0xff] }
 0x268   : > { %6920 = vmatprep.subr.bf16.mxu0 %v10278_v23  ;;  %7248 = vmatprep.subr.bf16.mxu1 %v10280_v25  ;;  %v10326_v23 = vcombine.high %v1329_v2, %v1333_v18  ;;  %v10328_v25 = vcombine.high %v1330_v54, %v1334_v17  ;;  %v1373_v7 = vld [vmem:[%s11453_s18 + $0x1f60] sm:$0xff]  ;;  %v1374_v12 = vld [vmem:[%s11453_s18 + $0x1f68] sm:$0xff] }
 0x26b   : > { %6921 = vmatpush1.bf16.msra.mxu0 %v10277_v32  ;;  %7249 = vmatpush1.bf16.msra.mxu1 %v10279_v0  ;;  %v10325_v32 = vcombine.low %v1329_v2, %v1333_v18  ;;  %v10327_v0 = vcombine.low %v1330_v54, %v1334_v17  ;;  %v1377_v2 = vld [vmem:[%s11453_s18 + $0x1f80] sm:$0xff]  ;;  %v1378_v54 = vld [vmem:[%s11453_s18 + $0x1f88] sm:$0xff] }
 0x26c   : > { %6922 = vmatprep.subr.bf16.mxu0 %v10286_v34  ;;  %7250 = vmatprep.subr.bf16.mxu1 %v10288_v35  ;;  %v10334_v34 = vcombine.high %v1337_v26, %v1341_v27  ;;  %v10336_v35 = vcombine.high %v1338_v29, %v1342_v31  ;;  %v1381_v18 = vld [vmem:[%s11453_s18 + $0x1fa0] sm:$0xff]  ;;  %v1382_v17 = vld [vmem:[%s11453_s18 + $0x1fa8] sm:$0xff] }
 0x26f   : > { %6923 = vmatpush1.bf16.msra.mxu0 %v10285_v42  ;;  %7251 = vmatpush1.bf16.msra.mxu1 %v10287_v43  ;;  %v10333_v42 = vcombine.low %v1337_v26, %v1341_v27  ;;  %v10335_v43 = vcombine.low %v1338_v29, %v1342_v31  ;;  %v1385_v26 = vld [vmem:[%s11453_s18 + $0x1fc0] sm:$0xff]  ;;  %v1386_v29 = vld [vmem:[%s11453_s18 + $0x1fc8] sm:$0xff] }
 0x270   : > { %6924 = vmatprep.subr.bf16.mxu0 %v10294_v44  ;;  %7252 = vmatprep.subr.bf16.mxu1 %v10296_v46  ;;  %v10342_v44 = vcombine.high %v1345_v36, %v1349_v37  ;;  %v10344_v46 = vcombine.high %v1346_v40, %v1350_v41  ;;  %v1389_v27 = vld [vmem:[%s11453_s18 + $0x1fe0] sm:$0xff]  ;;  %v1390_v31 = vld [vmem:[%s11453_s18 + $0x1fe8] sm:$0xff] }
 0x273   : > { %6925 = vmatpush1.bf16.msra.mxu0 %v10293_v53  ;;  %7253 = vmatpush1.bf16.msra.mxu1 %v10295_v55  ;;  %v10341_v53 = vcombine.low %v1345_v36, %v1349_v37  ;;  %v10343_v55 = vcombine.low %v1346_v40, %v1350_v41  ;;  %v371_v36 = vld [vmem:[%s11453_s18 + $0x10] sm:$0xff]  ;;  %v372_v40 = vld [vmem:[%s11453_s18 + $0x18] sm:$0xff] }
 0x274   : > { %6926 = vmatprep.subr.bf16.mxu0 %v10302_v56  ;;  %7254 = vmatprep.subr.bf16.mxu1 %v10304_v57  ;;  %v10350_v56 = vcombine.high %v1353_v47, %v1357_v48  ;;  %v10352_v57 = vcombine.high %v1354_v50, %v1358_v51  ;;  %v375_v37 = vld [vmem:[%s11453_s18 + $0x30] sm:$0xff]  ;;  %v376_v41 = vld [vmem:[%s11453_s18 + $0x38] sm:$0xff] }
 0x277   : > { %6927 = vmatpush1.bf16.msra.mxu0 %v10301_v9  ;;  %7255 = vmatpush1.bf16.msra.mxu1 %v10303_v3  ;;  %v10349_v9 = vcombine.low %v1353_v47, %v1357_v48  ;;  %v10351_v3 = vcombine.low %v1354_v50, %v1358_v51  ;;  %v379_v47 = vld [vmem:[%s11453_s18 + $0x50] sm:$0xff]  ;;  %v12118_v50 = vcombine.high %v12042_v8, %v12042_v8  ;;  %v380_v51 = vld [vmem:[%s11453_s18 + $0x58] sm:$0xff] }
 0x278   : > { %6928 = vmatprep.subr.bf16.mxu0 %v10310_v4  ;;  %7256 = vmatprep.subr.bf16.mxu1 %v10312_v5  ;;  %v10358_v4 = vcombine.high %v1361_v58, %v1365_v61  ;;  %v10360_v5 = vcombine.high %v1362_v62, %v1366_v63  ;;  %v383_v48 = vld [vmem:[%s11453_s18 + $0x70] sm:$0xff] }
 0x27b   : > { %6929 = vmatpush1.bf16.msra.mxu0 %v10309_v13  ;;  %7257 = vmatpush1.bf16.msra.mxu1 %v10311_v14  ;;  %v10357_v13 = vcombine.low %v1361_v58, %v1365_v61  ;;  %v10359_v14 = vcombine.low %v1362_v62, %v1366_v63  ;;  %v387_v61 = vld [vmem:[%s11453_s18 + $0x90] sm:$0xff]  ;;  %v388_v63 = vld [vmem:[%s11453_s18 + $0x98] sm:$0xff] }
 0x27c   : > { %6930 = vmatprep.subr.bf16.mxu0 %v10318_v15  ;;  %7258 = vmatprep.subr.bf16.mxu1 %v10320_v16  ;;  %v10366_v15 = vcombine.high %v1369_v30, %v1373_v7  ;;  %v10368_v16 = vcombine.high %v1370_v11, %v1374_v12  ;;  %v391_v62 = vld [vmem:[%s11453_s18 + $0xb0] sm:$0xff] }
 0x27f   : > { %6931 = vmatpush1.bf16.msra.mxu0 %v10317_v21  ;;  %7259 = vmatpush1.bf16.msra.mxu1 %v10319_v22  ;;  %v10365_v21 = vcombine.low %v1369_v30, %v1373_v7  ;;  %v10367_v22 = vcombine.low %v1370_v11, %v1374_v12  ;;  %v395_v7 = vld [vmem:[%s11453_s18 + $0xd0] sm:$0xff]  ;;  %v396_v12 = vld [vmem:[%s11453_s18 + $0xd8] sm:$0xff] }
 0x280   : > { %6932 = vmatprep.subr.bf16.mxu0 %v10326_v23  ;;  %7260 = vmatprep.subr.bf16.mxu1 %v10328_v25  ;;  %v10374_v23 = vcombine.high %v1377_v2, %v1381_v18  ;;  %v10376_v25 = vcombine.high %v1378_v54, %v1382_v17  ;;  %v399_v11 = vld [vmem:[%s11453_s18 + $0xf0] sm:$0xff] }
 0x283   : > { %6933 = vmatpush1.bf16.msra.mxu0 %v10325_v32  ;;  %7261 = vmatpush1.bf16.msra.mxu1 %v10327_v0  ;;  %v10373_v32 = vcombine.low %v1377_v2, %v1381_v18  ;;  %v10375_v0 = vcombine.low %v1378_v54, %v1382_v17  ;;  %v403_v18 = vld [vmem:[%s11453_s18 + $0x110] sm:$0xff]  ;;  %v404_v17 = vld [vmem:[%s11453_s18 + $0x118] sm:$0xff] }
 0x284   : > { %6934 = vmatprep.subr.bf16.mxu0 %v10334_v34  ;;  %7262 = vmatprep.subr.bf16.mxu1 %v10336_v35  ;;  %v10382_v34 = vcombine.high %v1385_v26, %v1389_v27  ;;  %v10384_v35 = vcombine.high %v1386_v29, %v1390_v31  ;;  %v407_v54 = vld [vmem:[%s11453_s18 + $0x130] sm:$0xff] }
 0x287   : > { %6935 = vmatpush1.bf16.msra.mxu0 %v10333_v42  ;;  %7263 = vmatpush1.bf16.msra.mxu1 %v10335_v43  ;;  %v10381_v42 = vcombine.low %v1385_v26, %v1389_v27  ;;  %v10383_v43 = vcombine.low %v1386_v29, %v1390_v31  ;;  %v411_v26 = vld [vmem:[%s11453_s18 + $0x150] sm:$0xff]  ;;  %v412_v29 = vld [vmem:[%s11453_s18 + $0x158] sm:$0xff] }
 0x288   : > { %6936 = vmatprep.subr.bf16.mxu0 %v10342_v44  ;;  %7264 = vmatprep.subr.bf16.mxu1 %v10344_v46  ;;  %v9370_v44 = vcombine.high %v371_v36, %v375_v37  ;;  %v9372_v46 = vcombine.high %v372_v40, %v376_v41  ;;  %v415_v27 = vld [vmem:[%s11453_s18 + $0x170] sm:$0xff]  ;;  %v416_v31 = vld [vmem:[%s11453_s18 + $0x178] sm:$0xff] }
 0x28b   : > { %6937 = vmatpush1.bf16.msra.mxu0 %v10341_v53  ;;  %7265 = vmatpush1.bf16.msra.mxu1 %v10343_v55  ;;  %v384_v53 = vld [vmem:[%s11453_s18 + $0x78] sm:$0xff]  ;;  %v9369_v55 = vcombine.low %v371_v36, %v375_v37  ;;  %v419_v36 = vld [vmem:[%s11453_s18 + $0x190] sm:$0xff] }
 0x28c   : > { %6938 = vmatprep.subr.bf16.mxu0 %v10350_v56  ;;  %7266 = vmatprep.subr.bf16.mxu1 %v10352_v57  ;;  %v9371_v56 = vcombine.low %v372_v40, %v376_v41  ;;  %v9378_v57 = vcombine.high %v379_v47, %v383_v48  ;;  %v9380_v58 = vcombine.high %v380_v51, %v384_v53  ;;  %v423_v37 = vld [vmem:[%s11453_s18 + $0x1b0] sm:$0xff]  ;;  %v420_v40 = vld [vmem:[%s11453_s18 + $0x198] sm:$0xff] }
 0x28d   : > { %v424_v41 = vld [vmem:[%s11453_s18 + $0x1b8] sm:$0xff] }
 0x28f   : > { %6939 = vmatpush1.bf16.msra.mxu0 %v10349_v9  ;;  %7267 = vmatpush1.bf16.msra.mxu1 %v10351_v3  ;;  %v392_v9 = vld [vmem:[%s11453_s18 + $0xb8] sm:$0xff]  ;;  %v9377_v3 = vcombine.low %v379_v47, %v383_v48  ;;  %v427_v47 = vld [vmem:[%s11453_s18 + $0x1d0] sm:$0xff] }
 0x290   : > { %6940 = vmatprep.subr.bf16.mxu0 %v10358_v4  ;;  %7268 = vmatprep.subr.bf16.mxu1 %v10360_v5  ;;  %v9379_v4 = vcombine.low %v380_v51, %v384_v53  ;;  %v9386_v5 = vcombine.high %v387_v61, %v391_v62  ;;  %v9388_v30 = vcombine.high %v388_v63, %v392_v9  ;;  %v431_v48 = vld [vmem:[%s11453_s18 + $0x1f0] sm:$0xff]  ;;  %v428_v51 = vld [vmem:[%s11453_s18 + $0x1d8] sm:$0xff] }
 0x291   : > { %v432_v53 = vld [vmem:[%s11453_s18 + $0x1f8] sm:$0xff] }
 0x293   : > { %6941 = vmatpush1.bf16.msra.mxu0 %v10357_v13  ;;  %7269 = vmatpush1.bf16.msra.mxu1 %v10359_v14  ;;  %v400_v13 = vld [vmem:[%s11453_s18 + $0xf8] sm:$0xff]  ;;  %v9385_v14 = vcombine.low %v387_v61, %v391_v62  ;;  %v435_v61 = vld [vmem:[%s11453_s18 + $0x210] sm:$0xff] }
 0x294   : > { %6942 = vmatprep.subr.bf16.mxu0 %v10366_v15  ;;  %7270 = vmatprep.subr.bf16.mxu1 %v10368_v16  ;;  %v9387_v15 = vcombine.low %v388_v63, %v392_v9  ;;  %v9394_v16 = vcombine.high %v395_v7, %v399_v11  ;;  %v9396_v2 = vcombine.high %v396_v12, %v400_v13  ;;  %v439_v62 = vld [vmem:[%s11453_s18 + $0x230] sm:$0xff]  ;;  %v436_v63 = vld [vmem:[%s11453_s18 + $0x218] sm:$0xff] }
 0x295   : > { %v440_v9 = vld [vmem:[%s11453_s18 + $0x238] sm:$0xff] }
 0x297   : > { %6943 = vmatpush1.bf16.msra.mxu0 %v10365_v21  ;;  %7271 = vmatpush1.bf16.msra.mxu1 %v10367_v22  ;;  %v408_v21 = vld [vmem:[%s11453_s18 + $0x138] sm:$0xff]  ;;  %v9393_v22 = vcombine.low %v395_v7, %v399_v11  ;;  %v443_v7 = vld [vmem:[%s11453_s18 + $0x250] sm:$0xff] }
 0x298   : > { %6944 = vmatprep.subr.bf16.mxu0 %v10374_v23  ;;  %7272 = vmatprep.subr.bf16.mxu1 %v10376_v25  ;;  %v9402_v23 = vcombine.high %v403_v18, %v407_v54  ;;  %v9404_v25 = vcombine.high %v404_v17, %v408_v21  ;;  %v447_v11 = vld [vmem:[%s11453_s18 + $0x270] sm:$0xff] }
 0x29b   : > { %6945 = vmatpush1.bf16.msra.mxu0 %v10373_v32  ;;  %7273 = vmatpush1.bf16.msra.mxu1 %v10375_v0  ;;  %v9401_v32 = vcombine.low %v403_v18, %v407_v54  ;;  %v9403_v0 = vcombine.low %v404_v17, %v408_v21  ;;  %v451_v18 = vld [vmem:[%s11453_s18 + $0x290] sm:$0xff]  ;;  %v452_v17 = vld [vmem:[%s11453_s18 + $0x298] sm:$0xff] }
 0x29c   : > { %6946 = vmatprep.subr.bf16.mxu0 %v10382_v34  ;;  %7274 = vmatprep.subr.bf16.mxu1 %v10384_v35  ;;  %v9410_v34 = vcombine.high %v411_v26, %v415_v27  ;;  %v9412_v35 = vcombine.high %v412_v29, %v416_v31  ;;  %v455_v54 = vld [vmem:[%s11453_s18 + $0x2b0] sm:$0xff]  ;;  %v456_v21 = vld [vmem:[%s11453_s18 + $0x2b8] sm:$0xff] }
 0x29f   : > { %6947 = vmatpush1.bf16.msra.mxu0 %v10381_v42  ;;  %7275 = vmatpush1.bf16.msra.mxu1 %v10383_v43  ;;  %v9409_v42 = vcombine.low %v411_v26, %v415_v27  ;;  %v9411_v43 = vcombine.low %v412_v29, %v416_v31  ;;  %v459_v26 = vld [vmem:[%s11453_s18 + $0x2d0] sm:$0xff]  ;;  %v460_v29 = vld [vmem:[%s11453_s18 + $0x2d8] sm:$0xff] }
 0x2a0   : > { %7285 = vmatprep.subr.bf16.mxu0 %v9370_v44  ;;  %7613 = vmatprep.subr.bf16.mxu1 %v9372_v46  ;;  %v9418_v44 = vcombine.high %v419_v36, %v423_v37  ;;  %v9420_v46 = vcombine.high %v420_v40, %v424_v41  ;;  %v463_v27 = vld [vmem:[%s11453_s18 + $0x2f0] sm:$0xff]  ;;  %v464_v31 = vld [vmem:[%s11453_s18 + $0x2f8] sm:$0xff] }
 0x2a2   : > { %6949 = vmatmul.mubr.bf16.vlgmr.msra.gmra.mrb[0].mxu0 %v12118_v50  ;;  %7277 = vmatmul.mubr.bf16.vlgmr.msra.gmra.mrb[0].mxu1 %v12118_v50 }
 0x2a3   : > { %7286 = vmatpush1.bf16.msra.mxu0 %v9369_v55  ;;  %7614 = vmatpush1.bf16.msra.mxu1 %v9371_v56  ;;  %v9417_v55 = vcombine.low %v419_v36, %v423_v37  ;;  %v9419_v56 = vcombine.low %v420_v40, %v424_v41  ;;  %v467_v36 = vld [vmem:[%s11453_s18 + $0x310] sm:$0xff]  ;;  %v468_v40 = vld [vmem:[%s11453_s18 + $0x318] sm:$0xff] }
 0x2a4   : > { %7287 = vmatprep.subr.bf16.mxu0 %v9378_v57  ;;  %7615 = vmatprep.subr.bf16.mxu1 %v9380_v58  ;;  %v9426_v57 = vcombine.high %v427_v47, %v431_v48  ;;  %v9428_v58 = vcombine.high %v428_v51, %v432_v53  ;;  %v471_v37 = vld [vmem:[%s11453_s18 + $0x330] sm:$0xff]  ;;  %v472_v41 = vld [vmem:[%s11453_s18 + $0x338] sm:$0xff] }
 0x2a5   : > { %7317 = vmatprep.mubr.bf16.mxu0 %v11524_v10  ;;  %7645 = vmatprep.mubr.bf16.mxu1 %v11524_v10  ;;  %v9395_v10 = vcombine.low %v396_v12, %v400_v13  ;;  %v444_v12 = vld [vmem:[%s11453_s18 + $0x258] sm:$0xff] }
 0x2a6   : > { %v448_v13 = vld [vmem:[%s11453_s18 + $0x278] sm:$0xff] }
 0x2a7   : > { %7288 = vmatpush1.bf16.msra.mxu0 %v9377_v3  ;;  %7616 = vmatpush1.bf16.msra.mxu1 %v9379_v4  ;;  %v9425_v3 = vcombine.low %v427_v47, %v431_v48  ;;  %v9427_v4 = vcombine.low %v428_v51, %v432_v53  ;;  %v475_v47 = vld [vmem:[%s11453_s18 + $0x350] sm:$0xff]  ;;  %v476_v51 = vld [vmem:[%s11453_s18 + $0x358] sm:$0xff] }
 0x2a8   : > { %7289 = vmatprep.subr.bf16.mxu0 %v9386_v5  ;;  %7617 = vmatprep.subr.bf16.mxu1 %v9388_v30  ;;  %v9434_v5 = vcombine.high %v435_v61, %v439_v62  ;;  %v9436_v30 = vcombine.high %v436_v63, %v440_v9  ;;  %v479_v48 = vld [vmem:[%s11453_s18 + $0x370] sm:$0xff]  ;;  %v480_v53 = vld [vmem:[%s11453_s18 + $0x378] sm:$0xff] }
 0x2ab   : > { %7290 = vmatpush1.bf16.msra.mxu0 %v9385_v14  ;;  %7618 = vmatpush1.bf16.msra.mxu1 %v9387_v15  ;;  %v9433_v14 = vcombine.low %v435_v61, %v439_v62  ;;  %v9435_v15 = vcombine.low %v436_v63, %v440_v9  ;;  %v483_v61 = vld [vmem:[%s11453_s18 + $0x390] sm:$0xff]  ;;  %v484_v63 = vld [vmem:[%s11453_s18 + $0x398] sm:$0xff] }
 0x2ac   : > { %7291 = vmatprep.subr.bf16.mxu0 %v9394_v16  ;;  %7619 = vmatprep.subr.bf16.mxu1 %v9396_v2  ;;  %v9442_v16 = vcombine.high %v443_v7, %v447_v11  ;;  %v9444_v2 = vcombine.high %v444_v12, %v448_v13  ;;  %v487_v62 = vld [vmem:[%s11453_s18 + $0x3b0] sm:$0xff]  ;;  %v488_v9 = vld [vmem:[%s11453_s18 + $0x3b8] sm:$0xff] }
 0x2af   : > { %7292 = vmatpush1.bf16.msra.mxu0 %v9393_v22  ;;  %7620 = vmatpush1.bf16.msra.mxu1 %v9395_v10  ;;  %v9441_v22 = vcombine.low %v443_v7, %v447_v11  ;;  %v9443_v10 = vcombine.low %v444_v12, %v448_v13  ;;  %v491_v7 = vld [vmem:[%s11453_s18 + $0x3d0] sm:$0xff]  ;;  %v492_v12 = vld [vmem:[%s11453_s18 + $0x3d8] sm:$0xff] }
 0x2b0   : > { %7293 = vmatprep.subr.bf16.mxu0 %v9402_v23  ;;  %7621 = vmatprep.subr.bf16.mxu1 %v9404_v25  ;;  %v9450_v23 = vcombine.high %v451_v18, %v455_v54  ;;  %v9452_v25 = vcombine.high %v452_v17, %v456_v21  ;;  %v495_v11 = vld [vmem:[%s11453_s18 + $0x3f0] sm:$0xff]  ;;  %v496_v13 = vld [vmem:[%s11453_s18 + $0x3f8] sm:$0xff] }
 0x2b3   : > { %7294 = vmatpush1.bf16.msra.mxu0 %v9401_v32  ;;  %7622 = vmatpush1.bf16.msra.mxu1 %v9403_v0  ;;  %v9449_v32 = vcombine.low %v451_v18, %v455_v54  ;;  %v9451_v0 = vcombine.low %v452_v17, %v456_v21  ;;  %v499_v18 = vld [vmem:[%s11453_s18 + $0x410] sm:$0xff]  ;;  %v500_v17 = vld [vmem:[%s11453_s18 + $0x418] sm:$0xff] }
 0x2b4   : > { %7295 = vmatprep.subr.bf16.mxu0 %v9410_v34  ;;  %7623 = vmatprep.subr.bf16.mxu1 %v9412_v35  ;;  %v9458_v34 = vcombine.high %v459_v26, %v463_v27  ;;  %v9460_v35 = vcombine.high %v460_v29, %v464_v31  ;;  %v503_v54 = vld [vmem:[%s11453_s18 + $0x430] sm:$0xff]  ;;  %v504_v21 = vld [vmem:[%s11453_s18 + $0x438] sm:$0xff] }
 0x2b7   : > { %7296 = vmatpush1.bf16.msra.mxu0 %v9409_v42  ;;  %7624 = vmatpush1.bf16.msra.mxu1 %v9411_v43  ;;  %v9457_v42 = vcombine.low %v459_v26, %v463_v27  ;;  %v9459_v43 = vcombine.low %v460_v29, %v464_v31  ;;  %v507_v26 = vld [vmem:[%s11453_s18 + $0x450] sm:$0xff]  ;;  %v508_v29 = vld [vmem:[%s11453_s18 + $0x458] sm:$0xff] }
 0x2b8   : > { %7297 = vmatprep.subr.bf16.mxu0 %v9418_v44  ;;  %7625 = vmatprep.subr.bf16.mxu1 %v9420_v46  ;;  %v9466_v44 = vcombine.high %v467_v36, %v471_v37  ;;  %v9468_v46 = vcombine.high %v468_v40, %v472_v41  ;;  %v511_v27 = vld [vmem:[%s11453_s18 + $0x470] sm:$0xff]  ;;  %v512_v31 = vld [vmem:[%s11453_s18 + $0x478] sm:$0xff] }
 0x2bb   : > { %7298 = vmatpush1.bf16.msra.mxu0 %v9417_v55  ;;  %7626 = vmatpush1.bf16.msra.mxu1 %v9419_v56  ;;  %v9465_v55 = vcombine.low %v467_v36, %v471_v37  ;;  %v9467_v56 = vcombine.low %v468_v40, %v472_v41  ;;  %v515_v36 = vld [vmem:[%s11453_s18 + $0x490] sm:$0xff]  ;;  %v516_v40 = vld [vmem:[%s11453_s18 + $0x498] sm:$0xff] }
 0x2bc   : > { %7299 = vmatprep.subr.bf16.mxu0 %v9426_v57  ;;  %7627 = vmatprep.subr.bf16.mxu1 %v9428_v58  ;;  %v9474_v57 = vcombine.high %v475_v47, %v479_v48  ;;  %v9476_v58 = vcombine.high %v476_v51, %v480_v53  ;;  %v519_v37 = vld [vmem:[%s11453_s18 + $0x4b0] sm:$0xff]  ;;  %v520_v41 = vld [vmem:[%s11453_s18 + $0x4b8] sm:$0xff] }
 0x2bf   : > { %7300 = vmatpush1.bf16.msra.mxu0 %v9425_v3  ;;  %7628 = vmatpush1.bf16.msra.mxu1 %v9427_v4  ;;  %v9473_v3 = vcombine.low %v475_v47, %v479_v48  ;;  %v9475_v4 = vcombine.low %v476_v51, %v480_v53  ;;  %v523_v47 = vld [vmem:[%s11453_s18 + $0x4d0] sm:$0xff]  ;;  %v524_v51 = vld [vmem:[%s11453_s18 + $0x4d8] sm:$0xff] }
 0x2c0   : > { %7301 = vmatprep.subr.bf16.mxu0 %v9434_v5  ;;  %7629 = vmatprep.subr.bf16.mxu1 %v9436_v30  ;;  %v9482_v5 = vcombine.high %v483_v61, %v487_v62  ;;  %v9484_v30 = vcombine.high %v484_v63, %v488_v9  ;;  %v527_v48 = vld [vmem:[%s11453_s18 + $0x4f0] sm:$0xff]  ;;  %v528_v53 = vld [vmem:[%s11453_s18 + $0x4f8] sm:$0xff] }
 0x2c3   : > { %7302 = vmatpush1.bf16.msra.mxu0 %v9433_v14  ;;  %7630 = vmatpush1.bf16.msra.mxu1 %v9435_v15  ;;  %v9481_v14 = vcombine.low %v483_v61, %v487_v62  ;;  %v9483_v15 = vcombine.low %v484_v63, %v488_v9  ;;  %v535_v61 = vld [vmem:[%s11453_s18 + $0x530] sm:$0xff]  ;;  %v532_v62 = vld [vmem:[%s11453_s18 + $0x518] sm:$0xff]  ;;  %v9521_v9 = vcombine.low %v523_v47, %v527_v48 }
 0x2c4   : > { %7303 = vmatprep.subr.bf16.mxu0 %v9442_v16  ;;  %7631 = vmatprep.subr.bf16.mxu1 %v9444_v2  ;;  %v9490_v16 = vcombine.high %v491_v7, %v495_v11  ;;  %v9492_v2 = vcombine.high %v492_v12, %v496_v13  ;;  %v536_v63 = vld [vmem:[%s11453_s18 + $0x538] sm:$0xff] }
 0x2c7   : > { %7304 = vmatpush1.bf16.msra.mxu0 %v9441_v22  ;;  %7632 = vmatpush1.bf16.msra.mxu1 %v9443_v10  ;;  %v9489_v22 = vcombine.low %v491_v7, %v495_v11  ;;  %v9491_v10 = vcombine.low %v492_v12, %v496_v13  ;;  %v540_v7 = vld [vmem:[%s11453_s18 + $0x558] sm:$0xff]  ;;  %v9531_v13 = vcombine.low %v532_v62, %v536_v63 }
 0x2c8   : > { %7305 = vmatprep.subr.bf16.mxu0 %v9450_v23  ;;  %7633 = vmatprep.subr.bf16.mxu1 %v9452_v25  ;;  %v9498_v23 = vcombine.high %v499_v18, %v503_v54  ;;  %v9500_v25 = vcombine.high %v500_v17, %v504_v21  ;;  %v544_v11 = vld [vmem:[%s11453_s18 + $0x578] sm:$0xff] }
 0x2cb   : > { %7306 = vmatpush1.bf16.msra.mxu0 %v9449_v32  ;;  %7634 = vmatpush1.bf16.msra.mxu1 %v9451_v0  ;;  %v9497_v32 = vcombine.low %v499_v18, %v503_v54  ;;  %v9499_v0 = vcombine.low %v500_v17, %v504_v21  ;;  %v548_v18 = vld [vmem:[%s11453_s18 + $0x598] sm:$0xff]  ;;  %v9539_v21 = vcombine.low %v540_v7, %v544_v11 }
 0x2cc   : > { %7307 = vmatprep.subr.bf16.mxu0 %v9458_v34  ;;  %7635 = vmatprep.subr.bf16.mxu1 %v9460_v35  ;;  %v9506_v34 = vcombine.high %v507_v26, %v511_v27  ;;  %v9508_v35 = vcombine.high %v508_v29, %v512_v31  ;;  %v552_v54 = vld [vmem:[%s11453_s18 + $0x5b8] sm:$0xff] }
 0x2cf   : > { %7308 = vmatpush1.bf16.msra.mxu0 %v9457_v42  ;;  %7636 = vmatpush1.bf16.msra.mxu1 %v9459_v43  ;;  %v9505_v42 = vcombine.low %v507_v26, %v511_v27  ;;  %v9507_v43 = vcombine.low %v508_v29, %v512_v31  ;;  %v556_v26 = vld [vmem:[%s11453_s18 + $0x5d8] sm:$0xff]  ;;  %v9547_v31 = vcombine.low %v548_v18, %v552_v54 }
 0x2d0   : > { %7309 = vmatprep.subr.bf16.mxu0 %v9466_v44  ;;  %7637 = vmatprep.subr.bf16.mxu1 %v9468_v46  ;;  %v9514_v44 = vcombine.high %v515_v36, %v519_v37  ;;  %v9516_v46 = vcombine.high %v516_v40, %v520_v41  ;;  %v560_v27 = vld [vmem:[%s11453_s18 + $0x5f8] sm:$0xff] }
 0x2d3   : > { %7310 = vmatpush1.bf16.msra.mxu0 %v9465_v55  ;;  %7638 = vmatpush1.bf16.msra.mxu1 %v9467_v56  ;;  %v9515_v55 = vcombine.low %v516_v40, %v520_v41  ;;  %v9522_v56 = vcombine.high %v523_v47, %v527_v48  ;;  %v9555_v41 = vcombine.low %v556_v26, %v560_v27  ;;  %v572_v47 = vld [vmem:[%s11453_s18 + $0x658] sm:$0xff] }
 0x2d4   : > { %7311 = vmatprep.subr.bf16.mxu0 %v9474_v57  ;;  %7639 = vmatprep.subr.bf16.mxu1 %v9476_v58  ;;  %v9524_v57 = vcombine.high %v524_v51, %v528_v53  ;;  %v531_v58 = vld [vmem:[%s11453_s18 + $0x510] sm:$0xff]  ;;  %v576_v48 = vld [vmem:[%s11453_s18 + $0x678] sm:$0xff] }
 0x2d5   : > { %v9529_v12 = vcombine.low %v531_v58, %v535_v61 }
 0x2d7   : > { %7312 = vmatpush1.bf16.msra.mxu0 %v9473_v3  ;;  %7640 = vmatpush1.bf16.msra.mxu1 %v9475_v4  ;;  %v9530_v3 = vcombine.high %v531_v58, %v535_v61  ;;  %v9532_v4 = vcombine.high %v532_v62, %v536_v63  ;;  %v580_v58 = vld [vmem:[%s11453_s18 + $0x698] sm:$0xff]  ;;  %v9571_v63 = vcombine.low %v572_v47, %v576_v48 }
 0x2d8   : > { %7313 = vmatprep.subr.bf16.mxu0 %v9482_v5  ;;  %7641 = vmatprep.subr.bf16.mxu1 %v9484_v30  ;;  %v539_v5 = vld [vmem:[%s11453_s18 + $0x550] sm:$0xff]  ;;  %v584_v61 = vld [vmem:[%s11453_s18 + $0x6b8] sm:$0xff] }
 0x2d9   : > { %v543_v30 = vld [vmem:[%s11453_s18 + $0x570] sm:$0xff] }
 0x2da   : > { %v9537_v17 = vcombine.low %v539_v5, %v543_v30 }
 0x2db   : > { %7314 = vmatpush1.bf16.msra.mxu0 %v9481_v14  ;;  %7642 = vmatpush1.bf16.msra.mxu1 %v9483_v15  ;;  %v9538_v14 = vcombine.high %v539_v5, %v543_v30  ;;  %v9540_v15 = vcombine.high %v540_v7, %v544_v11  ;;  %v588_v5 = vld [vmem:[%s11453_s18 + $0x6d8] sm:$0xff]  ;;  %v9579_v11 = vcombine.low %v580_v58, %v584_v61 }
 0x2dc   : > { %7315 = vmatprep.subr.bf16.mxu0 %v9490_v16  ;;  %7643 = vmatprep.subr.bf16.mxu1 %v9492_v2  ;;  %v547_v16 = vld [vmem:[%s11453_s18 + $0x590] sm:$0xff]  ;;  %v592_v30 = vld [vmem:[%s11453_s18 + $0x6f8] sm:$0xff] }
 0x2dd   : > { %v551_v2 = vld [vmem:[%s11453_s18 + $0x5b0] sm:$0xff] }
 0x2de   : > { %v9545_v29 = vcombine.low %v547_v16, %v551_v2 }
 0x2df   : > { %7316 = vmatpush1.bf16.msra.mxu0 %v9489_v22  ;;  %7644 = vmatpush1.bf16.msra.mxu1 %v9491_v10  ;;  %v9546_v22 = vcombine.high %v547_v16, %v551_v2  ;;  %v9548_v10 = vcombine.high %v548_v18, %v552_v54  ;;  %v596_v16 = vld [vmem:[%s11453_s18 + $0x718] sm:$0xff]  ;;  %v9587_v54 = vcombine.low %v588_v5, %v592_v30 }
 0x2e0   : > { %7326 = vmatprep.subr.bf16.mxu0 %v9498_v23  ;;  %7654 = vmatprep.subr.bf16.mxu1 %v9500_v25  ;;  %v555_v23 = vld [vmem:[%s11453_s18 + $0x5d0] sm:$0xff]  ;;  %v600_v2 = vld [vmem:[%s11453_s18 + $0x738] sm:$0xff] }
 0x2e1   : > { %v559_v25 = vld [vmem:[%s11453_s18 + $0x5f0] sm:$0xff] }
 0x2e2   : > { %7318 = vmatmul.mubr.bf16.vlgmr.msra.gmra.mrb[4].mxu0 %v11566_v24  ;;  %7646 = vmatmul.mubr.bf16.vlgmr.msra.gmra.mrb[4].mxu1 %v11566_v24  ;;  %v9513_v24 = vcombine.low %v515_v36, %v519_v37  ;;  %v564_v36 = vld [vmem:[%s11453_s18 + $0x618] sm:$0xff]  ;;  %v9553_v40 = vcombine.low %v555_v23, %v559_v25 }
 0x2e3   : > { %7327 = vmatpush1.bf16.msra.mxu0 %v9497_v32  ;;  %7655 = vmatpush1.bf16.msra.mxu1 %v9499_v0  ;;  %v9554_v32 = vcombine.high %v555_v23, %v559_v25  ;;  %v9556_v0 = vcombine.high %v556_v26, %v560_v27  ;;  %v568_v37 = vld [vmem:[%s11453_s18 + $0x638] sm:$0xff]  ;;  %v9595_v27 = vcombine.low %v596_v16, %v600_v2 }
 0x2e4   : > { %7328 = vmatprep.subr.bf16.mxu0 %v9506_v34  ;;  %7656 = vmatprep.subr.bf16.mxu1 %v9508_v35  ;;  %v563_v34 = vld [vmem:[%s11453_s18 + $0x610] sm:$0xff]  ;;  %v604_v23 = vld [vmem:[%s11453_s18 + $0x758] sm:$0xff] }
 0x2e5   : > { %7358 = vmatprep.mubr.bf16.mxu0 %v11574_v33  ;;  %7686 = vmatprep.mubr.bf16.mxu1 %v11574_v33  ;;  %v9523_v33 = vcombine.low %v524_v51, %v528_v53  ;;  %v567_v35 = vld [vmem:[%s11453_s18 + $0x630] sm:$0xff]  ;;  %v9563_v53 = vcombine.low %v564_v36, %v568_v37  ;;  %v608_v25 = vld [vmem:[%s11453_s18 + $0x778] sm:$0xff] }
 0x2e6   : > { %v9561_v51 = vcombine.low %v563_v34, %v567_v35 }
 0x2e7   : > { %7329 = vmatpush1.bf16.msra.mxu0 %v9505_v42  ;;  %7657 = vmatpush1.bf16.msra.mxu1 %v9507_v43  ;;  %v9562_v42 = vcombine.high %v563_v34, %v567_v35  ;;  %v9564_v43 = vcombine.high %v564_v36, %v568_v37  ;;  %v612_v34 = vld [vmem:[%s11453_s18 + $0x798] sm:$0xff]  ;;  %v9603_v37 = vcombine.low %v604_v23, %v608_v25 }
 0x2e8   : > { %7330 = vmatprep.subr.bf16.mxu0 %v9514_v44  ;;  %7658 = vmatprep.subr.bf16.mxu1 %v9516_v46  ;;  %v571_v44 = vld [vmem:[%s11453_s18 + $0x650] sm:$0xff]  ;;  %v616_v35 = vld [vmem:[%s11453_s18 + $0x7b8] sm:$0xff] }
 0x2e9   : > { %v575_v46 = vld [vmem:[%s11453_s18 + $0x670] sm:$0xff] }
 0x2ea   : > { %v9569_v62 = vcombine.low %v571_v44, %v575_v46 }
 0x2eb   : > { %7331 = vmatpush1.bf16.msra.mxu0 %v9513_v24  ;;  %7659 = vmatpush1.bf16.msra.mxu1 %v9515_v55  ;;  %v9570_v24 = vcombine.high %v571_v44, %v575_v46  ;;  %v9572_v55 = vcombine.high %v572_v47, %v576_v48  ;;  %v620_v44 = vld [vmem:[%s11453_s18 + $0x7d8] sm:$0xff]  ;;  %v9611_v48 = vcombine.low %v612_v34, %v616_v35 }
 0x2ec   : > { %7332 = vmatprep.subr.bf16.mxu0 %v9522_v56  ;;  %7660 = vmatprep.subr.bf16.mxu1 %v9524_v57  ;;  %v579_v56 = vld [vmem:[%s11453_s18 + $0x690] sm:$0xff]  ;;  %v624_v46 = vld [vmem:[%s11453_s18 + $0x7f8] sm:$0xff] }
 0x2ed   : > { %v583_v57 = vld [vmem:[%s11453_s18 + $0x6b0] sm:$0xff] }
 0x2ee   : > { %v9577_v7 = vcombine.low %v579_v56, %v583_v57 }
 0x2ef   : > { %7333 = vmatpush1.bf16.msra.mxu0 %v9521_v9  ;;  %7661 = vmatpush1.bf16.msra.mxu1 %v9523_v33  ;;  %v9578_v9 = vcombine.high %v579_v56, %v583_v57  ;;  %v9580_v33 = vcombine.high %v580_v58, %v584_v61  ;;  %v628_v56 = vld [vmem:[%s11453_s18 + $0x818] sm:$0xff]  ;;  %v9619_v61 = vcombine.low %v620_v44, %v624_v46 }
 0x2f0   : > { %7334 = vmatprep.subr.bf16.mxu0 %v9530_v3  ;;  %7662 = vmatprep.subr.bf16.mxu1 %v9532_v4  ;;  %v587_v3 = vld [vmem:[%s11453_s18 + $0x6d0] sm:$0xff]  ;;  %v632_v57 = vld [vmem:[%s11453_s18 + $0x838] sm:$0xff] }
 0x2f1   : > { %v591_v4 = vld [vmem:[%s11453_s18 + $0x6f0] sm:$0xff] }
 0x2f2   : > { %v9585_v18 = vcombine.low %v587_v3, %v591_v4 }
 0x2f3   : > { %7335 = vmatpush1.bf16.msra.mxu0 %v9529_v12  ;;  %7663 = vmatpush1.bf16.msra.mxu1 %v9531_v13  ;;  %v9586_v12 = vcombine.high %v587_v3, %v591_v4  ;;  %v9588_v13 = vcombine.high %v588_v5, %v592_v30  ;;  %v636_v3 = vld [vmem:[%s11453_s18 + $0x858] sm:$0xff]  ;;  %v9627_v30 = vcombine.low %v628_v56, %v632_v57 }
 0x2f4   : > { %7336 = vmatprep.subr.bf16.mxu0 %v9538_v14  ;;  %7664 = vmatprep.subr.bf16.mxu1 %v9540_v15  ;;  %v595_v14 = vld [vmem:[%s11453_s18 + $0x710] sm:$0xff]  ;;  %v640_v4 = vld [vmem:[%s11453_s18 + $0x878] sm:$0xff] }
 0x2f5   : > { %v599_v15 = vld [vmem:[%s11453_s18 + $0x730] sm:$0xff] }
 0x2f6   : > { %v9593_v26 = vcombine.low %v595_v14, %v599_v15 }
 0x2f7   : > { %7337 = vmatpush1.bf16.msra.mxu0 %v9537_v17  ;;  %7665 = vmatpush1.bf16.msra.mxu1 %v9539_v21  ;;  %v9594_v17 = vcombine.high %v595_v14, %v599_v15  ;;  %v9596_v21 = vcombine.high %v596_v16, %v600_v2  ;;  %v644_v14 = vld [vmem:[%s11453_s18 + $0x898] sm:$0xff]  ;;  %v9635_v2 = vcombine.low %v636_v3, %v640_v4 }
 0x2f8   : > { %7338 = vmatprep.subr.bf16.mxu0 %v9546_v22  ;;  %7666 = vmatprep.subr.bf16.mxu1 %v9548_v10  ;;  %v603_v22 = vld [vmem:[%s11453_s18 + $0x750] sm:$0xff]  ;;  %v648_v15 = vld [vmem:[%s11453_s18 + $0x8b8] sm:$0xff] }
 0x2f9   : > { %v607_v10 = vld [vmem:[%s11453_s18 + $0x770] sm:$0xff] }
 0x2fa   : > { %v9601_v36 = vcombine.low %v603_v22, %v607_v10 }
 0x2fb   : > { %7339 = vmatpush1.bf16.msra.mxu0 %v9545_v29  ;;  %7667 = vmatpush1.bf16.msra.mxu1 %v9547_v31  ;;  %v9602_v29 = vcombine.high %v603_v22, %v607_v10  ;;  %v9604_v31 = vcombine.high %v604_v23, %v608_v25  ;;  %v652_v22 = vld [vmem:[%s11453_s18 + $0x8d8] sm:$0xff]  ;;  %v9643_v23 = vcombine.low %v644_v14, %v648_v15 }
 0x2fc   : > { %7340 = vmatprep.subr.bf16.mxu0 %v9554_v32  ;;  %7668 = vmatprep.subr.bf16.mxu1 %v9556_v0  ;;  %v611_v32 = vld [vmem:[%s11453_s18 + $0x790] sm:$0xff]  ;;  %v656_v10 = vld [vmem:[%s11453_s18 + $0x8f8] sm:$0xff] }
 0x2fd   : > { %v615_v0 = vld [vmem:[%s11453_s18 + $0x7b0] sm:$0xff] }
 0x2fe   : > { %v9609_v47 = vcombine.low %v611_v32, %v615_v0 }
 0x2ff   : > { %7341 = vmatpush1.bf16.msra.mxu0 %v9553_v40  ;;  %7669 = vmatpush1.bf16.msra.mxu1 %v9555_v41  ;;  %v9610_v40 = vcombine.high %v611_v32, %v615_v0  ;;  %v9612_v41 = vcombine.high %v612_v34, %v616_v35  ;;  %v664_v32 = vld [vmem:[%s11453_s18 + $0x938] sm:$0xff] }
 0x300   : > { %7342 = vmatprep.subr.bf16.mxu0 %v9562_v42  ;;  %7670 = vmatprep.subr.bf16.mxu1 %v9564_v43  ;;  %v619_v42 = vld [vmem:[%s11453_s18 + $0x7d0] sm:$0xff] }
 0x301   : > { %v623_v43 = vld [vmem:[%s11453_s18 + $0x7f0] sm:$0xff] }
 0x302   : > { %v9617_v58 = vcombine.low %v619_v42, %v623_v43 }
 0x303   : > { %7343 = vmatpush1.bf16.msra.mxu0 %v9561_v51  ;;  %7671 = vmatpush1.bf16.msra.mxu1 %v9563_v53  ;;  %v9618_v51 = vcombine.high %v619_v42, %v623_v43  ;;  %v9620_v53 = vcombine.high %v620_v44, %v624_v46 }
 0x304   : > { %7344 = vmatprep.subr.bf16.mxu0 %v9570_v24  ;;  %7672 = vmatprep.subr.bf16.mxu1 %v9572_v55  ;;  %v627_v24 = vld [vmem:[%s11453_s18 + $0x810] sm:$0xff] }
 0x305   : > { %v631_v55 = vld [vmem:[%s11453_s18 + $0x830] sm:$0xff] }
 0x306   : > { %v9625_v5 = vcombine.low %v627_v24, %v631_v55 }
 0x307   : > { %7345 = vmatpush1.bf16.msra.mxu0 %v9569_v62  ;;  %7673 = vmatpush1.bf16.msra.mxu1 %v9571_v63  ;;  %v9626_v62 = vcombine.high %v627_v24, %v631_v55  ;;  %v9628_v63 = vcombine.high %v628_v56, %v632_v57 }
 0x308   : > { %7346 = vmatprep.subr.bf16.mxu0 %v9578_v9  ;;  %7674 = vmatprep.subr.bf16.mxu1 %v9580_v33  ;;  %v635_v9 = vld [vmem:[%s11453_s18 + $0x850] sm:$0xff] }
 0x309   : > { %v639_v33 = vld [vmem:[%s11453_s18 + $0x870] sm:$0xff] }
 0x30a   : > { %v9633_v16 = vcombine.low %v635_v9, %v639_v33 }
 0x30b   : > { %7347 = vmatpush1.bf16.msra.mxu0 %v9577_v7  ;;  %7675 = vmatpush1.bf16.msra.mxu1 %v9579_v11  ;;  %v9634_v7 = vcombine.high %v635_v9, %v639_v33  ;;  %v9636_v11 = vcombine.high %v636_v3, %v640_v4 }
 0x30c   : > { %7348 = vmatprep.subr.bf16.mxu0 %v9586_v12  ;;  %7676 = vmatprep.subr.bf16.mxu1 %v9588_v13  ;;  %v643_v12 = vld [vmem:[%s11453_s18 + $0x890] sm:$0xff] }
 0x30d   : > { %v647_v13 = vld [vmem:[%s11453_s18 + $0x8b0] sm:$0xff] }
 0x30f   : > { %7349 = vmatpush1.bf16.msra.mxu0 %v9585_v18  ;;  %7677 = vmatpush1.bf16.msra.mxu1 %v9587_v54  ;;  %v9642_v18 = vcombine.high %v643_v12, %v647_v13  ;;  %v9644_v54 = vcombine.high %v644_v14, %v648_v15 }
 0x310   : > { %7350 = vmatprep.subr.bf16.mxu0 %v9594_v17  ;;  %7678 = vmatprep.subr.bf16.mxu1 %v9596_v21  ;;  %v651_v17 = vld [vmem:[%s11453_s18 + $0x8d0] sm:$0xff] }
 0x311   : > { %v655_v21 = vld [vmem:[%s11453_s18 + $0x8f0] sm:$0xff] }
 0x312   : > { %v9650_v25 = vcombine.high %v651_v17, %v655_v21  ;;  %v9649_v0 = vcombine.low %v651_v17, %v655_v21 }
 0x313   : > { %7351 = vmatpush1.bf16.msra.mxu0 %v9593_v26  ;;  %7679 = vmatpush1.bf16.msra.mxu1 %v9595_v27  ;;  %v9652_v26 = vcombine.high %v652_v22, %v656_v10  ;;  %v659_v27 = vld [vmem:[%s11453_s18 + $0x910] sm:$0xff] }
 0x314   : > { %7352 = vmatprep.subr.bf16.mxu0 %v9602_v29  ;;  %7680 = vmatprep.subr.bf16.mxu1 %v9604_v31  ;;  %v663_v29 = vld [vmem:[%s11453_s18 + $0x930] sm:$0xff]  ;;  %v660_v31 = vld [vmem:[%s11453_s18 + $0x918] sm:$0xff] }
 0x315   : > { %v9658_v34 = vcombine.high %v659_v27, %v663_v29  ;;  %v9660_v35 = vcombine.high %v660_v31, %v664_v32  ;;  %v9657_v42 = vcombine.low %v659_v27, %v663_v29  ;;  %v9659_v43 = vcombine.low %v660_v31, %v664_v32 }
 0x317   : > { %7353 = vmatpush1.bf16.msra.mxu0 %v9601_v36  ;;  %7681 = vmatpush1.bf16.msra.mxu1 %v9603_v37  ;;  %v667_v36 = vld [vmem:[%s11453_s18 + $0x950] sm:$0xff] }
 0x318   : > { %7354 = vmatprep.subr.bf16.mxu0 %v9610_v40  ;;  %7682 = vmatprep.subr.bf16.mxu1 %v9612_v41  ;;  %v671_v37 = vld [vmem:[%s11453_s18 + $0x970] sm:$0xff]  ;;  %v668_v40 = vld [vmem:[%s11453_s18 + $0x958] sm:$0xff] }
 0x319   : > { %v672_v41 = vld [vmem:[%s11453_s18 + $0x978] sm:$0xff]  ;;  %v9666_v44 = vcombine.high %v667_v36, %v671_v37  ;;  %v9665_v24 = vcombine.low %v667_v36, %v671_v37 }
 0x31a   : > { %v9668_v46 = vcombine.high %v668_v40, %v672_v41  ;;  %v9667_v55 = vcombine.low %v668_v40, %v672_v41 }
 0x31b   : > { %7355 = vmatpush1.bf16.msra.mxu0 %v9609_v47  ;;  %7683 = vmatpush1.bf16.msra.mxu1 %v9611_v48  ;;  %v675_v47 = vld [vmem:[%s11453_s18 + $0x990] sm:$0xff] }
 0x31c   : > { %7356 = vmatprep.subr.bf16.mxu0 %v9618_v51  ;;  %7684 = vmatprep.subr.bf16.mxu1 %v9620_v53  ;;  %v679_v48 = vld [vmem:[%s11453_s18 + $0x9b0] sm:$0xff]  ;;  %v676_v51 = vld [vmem:[%s11453_s18 + $0x998] sm:$0xff] }
 0x31d   : > { %v680_v53 = vld [vmem:[%s11453_s18 + $0x9b8] sm:$0xff]  ;;  %v9674_v56 = vcombine.high %v675_v47, %v679_v48  ;;  %v9673_v9 = vcombine.low %v675_v47, %v679_v48 }
 0x31e   : > { %v9676_v57 = vcombine.high %v676_v51, %v680_v53  ;;  %v9675_v33 = vcombine.low %v676_v51, %v680_v53 }
 0x31f   : > { %7357 = vmatpush1.bf16.msra.mxu0 %v9617_v58  ;;  %7685 = vmatpush1.bf16.msra.mxu1 %v9619_v61  ;;  %v683_v58 = vld [vmem:[%s11453_s18 + $0x9d0] sm:$0xff] }
 0x320   : > { %7367 = vmatprep.subr.bf16.mxu0 %v9626_v62  ;;  %7695 = vmatprep.subr.bf16.mxu1 %v9628_v63  ;;  %v687_v61 = vld [vmem:[%s11453_s18 + $0x9f0] sm:$0xff]  ;;  %v684_v62 = vld [vmem:[%s11453_s18 + $0x9d8] sm:$0xff] }
 0x321   : > { %v688_v63 = vld [vmem:[%s11453_s18 + $0x9f8] sm:$0xff]  ;;  %v9682_v3 = vcombine.high %v683_v58, %v687_v61 }
 0x322   : > { %7359 = vmatmul.mubr.bf16.vlgmr.msra.gmra.mrb[4].mxu0 %v11649_v39  ;;  %7687 = vmatmul.mubr.bf16.vlgmr.msra.gmra.mrb[4].mxu1 %v11649_v39  ;;  %v9641_v39 = vcombine.low %v643_v12, %v647_v13  ;;  %v9684_v4 = vcombine.high %v684_v62, %v688_v63  ;;  %v9681_v12 = vcombine.low %v683_v58, %v687_v61 }
 0x323   : > { %7368 = vmatpush1.bf16.msra.mxu0 %v9625_v5  ;;  %7696 = vmatpush1.bf16.msra.mxu1 %v9627_v30  ;;  %v691_v5 = vld [vmem:[%s11453_s18 + $0xa10] sm:$0xff]  ;;  %v9683_v13 = vcombine.low %v684_v62, %v688_v63 }
 0x324   : > { %7369 = vmatprep.subr.bf16.mxu0 %v9634_v7  ;;  %7697 = vmatprep.subr.bf16.mxu1 %v9636_v11  ;;  %v695_v30 = vld [vmem:[%s11453_s18 + $0xa30] sm:$0xff]  ;;  %v692_v7 = vld [vmem:[%s11453_s18 + $0xa18] sm:$0xff] }
 0x325   : > { %7399 = vmatprep.mubr.bf16.mxu0 %v11656_v49  ;;  %7727 = vmatprep.mubr.bf16.mxu1 %v11656_v49  ;;  %v9651_v49 = vcombine.low %v652_v22, %v656_v10  ;;  %v696_v11 = vld [vmem:[%s11453_s18 + $0xa38] sm:$0xff]  ;;  %v9690_v14 = vcombine.high %v691_v5, %v695_v30  ;;  %v9689_v17 = vcombine.low %v691_v5, %v695_v30 }
 0x326   : > { %v9692_v15 = vcombine.high %v692_v7, %v696_v11  ;;  %v9691_v21 = vcombine.low %v692_v7, %v696_v11 }
 0x327   : > { %7370 = vmatpush1.bf16.msra.mxu0 %v9633_v16  ;;  %7698 = vmatpush1.bf16.msra.mxu1 %v9635_v2  ;;  %v699_v16 = vld [vmem:[%s11453_s18 + $0xa50] sm:$0xff] }
 0x328   : > { %7371 = vmatprep.subr.bf16.mxu0 %v9642_v18  ;;  %7699 = vmatprep.subr.bf16.mxu1 %v9644_v54  ;;  %v703_v2 = vld [vmem:[%s11453_s18 + $0xa70] sm:$0xff]  ;;  %v700_v18 = vld [vmem:[%s11453_s18 + $0xa58] sm:$0xff] }
 0x329   : > { %v704_v54 = vld [vmem:[%s11453_s18 + $0xa78] sm:$0xff]  ;;  %v9698_v22 = vcombine.high %v699_v16, %v703_v2  ;;  %v9697_v27 = vcombine.low %v699_v16, %v703_v2 }
 0x32a   : > { %v9700_v10 = vcombine.high %v700_v18, %v704_v54  ;;  %v9699_v29 = vcombine.low %v700_v18, %v704_v54 }
 0x32b   : > { %7372 = vmatpush1.bf16.msra.mxu0 %v9641_v39  ;;  %7700 = vmatpush1.bf16.msra.mxu1 %v9643_v23  ;;  %v707_v39 = vld [vmem:[%s11453_s18 + $0xa90] sm:$0xff] }
 0x32c   : > { %7373 = vmatprep.subr.bf16.mxu0 %v9650_v25  ;;  %7701 = vmatprep.subr.bf16.mxu1 %v9652_v26  ;;  %v711_v23 = vld [vmem:[%s11453_s18 + $0xab0] sm:$0xff]  ;;  %v708_v25 = vld [vmem:[%s11453_s18 + $0xa98] sm:$0xff] }
 0x32d   : > { %v712_v26 = vld [vmem:[%s11453_s18 + $0xab8] sm:$0xff]  ;;  %v9706_v31 = vcombine.high %v707_v39, %v711_v23  ;;  %v9705_v36 = vcombine.low %v707_v39, %v711_v23 }
 0x32e   : > { %v9708_v32 = vcombine.high %v708_v25, %v712_v26  ;;  %v9707_v37 = vcombine.low %v708_v25, %v712_v26 }
 0x32f   : > { %7374 = vmatpush1.bf16.msra.mxu0 %v9649_v0  ;;  %7702 = vmatpush1.bf16.msra.mxu1 %v9651_v49  ;;  %v715_v0 = vld [vmem:[%s11453_s18 + $0xad0] sm:$0xff] }
 0x330   : > { %7375 = vmatprep.subr.bf16.mxu0 %v9658_v34  ;;  %7703 = vmatprep.subr.bf16.mxu1 %v9660_v35  ;;  %v719_v49 = vld [vmem:[%s11453_s18 + $0xaf0] sm:$0xff]  ;;  %v716_v34 = vld [vmem:[%s11453_s18 + $0xad8] sm:$0xff] }
 0x331   : > { %v720_v35 = vld [vmem:[%s11453_s18 + $0xaf8] sm:$0xff]  ;;  %v9714_v40 = vcombine.high %v715_v0, %v719_v49  ;;  %v9713_v47 = vcombine.low %v715_v0, %v719_v49 }
 0x332   : > { %v9716_v41 = vcombine.high %v716_v34, %v720_v35  ;;  %v9715_v48 = vcombine.low %v716_v34, %v720_v35 }
 0x333   : > { %7376 = vmatpush1.bf16.msra.mxu0 %v9657_v42  ;;  %7704 = vmatpush1.bf16.msra.mxu1 %v9659_v43  ;;  %v723_v42 = vld [vmem:[%s11453_s18 + $0xb10] sm:$0xff] }
 0x334   : > { %7377 = vmatprep.subr.bf16.mxu0 %v9666_v44  ;;  %7705 = vmatprep.subr.bf16.mxu1 %v9668_v46  ;;  %v727_v43 = vld [vmem:[%s11453_s18 + $0xb30] sm:$0xff]  ;;  %v724_v44 = vld [vmem:[%s11453_s18 + $0xb18] sm:$0xff] }
 0x335   : > { %v728_v46 = vld [vmem:[%s11453_s18 + $0xb38] sm:$0xff]  ;;  %v9722_v51 = vcombine.high %v723_v42, %v727_v43  ;;  %v9721_v58 = vcombine.low %v723_v42, %v727_v43 }
 0x336   : > { %v9724_v53 = vcombine.high %v724_v44, %v728_v46  ;;  %v9723_v61 = vcombine.low %v724_v44, %v728_v46 }
 0x337   : > { %7378 = vmatpush1.bf16.msra.mxu0 %v9665_v24  ;;  %7706 = vmatpush1.bf16.msra.mxu1 %v9667_v55  ;;  %v731_v24 = vld [vmem:[%s11453_s18 + $0xb50] sm:$0xff] }
 0x338   : > { %7379 = vmatprep.subr.bf16.mxu0 %v9674_v56  ;;  %7707 = vmatprep.subr.bf16.mxu1 %v9676_v57  ;;  %v735_v55 = vld [vmem:[%s11453_s18 + $0xb70] sm:$0xff]  ;;  %v732_v56 = vld [vmem:[%s11453_s18 + $0xb58] sm:$0xff] }
 0x339   : > { %v736_v57 = vld [vmem:[%s11453_s18 + $0xb78] sm:$0xff]  ;;  %v9730_v62 = vcombine.high %v731_v24, %v735_v55  ;;  %v9729_v5 = vcombine.low %v731_v24, %v735_v55 }
 0x33a   : > { %v9732_v63 = vcombine.high %v732_v56, %v736_v57  ;;  %v9731_v30 = vcombine.low %v732_v56, %v736_v57  ;;  %v787_v57 = vld [vmem:[%s11453_s18 + $0xd10] sm:$0xff] }
 0x33b   : > { %7380 = vmatpush1.bf16.msra.mxu0 %v9673_v9  ;;  %7708 = vmatpush1.bf16.msra.mxu1 %v9675_v33  ;;  %v739_v9 = vld [vmem:[%s11453_s18 + $0xb90] sm:$0xff] }
 0x33c   : > { %7381 = vmatprep.subr.bf16.mxu0 %v9682_v3  ;;  %7709 = vmatprep.subr.bf16.mxu1 %v9684_v4  ;;  %v743_v33 = vld [vmem:[%s11453_s18 + $0xbb0] sm:$0xff]  ;;  %v740_v3 = vld [vmem:[%s11453_s18 + $0xb98] sm:$0xff] }
 0x33d   : > { %v744_v4 = vld [vmem:[%s11453_s18 + $0xbb8] sm:$0xff]  ;;  %v9738_v7 = vcombine.high %v739_v9, %v743_v33  ;;  %v9737_v16 = vcombine.low %v739_v9, %v743_v33 }
 0x33e   : > { %v9740_v11 = vcombine.high %v740_v3, %v744_v4  ;;  %v9739_v2 = vcombine.low %v740_v3, %v744_v4  ;;  %v11218_v3 = vmov 1983009808  }
 0x33f   : > { %7382 = vmatpush1.bf16.msra.mxu0 %v9681_v12  ;;  %7710 = vmatpush1.bf16.msra.mxu1 %v9683_v13  ;;  %v747_v12 = vld [vmem:[%s11453_s18 + $0xbd0] sm:$0xff]  ;;  %v7952_v4 = vunpack.c.l.s4 %v11218_v3  ;;  %v832_v3 = vld [vmem:[%s11453_s18 + $0xe78] sm:$0xff] }
 0x340   : > { %7383 = vmatprep.subr.bf16.mxu0 %v9690_v14  ;;  %7711 = vmatprep.subr.bf16.mxu1 %v9692_v15  ;;  %v751_v13 = vld [vmem:[%s11453_s18 + $0xbf0] sm:$0xff]  ;;  %v748_v14 = vld [vmem:[%s11453_s18 + $0xbd8] sm:$0xff] }
 0x341   : > { %v752_v15 = vld [vmem:[%s11453_s18 + $0xbf8] sm:$0xff]  ;;  %v9746_v18 = vcombine.high %v747_v12, %v751_v13  ;;  %v9745_v39 = vcombine.low %v747_v12, %v751_v13 }
 0x342   : > { %v9748_v54 = vcombine.high %v748_v14, %v752_v15  ;;  %v9747_v23 = vcombine.low %v748_v14, %v752_v15  ;;  %v7953_v15 = vunpack.c.0.s8 %v7952_v4 }
 0x343   : > { %7384 = vmatpush1.bf16.msra.mxu0 %v9689_v17  ;;  %7712 = vmatpush1.bf16.msra.mxu1 %v9691_v21  ;;  %v755_v17 = vld [vmem:[%s11453_s18 + $0xc10] sm:$0xff] }
 0x344   : > { %7385 = vmatprep.subr.bf16.mxu0 %v9698_v22  ;;  %7713 = vmatprep.subr.bf16.mxu1 %v9700_v10  ;;  %v759_v21 = vld [vmem:[%s11453_s18 + $0xc30] sm:$0xff]  ;;  %v756_v22 = vld [vmem:[%s11453_s18 + $0xc18] sm:$0xff] }
 0x345   : > { %v760_v10 = vld [vmem:[%s11453_s18 + $0xc38] sm:$0xff]  ;;  %v9754_v25 = vcombine.high %v755_v17, %v759_v21  ;;  %v9753_v0 = vcombine.low %v755_v17, %v759_v21 }
 0x346   : > { %v9756_v26 = vcombine.high %v756_v22, %v760_v10  ;;  %v9755_v49 = vcombine.low %v756_v22, %v760_v10  ;;  %v808_v17 = vld [vmem:[%s11453_s18 + $0xdb8] sm:$0xff] }
 0x347   : > { %7386 = vmatpush1.bf16.msra.mxu0 %v9697_v27  ;;  %7714 = vmatpush1.bf16.msra.mxu1 %v9699_v29  ;;  %v763_v27 = vld [vmem:[%s11453_s18 + $0xc50] sm:$0xff] }
 0x348   : > { %7387 = vmatprep.subr.bf16.mxu0 %v9706_v31  ;;  %7715 = vmatprep.subr.bf16.mxu1 %v9708_v32  ;;  %v767_v29 = vld [vmem:[%s11453_s18 + $0xc70] sm:$0xff]  ;;  %v764_v31 = vld [vmem:[%s11453_s18 + $0xc58] sm:$0xff] }
 0x349   : > { %v768_v32 = vld [vmem:[%s11453_s18 + $0xc78] sm:$0xff]  ;;  %v9762_v34 = vcombine.high %v763_v27, %v767_v29  ;;  %v9761_v42 = vcombine.low %v763_v27, %v767_v29  ;;  %v815_v27 = vld [vmem:[%s11453_s18 + $0xdf0] sm:$0xff] }
 0x34a   : > { %v9764_v35 = vcombine.high %v764_v31, %v768_v32  ;;  %v9763_v43 = vcombine.low %v764_v31, %v768_v32  ;;  %v812_v32 = vld [vmem:[%s11453_s18 + $0xdd8] sm:$0xff] }
 0x34b   : > { %7388 = vmatpush1.bf16.msra.mxu0 %v9705_v36  ;;  %7716 = vmatpush1.bf16.msra.mxu1 %v9707_v37  ;;  %v771_v36 = vld [vmem:[%s11453_s18 + $0xc90] sm:$0xff] }
 0x34c   : > { %7389 = vmatprep.subr.bf16.mxu0 %v9714_v40  ;;  %7717 = vmatprep.subr.bf16.mxu1 %v9716_v41  ;;  %v775_v37 = vld [vmem:[%s11453_s18 + $0xcb0] sm:$0xff]  ;;  %v772_v40 = vld [vmem:[%s11453_s18 + $0xc98] sm:$0xff] }
 0x34d   : > { %v776_v41 = vld [vmem:[%s11453_s18 + $0xcb8] sm:$0xff]  ;;  %v9770_v44 = vcombine.high %v771_v36, %v775_v37 }
 0x34e   : > { %v9772_v46 = vcombine.high %v772_v40, %v776_v41  ;;  %v9771_v24 = vcombine.low %v772_v40, %v776_v41 }
 0x34f   : > { %7390 = vmatpush1.bf16.msra.mxu0 %v9713_v47  ;;  %7718 = vmatpush1.bf16.msra.mxu1 %v9715_v48  ;;  %v779_v47 = vld [vmem:[%s11453_s18 + $0xcd0] sm:$0xff] }
 0x350   : > { %7391 = vmatprep.subr.bf16.mxu0 %v9722_v51  ;;  %7719 = vmatprep.subr.bf16.mxu1 %v9724_v53  ;;  %v783_v48 = vld [vmem:[%s11453_s18 + $0xcf0] sm:$0xff]  ;;  %v780_v51 = vld [vmem:[%s11453_s18 + $0xcd8] sm:$0xff] }
 0x351   : > { %v784_v53 = vld [vmem:[%s11453_s18 + $0xcf8] sm:$0xff]  ;;  %v9778_v55 = vcombine.high %v779_v47, %v783_v48 }
 0x352   : > { %v9780_v56 = vcombine.high %v780_v51, %v784_v53 }
 0x353   : > { %7392 = vmatpush1.bf16.msra.mxu0 %v9721_v58  ;;  %7720 = vmatpush1.bf16.msra.mxu1 %v9723_v61  ;;  %v791_v58 = vld [vmem:[%s11453_s18 + $0xd30] sm:$0xff]  ;;  %v788_v61 = vld [vmem:[%s11453_s18 + $0xd18] sm:$0xff] }
 0x354   : > { %7393 = vmatprep.subr.bf16.mxu0 %v9730_v62  ;;  %7721 = vmatprep.subr.bf16.mxu1 %v9732_v63  ;;  %v792_v62 = vld [vmem:[%s11453_s18 + $0xd38] sm:$0xff]  ;;  %v9777_v63 = vcombine.low %v779_v47, %v783_v48  ;;  %v9786_v9 = vcombine.high %v787_v57, %v791_v58  ;;  %v9785_v12 = vcombine.low %v787_v57, %v791_v58  ;;  %v819_v48 = vld [vmem:[%s11453_s18 + $0xe10] sm:$0xff] }
 0x355   : > { %v9788_v33 = vcombine.high %v788_v61, %v792_v62  ;;  %v9787_v13 = vcombine.low %v788_v61, %v792_v62 }
 0x357   : > { %7394 = vmatpush1.bf16.msra.mxu0 %v9729_v5  ;;  %7722 = vmatpush1.bf16.msra.mxu1 %v9731_v30  ;;  %v795_v5 = vld [vmem:[%s11453_s18 + $0xd50] sm:$0xff] }
 0x358   : > { %7395 = vmatprep.subr.bf16.mxu0 %v9738_v7  ;;  %7723 = vmatprep.subr.bf16.mxu1 %v9740_v11  ;;  %v799_v30 = vld [vmem:[%s11453_s18 + $0xd70] sm:$0xff]  ;;  %v796_v7 = vld [vmem:[%s11453_s18 + $0xd58] sm:$0xff] }
 0x359   : > { %v800_v11 = vld [vmem:[%s11453_s18 + $0xd78] sm:$0xff]  ;;  %v9794_v14 = vcombine.high %v795_v5, %v799_v30  ;;  %v9793_v21 = vcombine.low %v795_v5, %v799_v30 }
 0x35a   : > { %v9795_v22 = vcombine.low %v796_v7, %v800_v11 }
 0x35b   : > { %7396 = vmatpush1.bf16.msra.mxu0 %v9737_v16  ;;  %7724 = vmatpush1.bf16.msra.mxu1 %v9739_v2  ;;  %v9796_v16 = vcombine.high %v796_v7, %v800_v11  ;;  %v803_v2 = vld [vmem:[%s11453_s18 + $0xd90] sm:$0xff] }
 0x35c   : > { %7397 = vmatprep.subr.bf16.mxu0 %v9746_v18  ;;  %7725 = vmatprep.subr.bf16.mxu1 %v9748_v54  ;;  %v807_v18 = vld [vmem:[%s11453_s18 + $0xdb0] sm:$0xff]  ;;  %v804_v54 = vld [vmem:[%s11453_s18 + $0xd98] sm:$0xff] }
 0x35d   : > { %v9802_v10 = vcombine.high %v803_v2, %v807_v18  ;;  %v835_v11 = vld [vmem:[%s11453_s18 + $0xe90] sm:$0xff] }
 0x35f   : > { %7398 = vmatpush1.bf16.msra.mxu0 %v9745_v39  ;;  %7726 = vmatpush1.bf16.msra.mxu1 %v9747_v23  ;;  %v12351_v23 = vsub.s32 %v7953_v15, %v11497_v45 }
 0x360   : > { %7408 = vmatprep.subr.bf16.mxu0 %v9754_v25  ;;  %7736 = vmatprep.subr.bf16.mxu1 %v9756_v26  ;;  %v9804_v25 = vcombine.high %v804_v54, %v808_v17  ;;  %v811_v26 = vld [vmem:[%s11453_s18 + $0xdd0] sm:$0xff] }
 0x362   : > { %7400 = vmatmul.mubr.bf16.vlgmr.msra.gmra.mrb[4].mxu0 %v11724_v59  ;;  %7728 = vmatmul.mubr.bf16.vlgmr.msra.gmra.mrb[4].mxu1 %v11724_v59  ;;  %v9769_v59 = vcombine.low %v771_v36, %v775_v37  ;;  %v9801_v36 = vcombine.low %v803_v2, %v807_v18 }
 0x363   : > { %7409 = vmatpush1.bf16.msra.mxu0 %v9753_v0  ;;  %7737 = vmatpush1.bf16.msra.mxu1 %v9755_v49  ;;  %v816_v0 = vld [vmem:[%s11453_s18 + $0xdf8] sm:$0xff] }
 0x364   : > { %7410 = vmatprep.subr.bf16.mxu0 %v9762_v34  ;;  %7738 = vmatprep.subr.bf16.mxu1 %v9764_v35  ;;  %v9812_v47 = vcombine.high %v812_v32, %v816_v0  ;;  %v9811_v58 = vcombine.low %v812_v32, %v816_v0  ;;  %v856_v32 = vld [vmem:[%s11453_s18 + $0xf38] sm:$0xff] }
 0x365   : > { %7440 = vmatprep.mubr.bf16.mxu0 %v11732_v6  ;;  %7768 = vmatprep.mubr.bf16.mxu1 %v11732_v6  ;;  %v9779_v6 = vcombine.low %v780_v51, %v784_v53  ;;  %v823_v51 = vld [vmem:[%s11453_s18 + $0xe30] sm:$0xff] }
 0x366   : > { %v9818_v61 = vcombine.high %v819_v48, %v823_v51  ;;  %v9817_v4 = vcombine.low %v819_v48, %v823_v51  ;;  %v871_v48 = vld [vmem:[%s11453_s18 + $0xfb0] sm:$0xff]  ;;  %v868_v51 = vld [vmem:[%s11453_s18 + $0xf98] sm:$0xff] }
 0x367   : > { %7411 = vmatpush1.bf16.msra.mxu0 %v9761_v42  ;;  %7739 = vmatpush1.bf16.msra.mxu1 %v9763_v43  ;;  %v9803_v42 = vcombine.low %v804_v54, %v808_v17  ;;  %v9810_v43 = vcombine.high %v811_v26, %v815_v27  ;;  %v843_v54 = vld [vmem:[%s11453_s18 + $0xed0] sm:$0xff] }
 0x368   : > { %7412 = vmatprep.subr.bf16.mxu0 %v9770_v44  ;;  %7740 = vmatprep.subr.bf16.mxu1 %v9772_v46  ;;  %v847_v17 = vld [vmem:[%s11453_s18 + $0xef0] sm:$0xff] }
 0x369   : > { %v9841_v0 = vcombine.low %v843_v54, %v847_v17 }
 0x36b   : > { %7413 = vmatpush1.bf16.msra.mxu0 %v9769_v59  ;;  %7741 = vmatpush1.bf16.msra.mxu1 %v9771_v24  ;;  %v820_v59 = vld [vmem:[%s11453_s18 + $0xe18] sm:$0xff] }
 0x36c   : > { %7414 = vmatprep.subr.bf16.mxu0 %v9778_v55  ;;  %7742 = vmatprep.subr.bf16.mxu1 %v9780_v56  ;;  %v824_v24 = vld [vmem:[%s11453_s18 + $0xe38] sm:$0xff]  ;;  %v365_v55 = vld [vmem:[#allocation2] sm:$0xff]  ;;  %v9809_v56 = vcombine.low %v811_v26, %v815_v27 }
 0x36d   : > { %v9820_v62 = vcombine.high %v820_v59, %v824_v24  ;;  %v9819_v5 = vcombine.low %v820_v59, %v824_v24  ;;  %v851_v27 = vld [vmem:[%s11453_s18 + $0xf10] sm:$0xff] }
 0x36f   : > { %7415 = vmatpush1.bf16.msra.mxu0 %v9777_v63  ;;  %7743 = vmatpush1.bf16.msra.mxu1 %v9779_v6  ;;  %v827_v63 = vld [vmem:[%s11453_s18 + $0xe50] sm:$0xff] }
 0x370   : > { %7416 = vmatprep.subr.bf16.mxu0 %v9786_v9  ;;  %7744 = vmatprep.subr.bf16.mxu1 %v9788_v33  ;;  %v831_v6 = vld [vmem:[%s11453_s18 + $0xe70] sm:$0xff]  ;;  %v828_v33 = vld [vmem:[%s11453_s18 + $0xe58] sm:$0xff] }
 0x371   : > { %v9826_v30 = vcombine.high %v827_v63, %v831_v6  ;;  %v9828_v7 = vcombine.high %v828_v33, %v832_v3  ;;  %v9825_v15 = vcombine.low %v827_v63, %v831_v6 }
 0x373   : > { %7417 = vmatpush1.bf16.msra.mxu0 %v9785_v12  ;;  %7745 = vmatpush1.bf16.msra.mxu1 %v9787_v13  ;;  %v839_v12 = vld [vmem:[%s11453_s18 + $0xeb0] sm:$0xff]  ;;  %v836_v13 = vld [vmem:[%s11453_s18 + $0xe98] sm:$0xff] }
 0x374   : > { %7418 = vmatprep.subr.bf16.mxu0 %v9794_v14  ;;  %7746 = vmatprep.subr.bf16.mxu1 %v9796_v16  ;;  %v840_v14 = vld [vmem:[%s11453_s18 + $0xeb8] sm:$0xff]  ;;  %v9827_v16 = vcombine.low %v828_v33, %v832_v3  ;;  %v9834_v2 = vcombine.high %v835_v11, %v839_v12  ;;  %v883_v3 = vld [vmem:[%s11453_s18 + $0x1010] sm:$0xff] }
 0x375   : > { %v6950_v39 = vpop.f32.mrb[0].mxu0  ;;  %v7278_v29 = vpop.f32.mrb[0].mxu1  ;;  %v9836_v18 = vcombine.high %v836_v13, %v840_v14 }
 0x376   : > { %v6952_v31 = vpop.f32.mrb[1].mxu0  ;;  %v7280_v34 = vpop.f32.mrb[1].mxu1 }
 0x377   : > { %v7949_v49 = vcombine.low %v6950_v39, %v6952_v31  ;;  %v6954_v35 = vpop.f32.mrb[2].mxu0  ;;  %7419 = vmatpush1.bf16.msra.mxu0 %v9793_v21  ;;  %v7950_v37 = vcombine.low %v7278_v29, %v7280_v34  ;;  %v7282_v40 = vpop.f32.mrb[2].mxu1  ;;  %7747 = vmatpush1.bf16.msra.mxu1 %v9795_v22  ;;  %v844_v21 = vld [vmem:[%s11453_s18 + $0xed8] sm:$0xff]  ;;  %v9835_v39 = vcombine.low %v836_v13, %v840_v14  ;;  %v855_v29 = vld [vmem:[%s11453_s18 + $0xf30] sm:$0xff] }
 0x378   : > { %v6955_v41 = vpop.f32.mrb[3].mxu0  ;;  %7420 = vmatprep.subr.bf16.mxu0 %v9802_v10  ;;  %v7283_v46 = vpop.f32.mrb[3].mxu1  ;;  %7748 = vmatprep.subr.bf16.mxu1 %v9804_v25  ;;  %v848_v22 = vld [vmem:[%s11453_s18 + $0xef8] sm:$0xff]  ;;  %v9833_v10 = vcombine.low %v835_v11, %v839_v12  ;;  %v9842_v25 = vcombine.high %v843_v54, %v847_v17  ;;  %v9850_v34 = vcombine.high %v851_v27, %v855_v29  ;;  %v891_v14 = vld [vmem:[%s11453_s18 + $0x1050] sm:$0xff] }
 0x379   : > { %v7957_v44 = vrot.slane %v7949_v49, %v12351_v23  ;;  %v7964_v53 = vrot.slane %v7950_v37, %v12351_v23  ;;  %v9844_v26 = vcombine.high %v844_v21, %v848_v22  ;;  %v852_v31 = vld [vmem:[%s11453_s18 + $0xf18] sm:$0xff]  ;;  %v9843_v49 = vcombine.low %v844_v21, %v848_v22  ;;  %v863_v37 = vld [vmem:[%s11453_s18 + $0xf70] sm:$0xff] }
 0x37a   : > { %v9852_v35 = vcombine.high %v852_v31, %v856_v32  ;;  %v860_v40 = vld [vmem:[%s11453_s18 + $0xf58] sm:$0xff]  ;;  %v899_v22 = vld [vmem:[%s11453_s18 + $0x1090] sm:$0xff] }
 0x37b   : > { %7421 = vmatpush1.bf16.msra.mxu0 %v9801_v36  ;;  %v7965_v57 = vcombine.low %v7957_v44, %v7964_v53  ;;  %7749 = vmatpush1.bf16.msra.mxu1 %v9803_v42  ;;  %v859_v36 = vld [vmem:[%s11453_s18 + $0xf50] sm:$0xff]  ;;  %v864_v41 = vld [vmem:[%s11453_s18 + $0xf78] sm:$0xff]  ;;  %v9849_v42 = vcombine.low %v851_v27, %v855_v29 }
 0x37c   : > { %7422 = vmatprep.subr.bf16.mxu0 %v9810_v43  ;;  %7750 = vmatprep.subr.bf16.mxu1 %v9812_v47  ;;  %v9851_v43 = vcombine.low %v852_v31, %v856_v32  ;;  %v9858_v44 = vcombine.high %v859_v36, %v863_v37  ;;  %v9860_v46 = vcombine.high %v860_v40, %v864_v41  ;;  %v867_v47 = vld [vmem:[%s11453_s18 + $0xf90] sm:$0xff]  ;;  %v872_v53 = vld [vmem:[%s11453_s18 + $0xfb8] sm:$0xff] }
 0x37d   : > { %v7985_v9 = vadd.f32 %v7965_v57, %v365_v55  ;;  %v9857_v59 = vcombine.low %v859_v36, %v863_v37  ;;  %v9859_v24 = vcombine.low %v860_v40, %v864_v41  ;;  %v9866_v55 = vcombine.high %v867_v47, %v871_v48  ;;  %v875_v57 = vld [vmem:[%s11453_s18 + $0xfd0] sm:$0xff] }
 0x37e   : > { %v9865_v63 = vcombine.low %v867_v47, %v871_v48  ;;  %v9867_v6 = vcombine.low %v868_v51, %v872_v53  ;;  %v907_v32 = vld [vmem:[%s11453_s18 + $0x10d0] sm:$0xff] }
 0x37f   : > { %7423 = vmatpush1.bf16.msra.mxu0 %v9809_v56  ;;  %7987 = vst [vmem:[#allocation2] sm:$0xff] %v7985_v9  ;;  %7751 = vmatpush1.bf16.msra.mxu1 %v9811_v58  ;;  %v9868_v56 = vcombine.high %v868_v51, %v872_v53  ;;  %v879_v58 = vld [vmem:[%s11453_s18 + $0xff0] sm:$0xff]  ;;  %v924_v53 = vld [vmem:[%s11453_s18 + $0x1158] sm:$0xff] }
 0x380   : > { %7424 = vmatprep.subr.bf16.mxu0 %v9818_v61  ;;  %7752 = vmatprep.subr.bf16.mxu1 %v9820_v62  ;;  %v876_v61 = vld [vmem:[%s11453_s18 + $0xfd8] sm:$0xff]  ;;  %v9874_v9 = vcombine.high %v875_v57, %v879_v58  ;;  %v915_v40 = vld [vmem:[%s11453_s18 + $0x1110] sm:$0xff] }
 0x381   : > { %v880_v62 = vld [vmem:[%s11453_s18 + $0xff8] sm:$0xff]  ;;  %v919_v41 = vld [vmem:[%s11453_s18 + $0x1130] sm:$0xff] }
 0x382   : > { %v9876_v33 = vcombine.high %v876_v61, %v880_v62  ;;  %v9875_v11 = vcombine.low %v876_v61, %v880_v62  ;;  %v923_v48 = vld [vmem:[%s11453_s18 + $0x1150] sm:$0xff]  ;;  %v932_v62 = vld [vmem:[%s11453_s18 + $0x1198] sm:$0xff] }
 0x383   : > { %7425 = vmatpush1.bf16.msra.mxu0 %v9817_v4  ;;  %7753 = vmatpush1.bf16.msra.mxu1 %v9819_v5  ;;  %v887_v4 = vld [vmem:[%s11453_s18 + $0x1030] sm:$0xff]  ;;  %v884_v5 = vld [vmem:[%s11453_s18 + $0x1018] sm:$0xff] }
 0x384   : > { %7426 = vmatprep.subr.bf16.mxu0 %v9826_v30  ;;  %7754 = vmatprep.subr.bf16.mxu1 %v9828_v7  ;;  %v888_v30 = vld [vmem:[%s11453_s18 + $0x1038] sm:$0xff]  ;;  %v9873_v7 = vcombine.low %v875_v57, %v879_v58  ;;  %v9882_v12 = vcombine.high %v883_v3, %v887_v4  ;;  %v927_v51 = vld [vmem:[%s11453_s18 + $0x1170] sm:$0xff] }
 0x385   : > { %v9884_v13 = vcombine.high %v884_v5, %v888_v30  ;;  %v9883_v54 = vcombine.low %v884_v5, %v888_v30  ;;  %v931_v58 = vld [vmem:[%s11453_s18 + $0x1190] sm:$0xff]  ;;  %v940_v30 = vld [vmem:[%s11453_s18 + $0x11d8] sm:$0xff] }
 0x386   : > { %v935_v61 = vld [vmem:[%s11453_s18 + $0x11b0] sm:$0xff] }
 0x387   : > { %7427 = vmatpush1.bf16.msra.mxu0 %v9825_v15  ;;  %7755 = vmatpush1.bf16.msra.mxu1 %v9827_v16  ;;  %v895_v15 = vld [vmem:[%s11453_s18 + $0x1070] sm:$0xff]  ;;  %v892_v16 = vld [vmem:[%s11453_s18 + $0x1058] sm:$0xff] }
 0x388   : > { %7428 = vmatprep.subr.bf16.mxu0 %v9834_v2  ;;  %7756 = vmatprep.subr.bf16.mxu1 %v9836_v18  ;;  %v896_v2 = vld [vmem:[%s11453_s18 + $0x1078] sm:$0xff]  ;;  %v9881_v18 = vcombine.low %v883_v3, %v887_v4  ;;  %v9890_v17 = vcombine.high %v891_v14, %v895_v15  ;;  %v939_v4 = vld [vmem:[%s11453_s18 + $0x11d0] sm:$0xff] }
 0x389   : > { %v9892_v21 = vcombine.high %v892_v16, %v896_v2  ;;  %v9891_v27 = vcombine.low %v892_v16, %v896_v2  ;;  %v943_v5 = vld [vmem:[%s11453_s18 + $0x11f0] sm:$0xff]  ;;  %v948_v2 = vld [vmem:[%s11453_s18 + $0x1218] sm:$0xff] }
 0x38a   : > { %v951_v16 = vld [vmem:[%s11453_s18 + $0x1230] sm:$0xff] }
 0x38b   : > { %7429 = vmatpush1.bf16.msra.mxu0 %v9833_v10  ;;  %7757 = vmatpush1.bf16.msra.mxu1 %v9835_v39  ;;  %v903_v10 = vld [vmem:[%s11453_s18 + $0x10b0] sm:$0xff]  ;;  %v900_v39 = vld [vmem:[%s11453_s18 + $0x1098] sm:$0xff] }
 0x38c   : > { %7430 = vmatprep.subr.bf16.mxu0 %v9842_v25  ;;  %7758 = vmatprep.subr.bf16.mxu1 %v9844_v26  ;;  %v904_v25 = vld [vmem:[%s11453_s18 + $0x10b8] sm:$0xff]  ;;  %v9889_v26 = vcombine.low %v891_v14, %v895_v15  ;;  %v9898_v29 = vcombine.high %v899_v22, %v903_v10  ;;  %v947_v15 = vld [vmem:[%s11453_s18 + $0x1210] sm:$0xff] }
 0x38d   : > { %v9900_v31 = vcombine.high %v900_v39, %v904_v25 }
 0x38f   : > { %7431 = vmatpush1.bf16.msra.mxu0 %v9841_v0  ;;  %7759 = vmatpush1.bf16.msra.mxu1 %v9843_v49  ;;  %v911_v0 = vld [vmem:[%s11453_s18 + $0x10f0] sm:$0xff]  ;;  %v908_v49 = vld [vmem:[%s11453_s18 + $0x10d8] sm:$0xff] }
 0x390   : > { %7432 = vmatprep.subr.bf16.mxu0 %v9850_v34  ;;  %7760 = vmatprep.subr.bf16.mxu1 %v9852_v35  ;;  %v912_v34 = vld [vmem:[%s11453_s18 + $0x10f8] sm:$0xff]  ;;  %v9899_v35 = vcombine.low %v900_v39, %v904_v25  ;;  %v9906_v36 = vcombine.high %v907_v32, %v911_v0  ;;  %v959_v39 = vld [vmem:[%s11453_s18 + $0x1270] sm:$0xff] }
 0x391   : > { %v9908_v37 = vcombine.high %v908_v49, %v912_v34  ;;  %v956_v25 = vld [vmem:[%s11453_s18 + $0x1258] sm:$0xff] }
 0x393   : > { %7433 = vmatpush1.bf16.msra.mxu0 %v9849_v42  ;;  %7761 = vmatpush1.bf16.msra.mxu1 %v9851_v43  ;;  %v916_v42 = vld [vmem:[%s11453_s18 + $0x1118] sm:$0xff] }
 0x394   : > { %7434 = vmatprep.subr.bf16.mxu0 %v9858_v44  ;;  %7762 = vmatprep.subr.bf16.mxu1 %v9860_v46  ;;  %v920_v43 = vld [vmem:[%s11453_s18 + $0x1138] sm:$0xff]  ;;  %v9905_v44 = vcombine.low %v907_v32, %v911_v0  ;;  %v9914_v46 = vcombine.high %v915_v40, %v919_v41  ;;  %v963_v0 = vld [vmem:[%s11453_s18 + $0x1290] sm:$0xff] }
 0x395   : > { %v9916_v47 = vcombine.high %v916_v42, %v920_v43 }
 0x397   : > { %7435 = vmatpush1.bf16.msra.mxu0 %v9857_v59  ;;  %7763 = vmatpush1.bf16.msra.mxu1 %v9859_v24  ;;  %v928_v59 = vld [vmem:[%s11453_s18 + $0x1178] sm:$0xff]  ;;  %v9913_v24 = vcombine.low %v915_v40, %v919_v41  ;;  %v971_v41 = vld [vmem:[%s11453_s18 + $0x12d0] sm:$0xff] }
 0x398   : > { %7436 = vmatprep.subr.bf16.mxu0 %v9866_v55  ;;  %7764 = vmatprep.subr.bf16.mxu1 %v9868_v56  ;;  %v9915_v55 = vcombine.low %v916_v42, %v920_v43  ;;  %v9922_v56 = vcombine.high %v923_v48, %v927_v51  ;;  %v9924_v57 = vcombine.high %v924_v53, %v928_v59  ;;  %v975_v42 = vld [vmem:[%s11453_s18 + $0x12f0] sm:$0xff]  ;;  %v972_v43 = vld [vmem:[%s11453_s18 + $0x12d8] sm:$0xff] }
 0x39b   : > { %7437 = vmatpush1.bf16.msra.mxu0 %v9865_v63  ;;  %7765 = vmatpush1.bf16.msra.mxu1 %v9867_v6  ;;  %v936_v63 = vld [vmem:[%s11453_s18 + $0x11b8] sm:$0xff]  ;;  %v9921_v6 = vcombine.low %v923_v48, %v927_v51  ;;  %v979_v51 = vld [vmem:[%s11453_s18 + $0x1310] sm:$0xff] }
 0x39c   : > { %7438 = vmatprep.subr.bf16.mxu0 %v9874_v9  ;;  %7766 = vmatprep.subr.bf16.mxu1 %v9876_v33  ;;  %v9923_v9 = vcombine.low %v924_v53, %v928_v59  ;;  %v9930_v33 = vcombine.high %v931_v58, %v935_v61  ;;  %v9932_v3 = vcombine.high %v932_v62, %v936_v63  ;;  %v983_v53 = vld [vmem:[%s11453_s18 + $0x1330] sm:$0xff]  ;;  %v980_v59 = vld [vmem:[%s11453_s18 + $0x1318] sm:$0xff] }
 0x39f   : > { %7439 = vmatpush1.bf16.msra.mxu0 %v9873_v7  ;;  %7767 = vmatpush1.bf16.msra.mxu1 %v9875_v11  ;;  %v944_v7 = vld [vmem:[%s11453_s18 + $0x11f8] sm:$0xff]  ;;  %v9929_v11 = vcombine.low %v931_v58, %v935_v61  ;;  %v987_v61 = vld [vmem:[%s11453_s18 + $0x1350] sm:$0xff] }
 0x3a0   : > { %7449 = vmatprep.subr.bf16.mxu0 %v9882_v12  ;;  %7777 = vmatprep.subr.bf16.mxu1 %v9884_v13  ;;  %v9931_v12 = vcombine.low %v932_v62, %v936_v63  ;;  %v9938_v13 = vcombine.high %v939_v4, %v943_v5  ;;  %v9940_v14 = vcombine.high %v940_v30, %v944_v7  ;;  %v991_v62 = vld [vmem:[%s11453_s18 + $0x1370] sm:$0xff]  ;;  %v988_v63 = vld [vmem:[%s11453_s18 + $0x1358] sm:$0xff] }
 0x3a2   : > { %7441 = vmatmul.mubr.bf16.vlgmr.msra.gmra.mrb[4].mxu0 %v11809_v20  ;;  %7769 = vmatmul.mubr.bf16.vlgmr.msra.gmra.mrb[4].mxu1 %v11809_v20  ;;  %v9897_v20 = vcombine.low %v899_v22, %v903_v10  ;;  %v955_v10 = vld [vmem:[%s11453_s18 + $0x1250] sm:$0xff] }
 0x3a3   : > { %7450 = vmatpush1.bf16.msra.mxu0 %v9881_v18  ;;  %7778 = vmatpush1.bf16.msra.mxu1 %v9883_v54  ;;  %v952_v18 = vld [vmem:[%s11453_s18 + $0x1238] sm:$0xff]  ;;  %v9937_v54 = vcombine.low %v939_v4, %v943_v5  ;;  %v995_v5 = vld [vmem:[%s11453_s18 + $0x1390] sm:$0xff] }
 0x3a4   : > { %7451 = vmatprep.subr.bf16.mxu0 %v9890_v17  ;;  %7779 = vmatprep.subr.bf16.mxu1 %v9892_v21  ;;  %v9939_v17 = vcombine.low %v940_v30, %v944_v7  ;;  %v9946_v21 = vcombine.high %v947_v15, %v951_v16  ;;  %v9948_v22 = vcombine.high %v948_v2, %v952_v18  ;;  %v999_v30 = vld [vmem:[%s11453_s18 + $0x13b0] sm:$0xff]  ;;  %v996_v7 = vld [vmem:[%s11453_s18 + $0x1398] sm:$0xff] }
 0x3a5   : > { %7481 = vmatprep.mubr.bf16.mxu0 %v11816_v60  ;;  %7809 = vmatprep.mubr.bf16.mxu1 %v11816_v60  ;;  %v9907_v60 = vcombine.low %v908_v49, %v912_v34  ;;  %v967_v49 = vld [vmem:[%s11453_s18 + $0x12b0] sm:$0xff]  ;;  %v964_v34 = vld [vmem:[%s11453_s18 + $0x1298] sm:$0xff] }
 0x3a7   : > { %7452 = vmatpush1.bf16.msra.mxu0 %v9889_v26  ;;  %7780 = vmatpush1.bf16.msra.mxu1 %v9891_v27  ;;  %v960_v26 = vld [vmem:[%s11453_s18 + $0x1278] sm:$0xff]  ;;  %v9945_v27 = vcombine.low %v947_v15, %v951_v16  ;;  %v1003_v16 = vld [vmem:[%s11453_s18 + $0x13d0] sm:$0xff] }
 0x3a8   : > { %7453 = vmatprep.subr.bf16.mxu0 %v9898_v29  ;;  %7781 = vmatprep.subr.bf16.mxu1 %v9900_v31  ;;  %v9947_v29 = vcombine.low %v948_v2, %v952_v18  ;;  %v9954_v31 = vcombine.high %v955_v10, %v959_v39  ;;  %v9956_v32 = vcombine.high %v956_v25, %v960_v26  ;;  %v1007_v2 = vld [vmem:[%s11453_s18 + $0x13f0] sm:$0xff]  ;;  %v1004_v18 = vld [vmem:[%s11453_s18 + $0x13d8] sm:$0xff] }
 0x3ab   : > { %7454 = vmatpush1.bf16.msra.mxu0 %v9897_v20  ;;  %7782 = vmatpush1.bf16.msra.mxu1 %v9899_v35  ;;  %v968_v20 = vld [vmem:[%s11453_s18 + $0x12b8] sm:$0xff]  ;;  %v9953_v35 = vcombine.low %v955_v10, %v959_v39  ;;  %v1011_v39 = vld [vmem:[%s11453_s18 + $0x1410] sm:$0xff] }
 0x3ac   : > { %7455 = vmatprep.subr.bf16.mxu0 %v9906_v36  ;;  %7783 = vmatprep.subr.bf16.mxu1 %v9908_v37  ;;  %v9955_v36 = vcombine.low %v956_v25, %v960_v26  ;;  %v9962_v37 = vcombine.high %v963_v0, %v967_v49  ;;  %v9964_v40 = vcombine.high %v964_v34, %v968_v20  ;;  %v1015_v25 = vld [vmem:[%s11453_s18 + $0x1430] sm:$0xff]  ;;  %v1012_v26 = vld [vmem:[%s11453_s18 + $0x1418] sm:$0xff] }
 0x3af   : > { %7456 = vmatpush1.bf16.msra.mxu0 %v9905_v44  ;;  %7784 = vmatpush1.bf16.msra.mxu1 %v9907_v60  ;;  %v976_v44 = vld [vmem:[%s11453_s18 + $0x12f8] sm:$0xff]  ;;  %v9961_v60 = vcombine.low %v963_v0, %v967_v49  ;;  %v1019_v49 = vld [vmem:[%s11453_s18 + $0x1450] sm:$0xff] }
 0x3b0   : > { %7457 = vmatprep.subr.bf16.mxu0 %v9914_v46  ;;  %7785 = vmatprep.subr.bf16.mxu1 %v9916_v47  ;;  %v9963_v46 = vcombine.low %v964_v34, %v968_v20  ;;  %v9970_v47 = vcombine.high %v971_v41, %v975_v42  ;;  %v9972_v48 = vcombine.high %v972_v43, %v976_v44  ;;  %v1023_v34 = vld [vmem:[%s11453_s18 + $0x1470] sm:$0xff]  ;;  %v1020_v20 = vld [vmem:[%s11453_s18 + $0x1458] sm:$0xff] }
 0x3b3   : > { %7458 = vmatpush1.bf16.msra.mxu0 %v9913_v24  ;;  %7786 = vmatpush1.bf16.msra.mxu1 %v9915_v55  ;;  %v984_v24 = vld [vmem:[%s11453_s18 + $0x1338] sm:$0xff]  ;;  %v9969_v55 = vcombine.low %v971_v41, %v975_v42  ;;  %v1027_v42 = vld [vmem:[%s11453_s18 + $0x1490] sm:$0xff] }
 0x3b4   : > { %7459 = vmatprep.subr.bf16.mxu0 %v9922_v56  ;;  %7787 = vmatprep.subr.bf16.mxu1 %v9924_v57  ;;  %v9971_v56 = vcombine.low %v972_v43, %v976_v44  ;;  %v9978_v57 = vcombine.high %v979_v51, %v983_v53  ;;  %v9980_v58 = vcombine.high %v980_v59, %v984_v24  ;;  %v1031_v43 = vld [vmem:[%s11453_s18 + $0x14b0] sm:$0xff]  ;;  %v1028_v44 = vld [vmem:[%s11453_s18 + $0x1498] sm:$0xff] }
 0x3b7   : > { %7460 = vmatpush1.bf16.msra.mxu0 %v9921_v6  ;;  %7788 = vmatpush1.bf16.msra.mxu1 %v9923_v9  ;;  %v992_v6 = vld [vmem:[%s11453_s18 + $0x1378] sm:$0xff]  ;;  %v9977_v9 = vcombine.low %v979_v51, %v983_v53  ;;  %v1035_v53 = vld [vmem:[%s11453_s18 + $0x14d0] sm:$0xff] }
 0x3b8   : > { %7461 = vmatprep.subr.bf16.mxu0 %v9930_v33  ;;  %7789 = vmatprep.subr.bf16.mxu1 %v9932_v3  ;;  %v9979_v33 = vcombine.low %v980_v59, %v984_v24  ;;  %v9986_v3 = vcombine.high %v987_v61, %v991_v62  ;;  %v9988_v4 = vcombine.high %v988_v63, %v992_v6  ;;  %v1039_v59 = vld [vmem:[%s11453_s18 + $0x14f0] sm:$0xff]  ;;  %v1036_v24 = vld [vmem:[%s11453_s18 + $0x14d8] sm:$0xff] }
 0x3bb   : > { %7462 = vmatpush1.bf16.msra.mxu0 %v9929_v11  ;;  %7790 = vmatpush1.bf16.msra.mxu1 %v9931_v12  ;;  %v1000_v11 = vld [vmem:[%s11453_s18 + $0x13b8] sm:$0xff]  ;;  %v9985_v12 = vcombine.low %v987_v61, %v991_v62  ;;  %v1043_v61 = vld [vmem:[%s11453_s18 + $0x1510] sm:$0xff] }
 0x3bc   : > { %7463 = vmatprep.subr.bf16.mxu0 %v9938_v13  ;;  %7791 = vmatprep.subr.bf16.mxu1 %v9940_v14  ;;  %v9987_v13 = vcombine.low %v988_v63, %v992_v6  ;;  %v9994_v14 = vcombine.high %v995_v5, %v999_v30  ;;  %v9996_v15 = vcombine.high %v996_v7, %v1000_v11  ;;  %v1047_v62 = vld [vmem:[%s11453_s18 + $0x1530] sm:$0xff]  ;;  %v1044_v63 = vld [vmem:[%s11453_s18 + $0x1518] sm:$0xff] }
 0x3bd   : > { %v1048_v6 = vld [vmem:[%s11453_s18 + $0x1538] sm:$0xff] }
 0x3bf   : > { %7464 = vmatpush1.bf16.msra.mxu0 %v9937_v54  ;;  %7792 = vmatpush1.bf16.msra.mxu1 %v9939_v17  ;;  %v1008_v54 = vld [vmem:[%s11453_s18 + $0x13f8] sm:$0xff]  ;;  %v9993_v17 = vcombine.low %v995_v5, %v999_v30  ;;  %v1055_v5 = vld [vmem:[%s11453_s18 + $0x1570] sm:$0xff] }
 0x3c0   : > { %7465 = vmatprep.subr.bf16.mxu0 %v9946_v21  ;;  %7793 = vmatprep.subr.bf16.mxu1 %v9948_v22  ;;  %v9995_v21 = vcombine.low %v996_v7, %v1000_v11  ;;  %v10002_v22 = vcombine.high %v1003_v16, %v1007_v2  ;;  %v10004_v10 = vcombine.high %v1004_v18, %v1008_v54  ;;  %v1052_v30 = vld [vmem:[%s11453_s18 + $0x1558] sm:$0xff] }
 0x3c1   : > { %v1056_v7 = vld [vmem:[%s11453_s18 + $0x1578] sm:$0xff]  ;;  %v10041_v11 = vcombine.low %v1043_v61, %v1047_v62 }
 0x3c3   : > { %7466 = vmatpush1.bf16.msra.mxu0 %v9945_v27  ;;  %7794 = vmatpush1.bf16.msra.mxu1 %v9947_v29  ;;  %v1016_v27 = vld [vmem:[%s11453_s18 + $0x1438] sm:$0xff]  ;;  %v10001_v29 = vcombine.low %v1003_v16, %v1007_v2  ;;  %v1063_v16 = vld [vmem:[%s11453_s18 + $0x15b0] sm:$0xff] }
 0x3c4   : > { %7467 = vmatprep.subr.bf16.mxu0 %v9954_v31  ;;  %7795 = vmatprep.subr.bf16.mxu1 %v9956_v32  ;;  %v10003_v31 = vcombine.low %v1004_v18, %v1008_v54  ;;  %v10010_v32 = vcombine.high %v1011_v39, %v1015_v25  ;;  %v10012_v0 = vcombine.high %v1012_v26, %v1016_v27  ;;  %v1060_v2 = vld [vmem:[%s11453_s18 + $0x1598] sm:$0xff] }
 0x3c5   : > { %v1064_v18 = vld [vmem:[%s11453_s18 + $0x15b8] sm:$0xff] }
 0x3c7   : > { %7468 = vmatpush1.bf16.msra.mxu0 %v9953_v35  ;;  %7796 = vmatpush1.bf16.msra.mxu1 %v9955_v36  ;;  %v1024_v35 = vld [vmem:[%s11453_s18 + $0x1478] sm:$0xff]  ;;  %v10009_v36 = vcombine.low %v1011_v39, %v1015_v25  ;;  %v1071_v39 = vld [vmem:[%s11453_s18 + $0x15f0] sm:$0xff] }
 0x3c8   : > { %7469 = vmatprep.subr.bf16.mxu0 %v9962_v37  ;;  %7797 = vmatprep.subr.bf16.mxu1 %v9964_v40  ;;  %v10011_v37 = vcombine.low %v1012_v26, %v1016_v27  ;;  %v10018_v40 = vcombine.high %v1019_v49, %v1023_v34  ;;  %v10020_v41 = vcombine.high %v1020_v20, %v1024_v35  ;;  %v1068_v25 = vld [vmem:[%s11453_s18 + $0x15d8] sm:$0xff] }
 0x3c9   : > { %v1072_v26 = vld [vmem:[%s11453_s18 + $0x15f8] sm:$0xff] }
 0x3cb   : > { %7470 = vmatpush1.bf16.msra.mxu0 %v9961_v60  ;;  %7798 = vmatpush1.bf16.msra.mxu1 %v9963_v46  ;;  %v1032_v60 = vld [vmem:[%s11453_s18 + $0x14b8] sm:$0xff]  ;;  %v10017_v46 = vcombine.low %v1019_v49, %v1023_v34  ;;  %v1079_v49 = vld [vmem:[%s11453_s18 + $0x1630] sm:$0xff] }
 0x3cc   : > { %7471 = vmatprep.subr.bf16.mxu0 %v9970_v47  ;;  %7799 = vmatprep.subr.bf16.mxu1 %v9972_v48  ;;  %v10019_v47 = vcombine.low %v1020_v20, %v1024_v35  ;;  %v10026_v48 = vcombine.high %v1027_v42, %v1031_v43  ;;  %v10028_v51 = vcombine.high %v1028_v44, %v1032_v60  ;;  %v1076_v34 = vld [vmem:[%s11453_s18 + $0x1618] sm:$0xff] }
 0x3cd   : > { %v1080_v20 = vld [vmem:[%s11453_s18 + $0x1638] sm:$0xff] }
 0x3cf   : > { %7472 = vmatpush1.bf16.msra.mxu0 %v9969_v55  ;;  %7800 = vmatpush1.bf16.msra.mxu1 %v9971_v56  ;;  %v1040_v55 = vld [vmem:[%s11453_s18 + $0x14f8] sm:$0xff]  ;;  %v10027_v56 = vcombine.low %v1028_v44, %v1032_v60 }
 0x3d0   : > { %7473 = vmatprep.subr.bf16.mxu0 %v9978_v57  ;;  %7801 = vmatprep.subr.bf16.mxu1 %v9980_v58  ;;  %v10034_v57 = vcombine.high %v1035_v53, %v1039_v59  ;;  %v10036_v58 = vcombine.high %v1036_v24, %v1040_v55  ;;  %v1088_v44 = vld [vmem:[%s11453_s18 + $0x1678] sm:$0xff] }
 0x3d3   : > { %7474 = vmatpush1.bf16.msra.mxu0 %v9977_v9  ;;  %7802 = vmatpush1.bf16.msra.mxu1 %v9979_v33  ;;  %v10033_v9 = vcombine.low %v1035_v53, %v1039_v59  ;;  %v10042_v33 = vcombine.high %v1043_v61, %v1047_v62  ;;  %v1095_v53 = vld [vmem:[%s11453_s18 + $0x16b0] sm:$0xff]  ;;  %v1092_v59 = vld [vmem:[%s11453_s18 + $0x1698] sm:$0xff] }
 0x3d4   : > { %7475 = vmatprep.subr.bf16.mxu0 %v9986_v3  ;;  %7803 = vmatprep.subr.bf16.mxu1 %v9988_v4  ;;  %v10044_v3 = vcombine.high %v1044_v63, %v1048_v6  ;;  %v1051_v4 = vld [vmem:[%s11453_s18 + $0x1550] sm:$0xff]  ;;  %v1100_v62 = vld [vmem:[%s11453_s18 + $0x16d8] sm:$0xff] }
 0x3d5   : > { %v10049_v54 = vcombine.low %v1051_v4, %v1055_v5  ;;  %v1103_v61 = vld [vmem:[%s11453_s18 + $0x16f0] sm:$0xff] }
 0x3d7   : > { %7476 = vmatpush1.bf16.msra.mxu0 %v9985_v12  ;;  %7804 = vmatpush1.bf16.msra.mxu1 %v9987_v13  ;;  %v10043_v12 = vcombine.low %v1044_v63, %v1048_v6  ;;  %v10050_v13 = vcombine.high %v1051_v4, %v1055_v5  ;;  %v1104_v63 = vld [vmem:[%s11453_s18 + $0x16f8] sm:$0xff]  ;;  %v1111_v4 = vld [vmem:[%s11453_s18 + $0x1730] sm:$0xff] }
 0x3d8   : > { %7477 = vmatprep.subr.bf16.mxu0 %v9994_v14  ;;  %7805 = vmatprep.subr.bf16.mxu1 %v9996_v15  ;;  %v10052_v14 = vcombine.high %v1052_v30, %v1056_v7  ;;  %v1059_v15 = vld [vmem:[%s11453_s18 + $0x1590] sm:$0xff]  ;;  %v1108_v5 = vld [vmem:[%s11453_s18 + $0x1718] sm:$0xff] }
 0x3d9   : > { %v10057_v27 = vcombine.low %v1059_v15, %v1063_v16 }
 0x3db   : > { %7478 = vmatpush1.bf16.msra.mxu0 %v9993_v17  ;;  %7806 = vmatpush1.bf16.msra.mxu1 %v9995_v21  ;;  %v10051_v17 = vcombine.low %v1052_v30, %v1056_v7  ;;  %v10058_v21 = vcombine.high %v1059_v15, %v1063_v16  ;;  %v1112_v30 = vld [vmem:[%s11453_s18 + $0x1738] sm:$0xff]  ;;  %v1119_v15 = vld [vmem:[%s11453_s18 + $0x1770] sm:$0xff] }
 0x3dc   : > { %7479 = vmatprep.subr.bf16.mxu0 %v10002_v22  ;;  %7807 = vmatprep.subr.bf16.mxu1 %v10004_v10  ;;  %v10060_v22 = vcombine.high %v1060_v2, %v1064_v18  ;;  %v1067_v10 = vld [vmem:[%s11453_s18 + $0x15d0] sm:$0xff]  ;;  %v1116_v16 = vld [vmem:[%s11453_s18 + $0x1758] sm:$0xff] }
 0x3dd   : > { %v10065_v35 = vcombine.low %v1067_v10, %v1071_v39 }
 0x3df   : > { %7480 = vmatpush1.bf16.msra.mxu0 %v10001_v29  ;;  %7808 = vmatpush1.bf16.msra.mxu1 %v10003_v31  ;;  %v10059_v29 = vcombine.low %v1060_v2, %v1064_v18  ;;  %v10066_v31 = vcombine.high %v1067_v10, %v1071_v39  ;;  %v1120_v2 = vld [vmem:[%s11453_s18 + $0x1778] sm:$0xff]  ;;  %v1127_v10 = vld [vmem:[%s11453_s18 + $0x17b0] sm:$0xff] }
 0x3e0   : > { %7490 = vmatprep.subr.bf16.mxu0 %v10010_v32  ;;  %7818 = vmatprep.subr.bf16.mxu1 %v10012_v0  ;;  %v10068_v32 = vcombine.high %v1068_v25, %v1072_v26  ;;  %v1075_v0 = vld [vmem:[%s11453_s18 + $0x1610] sm:$0xff]  ;;  %v1124_v39 = vld [vmem:[%s11453_s18 + $0x1798] sm:$0xff] }
 0x3e1   : > { %v10073_v60 = vcombine.low %v1075_v0, %v1079_v49 }
 0x3e2   : > { %7482 = vmatmul.mubr.bf16.vlgmr.msra.gmra.mrb[4].mxu0 %v11884_v52  ;;  %7810 = vmatmul.mubr.bf16.vlgmr.msra.gmra.mrb[4].mxu1 %v11884_v52  ;;  %v10025_v52 = vcombine.low %v1027_v42, %v1031_v43  ;;  %v1087_v42 = vld [vmem:[%s11453_s18 + $0x1670] sm:$0xff]  ;;  %v1084_v43 = vld [vmem:[%s11453_s18 + $0x1658] sm:$0xff] }
 0x3e3   : > { %7491 = vmatpush1.bf16.msra.mxu0 %v10009_v36  ;;  %7819 = vmatpush1.bf16.msra.mxu1 %v10011_v37  ;;  %v10067_v36 = vcombine.low %v1068_v25, %v1072_v26  ;;  %v10074_v37 = vcombine.high %v1075_v0, %v1079_v49  ;;  %v1128_v25 = vld [vmem:[%s11453_s18 + $0x17b8] sm:$0xff]  ;;  %v1135_v0 = vld [vmem:[%s11453_s18 + $0x17f0] sm:$0xff] }
 0x3e4   : > { %7492 = vmatprep.subr.bf16.mxu0 %v10018_v40  ;;  %7820 = vmatprep.subr.bf16.mxu1 %v10020_v41  ;;  %v10076_v40 = vcombine.high %v1076_v34, %v1080_v20  ;;  %v1083_v41 = vld [vmem:[%s11453_s18 + $0x1650] sm:$0xff]  ;;  %v1132_v49 = vld [vmem:[%s11453_s18 + $0x17d8] sm:$0xff] }
 0x3e5   : > { %7522 = vmatprep.mubr.bf16.mxu0 %v11892_v1  ;;  %7850 = vmatprep.mubr.bf16.mxu1 %v11892_v1  ;;  %v10035_v1 = vcombine.low %v1036_v24, %v1040_v55  ;;  %v1096_v24 = vld [vmem:[%s11453_s18 + $0x16b8] sm:$0xff]  ;;  %v10081_v55 = vcombine.low %v1083_v41, %v1087_v42 }
 0x3e7   : > { %7493 = vmatpush1.bf16.msra.mxu0 %v10017_v46  ;;  %7821 = vmatpush1.bf16.msra.mxu1 %v10019_v47  ;;  %v10075_v46 = vcombine.low %v1076_v34, %v1080_v20  ;;  %v10082_v47 = vcombine.high %v1083_v41, %v1087_v42  ;;  %v1136_v34 = vld [vmem:[%s11453_s18 + $0x17f8] sm:$0xff]  ;;  %v1143_v41 = vld [vmem:[%s11453_s18 + $0x1830] sm:$0xff] }
 0x3e8   : > { %7494 = vmatprep.subr.bf16.mxu0 %v10026_v48  ;;  %7822 = vmatprep.subr.bf16.mxu1 %v10028_v51  ;;  %v10084_v48 = vcombine.high %v1084_v43, %v1088_v44  ;;  %v1091_v51 = vld [vmem:[%s11453_s18 + $0x1690] sm:$0xff]  ;;  %v1140_v42 = vld [vmem:[%s11453_s18 + $0x1818] sm:$0xff] }
 0x3e9   : > { %v10089_v6 = vcombine.low %v1091_v51, %v1095_v53 }
 0x3eb   : > { %7495 = vmatpush1.bf16.msra.mxu0 %v10025_v52  ;;  %7823 = vmatpush1.bf16.msra.mxu1 %v10027_v56  ;;  %v10083_v52 = vcombine.low %v1084_v43, %v1088_v44  ;;  %v10090_v56 = vcombine.high %v1091_v51, %v1095_v53  ;;  %v1144_v43 = vld [vmem:[%s11453_s18 + $0x1838] sm:$0xff]  ;;  %v1151_v51 = vld [vmem:[%s11453_s18 + $0x1870] sm:$0xff] }
 0x3ec   : > { %7496 = vmatprep.subr.bf16.mxu0 %v10034_v57  ;;  %7824 = vmatprep.subr.bf16.mxu1 %v10036_v58  ;;  %v10092_v57 = vcombine.high %v1092_v59, %v1096_v24  ;;  %v1099_v58 = vld [vmem:[%s11453_s18 + $0x16d0] sm:$0xff]  ;;  %v1148_v53 = vld [vmem:[%s11453_s18 + $0x1858] sm:$0xff] }
 0x3ed   : > { %v10097_v7 = vcombine.low %v1099_v58, %v1103_v61 }
 0x3ef   : > { %7497 = vmatpush1.bf16.msra.mxu0 %v10033_v9  ;;  %7825 = vmatpush1.bf16.msra.mxu1 %v10035_v1  ;;  %v10091_v9 = vcombine.low %v1092_v59, %v1096_v24  ;;  %v10098_v1 = vcombine.high %v1099_v58, %v1103_v61  ;;  %v1152_v59 = vld [vmem:[%s11453_s18 + $0x1878] sm:$0xff]  ;;  %v1159_v58 = vld [vmem:[%s11453_s18 + $0x18b0] sm:$0xff] }
 0x3f0   : > { %7498 = vmatprep.subr.bf16.mxu0 %v10042_v33  ;;  %7826 = vmatprep.subr.bf16.mxu1 %v10044_v3  ;;  %v10100_v33 = vcombine.high %v1100_v62, %v1104_v63  ;;  %v1107_v3 = vld [vmem:[%s11453_s18 + $0x1710] sm:$0xff]  ;;  %v1156_v61 = vld [vmem:[%s11453_s18 + $0x1898] sm:$0xff] }
 0x3f1   : > { %v10105_v18 = vcombine.low %v1107_v3, %v1111_v4 }
 0x3f3   : > { %7499 = vmatpush1.bf16.msra.mxu0 %v10041_v11  ;;  %7827 = vmatpush1.bf16.msra.mxu1 %v10043_v12  ;;  %v10099_v11 = vcombine.low %v1100_v62, %v1104_v63  ;;  %v10106_v12 = vcombine.high %v1107_v3, %v1111_v4  ;;  %v1160_v62 = vld [vmem:[%s11453_s18 + $0x18b8] sm:$0xff]  ;;  %v1167_v3 = vld [vmem:[%s11453_s18 + $0x18f0] sm:$0xff] }
 0x3f4   : > { %7500 = vmatprep.subr.bf16.mxu0 %v10050_v13  ;;  %7828 = vmatprep.subr.bf16.mxu1 %v10052_v14  ;;  %v10108_v13 = vcombine.high %v1108_v5, %v1112_v30  ;;  %v1115_v14 = vld [vmem:[%s11453_s18 + $0x1750] sm:$0xff]  ;;  %v1164_v4 = vld [vmem:[%s11453_s18 + $0x18d8] sm:$0xff] }
 0x3f5   : > { %v10113_v26 = vcombine.low %v1115_v14, %v1119_v15 }
 0x3f7   : > { %7501 = vmatpush1.bf16.msra.mxu0 %v10049_v54  ;;  %7829 = vmatpush1.bf16.msra.mxu1 %v10051_v17  ;;  %v10107_v54 = vcombine.low %v1108_v5, %v1112_v30  ;;  %v10114_v17 = vcombine.high %v1115_v14, %v1119_v15  ;;  %v1168_v5 = vld [vmem:[%s11453_s18 + $0x18f8] sm:$0xff]  ;;  %v10155_v30 = vcombine.low %v1156_v61, %v1160_v62 }
 0x3f8   : > { %7502 = vmatprep.subr.bf16.mxu0 %v10058_v21  ;;  %7830 = vmatprep.subr.bf16.mxu1 %v10060_v22  ;;  %v10116_v21 = vcombine.high %v1116_v16, %v1120_v2  ;;  %v1123_v22 = vld [vmem:[%s11453_s18 + $0x1790] sm:$0xff]  ;;  %v1172_v14 = vld [vmem:[%s11453_s18 + $0x1918] sm:$0xff] }
 0x3f9   : > { %v10121_v20 = vcombine.low %v1123_v22, %v1127_v10  ;;  %v1176_v15 = vld [vmem:[%s11453_s18 + $0x1938] sm:$0xff] }
 0x3fb   : > { %7503 = vmatpush1.bf16.msra.mxu0 %v10057_v27  ;;  %7831 = vmatpush1.bf16.msra.mxu1 %v10059_v29  ;;  %v10115_v27 = vcombine.low %v1116_v16, %v1120_v2  ;;  %v10122_v29 = vcombine.high %v1123_v22, %v1127_v10  ;;  %v1184_v22 = vld [vmem:[%s11453_s18 + $0x1978] sm:$0xff] }
 0x3fc   : > { %7504 = vmatprep.subr.bf16.mxu0 %v10066_v31  ;;  %7832 = vmatprep.subr.bf16.mxu1 %v10068_v32  ;;  %v10124_v31 = vcombine.high %v1124_v39, %v1128_v25  ;;  %v1131_v32 = vld [vmem:[%s11453_s18 + $0x17d0] sm:$0xff] }
 0x3fd   : > { %v10129_v44 = vcombine.low %v1131_v32, %v1135_v0 }
 0x3ff   : > { %7505 = vmatpush1.bf16.msra.mxu0 %v10065_v35  ;;  %7833 = vmatpush1.bf16.msra.mxu1 %v10067_v36  ;;  %v10123_v35 = vcombine.low %v1124_v39, %v1128_v25  ;;  %v10130_v36 = vcombine.high %v1131_v32, %v1135_v0  ;;  %v10171_v39 = vcombine.low %v1172_v14, %v1176_v15  ;;  %v1192_v32 = vld [vmem:[%s11453_s18 + $0x19b8] sm:$0xff] }
 0x400   : > { %7506 = vmatprep.subr.bf16.mxu0 %v10074_v37  ;;  %7834 = vmatprep.subr.bf16.mxu1 %v10076_v40  ;;  %v10132_v37 = vcombine.high %v1132_v49, %v1136_v34  ;;  %v1139_v40 = vld [vmem:[%s11453_s18 + $0x1810] sm:$0xff] }
 0x401   : > { %v10137_v24 = vcombine.low %v1139_v40, %v1143_v41 }
 0x403   : > { %7507 = vmatpush1.bf16.msra.mxu0 %v10073_v60  ;;  %7835 = vmatpush1.bf16.msra.mxu1 %v10075_v46  ;;  %v10131_v60 = vcombine.low %v1132_v49, %v1136_v34  ;;  %v10138_v46 = vcombine.high %v1139_v40, %v1143_v41  ;;  %v1200_v40 = vld [vmem:[%s11453_s18 + $0x19f8] sm:$0xff] }
 0x404   : > { %7508 = vmatprep.subr.bf16.mxu0 %v10082_v47  ;;  %7836 = vmatprep.subr.bf16.mxu1 %v10084_v48  ;;  %v10140_v47 = vcombine.high %v1140_v42, %v1144_v43  ;;  %v1147_v48 = vld [vmem:[%s11453_s18 + $0x1850] sm:$0xff] }
 0x405   : > { %v10145_v63 = vcombine.low %v1147_v48, %v1151_v51 }
 0x407   : > { %7509 = vmatpush1.bf16.msra.mxu0 %v10081_v55  ;;  %7837 = vmatpush1.bf16.msra.mxu1 %v10083_v52  ;;  %v10139_v55 = vcombine.low %v1140_v42, %v1144_v43  ;;  %v10146_v52 = vcombine.high %v1147_v48, %v1151_v51  ;;  %v1208_v48 = vld [vmem:[%s11453_s18 + $0x1a38] sm:$0xff] }
 0x408   : > { %7510 = vmatprep.subr.bf16.mxu0 %v10090_v56  ;;  %7838 = vmatprep.subr.bf16.mxu1 %v10092_v57  ;;  %v10148_v56 = vcombine.high %v1148_v53, %v1152_v59  ;;  %v1155_v57 = vld [vmem:[%s11453_s18 + $0x1890] sm:$0xff] }
 0x40b   : > { %7511 = vmatpush1.bf16.msra.mxu0 %v10089_v6  ;;  %7839 = vmatpush1.bf16.msra.mxu1 %v10091_v9  ;;  %v10147_v6 = vcombine.low %v1148_v53, %v1152_v59  ;;  %v10154_v9 = vcombine.high %v1155_v57, %v1159_v58 }
 0x40c   : > { %7512 = vmatprep.subr.bf16.mxu0 %v10098_v1  ;;  %7840 = vmatprep.subr.bf16.mxu1 %v10100_v33  ;;  %v10156_v1 = vcombine.high %v1156_v61, %v1160_v62  ;;  %v1163_v33 = vld [vmem:[%s11453_s18 + $0x18d0] sm:$0xff] }
 0x40d   : > { %v10161_v16 = vcombine.low %v1163_v33, %v1167_v3 }
 0x40f   : > { %7513 = vmatpush1.bf16.msra.mxu0 %v10097_v7  ;;  %7841 = vmatpush1.bf16.msra.mxu1 %v10099_v11  ;;  %v10162_v7 = vcombine.high %v1163_v33, %v1167_v3  ;;  %v10164_v11 = vcombine.high %v1164_v4, %v1168_v5  ;;  %v1224_v33 = vld [vmem:[%s11453_s18 + $0x1ab8] sm:$0xff] }
 0x410   : > { %7514 = vmatprep.subr.bf16.mxu0 %v10106_v12  ;;  %7842 = vmatprep.subr.bf16.mxu1 %v10108_v13  ;;  %v1171_v12 = vld [vmem:[%s11453_s18 + $0x1910] sm:$0xff] }
 0x411   : > { %v1175_v13 = vld [vmem:[%s11453_s18 + $0x1930] sm:$0xff] }
 0x412   : > { %v10170_v2 = vcombine.high %v1171_v12, %v1175_v13  ;;  %v10169_v10 = vcombine.low %v1171_v12, %v1175_v13  ;;  %v1232_v12 = vld [vmem:[%s11453_s18 + $0x1af8] sm:$0xff] }
 0x413   : > { %7515 = vmatpush1.bf16.msra.mxu0 %v10105_v18  ;;  %7843 = vmatpush1.bf16.msra.mxu1 %v10107_v54  ;;  %v10172_v18 = vcombine.high %v1172_v14, %v1176_v15  ;;  %v1179_v54 = vld [vmem:[%s11453_s18 + $0x1950] sm:$0xff] }
 0x414   : > { %7516 = vmatprep.subr.bf16.mxu0 %v10114_v17  ;;  %7844 = vmatprep.subr.bf16.mxu1 %v10116_v21  ;;  %v1183_v17 = vld [vmem:[%s11453_s18 + $0x1970] sm:$0xff]  ;;  %v1180_v21 = vld [vmem:[%s11453_s18 + $0x1958] sm:$0xff] }
 0x415   : > { %v10178_v25 = vcombine.high %v1179_v54, %v1183_v17  ;;  %v10177_v0 = vcombine.low %v1179_v54, %v1183_v17  ;;  %v10179_v49 = vcombine.low %v1180_v21, %v1184_v22  ;;  %v1240_v54 = vld [vmem:[%s11453_s18 + $0x1b38] sm:$0xff] }
 0x417   : > { %7517 = vmatpush1.bf16.msra.mxu0 %v10113_v26  ;;  %7845 = vmatpush1.bf16.msra.mxu1 %v10115_v27  ;;  %v10180_v26 = vcombine.high %v1180_v21, %v1184_v22  ;;  %v1187_v27 = vld [vmem:[%s11453_s18 + $0x1990] sm:$0xff] }
 0x418   : > { %7518 = vmatprep.subr.bf16.mxu0 %v10122_v29  ;;  %7846 = vmatprep.subr.bf16.mxu1 %v10124_v31  ;;  %v1191_v29 = vld [vmem:[%s11453_s18 + $0x19b0] sm:$0xff]  ;;  %v1188_v31 = vld [vmem:[%s11453_s18 + $0x1998] sm:$0xff] }
 0x419   : > { %v10186_v34 = vcombine.high %v1187_v27, %v1191_v29  ;;  %v10185_v41 = vcombine.low %v1187_v27, %v1191_v29  ;;  %v10187_v42 = vcombine.low %v1188_v31, %v1192_v32  ;;  %v1248_v27 = vld [vmem:[%s11453_s18 + $0x1b78] sm:$0xff] }
 0x41b   : > { %7519 = vmatpush1.bf16.msra.mxu0 %v10121_v20  ;;  %7847 = vmatpush1.bf16.msra.mxu1 %v10123_v35  ;;  %v10188_v20 = vcombine.high %v1188_v31, %v1192_v32  ;;  %v1195_v35 = vld [vmem:[%s11453_s18 + $0x19d0] sm:$0xff] }
 0x41c   : > { %7520 = vmatprep.subr.bf16.mxu0 %v10130_v36  ;;  %7848 = vmatprep.subr.bf16.mxu1 %v10132_v37  ;;  %v1199_v36 = vld [vmem:[%s11453_s18 + $0x19f0] sm:$0xff]  ;;  %v1196_v37 = vld [vmem:[%s11453_s18 + $0x19d8] sm:$0xff] }
 0x41d   : > { %v10194_v43 = vcombine.high %v1195_v35, %v1199_v36  ;;  %v10193_v51 = vcombine.low %v1195_v35, %v1199_v36  ;;  %v10195_v53 = vcombine.low %v1196_v37, %v1200_v40  ;;  %v1256_v35 = vld [vmem:[%s11453_s18 + $0x1bb8] sm:$0xff] }
 0x41f   : > { %7521 = vmatpush1.bf16.msra.mxu0 %v10129_v44  ;;  %7849 = vmatpush1.bf16.msra.mxu1 %v10131_v60  ;;  %v10196_v44 = vcombine.high %v1196_v37, %v1200_v40  ;;  %v1203_v60 = vld [vmem:[%s11453_s18 + $0x1a10] sm:$0xff] }
 0x420   : > { %7531 = vmatprep.subr.bf16.mxu0 %v10138_v46  ;;  %7859 = vmatprep.subr.bf16.mxu1 %v10140_v47  ;;  %v1207_v46 = vld [vmem:[%s11453_s18 + $0x1a30] sm:$0xff]  ;;  %v1204_v47 = vld [vmem:[%s11453_s18 + $0x1a18] sm:$0xff] }
 0x421   : > { %v10202_v59 = vcombine.high %v1203_v60, %v1207_v46  ;;  %v10203_v61 = vcombine.low %v1204_v47, %v1208_v48 }
 0x422   : > { %7523 = vmatmul.mubr.bf16.vlgmr.msra.gmra.mrb[4].mxu0 %v11967_v28  ;;  %7851 = vmatmul.mubr.bf16.vlgmr.msra.gmra.mrb[4].mxu1 %v11967_v28  ;;  %v10153_v28 = vcombine.low %v1155_v57, %v1159_v58  ;;  %v1216_v57 = vld [vmem:[%s11453_s18 + $0x1a78] sm:$0xff]  ;;  %v10201_v58 = vcombine.low %v1203_v60, %v1207_v46 }
 0x423   : > { %7532 = vmatpush1.bf16.msra.mxu0 %v10137_v24  ;;  %7860 = vmatpush1.bf16.msra.mxu1 %v10139_v55  ;;  %v10204_v24 = vcombine.high %v1204_v47, %v1208_v48  ;;  %v1211_v55 = vld [vmem:[%s11453_s18 + $0x1a50] sm:$0xff]  ;;  %v1264_v60 = vld [vmem:[%s11453_s18 + $0x1bf8] sm:$0xff] }
 0x424   : > { %7533 = vmatprep.subr.bf16.mxu0 %v10146_v52  ;;  %7861 = vmatprep.subr.bf16.mxu1 %v10148_v56  ;;  %v1215_v52 = vld [vmem:[%s11453_s18 + $0x1a70] sm:$0xff]  ;;  %v1212_v56 = vld [vmem:[%s11453_s18 + $0x1a58] sm:$0xff] }
 0x425   : > { %7563 = vmatprep.mubr.bf16.mxu0 %v11974_v38  ;;  %7891 = vmatprep.mubr.bf16.mxu1 %v11974_v38  ;;  %v10163_v38 = vcombine.low %v1164_v4, %v1168_v5  ;;  %v10210_v62 = vcombine.high %v1211_v55, %v1215_v52  ;;  %v10209_v3 = vcombine.low %v1211_v55, %v1215_v52  ;;  %v1272_v55 = vld [vmem:[%s11453_s18 + $0x1c38] sm:$0xff] }
 0x426   : > { %v10211_v4 = vcombine.low %v1212_v56, %v1216_v57 }
 0x427   : > { %7534 = vmatpush1.bf16.msra.mxu0 %v10145_v63  ;;  %7862 = vmatpush1.bf16.msra.mxu1 %v10147_v6  ;;  %v10212_v63 = vcombine.high %v1212_v56, %v1216_v57  ;;  %v1219_v6 = vld [vmem:[%s11453_s18 + $0x1a90] sm:$0xff] }
 0x428   : > { %7535 = vmatprep.subr.bf16.mxu0 %v10154_v9  ;;  %7863 = vmatprep.subr.bf16.mxu1 %v10156_v1  ;;  %v1223_v9 = vld [vmem:[%s11453_s18 + $0x1ab0] sm:$0xff]  ;;  %v1220_v1 = vld [vmem:[%s11453_s18 + $0x1a98] sm:$0xff] }
 0x429   : > { %v10218_v5 = vcombine.high %v1219_v6, %v1223_v9  ;;  %v10217_v13 = vcombine.low %v1219_v6, %v1223_v9  ;;  %v10219_v14 = vcombine.low %v1220_v1, %v1224_v33  ;;  %v1280_v6 = vld [vmem:[%s11453_s18 + $0x1c78] sm:$0xff] }
 0x42b   : > { %7536 = vmatpush1.bf16.msra.mxu0 %v10153_v28  ;;  %7864 = vmatpush1.bf16.msra.mxu1 %v10155_v30  ;;  %v10220_v28 = vcombine.high %v1220_v1, %v1224_v33  ;;  %v1227_v30 = vld [vmem:[%s11453_s18 + $0x1ad0] sm:$0xff] }
 0x42c   : > { %7537 = vmatprep.subr.bf16.mxu0 %v10162_v7  ;;  %7865 = vmatprep.subr.bf16.mxu1 %v10164_v11  ;;  %v1231_v7 = vld [vmem:[%s11453_s18 + $0x1af0] sm:$0xff]  ;;  %v1228_v11 = vld [vmem:[%s11453_s18 + $0x1ad8] sm:$0xff] }
 0x42d   : > { %v10226_v15 = vcombine.high %v1227_v30, %v1231_v7  ;;  %v10225_v17 = vcombine.low %v1227_v30, %v1231_v7  ;;  %v10227_v21 = vcombine.low %v1228_v11, %v1232_v12  ;;  %v1288_v30 = vld [vmem:[%s11453_s18 + $0x1cb8] sm:$0xff] }
 0x42f   : > { %7538 = vmatpush1.bf16.msra.mxu0 %v10161_v16  ;;  %7866 = vmatpush1.bf16.msra.mxu1 %v10163_v38  ;;  %v10228_v16 = vcombine.high %v1228_v11, %v1232_v12  ;;  %v1235_v38 = vld [vmem:[%s11453_s18 + $0x1b10] sm:$0xff] }
 0x430   : > { %7539 = vmatprep.subr.bf16.mxu0 %v10170_v2  ;;  %7867 = vmatprep.subr.bf16.mxu1 %v10172_v18  ;;  %v1239_v2 = vld [vmem:[%s11453_s18 + $0x1b30] sm:$0xff]  ;;  %v1236_v18 = vld [vmem:[%s11453_s18 + $0x1b18] sm:$0xff] }
 0x431   : > { %v10234_v22 = vcombine.high %v1235_v38, %v1239_v2  ;;  %v10233_v29 = vcombine.low %v1235_v38, %v1239_v2  ;;  %v10235_v31 = vcombine.low %v1236_v18, %v1240_v54  ;;  %v1296_v38 = vld [vmem:[%s11453_s18 + $0x1cf8] sm:$0xff] }
 0x433   : > { %7540 = vmatpush1.bf16.msra.mxu0 %v10169_v10  ;;  %7868 = vmatpush1.bf16.msra.mxu1 %v10171_v39  ;;  %v10236_v10 = vcombine.high %v1236_v18, %v1240_v54  ;;  %v1243_v39 = vld [vmem:[%s11453_s18 + $0x1b50] sm:$0xff] }
 0x434   : > { %7541 = vmatprep.subr.bf16.mxu0 %v10178_v25  ;;  %7869 = vmatprep.subr.bf16.mxu1 %v10180_v26  ;;  %v1247_v25 = vld [vmem:[%s11453_s18 + $0x1b70] sm:$0xff]  ;;  %v1244_v26 = vld [vmem:[%s11453_s18 + $0x1b58] sm:$0xff] }
 0x435   : > { %v10242_v32 = vcombine.high %v1243_v39, %v1247_v25  ;;  %v10241_v36 = vcombine.low %v1243_v39, %v1247_v25  ;;  %v10243_v37 = vcombine.low %v1244_v26, %v1248_v27 }
 0x437   : > { %7542 = vmatpush1.bf16.msra.mxu0 %v10177_v0  ;;  %7870 = vmatpush1.bf16.msra.mxu1 %v10179_v49  ;;  %v10244_v0 = vcombine.high %v1244_v26, %v1248_v27  ;;  %v1251_v49 = vld [vmem:[%s11453_s18 + $0x1b90] sm:$0xff] }
 0x438   : > { %7543 = vmatprep.subr.bf16.mxu0 %v10186_v34  ;;  %7871 = vmatprep.subr.bf16.mxu1 %v10188_v20  ;;  %v1255_v34 = vld [vmem:[%s11453_s18 + $0x1bb0] sm:$0xff]  ;;  %v1252_v20 = vld [vmem:[%s11453_s18 + $0x1b98] sm:$0xff] }
 0x439   : > { %v10250_v40 = vcombine.high %v1251_v49, %v1255_v34  ;;  %v10249_v46 = vcombine.low %v1251_v49, %v1255_v34  ;;  %v10251_v47 = vcombine.low %v1252_v20, %v1256_v35  ;;  %v1307_v27 = vld [vmem:[%s11453_s18 + $0x1d50] sm:$0xff] }
 0x43b   : > { %7544 = vmatpush1.bf16.msra.mxu0 %v10185_v41  ;;  %7872 = vmatpush1.bf16.msra.mxu1 %v10187_v42  ;;  %v10252_v41 = vcombine.high %v1252_v20, %v1256_v35  ;;  %v1259_v42 = vld [vmem:[%s11453_s18 + $0x1bd0] sm:$0xff] }
 0x43c   : > { %7545 = vmatprep.subr.bf16.mxu0 %v10194_v43  ;;  %7873 = vmatprep.subr.bf16.mxu1 %v10196_v44  ;;  %v1263_v43 = vld [vmem:[%s11453_s18 + $0x1bf0] sm:$0xff]  ;;  %v1260_v44 = vld [vmem:[%s11453_s18 + $0x1bd8] sm:$0xff] }
 0x43d   : > { %v10258_v48 = vcombine.high %v1259_v42, %v1263_v43  ;;  %v10257_v52 = vcombine.low %v1259_v42, %v1263_v43  ;;  %v10259_v56 = vcombine.low %v1260_v44, %v1264_v60  ;;  %v1315_v35 = vld [vmem:[%s11453_s18 + $0x1d90] sm:$0xff] }
 0x43f   : > { %7546 = vmatpush1.bf16.msra.mxu0 %v10193_v51  ;;  %7874 = vmatpush1.bf16.msra.mxu1 %v10195_v53  ;;  %v10260_v51 = vcombine.high %v1260_v44, %v1264_v60  ;;  %v1267_v53 = vld [vmem:[%s11453_s18 + $0x1c10] sm:$0xff] }
 0x440   : > { %7547 = vmatprep.subr.bf16.mxu0 %v10202_v59  ;;  %7875 = vmatprep.subr.bf16.mxu1 %v10204_v24  ;;  %v1271_v59 = vld [vmem:[%s11453_s18 + $0x1c30] sm:$0xff]  ;;  %v1268_v24 = vld [vmem:[%s11453_s18 + $0x1c18] sm:$0xff] }
 0x441   : > { %v10266_v57 = vcombine.high %v1267_v53, %v1271_v59  ;;  %v10265_v9 = vcombine.low %v1267_v53, %v1271_v59  ;;  %v10267_v1 = vcombine.low %v1268_v24, %v1272_v55  ;;  %v1323_v60 = vld [vmem:[%s11453_s18 + $0x1dd0] sm:$0xff] }
 0x443   : > { %7548 = vmatpush1.bf16.msra.mxu0 %v10201_v58  ;;  %7876 = vmatpush1.bf16.msra.mxu1 %v10203_v61  ;;  %v10268_v58 = vcombine.high %v1268_v24, %v1272_v55  ;;  %v1275_v61 = vld [vmem:[%s11453_s18 + $0x1c50] sm:$0xff] }
 0x444   : > { %7549 = vmatprep.subr.bf16.mxu0 %v10210_v62  ;;  %7877 = vmatprep.subr.bf16.mxu1 %v10212_v63  ;;  %v1279_v62 = vld [vmem:[%s11453_s18 + $0x1c70] sm:$0xff]  ;;  %v1276_v63 = vld [vmem:[%s11453_s18 + $0x1c58] sm:$0xff] }
 0x445   : > { %v10274_v33 = vcombine.high %v1275_v61, %v1279_v62  ;;  %v10273_v7 = vcombine.low %v1275_v61, %v1279_v62  ;;  %v10275_v11 = vcombine.low %v1276_v63, %v1280_v6  ;;  %v1331_v55 = vld [vmem:[%s11453_s18 + $0x1e10] sm:$0xff] }
 0x447   : > { %7550 = vmatpush1.bf16.msra.mxu0 %v10209_v3  ;;  %7878 = vmatpush1.bf16.msra.mxu1 %v10211_v4  ;;  %v10276_v3 = vcombine.high %v1276_v63, %v1280_v6  ;;  %v1283_v4 = vld [vmem:[%s11453_s18 + $0x1c90] sm:$0xff] }
 0x448   : > { %7551 = vmatprep.subr.bf16.mxu0 %v10218_v5  ;;  %7879 = vmatprep.subr.bf16.mxu1 %v10220_v28  ;;  %v1287_v5 = vld [vmem:[%s11453_s18 + $0x1cb0] sm:$0xff]  ;;  %v1284_v28 = vld [vmem:[%s11453_s18 + $0x1c98] sm:$0xff] }
 0x449   : > { %v10282_v12 = vcombine.high %v1283_v4, %v1287_v5  ;;  %v10283_v2 = vcombine.low %v1284_v28, %v1288_v30  ;;  %v1339_v6 = vld [vmem:[%s11453_s18 + $0x1e50] sm:$0xff] }
 0x44b   : > { %7552 = vmatpush1.bf16.msra.mxu0 %v10217_v13  ;;  %7880 = vmatpush1.bf16.msra.mxu1 %v10219_v14  ;;  %v10284_v13 = vcombine.high %v1284_v28, %v1288_v30  ;;  %v1291_v14 = vld [vmem:[%s11453_s18 + $0x1cd0] sm:$0xff] }
 0x44c   : > { %7553 = vmatprep.subr.bf16.mxu0 %v10226_v15  ;;  %7881 = vmatprep.subr.bf16.mxu1 %v10228_v16  ;;  %v1295_v15 = vld [vmem:[%s11453_s18 + $0x1cf0] sm:$0xff]  ;;  %v1292_v16 = vld [vmem:[%s11453_s18 + $0x1cd8] sm:$0xff] }
 0x44d   : > { %v10290_v18 = vcombine.high %v1291_v14, %v1295_v15  ;;  %v10292_v54 = vcombine.high %v1292_v16, %v1296_v38  ;;  %v10289_v39 = vcombine.low %v1291_v14, %v1295_v15  ;;  %v1347_v30 = vld [vmem:[%s11453_s18 + $0x1e90] sm:$0xff] }
 0x44f   : > { %7554 = vmatpush1.bf16.msra.mxu0 %v10225_v17  ;;  %7882 = vmatpush1.bf16.msra.mxu1 %v10227_v21  ;;  %v1299_v17 = vld [vmem:[%s11453_s18 + $0x1d10] sm:$0xff] }
 0x450   : > { %7555 = vmatprep.subr.bf16.mxu0 %v10234_v22  ;;  %7883 = vmatprep.subr.bf16.mxu1 %v10236_v10  ;;  %v1303_v21 = vld [vmem:[%s11453_s18 + $0x1d30] sm:$0xff]  ;;  %v1300_v22 = vld [vmem:[%s11453_s18 + $0x1d18] sm:$0xff] }
 0x451   : > { %v1304_v10 = vld [vmem:[%s11453_s18 + $0x1d38] sm:$0xff]  ;;  %v10298_v25 = vcombine.high %v1299_v17, %v1303_v21 }
 0x452   : > { %v10300_v26 = vcombine.high %v1300_v22, %v1304_v10  ;;  %v10299_v49 = vcombine.low %v1300_v22, %v1304_v10  ;;  %v1363_v10 = vld [vmem:[%s11453_s18 + $0x1f10] sm:$0xff] }
 0x453   : > { %7556 = vmatpush1.bf16.msra.mxu0 %v10233_v29  ;;  %7884 = vmatpush1.bf16.msra.mxu1 %v10235_v31  ;;  %v1311_v29 = vld [vmem:[%s11453_s18 + $0x1d70] sm:$0xff]  ;;  %v1308_v31 = vld [vmem:[%s11453_s18 + $0x1d58] sm:$0xff] }
 0x454   : > { %7557 = vmatprep.subr.bf16.mxu0 %v10242_v32  ;;  %7885 = vmatprep.subr.bf16.mxu1 %v10244_v0  ;;  %v1312_v32 = vld [vmem:[%s11453_s18 + $0x1d78] sm:$0xff]  ;;  %v10297_v0 = vcombine.low %v1299_v17, %v1303_v21  ;;  %v10306_v34 = vcombine.high %v1307_v27, %v1311_v29 }
 0x455   : > { %v10308_v20 = vcombine.high %v1308_v31, %v1312_v32  ;;  %v10307_v42 = vcombine.low %v1308_v31, %v1312_v32  ;;  %v1371_v32 = vld [vmem:[%s11453_s18 + $0x1f50] sm:$0xff] }
 0x457   : > { %7558 = vmatpush1.bf16.msra.mxu0 %v10241_v36  ;;  %7886 = vmatpush1.bf16.msra.mxu1 %v10243_v37  ;;  %v1319_v36 = vld [vmem:[%s11453_s18 + $0x1db0] sm:$0xff]  ;;  %v1316_v37 = vld [vmem:[%s11453_s18 + $0x1d98] sm:$0xff] }
 0x458   : > { %7559 = vmatprep.subr.bf16.mxu0 %v10250_v40  ;;  %7887 = vmatprep.subr.bf16.mxu1 %v10252_v41  ;;  %v1320_v40 = vld [vmem:[%s11453_s18 + $0x1db8] sm:$0xff]  ;;  %v10305_v41 = vcombine.low %v1307_v27, %v1311_v29  ;;  %v10314_v43 = vcombine.high %v1315_v35, %v1319_v36 }
 0x459   : > { %v10316_v44 = vcombine.high %v1316_v37, %v1320_v40  ;;  %v10315_v53 = vcombine.low %v1316_v37, %v1320_v40  ;;  %v1379_v40 = vld [vmem:[%s11453_s18 + $0x1f90] sm:$0xff] }
 0x45b   : > { %7560 = vmatpush1.bf16.msra.mxu0 %v10249_v46  ;;  %7888 = vmatpush1.bf16.msra.mxu1 %v10251_v47  ;;  %v1327_v46 = vld [vmem:[%s11453_s18 + $0x1df0] sm:$0xff]  ;;  %v1324_v47 = vld [vmem:[%s11453_s18 + $0x1dd8] sm:$0xff] }
 0x45c   : > { %7561 = vmatprep.subr.bf16.mxu0 %v10258_v48  ;;  %7889 = vmatprep.subr.bf16.mxu1 %v10260_v51  ;;  %v1328_v48 = vld [vmem:[%s11453_s18 + $0x1df8] sm:$0xff]  ;;  %v10313_v51 = vcombine.low %v1315_v35, %v1319_v36  ;;  %v10322_v59 = vcombine.high %v1323_v60, %v1327_v46 }
 0x45d   : > { %v10324_v24 = vcombine.high %v1324_v47, %v1328_v48  ;;  %v10323_v61 = vcombine.low %v1324_v47, %v1328_v48  ;;  %v1387_v48 = vld [vmem:[%s11453_s18 + $0x1fd0] sm:$0xff] }
 0x45f   : > { %7562 = vmatpush1.bf16.msra.mxu0 %v10257_v52  ;;  %7890 = vmatpush1.bf16.msra.mxu1 %v10259_v56  ;;  %v1335_v52 = vld [vmem:[%s11453_s18 + $0x1e30] sm:$0xff]  ;;  %v1332_v56 = vld [vmem:[%s11453_s18 + $0x1e18] sm:$0xff] }
 0x460   : > { %7572 = vmatprep.subr.bf16.mxu0 %v10266_v57  ;;  %7900 = vmatprep.subr.bf16.mxu1 %v10268_v58  ;;  %v1336_v57 = vld [vmem:[%s11453_s18 + $0x1e38] sm:$0xff]  ;;  %v10321_v58 = vcombine.low %v1323_v60, %v1327_v46  ;;  %v10330_v62 = vcombine.high %v1331_v55, %v1335_v52 }
 0x461   : > { %v10332_v63 = vcombine.high %v1332_v56, %v1336_v57 }
 0x462   : > { %7564 = vmatmul.mubr.bf16.vlgmr.msra.gmra.mrb[4].mxu0 %v12042_v8  ;;  %7892 = vmatmul.mubr.bf16.vlgmr.msra.gmra.mrb[4].mxu1 %v12042_v8  ;;  %v10281_v8 = vcombine.low %v1283_v4, %v1287_v5  ;;  %v10331_v4 = vcombine.low %v1332_v56, %v1336_v57 }
 0x463   : > { %7573 = vmatpush1.bf16.msra.mxu0 %v10265_v9  ;;  %7901 = vmatpush1.bf16.msra.mxu1 %v10267_v1  ;;  %v1343_v9 = vld [vmem:[%s11453_s18 + $0x1e70] sm:$0xff]  ;;  %v1340_v1 = vld [vmem:[%s11453_s18 + $0x1e58] sm:$0xff] }
 0x464   : > { %7574 = vmatprep.subr.bf16.mxu0 %v10274_v33  ;;  %7902 = vmatprep.subr.bf16.mxu1 %v10276_v3  ;;  %v1344_v33 = vld [vmem:[%s11453_s18 + $0x1e78] sm:$0xff]  ;;  %v10329_v3 = vcombine.low %v1331_v55, %v1335_v52  ;;  %v10338_v5 = vcombine.high %v1339_v6, %v1343_v9 }
 0x465   : > { %7604 = vmatprep.mubr.bf16.mxu0 %v12050_v19  ;;  %7932 = vmatprep.mubr.bf16.mxu1 %v12050_v19  ;;  %v10291_v19 = vcombine.low %v1292_v16, %v1296_v38  ;;  %v10340_v28 = vcombine.high %v1340_v1, %v1344_v33  ;;  %v10339_v14 = vcombine.low %v1340_v1, %v1344_v33  ;;  %v1355_v38 = vld [vmem:[%s11453_s18 + $0x1ed0] sm:$0xff] }
 0x467   : > { %7575 = vmatpush1.bf16.msra.mxu0 %v10273_v7  ;;  %7903 = vmatpush1.bf16.msra.mxu1 %v10275_v11  ;;  %v1351_v7 = vld [vmem:[%s11453_s18 + $0x1eb0] sm:$0xff]  ;;  %v1348_v11 = vld [vmem:[%s11453_s18 + $0x1e98] sm:$0xff] }
 0x468   : > { %7576 = vmatprep.subr.bf16.mxu0 %v10282_v12  ;;  %7904 = vmatprep.subr.bf16.mxu1 %v10284_v13  ;;  %v1352_v12 = vld [vmem:[%s11453_s18 + $0x1eb8] sm:$0xff]  ;;  %v10337_v13 = vcombine.low %v1339_v6, %v1343_v9  ;;  %v10346_v15 = vcombine.high %v1347_v30, %v1351_v7 }
 0x469   : > { %v10348_v16 = vcombine.high %v1348_v11, %v1352_v12  ;;  %v10347_v17 = vcombine.low %v1348_v11, %v1352_v12 }
 0x46b   : > { %7577 = vmatpush1.bf16.msra.mxu0 %v10281_v8  ;;  %7905 = vmatpush1.bf16.msra.mxu1 %v10283_v2  ;;  %v1359_v8 = vld [vmem:[%s11453_s18 + $0x1ef0] sm:$0xff]  ;;  %v1356_v2 = vld [vmem:[%s11453_s18 + $0x1ed8] sm:$0xff] }
 0x46c   : > { %7578 = vmatprep.subr.bf16.mxu0 %v10290_v18  ;;  %7906 = vmatprep.subr.bf16.mxu1 %v10292_v54  ;;  %v1360_v18 = vld [vmem:[%s11453_s18 + $0x1ef8] sm:$0xff]  ;;  %v10345_v54 = vcombine.low %v1347_v30, %v1351_v7  ;;  %v10354_v21 = vcombine.high %v1355_v38, %v1359_v8 }
 0x46d   : > { %v10356_v22 = vcombine.high %v1356_v2, %v1360_v18  ;;  %v10355_v27 = vcombine.low %v1356_v2, %v1360_v18  ;;  %v366_v7 = vld [vmem:[#allocation2 + $0x8] sm:$0xff]  ;;  %v10795_v18 = vld [vmem:[#allocation8 + $0x24] ss:$8 sps:$4 sm:$0xff] (!%p10389_p1)  }
 0x46e   : > { %v10794_v2 = vld [vmem:[#allocation8 + $0x210] ss:$8 sps:$4 sm:$0xff] (!%p10389_p1)  }
 0x46f   : > { %7579 = vmatpush1.bf16.msra.mxu0 %v10289_v39  ;;  %7907 = vmatpush1.bf16.msra.mxu1 %v10291_v19  ;;  %v1367_v39 = vld [vmem:[%s11453_s18 + $0x1f30] sm:$0xff]  ;;  %v1364_v19 = vld [vmem:[%s11453_s18 + $0x1f18] sm:$0xff] }
 0x470   : > { %7580 = vmatprep.subr.bf16.mxu0 %v10298_v25  ;;  %7908 = vmatprep.subr.bf16.mxu1 %v10300_v26  ;;  %v1368_v25 = vld [vmem:[%s11453_s18 + $0x1f38] sm:$0xff]  ;;  %v10353_v26 = vcombine.low %v1355_v38, %v1359_v8  ;;  %v10362_v29 = vcombine.high %v1363_v10, %v1367_v39 }
 0x471   : > { %v10364_v31 = vcombine.high %v1364_v19, %v1368_v25  ;;  %v10363_v35 = vcombine.low %v1364_v19, %v1368_v25  ;;  %v10791_v38 = vld [vmem:[#allocation8 + $0x214] ss:$8 sps:$4 sm:$0xff] (!%p10389_p1)   ;;  %v10793_v8 = vld [vmem:[#allocation8 + $0x10] ss:$8 sps:$4 sm:$0xff] (!%p10389_p1)   ;;  %v10807_v25 = vld [vmem:[#allocation8 + $0x44] ss:$8 sps:$4 sm:$0xff] (!%p10389_p1)  }
 0x472   : > { %v10806_v19 = vld [vmem:[#allocation8 + $0x230] ss:$8 sps:$4 sm:$0xff] (!%p10389_p1)  }
 0x473   : > { %7581 = vmatpush1.bf16.msra.mxu0 %v10297_v0  ;;  %7909 = vmatpush1.bf16.msra.mxu1 %v10299_v49  ;;  %v1375_v0 = vld [vmem:[%s11453_s18 + $0x1f70] sm:$0xff]  ;;  %v1372_v49 = vld [vmem:[%s11453_s18 + $0x1f58] sm:$0xff] }
 0x474   : > { %7582 = vmatprep.subr.bf16.mxu0 %v10306_v34  ;;  %7910 = vmatprep.subr.bf16.mxu1 %v10308_v20  ;;  %v1376_v34 = vld [vmem:[%s11453_s18 + $0x1f78] sm:$0xff]  ;;  %v10361_v20 = vcombine.low %v1363_v10, %v1367_v39  ;;  %v10370_v36 = vcombine.high %v1371_v32, %v1375_v0 }
 0x475   : > { %v10372_v37 = vcombine.high %v1372_v49, %v1376_v34  ;;  %v10371_v60 = vcombine.low %v1372_v49, %v1376_v34  ;;  %v10803_v10 = vld [vmem:[#allocation8 + $0x234] ss:$8 sps:$4 sm:$0xff] (!%p10389_p1)   ;;  %v10805_v39 = vld [vmem:[#allocation8 + $0x30] ss:$8 sps:$4 sm:$0xff] (!%p10389_p1)   ;;  %v10819_v34 = vld [vmem:[#allocation8 + $0x64] ss:$8 sps:$4 sm:$0xff] (!%p10389_p1)  }
 0x476   : > { %v10818_v49 = vld [vmem:[#allocation8 + $0x250] ss:$8 sps:$4 sm:$0xff] (!%p10389_p1)  }
 0x477   : > { %7583 = vmatpush1.bf16.msra.mxu0 %v10305_v41  ;;  %7911 = vmatpush1.bf16.msra.mxu1 %v10307_v42  ;;  %v1383_v41 = vld [vmem:[%s11453_s18 + $0x1fb0] sm:$0xff]  ;;  %v1380_v42 = vld [vmem:[%s11453_s18 + $0x1f98] sm:$0xff] }
 0x478   : > { %7584 = vmatprep.subr.bf16.mxu0 %v10314_v43  ;;  %7912 = vmatprep.subr.bf16.mxu1 %v10316_v44  ;;  %v1384_v43 = vld [vmem:[%s11453_s18 + $0x1fb8] sm:$0xff]  ;;  %v10369_v44 = vcombine.low %v1371_v32, %v1375_v0  ;;  %v10378_v46 = vcombine.high %v1379_v40, %v1383_v41 }
 0x479   : > { %v10380_v47 = vcombine.high %v1380_v42, %v1384_v43  ;;  %v10379_v55 = vcombine.low %v1380_v42, %v1384_v43  ;;  %v10815_v32 = vld [vmem:[#allocation8 + $0x254] ss:$8 sps:$4 sm:$0xff] (!%p10389_p1)   ;;  %v10817_v0 = vld [vmem:[#allocation8 + $0x50] ss:$8 sps:$4 sm:$0xff] (!%p10389_p1)   ;;  %v10831_v43 = vld [vmem:[#allocation8 + $0x84] ss:$8 sps:$4 sm:$0xff] (!%p10389_p1)  }
 0x47a   : > { %v10830_v42 = vld [vmem:[#allocation8 + $0x270] ss:$8 sps:$4 sm:$0xff] (!%p10389_p1)  }
 0x47b   : > { %7585 = vmatpush1.bf16.msra.mxu0 %v10313_v51  ;;  %7913 = vmatpush1.bf16.msra.mxu1 %v10315_v53  ;;  %v1391_v51 = vld [vmem:[%s11453_s18 + $0x1ff0] sm:$0xff]  ;;  %v1388_v53 = vld [vmem:[%s11453_s18 + $0x1fd8] sm:$0xff] }
 0x47c   : > { %7586 = vmatprep.subr.bf16.mxu0 %v10322_v59  ;;  %7914 = vmatprep.subr.bf16.mxu1 %v10324_v24  ;;  %v1392_v59 = vld [vmem:[%s11453_s18 + $0x1ff8] sm:$0xff]  ;;  %v10377_v24 = vcombine.low %v1379_v40, %v1383_v41  ;;  %v10386_v52 = vcombine.high %v1387_v48, %v1391_v51  ;;  %v10385_v57 = vcombine.low %v1387_v48, %v1391_v51 }
 0x47d   : > { %v10388_v56 = vcombine.high %v1388_v53, %v1392_v59  ;;  %v10827_v40 = vld [vmem:[#allocation8 + $0x274] ss:$8 sps:$4 sm:$0xff] (!%p10389_p1)   ;;  %v10829_v41 = vld [vmem:[#allocation8 + $0x70] ss:$8 sps:$4 sm:$0xff] (!%p10389_p1)  }
 0x47e   : > { %v10839_v48 = vld [vmem:[#allocation8 + $0x294] ss:$8 sps:$4 sm:$0xff] (!%p10389_p1)   ;;  %v10841_v51 = vld [vmem:[#allocation8 + $0x90] ss:$8 sps:$4 sm:$0xff] (!%p10389_p1)  }
 0x47f   : > { %7587 = vmatpush1.bf16.msra.mxu0 %v10321_v58  ;;  %7915 = vmatpush1.bf16.msra.mxu1 %v10323_v61  ;;  %v10387_v58 = vcombine.low %v1388_v53, %v1392_v59  ;;  %v10842_v53 = vld [vmem:[#allocation8 + $0x290] ss:$8 sps:$4 sm:$0xff] (!%p10389_p1)   ;;  %v10843_v59 = vld [vmem:[#allocation8 + $0xa4] ss:$8 sps:$4 sm:$0xff] (!%p10389_p1)  }
 0x480   : > { %7588 = vmatprep.subr.bf16.mxu0 %v10330_v62  ;;  %7916 = vmatprep.subr.bf16.mxu1 %v10332_v63 }
 0x483   : > { %7589 = vmatpush1.bf16.msra.mxu0 %v10329_v3  ;;  %7917 = vmatpush1.bf16.msra.mxu1 %v10331_v4 }
 0x484   : > { %7590 = vmatprep.subr.bf16.mxu0 %v10338_v5  ;;  %7918 = vmatprep.subr.bf16.mxu1 %v10340_v28 }
 0x487   : > { %7591 = vmatpush1.bf16.msra.mxu0 %v10337_v13  ;;  %7919 = vmatpush1.bf16.msra.mxu1 %v10339_v14  ;;  %v10785_v13 = vld [vmem:[#allocation8 + $0x204] ss:$8 sps:$4 sm:$0xff] (!%p10389_p1)   ;;  %v10787_v14 = vld [vmem:[#allocation8] ss:$8 sps:$4 sm:$0xff] (!%p10389_p1)  }
 0x488   : > { %7592 = vmatprep.subr.bf16.mxu0 %v10346_v15  ;;  %7920 = vmatprep.subr.bf16.mxu1 %v10348_v16  ;;  %v10788_v15 = vld [vmem:[#allocation8 + $0x200] ss:$8 sps:$4 sm:$0xff] (!%p10389_p1)   ;;  %v10789_v16 = vld [vmem:[#allocation8 + $0x14] ss:$8 sps:$4 sm:$0xff] (!%p10389_p1)  }
 0x48b   : > { %7593 = vmatpush1.bf16.msra.mxu0 %v10345_v54  ;;  %7921 = vmatpush1.bf16.msra.mxu1 %v10347_v17  ;;  %v10797_v54 = vld [vmem:[#allocation8 + $0x224] ss:$8 sps:$4 sm:$0xff] (!%p10389_p1)   ;;  %v10799_v17 = vld [vmem:[#allocation8 + $0x20] ss:$8 sps:$4 sm:$0xff] (!%p10389_p1)  }
 0x48c   : > { %7594 = vmatprep.subr.bf16.mxu0 %v10354_v21  ;;  %7922 = vmatprep.subr.bf16.mxu1 %v10356_v22  ;;  %v10800_v21 = vld [vmem:[#allocation8 + $0x220] ss:$8 sps:$4 sm:$0xff] (!%p10389_p1)   ;;  %v10801_v22 = vld [vmem:[#allocation8 + $0x34] ss:$8 sps:$4 sm:$0xff] (!%p10389_p1)  }
 0x48f   : > { %7595 = vmatpush1.bf16.msra.mxu0 %v10353_v26  ;;  %7923 = vmatpush1.bf16.msra.mxu1 %v10355_v27  ;;  %v10809_v26 = vld [vmem:[#allocation8 + $0x244] ss:$8 sps:$4 sm:$0xff] (!%p10389_p1)   ;;  %v10811_v27 = vld [vmem:[#allocation8 + $0x40] ss:$8 sps:$4 sm:$0xff] (!%p10389_p1)  }
 0x490   : > { %7596 = vmatprep.subr.bf16.mxu0 %v10362_v29  ;;  %7924 = vmatprep.subr.bf16.mxu1 %v10364_v31  ;;  %v10812_v29 = vld [vmem:[#allocation8 + $0x240] ss:$8 sps:$4 sm:$0xff] (!%p10389_p1)   ;;  %v10813_v31 = vld [vmem:[#allocation8 + $0x54] ss:$8 sps:$4 sm:$0xff] (!%p10389_p1)  }
 0x493   : > { %7597 = vmatpush1.bf16.msra.mxu0 %v10361_v20  ;;  %7925 = vmatpush1.bf16.msra.mxu1 %v10363_v35  ;;  %v10821_v20 = vld [vmem:[#allocation8 + $0x264] ss:$8 sps:$4 sm:$0xff] (!%p10389_p1)   ;;  %v10823_v35 = vld [vmem:[#allocation8 + $0x60] ss:$8 sps:$4 sm:$0xff] (!%p10389_p1)  }
 0x494   : > { %7598 = vmatprep.subr.bf16.mxu0 %v10370_v36  ;;  %7926 = vmatprep.subr.bf16.mxu1 %v10372_v37  ;;  %v10824_v36 = vld [vmem:[#allocation8 + $0x260] ss:$8 sps:$4 sm:$0xff] (!%p10389_p1)   ;;  %v10825_v37 = vld [vmem:[#allocation8 + $0x74] ss:$8 sps:$4 sm:$0xff] (!%p10389_p1)  }
 0x497   : > { %7599 = vmatpush1.bf16.msra.mxu0 %v10369_v44  ;;  %7927 = vmatpush1.bf16.msra.mxu1 %v10371_v60  ;;  %v10833_v44 = vld [vmem:[#allocation8 + $0x284] ss:$8 sps:$4 sm:$0xff] (!%p10389_p1)   ;;  %v10835_v60 = vld [vmem:[#allocation8 + $0x80] ss:$8 sps:$4 sm:$0xff] (!%p10389_p1)  }
 0x498   : > { %7600 = vmatprep.subr.bf16.mxu0 %v10378_v46  ;;  %7928 = vmatprep.subr.bf16.mxu1 %v10380_v47  ;;  %v10836_v46 = vld [vmem:[#allocation8 + $0x280] ss:$8 sps:$4 sm:$0xff] (!%p10389_p1)   ;;  %v10837_v47 = vld [vmem:[#allocation8 + $0x94] ss:$8 sps:$4 sm:$0xff] (!%p10389_p1)  }
 0x49b   : > { %7601 = vmatpush1.bf16.msra.mxu0 %v10377_v24  ;;  %7929 = vmatpush1.bf16.msra.mxu1 %v10379_v55  ;;  %v10845_v24 = vld [vmem:[#allocation8 + $0x2a4] ss:$8 sps:$4 sm:$0xff] (!%p10389_p1)   ;;  %v10847_v55 = vld [vmem:[#allocation8 + $0xa0] ss:$8 sps:$4 sm:$0xff] (!%p10389_p1)  }
 0x49c   : > { %7602 = vmatprep.subr.bf16.mxu0 %v10386_v52  ;;  %7930 = vmatprep.subr.bf16.mxu1 %v10388_v56  ;;  %v10848_v52 = vld [vmem:[#allocation8 + $0x2a0] ss:$8 sps:$4 sm:$0xff] (!%p10389_p1)   ;;  %v7999_v56 = vsub.s32 (!%p10389_p1), 0, %v11497_v45 }
 0x49f   : > { %7603 = vmatpush1.bf16.msra.mxu0 %v10385_v57  ;;  %7931 = vmatpush1.bf16.msra.mxu1 %v10387_v58  ;;  %v8003_v57 = vsub.s32 (!%p10389_p1), 1, %v11497_v45  ;;  %v10849_v58 = vld [vmem:[#allocation8 + $0xb4] ss:$8 sps:$4 sm:$0xff] (!%p10389_p1)  }
 0x4a0   : > { %8981 = vmatprep.subr.bf16.mxu0 (!%p10389_p1), %v10785_v13 }
 0x4a2   : > { %7605 = vmatmul.mubr.bf16.vlgmr.msra.gmra.mrb[4].mxu0 %v12118_v50  ;;  %7933 = vmatmul.mubr.bf16.vlgmr.msra.gmra.mrb[4].mxu1 %v12118_v50  ;;  %v10783_v50 = vld [vmem:[#allocation8 + $0x4] ss:$8 sps:$4 sm:$0xff] (!%p10389_p1)  }
 0x4a3   : > { %8899 = vmatprep.subr.bf16.mxu1 (!%p10389_p1), %v10783_v50  ;;  %8982 = vmatpush1.bf16.msra.mxu0 (!%p10389_p1), %v10788_v15 }
 0x4a4   : > { %8900 = vmatpush1.bf16.msra.mxu1 (!%p10389_p1), %v10787_v14  ;;  %8983 = vmatprep.subr.bf16.mxu0 (!%p10389_p1), %v10791_v38 }
 0x4a5   : > { %8901 = vmatprep.subr.bf16.mxu1 (!%p10389_p1), %v10789_v16 }
 0x4a7   : > { %8984 = vmatpush1.bf16.msra.mxu0 (!%p10389_p1), %v10794_v2 }
 0x4a8   : > { %8902 = vmatpush1.bf16.msra.mxu1 (!%p10389_p1), %v10793_v8  ;;  %8985 = vmatprep.subr.bf16.mxu0 (!%p10389_p1), %v10797_v54  ;;  %v10859_v8 = vld [vmem:[#allocation8 + $0xc0] ss:$8 sps:$4 sm:$0xff] (!%p10389_p1)  }
 0x4a9   : > { %8903 = vmatprep.subr.bf16.mxu1 (!%p10389_p1), %v10795_v18  ;;  %v10860_v54 = vld [vmem:[#allocation8 + $0x2c0] ss:$8 sps:$4 sm:$0xff] (!%p10389_p1)  }
 0x4ab   : > { %8986 = vmatpush1.bf16.msra.mxu0 (!%p10389_p1), %v10800_v21 }
 0x4ac   : > { %8904 = vmatpush1.bf16.msra.mxu1 (!%p10389_p1), %v10799_v17  ;;  %8987 = vmatprep.subr.bf16.mxu0 (!%p10389_p1), %v10803_v10  ;;  %v10861_v17 = vld [vmem:[#allocation8 + $0xd4] ss:$8 sps:$4 sm:$0xff] (!%p10389_p1)  }
 0x4ad   : > { %8905 = vmatprep.subr.bf16.mxu1 (!%p10389_p1), %v10801_v22  ;;  %v10863_v10 = vld [vmem:[#allocation8 + $0x2d4] ss:$8 sps:$4 sm:$0xff] (!%p10389_p1)  }
 0x4af   : > { %8988 = vmatpush1.bf16.msra.mxu0 (!%p10389_p1), %v10806_v19 }
 0x4b0   : > { %8906 = vmatpush1.bf16.msra.mxu1 (!%p10389_p1), %v10805_v39  ;;  %8989 = vmatprep.subr.bf16.mxu0 (!%p10389_p1), %v10809_v26 }
 0x4b1   : > { %8907 = vmatprep.subr.bf16.mxu1 (!%p10389_p1), %v10807_v25  ;;  %v7993_v25 = vld [vmem:[#allocation2] sm:$0xff] (!%p10389_p1) }
 0x4b3   : > { %8990 = vmatpush1.bf16.msra.mxu0 (!%p10389_p1), %v10812_v29 }
 0x4b4   : > { %8908 = vmatpush1.bf16.msra.mxu1 (!%p10389_p1), %v10811_v27  ;;  %8991 = vmatprep.subr.bf16.mxu0 (!%p10389_p1), %v10815_v32  ;;  %v10865_v27 = vld [vmem:[#allocation8 + $0xd0] ss:$8 sps:$4 sm:$0xff] (!%p10389_p1)  }
 0x4b5   : > { %8909 = vmatprep.subr.bf16.mxu1 (!%p10389_p1), %v10813_v31  ;;  %v10866_v32 = vld [vmem:[#allocation8 + $0x2d0] ss:$8 sps:$4 sm:$0xff] (!%p10389_p1)  }
 0x4b7   : > { %8992 = vmatpush1.bf16.msra.mxu0 (!%p10389_p1), %v10818_v49 }
 0x4b8   : > { %8910 = vmatpush1.bf16.msra.mxu1 (!%p10389_p1), %v10817_v0  ;;  %8993 = vmatprep.subr.bf16.mxu0 (!%p10389_p1), %v10821_v20  ;;  %v10867_v0 = vld [vmem:[#allocation8 + $0xe4] ss:$8 sps:$4 sm:$0xff] (!%p10389_p1)  }
 0x4b9   : > { %8911 = vmatprep.subr.bf16.mxu1 (!%p10389_p1), %v10819_v34  ;;  %v10869_v34 = vld [vmem:[#allocation8 + $0x2e4] ss:$8 sps:$4 sm:$0xff] (!%p10389_p1)  }
 0x4bb   : > { %8994 = vmatpush1.bf16.msra.mxu0 (!%p10389_p1), %v10824_v36  ;;  %v10871_v36 = vld [vmem:[#allocation8 + $0xe0] ss:$8 sps:$4 sm:$0xff] (!%p10389_p1)  }
 0x4bc   : > { %8912 = vmatpush1.bf16.msra.mxu1 (!%p10389_p1), %v10823_v35  ;;  %8995 = vmatprep.subr.bf16.mxu0 (!%p10389_p1), %v10827_v40 }
 0x4bd   : > { %8913 = vmatprep.subr.bf16.mxu1 (!%p10389_p1), %v10825_v37 }
 0x4bf   : > { %8996 = vmatpush1.bf16.msra.mxu0 (!%p10389_p1), %v10830_v42  ;;  %v10873_v42 = vld [vmem:[#allocation8 + $0xf4] ss:$8 sps:$4 sm:$0xff] (!%p10389_p1)  }
 0x4c0   : > { %8914 = vmatpush1.bf16.msra.mxu1 (!%p10389_p1), %v10829_v41  ;;  %8997 = vmatprep.subr.bf16.mxu0 (!%p10389_p1), %v10833_v44  ;;  %v10872_v41 = vld [vmem:[#allocation8 + $0x2e0] ss:$8 sps:$4 sm:$0xff] (!%p10389_p1)  }
 0x4c1   : > { %8915 = vmatprep.subr.bf16.mxu1 (!%p10389_p1), %v10831_v43 }
 0x4c3   : > { %8998 = vmatpush1.bf16.msra.mxu0 (!%p10389_p1), %v10836_v46 }
 0x4c4   : > { %8916 = vmatpush1.bf16.msra.mxu1 (!%p10389_p1), %v10835_v60  ;;  %8999 = vmatprep.subr.bf16.mxu0 (!%p10389_p1), %v10839_v48  ;;  %v10875_v60 = vld [vmem:[#allocation8 + $0x2f4] ss:$8 sps:$4 sm:$0xff] (!%p10389_p1)  }
 0x4c5   : > { %8917 = vmatprep.subr.bf16.mxu1 (!%p10389_p1), %v10837_v47 }
 0x4c7   : > { %9000 = vmatpush1.bf16.msra.mxu0 (!%p10389_p1), %v10842_v53  ;;  %v10877_v53 = vld [vmem:[#allocation8 + $0xf0] ss:$8 sps:$4 sm:$0xff] (!%p10389_p1)  }
 0x4c8   : > { %8918 = vmatpush1.bf16.msra.mxu1 (!%p10389_p1), %v10841_v51  ;;  %9001 = vmatprep.subr.bf16.mxu0 (!%p10389_p1), %v10845_v24  ;;  %v10878_v24 = vld [vmem:[#allocation8 + $0x2f0] ss:$8 sps:$4 sm:$0xff] (!%p10389_p1)  }
 0x4c9   : > { %8919 = vmatprep.subr.bf16.mxu1 (!%p10389_p1), %v10843_v59 }
 0x4cb   : > { %9002 = vmatpush1.bf16.msra.mxu0 (!%p10389_p1), %v10848_v52 }
 0x4cc   : > { %8920 = vmatpush1.bf16.msra.mxu1 (!%p10389_p1), %v10847_v55  ;;  %v10881_v55 = vld [vmem:[#allocation8 + $0x104] ss:$8 sps:$4 sm:$0xff] (!%p10389_p1)  }
 0x4cd   : > { %8921 = vmatprep.subr.bf16.mxu1 (!%p10389_p1), %v10849_v58  ;;  %v10884_v58 = vld [vmem:[#allocation8 + $0x304] ss:$8 sps:$4 sm:$0xff] (!%p10389_p1)  }
 0x575   : > { %v7606_v61 = vpop.f32.mrb[4].mxu0  ;;  %v7934_v62 = vpop.f32.mrb[4].mxu1 }
 0x576   : > { %v7608_v63 = vpop.f32.mrb[5].mxu0  ;;  %v7936_v9 = vpop.f32.mrb[5].mxu1 }
 0x577   : > { %v7966_v6 = vcombine.low %v7606_v61, %v7608_v63  ;;  %v7610_v1 = vpop.f32.mrb[6].mxu0  ;;  %v7967_v33 = vcombine.low %v7934_v62, %v7936_v9  ;;  %v7938_v3 = vpop.f32.mrb[6].mxu1  ;;  %v8007_v61 = vsub.s32 (!%p10389_p1), 2, %v11497_v45  ;;  %v8011_v62 = vsub.s32 (!%p10389_p1), 3, %v11497_v45  ;;  %v10851_v63 = vld [vmem:[#allocation8 + $0x2b4] ss:$8 sps:$4 sm:$0xff] (!%p10389_p1)  }
 0x578   : > { %v7611_v4 = vpop.f32.mrb[7].mxu0  ;;  %v7939_v28 = vpop.f32.mrb[7].mxu1  ;;  %v8019_v9 = vsub.s32 (!%p10389_p1), 5, %v11497_v45  ;;  %v8023_v1 = vsub.s32 (!%p10389_p1), 6, %v11497_v45  ;;  %v7995_v3 = vld [vmem:[#allocation6] sm:$0xff] (!%p10389_p1)  ;;  %9003 = vmatprep.subr.bf16.mxu0 (!%p10389_p1), %v10851_v63 }
 0x579   : > { %v7974_v5 = vrot.slane %v7966_v6, %v12351_v23  ;;  %v7981_v30 = vrot.slane %v7967_v33, %v12351_v23  ;;  %7992 = sbr.rel (%p10389_p1) target bundleno = 1924 (0x784), region = 76  ;;  %v8015_v6 = vsub.s32 (!%p10389_p1), 4, %v11497_v45  ;;  %v8027_v33 = vsub.s32 (!%p10389_p1), 7, %v11497_v45  ;;  %v10853_v4 = vld [vmem:[#allocation8 + $0xb0] ss:$8 sps:$4 sm:$0xff] (!%p10389_p1)  }
 0x57a   : > { %v10855_v28 = vld [vmem:[#allocation8 + $0xc4] ss:$8 sps:$4 sm:$0xff] (!%p10389_p1)   ;;  %v8012_v50 = vrot.slane (!%p10389_p1), %v7995_v3, %v8011_v62  ;;  %v8020_v14 = vrot.slane (!%p10389_p1), %v7995_v3, %v8019_v9  ;;  %v8024_v16 = vrot.slane (!%p10389_p1), %v7995_v3, %v8023_v1  ;;  %8922 = vmatpush1.bf16.msra.mxu1 (!%p10389_p1), %v10853_v4  ;;  %v10882_v9 = vld [vmem:[#allocation8 + $0x300] ss:$8 sps:$4 sm:$0xff] (!%p10389_p1)   ;;  %v10887_v1 = vld [vmem:[#allocation8 + $0x114] ss:$8 sps:$4 sm:$0xff] (!%p10389_p1)  }
 0x57b   : > { %v7982_v11 = vcombine.low %v7974_v5, %v7981_v30  ;;  %v10854_v5 = vld [vmem:[#allocation8 + $0x2b0] ss:$8 sps:$4 sm:$0xff] (!%p10389_p1)   ;;  %v8000_v30 = vrot.slane (!%p10389_p1), %v7995_v3, %v7999_v56  ;;  %v8016_v13 = vrot.slane (!%p10389_p1), %v7995_v3, %v8015_v6  ;;  %v8028_v38 = vrot.slane (!%p10389_p1), %v7995_v3, %v8027_v33  ;;  %8923 = vmatprep.subr.bf16.mxu1 (!%p10389_p1), %v10855_v28  ;;  %v10890_v33 = vld [vmem:[#allocation8 + $0x314] ss:$8 sps:$4 sm:$0xff] (!%p10389_p1)  }
 0x57c   : > { %9004 = vmatpush1.bf16.msra.mxu0 (!%p10389_p1), %v10854_v5  ;;  %v10885_v5 = vld [vmem:[#allocation8 + $0x110] ss:$8 sps:$4 sm:$0xff] (!%p10389_p1)  }
 0x57d   : > { %v7986_v12 = vadd.f32 %v7982_v11, %v366_v7  ;;  %v8004_v7 = vrot.slane (!%p10389_p1), %v7995_v3, %v8003_v57  ;;  %v8008_v11 = vrot.slane (!%p10389_p1), %v7995_v3, %v8007_v61  ;;  %v8046_v18 = vcombine.low (!%p10389_p1), %v8016_v13, %v8020_v14  ;;  %v10888_v28 = vld [vmem:[#allocation8 + $0x310] ss:$8 sps:$4 sm:$0xff] (!%p10389_p1)   ;;  %v10902_v13 = vld [vmem:[#allocation8 + $0x334] ss:$8 sps:$4 sm:$0xff] (!%p10389_p1)  }
 0x57e   : > { %v8047_v22 = vcombine.low (!%p10389_p1), %v8024_v16, %v8028_v38  ;;  %8924 = vmatpush1.bf16.msra.mxu1 (!%p10389_p1), %v10859_v8  ;;  %v10897_v14 = vld [vmem:[#allocation8 + $0x130] ss:$8 sps:$4 sm:$0xff] (!%p10389_p1)   ;;  %v10905_v16 = vld [vmem:[#allocation8 + $0x144] ss:$8 sps:$4 sm:$0xff] (!%p10389_p1)   ;;  %v10903_v8 = vld [vmem:[#allocation8 + $0x140] ss:$8 sps:$4 sm:$0xff] (!%p10389_p1)  }
 0x57f   : > { %7988 = vst [vmem:[#allocation2 + $0x8] sm:$0xff] %v7986_v12  ;;  %v10857_v12 = vld [vmem:[#allocation8 + $0x2c4] ss:$8 sps:$4 sm:$0xff] (!%p10389_p1)   ;;  %v8029_v15 = vcombine.low (!%p10389_p1), %v8000_v30, %v8004_v7  ;;  %v8030_v2 = vcombine.low (!%p10389_p1), %v8008_v11, %v8012_v50  ;;  %v8054_v19 = vrot.slane (!%p10389_p1), %v8046_v18, %v12351_v23  ;;  %8925 = vmatprep.subr.bf16.mxu1 (!%p10389_p1), %v10861_v17  ;;  %v10891_v11 = vld [vmem:[#allocation8 + $0x120] ss:$8 sps:$4 sm:$0xff] (!%p10389_p1)  }
 0x580   : > { %9005 = vmatprep.subr.bf16.mxu0 %v10857_v12  ;;  %v8061_v26 = vrot.slane %v8047_v22, %v12351_v23  ;;  %v10893_v30 = vld [vmem:[#allocation8 + $0x124] ss:$8 sps:$4 sm:$0xff]   ;;  %v10894_v12 = vld [vmem:[#allocation8 + $0x320] ss:$8 sps:$4 sm:$0xff]   ;;  %v10899_v50 = vld [vmem:[#allocation8 + $0x134] ss:$8 sps:$4 sm:$0xff]  }
 0x581   : > { %v8037_v21 = vrot.slane %v8029_v15, %v12351_v23  ;;  %v8044_v39 = vrot.slane %v8030_v2, %v12351_v23  ;;  %9006 = vmatpush1.bf16.msra.mxu0 %v10860_v54  ;;  %v10896_v7 = vld [vmem:[#allocation8 + $0x324] ss:$8 sps:$4 sm:$0xff]   ;;  %v10900_v15 = vld [vmem:[#allocation8 + $0x330] ss:$8 sps:$4 sm:$0xff]   ;;  %v10906_v2 = vld [vmem:[#allocation8 + $0x340] ss:$8 sps:$4 sm:$0xff]  }
 0x582   : > { %v8062_v49 = vcombine.low %v8054_v19, %v8061_v26  ;;  %9007 = vmatprep.subr.bf16.mxu0 %v10863_v10  ;;  %8926 = vmatpush1.bf16.msra.mxu1 %v10865_v27  ;;  %v10908_v38 = vld [vmem:[#allocation8 + $0x344] ss:$8 sps:$4 sm:$0xff]   ;;  %v10911_v18 = vld [vmem:[#allocation8 + $0x154] ss:$8 sps:$4 sm:$0xff]   ;;  %v10909_v17 = vld [vmem:[#allocation8 + $0x150] ss:$8 sps:$4 sm:$0xff]  }
 0x583   : > { %v8045_v29 = vcombine.low %v8037_v21, %v8044_v39  ;;  %8927 = vmatprep.subr.bf16.mxu1 %v10867_v0  ;;  %v10914_v54 = vld [vmem:[#allocation8 + $0x354] ss:$8 sps:$4 sm:$0xff]   ;;  %v10912_v21 = vld [vmem:[#allocation8 + $0x350] ss:$8 sps:$4 sm:$0xff]   ;;  %v10917_v22 = vld [vmem:[#allocation8 + $0x164] ss:$8 sps:$4 sm:$0xff]  }
 0x584   : > { %v10920_v10 = vld [vmem:[#allocation8 + $0x364] ss:$8 sps:$4 sm:$0xff]   ;;  %v10915_v39 = vld [vmem:[#allocation8 + $0x160] ss:$8 sps:$4 sm:$0xff]   ;;  %v10926_v26 = vld [vmem:[#allocation8 + $0x374] ss:$8 sps:$4 sm:$0xff]  }
 0x585   : > { %v8065_v20 = vadd.f32 %v8045_v29, %v7993_v25  ;;  %9008 = vmatpush1.bf16.msra.mxu0 %v10866_v32  ;;  %v10918_v19 = vld [vmem:[#allocation8 + $0x360] ss:$8 sps:$4 sm:$0xff]   ;;  %v10923_v25 = vld [vmem:[#allocation8 + $0x174] ss:$8 sps:$4 sm:$0xff]   ;;  %v10921_v27 = vld [vmem:[#allocation8 + $0x170] ss:$8 sps:$4 sm:$0xff]  }
 0x586   : > { %v7994_v31 = vld [vmem:[#allocation2 + $0x8] sm:$0xff]  ;;  %9009 = vmatprep.subr.bf16.mxu0 %v10869_v34  ;;  %8928 = vmatpush1.bf16.msra.mxu1 %v10871_v36  ;;  %v10932_v32 = vld [vmem:[#allocation8 + $0x384] ss:$8 sps:$4 sm:$0xff]   ;;  %v10927_v0 = vld [vmem:[#allocation8 + $0x180] ss:$8 sps:$4 sm:$0xff]  }
 0x587   : > { %v8066_v35 = vadd.f32 %v8062_v49, %v7994_v31  ;;  %v8069_v37 = vcombine.high %v8065_v20, %v8065_v20  ;;  %v8076_v40 = vrot.slane %v8065_v20, %v12351_v23  ;;  %8929 = vmatprep.subr.bf16.mxu1 %v10873_v42  ;;  %v10924_v29 = vld [vmem:[#allocation8 + $0x370] ss:$8 sps:$4 sm:$0xff]   ;;  %v10929_v31 = vld [vmem:[#allocation8 + $0x184] ss:$8 sps:$4 sm:$0xff]   ;;  %v10930_v49 = vld [vmem:[#allocation8 + $0x380] ss:$8 sps:$4 sm:$0xff]  }
 0x588   : > { %v10935_v34 = vld [vmem:[#allocation8 + $0x194] ss:$8 sps:$4 sm:$0xff]   ;;  %v10936_v36 = vld [vmem:[#allocation8 + $0x390] ss:$8 sps:$4 sm:$0xff]   ;;  %v10942_v42 = vld [vmem:[#allocation8 + $0x3a0] ss:$8 sps:$4 sm:$0xff]  }
 0x589   : > { %v8086_v43 = vcombine.high %v8066_v35, %v8066_v35  ;;  %v8093_v44 = vrot.slane %v8066_v35, %v12351_v23  ;;  %v8084_v46 = vcombine.high %v8076_v40, %v8076_v40  ;;  %v12687_v48 = vrot.slane %v8069_v37, %v12351_v23  ;;  %9010 = vmatpush1.bf16.msra.mxu0 %v10872_v41  ;;  %v10938_v20 = vld [vmem:[#allocation8 + $0x394] ss:$8 sps:$4 sm:$0xff]   ;;  %v10933_v35 = vld [vmem:[#allocation8 + $0x190] ss:$8 sps:$4 sm:$0xff]   ;;  %v10941_v37 = vld [vmem:[#allocation8 + $0x1a4] ss:$8 sps:$4 sm:$0xff]  }
 0x58a   : > { %9011 = vmatprep.subr.bf16.mxu0 %v10875_v60  ;;  %v8111_v63 = vpack.c.bf16 %v8076_v40, %v8076_v40  ;;  %8930 = vmatpush1.bf16.msra.mxu1 %v10877_v53  ;;  %v10944_v40 = vld [vmem:[#allocation8 + $0x3a4] ss:$8 sps:$4 sm:$0xff]   ;;  %v10939_v41 = vld [vmem:[#allocation8 + $0x1a0] ss:$8 sps:$4 sm:$0xff]   ;;  %v10945_v60 = vld [vmem:[#allocation8 + $0x1b0] ss:$8 sps:$4 sm:$0xff]  }
 0x58b   : > { %v8101_v47 = vcombine.high %v8093_v44, %v8093_v44  ;;  %v12690_v51 = vrot.slane %v8086_v43, %v12351_v23  ;;  %v8112_v59 = vpack.c.bf16 %v8084_v46, %v8084_v46  ;;  %v8085_v61 = vcombine.high %v12687_v48, %v12687_v48  ;;  %v10879_v23 = vld [vmem:[#allocation8 + $0x100] ss:$8 sps:$4 sm:$0xff]   ;;  %8940 = vmatprep.subr.bf16.mxu1 %v10881_v55  ;;  %v10947_v43 = vld [vmem:[#allocation8 + $0x1b4] ss:$8 sps:$4 sm:$0xff]   ;;  %v10948_v46 = vld [vmem:[#allocation8 + $0x3b0] ss:$8 sps:$4 sm:$0xff]  }
 0x58c   : > { %v8115_v6 = vpack.c.bf16 %v8093_v44, %v8093_v44  ;;  %v10950_v44 = vld [vmem:[#allocation8 + $0x3b4] ss:$8 sps:$4 sm:$0xff]   ;;  %v10956_v53 = vld [vmem:[#allocation8 + $0x3c4] ss:$8 sps:$4 sm:$0xff]  }
 0x58d   : > { %v8116_v52 = vpack.c.bf16 %v8101_v47, %v8101_v47  ;;  %8931 = vmatprep.mubr.bf16.mxu1 %v8112_v59  ;;  %v8102_v62 = vcombine.high %v12690_v51, %v12690_v51  ;;  %9012 = vmatpush1.bf16.msra.mxu0 %v10878_v24  ;;  %v8114_v3 = vpack.c.bf16 %v8085_v61, %v8085_v61  ;;  %v10953_v47 = vld [vmem:[#allocation8 + $0x1c4] ss:$8 sps:$4 sm:$0xff]   ;;  %v10951_v59 = vld [vmem:[#allocation8 + $0x1c0] ss:$8 sps:$4 sm:$0xff]   ;;  %v10959_v55 = vld [vmem:[#allocation8 + $0x1d4] ss:$8 sps:$4 sm:$0xff]  }
 0x58e   : > { %9022 = vmatprep.subr.bf16.mxu0 %v10884_v58  ;;  %8932 = vmatmul.mubr.bf16.vlgmr.msra.gmra.mrb[0].mxu1 %v8111_v63  ;;  %v10954_v24 = vld [vmem:[#allocation8 + $0x3c0] ss:$8 sps:$4 sm:$0xff]   ;;  %v10957_v58 = vld [vmem:[#allocation8 + $0x1d0] ss:$8 sps:$4 sm:$0xff]  }
 0x58f   : > { %9013 = vmatprep.mubr.bf16.mxu0 %v8116_v52  ;;  %v8118_v4 = vpack.c.bf16 %v8102_v62, %v8102_v62  ;;  %8941 = vmatpush1.bf16.msra.mxu1 %v10879_v23  ;;  %v10962_v52 = vld [vmem:[#allocation8 + $0x3d4] ss:$8 sps:$4 sm:$0xff]   ;;  %v10960_v61 = vld [vmem:[#allocation8 + $0x3d0] ss:$8 sps:$4 sm:$0xff]   ;;  %v10965_v62 = vld [vmem:[#allocation8 + $0x1e4] ss:$8 sps:$4 sm:$0xff]  }
 0x590   : > { %9014 = vmatmul.mubr.bf16.vlgmr.msra.gmra.mrb[0].mxu0 %v8115_v6  ;;  %8942 = vmatprep.subr.bf16.mxu1 %v10887_v1  ;;  %v10968_v23 = vld [vmem:[#allocation8 + $0x3e4] ss:$8 sps:$4 sm:$0xff]   ;;  %v10963_v63 = vld [vmem:[#allocation8 + $0x1e0] ss:$8 sps:$4 sm:$0xff]   ;;  %v10974_v1 = vld [vmem:[#allocation8 + $0x3f4] ss:$8 sps:$4 sm:$0xff]  }
 0x591   : > { %9023 = vmatpush1.bf16.msra.mxu0 %v10882_v9  ;;  %8972 = vmatprep.mubr.bf16.mxu1 %v8114_v3  ;;  %v10966_v6 = vld [vmem:[#allocation8 + $0x3e0] ss:$8 sps:$4 sm:$0xff]   ;;  %v10971_v9 = vld [vmem:[#allocation8 + $0x1f4] ss:$8 sps:$4 sm:$0xff]   ;;  %v10972_v3 = vld [vmem:[#allocation8 + $0x3f0] ss:$8 sps:$4 sm:$0xff]  }
 0x592   : > { %9024 = vmatprep.subr.bf16.mxu0 %v10890_v33  ;;  %9054 = vmatprep.mubr.bf16.mxu0 %v8118_v4  ;;  %v10969_v33 = vld [vmem:[#allocation8 + $0x1f0] ss:$8 sps:$4 sm:$0xff]   ;;  %v10975_v4 = vld [vmem:[%s12793_s5 + $0x40] sm:$0xff]  }
 0x593   : > { %8943 = vmatpush1.bf16.msra.mxu1 %v10885_v5  ;;  %v8113_v5 = vpack.c.bf16 %v12687_v48, %v12687_v48  ;;  %v10978_v48 = vld [vmem:[%s12793_s5 + $0x8] sm:$0xff]  }
 0x594   : > { %8944 = vmatprep.subr.bf16.mxu1 %v10893_v30  ;;  %v10976_v30 = vld [vmem:[%s12793_s5] sm:$0xff]  }
 0x595   : > { %9025 = vmatpush1.bf16.msra.mxu0 %v10888_v28  ;;  %v8117_v28 = vpack.c.bf16 %v12690_v51, %v12690_v51  ;;  %v10979_v51 = vld [vmem:[%s12793_s5 + $0x50] sm:$0xff]  }
 0x596   : > { %9026 = vmatprep.subr.bf16.mxu0 %v10896_v7  ;;  %v10977_v7 = vld [vmem:[%s12793_s5 + $0x48] sm:$0xff]  }
 0x597   : > { %8945 = vmatpush1.bf16.msra.mxu1 %v10891_v11  ;;  %v10980_v11 = vld [vmem:[%s12793_s5 + $0x10] sm:$0xff]  }
 0x598   : > { %8946 = vmatprep.subr.bf16.mxu1 %v10899_v50  ;;  %v10982_v50 = vld [vmem:[%s12793_s5 + $0x18] sm:$0xff]  }
 0x599   : > { %9027 = vmatpush1.bf16.msra.mxu0 %v10894_v12  ;;  %v10981_v12 = vld [vmem:[%s12793_s5 + $0x58] sm:$0xff]  }
 0x59a   : > { %9028 = vmatprep.subr.bf16.mxu0 %v10902_v13  ;;  %v10983_v13 = vld [vmem:[%s12793_s5 + $0x60] sm:$0xff]  }
 0x59b   : > { %8947 = vmatpush1.bf16.msra.mxu1 %v10897_v14  ;;  %v10984_v14 = vld [vmem:[%s12793_s5 + $0x20] sm:$0xff]  }
 0x59c   : > { %8948 = vmatprep.subr.bf16.mxu1 %v10905_v16  ;;  %v10986_v16 = vld [vmem:[%s12793_s5 + $0x28] sm:$0xff]  }
 0x59d   : > { %9029 = vmatpush1.bf16.msra.mxu0 %v10900_v15  ;;  %v10985_v15 = vld [vmem:[%s12793_s5 + $0x68] sm:$0xff]  }
 0x59e   : > { %9030 = vmatprep.subr.bf16.mxu0 %v10908_v38  ;;  %v10987_v38 = vld [vmem:[%s12793_s5 + $0x70] sm:$0xff]  }
 0x59f   : > { %8949 = vmatpush1.bf16.msra.mxu1 %v10903_v8  ;;  %v10988_v8 = vld [vmem:[%s12793_s5 + $0x30] sm:$0xff]  }
 0x5a0   : > { %8950 = vmatprep.subr.bf16.mxu1 %v10911_v18  ;;  %v10990_v18 = vld [vmem:[%s12793_s5 + $0x38] sm:$0xff]  }
 0x5a1   : > { %9031 = vmatpush1.bf16.msra.mxu0 %v10906_v2  ;;  %v10989_v2 = vld [vmem:[%s12793_s5 + $0x78] sm:$0xff]  }
 0x5a2   : > { %9032 = vmatprep.subr.bf16.mxu0 %v10914_v54  ;;  %v8247_v54 = vld [vmem:[#allocation9] sm:$0x3] }
 0x5a3   : > { %8951 = vmatpush1.bf16.msra.mxu1 %v10909_v17  ;;  %v8252_v17 = vrot.slane %v8247_v54, %v7999_v56 }
 0x5a4   : > { %8952 = vmatprep.subr.bf16.mxu1 %v10917_v22 }
 0x5a5   : > { %9033 = vmatpush1.bf16.msra.mxu0 %v10912_v21  ;;  %v8256_v21 = vrot.slane %v8247_v54, %v8003_v57 }
 0x5a6   : > { %9034 = vmatprep.subr.bf16.mxu0 %v10920_v10 }
 0x5a7   : > { %8953 = vmatpush1.bf16.msra.mxu1 %v10915_v39 }
 0x5a8   : > { %8954 = vmatprep.subr.bf16.mxu1 %v10923_v25 }
 0x5a9   : > { %9035 = vmatpush1.bf16.msra.mxu0 %v10918_v19 }
 0x5aa   : > { %9036 = vmatprep.subr.bf16.mxu0 %v10926_v26 }
 0x5ab   : > { %8955 = vmatpush1.bf16.msra.mxu1 %v10921_v27 }
 0x5ac   : > { %8956 = vmatprep.subr.bf16.mxu1 %v10929_v31 }
 0x5ad   : > { %9037 = vmatpush1.bf16.msra.mxu0 %v10924_v29 }
 0x5ae   : > { %9038 = vmatprep.subr.bf16.mxu0 %v10932_v32 }
 0x5af   : > { %8957 = vmatpush1.bf16.msra.mxu1 %v10927_v0 }
 0x5b0   : > { %8958 = vmatprep.subr.bf16.mxu1 %v10935_v34 }
 0x5b1   : > { %9039 = vmatpush1.bf16.msra.mxu0 %v10930_v49 }
 0x5b2   : > { %9040 = vmatprep.subr.bf16.mxu0 %v10938_v20 }
 0x5b3   : > { %8959 = vmatpush1.bf16.msra.mxu1 %v10933_v35  ;;  %v10518_v35 = vld [vmem:[#allocation11] ss:$0 sm:$0xff] }
 0x5b4   : > { %8960 = vmatprep.subr.bf16.mxu1 %v10941_v37 }
 0x5b5   : > { %9041 = vmatpush1.bf16.msra.mxu0 %v10936_v36 }
 0x5b6   : > { %9042 = vmatprep.subr.bf16.mxu0 %v10944_v40 }
 0x5b7   : > { %8961 = vmatpush1.bf16.msra.mxu1 %v10939_v41 }
 0x5b8   : > { %8962 = vmatprep.subr.bf16.mxu1 %v10947_v43 }
 0x5b9   : > { %9043 = vmatpush1.bf16.msra.mxu0 %v10942_v42 }
 0x5ba   : > { %9044 = vmatprep.subr.bf16.mxu0 %v10950_v44 }
 0x5bb   : > { %8963 = vmatpush1.bf16.msra.mxu1 %v10945_v60 }
 0x5bc   : > { %8964 = vmatprep.subr.bf16.mxu1 %v10953_v47 }
 0x5bd   : > { %9045 = vmatpush1.bf16.msra.mxu0 %v10948_v46 }
 0x5be   : > { %9046 = vmatprep.subr.bf16.mxu0 %v10956_v53 }
 0x5bf   : > { %8965 = vmatpush1.bf16.msra.mxu1 %v10951_v59 }
 0x5c0   : > { %8966 = vmatprep.subr.bf16.mxu1 %v10959_v55 }
 0x5c1   : > { %9047 = vmatpush1.bf16.msra.mxu0 %v10954_v24 }
 0x5c2   : > { %9048 = vmatprep.subr.bf16.mxu0 %v10962_v52 }
 0x5c3   : > { %8967 = vmatpush1.bf16.msra.mxu1 %v10957_v58 }
 0x5c4   : > { %8968 = vmatprep.subr.bf16.mxu1 %v10965_v62 }
 0x5c5   : > { %9049 = vmatpush1.bf16.msra.mxu0 %v10960_v61 }
 0x5c6   : > { %9050 = vmatprep.subr.bf16.mxu0 %v10968_v23 }
 0x5c7   : > { %8969 = vmatpush1.bf16.msra.mxu1 %v10963_v63 }
 0x5c8   : > { %8970 = vmatprep.subr.bf16.mxu1 %v10971_v9 }
 0x5c9   : > { %9051 = vmatpush1.bf16.msra.mxu0 %v10966_v6 }
 0x5ca   : > { %9052 = vmatprep.subr.bf16.mxu0 %v10974_v1 }
 0x5cb   : > { %8971 = vmatpush1.bf16.msra.mxu1 %v10969_v33 }
 0x5cc   : > { %10541 = vmatprep.subr.bf16.mxu1 %v10975_v4 }
 0x5cd   : > { %9053 = vmatpush1.bf16.msra.mxu0 %v10972_v3 }
 0x5ce   : > { %8973 = vmatmul.mubr.bf16.vlgmr.msra.gmra.mrb[0].mxu1 %v8113_v5 }
 0x5cf   : > { %10542 = vmatpush3.bf16.msra.mxu1 %v10976_v30 }
 0x5d0   : > { %9055 = vmatmul.mubr.bf16.vlgmr.msra.gmra.mrb[0].mxu0 %v8117_v28  ;;  %10543 = vmatprep.subr.bf16.mxu1 %v10977_v7 }
 0x5d3   : > { %10544 = vmatpush3.bf16.msra.mxu1 %v10978_v48 }
 0x5d4   : > { %10545 = vmatprep.subr.bf16.mxu1 %v10979_v51 }
 0x5d7   : > { %10546 = vmatpush3.bf16.msra.mxu1 %v10980_v11 }
 0x5d8   : > { %10547 = vmatprep.subr.bf16.mxu1 %v10981_v12 }
 0x5db   : > { %10548 = vmatpush3.bf16.msra.mxu1 %v10982_v50 }
 0x5dc   : > { %10549 = vmatprep.subr.bf16.mxu1 %v10983_v13 }
 0x5df   : > { %10550 = vmatpush3.bf16.msra.mxu1 %v10984_v14 }
 0x5e0   : > { %10551 = vmatprep.subr.bf16.mxu1 %v10985_v15 }
 0x5e3   : > { %10552 = vmatpush3.bf16.msra.mxu1 %v10986_v16 }
 0x5e4   : > { %10553 = vmatprep.subr.bf16.mxu1 %v10987_v38 }
 0x5e7   : > { %10554 = vmatpush3.bf16.msra.mxu1 %v10988_v8 }
 0x5e8   : > { %10555 = vmatprep.subr.bf16.mxu1 %v10989_v2 }
 0x5eb   : > { %10556 = vmatpush3.bf16.msra.mxu1 %v10990_v18 }
 0x6a1   : > { %v8974_v22 = vpop.f32.mrb[0].mxu1 }
 0x6a2   : > { %v10675_v39 = vadd.f32 %v8974_v22, %v8252_v17  ;;  %v8976_v19 = vpop.f32.mrb[1].mxu1 }
 0x6a3   : > { %v9056_v10 = vpop.f32.mrb[0].mxu0  ;;  %v10677_v26 = vadd.f32 %v8976_v19, %v8256_v21  ;;  %v8978_v27 = vpop.f32.mrb[2].mxu1 }
 0x6a4   : > { %v9058_v25 = vpop.f32.mrb[1].mxu0  ;;  %v10676_v31 = vadd.f32 %v10675_v39, %v9056_v10  ;;  %v8979_v32 = vpop.f32.mrb[3].mxu1 }
 0x6a5   : > { %v9060_v29 = vpop.f32.mrb[2].mxu0  ;;  %v10678_v49 = vadd.f32 %v10677_v26, %v9058_v25 }
 0x6a6   : > { %v9061_v0 = vpop.f32.mrb[3].mxu0  ;;  %v9063_v20 = vpack.c.bf16 %v10676_v31, %v10676_v31 }
 0x6a7   : > { %v9064_v34 = vpack.c.bf16 %v10678_v49, %v10678_v49 }
 0x6a9   : > { %9232 = vmatprep.mubr.bf16.mxu1 %v9064_v34 }
 0x6aa   : > { %9233 = vmatmul.mubr.bf16.vlgmr.msra.gmra.mrb[4].mxu1 %v9063_v20 }
 0x77d   : > { %v10557_v56 = vpop.f32.mrb[4].mxu1 }
 0x77e   : > { %v10558_v45 = vpop.f32.mrb[5].mxu1 }
 0x77f   : > { %v10559_v57 = vadd.f32 %v10558_v45, %v10557_v56  ;;  %v10560_v36 = vpop.f32.mrb[6].mxu1 }
 0x780   : > { %v10561_v37 = vpop.f32.mrb[7].mxu1 }
 0x781   : > { %v9235_v40 = vadd.f32 %v10559_v57, %v10518_v35 }
 0x783   : > { %9241 = vst.msk [vmem:[#allocation12] sm:$0x3] %vm9240_vm0, %v9235_v40 }
 0x784 PF: > { %p10735_p4 = scmp.eq.s32.totalorder %s11279_s28, 1  ;;  %s11219_s30 = smov [#allocation12]  }
 0x785   : > { %s9249_s13 = sshll.u32 %s11219_s30, 4  ;;  %s9250_s13 = int_to_ptr.vmem [resolvable:$true] %s9249_s13 }
 0x786   : > { %s11133_s15 = scalar_lea.vmem %s9250_s13, 32  ;;  %p11140_p2 = scmp.lt.s32.totalorder %s9250_s13, %s9250_s13 }
 0x787   : > { %p11134_p5 = scmp.ne.s32.totalorder %s9250_s13, %s11133_s15  ;;  %p11141_p6 = scmp.lt.s32.totalorder %s11133_s15, %s11133_s15 }
 0x789   : > { %p11135_p12 = pnand %p11134_p5, %p10735_p4  ;;  %p11142_p13 = por %p11141_p6, %p11140_p2 }
 0x78b   : > { %p11136_p0 = pneg %p11135_p12 }
 0x78d   : > { %p11143_p3 = pnand %p11142_p13, %p11136_p0 }
 0x78f   : > { %11146 = shalt.err (!%p11143_p3)
}
 0x790   : > { %s11147_s27 = scalar_lea.hbm %s12795_s7, 32 }
 0x791   : > { %p11148_p8 = scmp.ne.s32.totalorder %s12795_s7, %s11147_s27  ;;  %p11153_p9 = scmp.lt.u32.totalorder %s11147_s27, %s12795_s7 }
 0x793   : > { %p11149_p7 = pnand %p11148_p8, %p10735_p4 }
 0x795   : > { %p11150_p10 = pneg %p11149_p7 }
 0x797   : > { %p11155_p11 = pnand %p11153_p9, %p11150_p10 }
 0x799   : > { %11158 = shalt.err (!%p11155_p11)
}
 0x79a   : > { %10706 = dma.vmem_to_hbm [thread:$0]  (%p10735_p4), %s9250_s13, 32, %s12795_s7, [#allocation5]  }
 0x79b   : > { %11188 = dma.done.wait (%p10735_p4), [#allocation5], 32  }
 0x79c   : > { %11190 = vsyncadd (%p10735_p4), [#allocation5], 4294967264 }
 0x79d PF: > { %p20_p1 = scmp.ge.s32.totalorder %s11397_s20, 4   ;;  %s12811_s24 = smov %s11197_s25 }
 0x79e   : > { %s12812_s25 = smov %s11201_s26  ;;  %s12813_s26 = smov %s11408_s21 }
 0x79f   : > { %s12814_s27 = smov %s11397_s20  ;;  %22 = sbr.rel (!%p20_p1) target bundleno = 6 (0x6), region = 112 }
 0x7a6   :  { %9262 = vsyncpa [#allocation4], 1 }
 0x7a7   :  { %9264 = vsyncpa [#allocation4 + $0x1], 1 }
 0x7a8   :  { %9265 = vsyncpa [#allocation7], 1 }
 0x7a9   :  { %9266 = vsyncpa [#allocation10], 1 }
 0x7aa   :  { %9267 = vsyncpa [#allocation5], 1 }
 0x7ab   :  { %9269 = vsyncpa [#allocation5 + $0x1], 1 }

</bundles_post_ra>
